<compile_context>
chip_gen: v7x
topology: tpu7x:2x2x1
jax: 0.10.0
libtpu: 0.0.40
codegen_flags: <defaults>
</compile_context>

<pallas_src>
import functools
import math

import numpy as np
import jax
import jax.numpy as jnp
from jax.experimental import pallas as pl
from jax.experimental.pallas import tpu as pltpu

# ----------------------------- small synthetic SAM config ----------------------------- #
C               = 32     # transformer / prompt embedding dim  (real SAM: 256)
EMB_H = EMB_W   = 8      # image-embedding spatial size        (real SAM: 64)
NUM_HEADS       = 2
DOWNSAMPLE      = 2      # attention_downsample_rate for cross-attention
MLP_DIM         = 64
NUM_MASK_TOKENS = 4      # num_multimask_outputs (3) + 1
IOU_HIDDEN      = 32
IMG_SIZE        = 64     # model.image_encoder.img_size
DEPTH           = 2      # TwoWayTransformer depth
BATCH           = 2      # number of boxes
MASK_THRESHOLD  = 0.0
STABILITY_SCORE_OFFSET = 1.0

_PARALLEL_1 = pltpu.CompilerParams(dimension_semantics=("parallel",))
_PARALLEL_2 = pltpu.CompilerParams(dimension_semantics=("parallel", "parallel"))


# ----------------------------------- Pallas kernels ----------------------------------- #
def _mm_bias_kernel(x_ref, w_ref, b_ref, o_ref, *, activation):
    y = jnp.dot(x_ref[...], w_ref[...], preferred_element_type=jnp.float32) + b_ref[...]
    if activation == "relu":
        y = jnp.maximum(y, 0.0)
    o_ref[...] = y


def pallas_linear(x, w, b, activation=None, tm_max=512):
    """y = act(x @ w + b).  M (rows) is tiled with a parallel grid."""
    *lead, K = x.shape
    N = w.shape[1]
    M = int(np.prod(lead)) if lead else 1
    x2 = x.reshape(M, K)
    if M <= tm_max:
        tm, grid_m = M, 1
    else:
        tm, grid_m = tm_max, pl.cdiv(M, tm_max)
    out = pl.pallas_call(
        functools.partial(_mm_bias_kernel, activation=activation),
        out_shape=jax.ShapeDtypeStruct((M, N), jnp.float32),
        grid=(grid_m,),
        in_specs=[
            pl.BlockSpec((tm, K), lambda i: (i, 0)),
            pl.BlockSpec((K, N), lambda i: (0, 0)),
            pl.BlockSpec((1, N), lambda i: (0, 0)),
        ],
        out_specs=pl.BlockSpec((tm, N), lambda i: (i, 0)),
        compiler_params=_PARALLEL_1,
    )(x2, w, b.reshape(1, N))
    return out.reshape(*lead, N)


def _convt_ln_kernel(x_ref, w_ref, b_ref, g_ref, beta_ref, o_ref, *, groups, eps):
    """ConvTranspose2d(k=2,s=2) as a per-input-pixel matmul with output columns ordered
    (dy, dx, c), fused with LayerNorm2d applied per output pixel (per contiguous group)."""
    y = jnp.dot(x_ref[...], w_ref[...], preferred_element_type=jnp.float32) + b_ref[...]
    cg = y.shape[-1] // groups
    pieces = []
    for g in range(groups):
        z = y[:, g * cg:(g + 1) * cg]
        mu = jnp.mean(z, axis=-1, keepdims=True)
        var = jnp.mean((z - mu) ** 2, axis=-1, keepdims=True)
        pieces.append((z - mu) * jax.lax.rsqrt(var + eps) * g_ref[...] + beta_ref[...])
    o_ref[...] = jnp.concatenate(pieces, axis=-1)


def fused_convt2x2_ln(x, w_conv, b_conv, ln_w, ln_b, eps=1e-6, tm_max=512):
    """x: (M, Cin) rows = input pixels; w_conv: (Cin, Cout, 2, 2) PyTorch layout.
    Returns (M, 4*Cout) with columns ordered (dy, dx, c); LayerNorm2d fused in."""
    M, Cin = x.shape
    Cout = w_conv.shape[1]
    w = w_conv.transpose(0, 2, 3, 1).reshape(Cin, 4 * Cout)   # cols: (dy, dx, c)
    b = jnp.tile(b_conv, 4)
    if M <= tm_max:
        tm, grid_m = M, 1
    else:
        tm, grid_m = tm_max, pl.cdiv(M, tm_max)
    return pl.pallas_call(
        functools.partial(_convt_ln_kernel, groups=4, eps=eps),
        out_shape=jax.ShapeDtypeStruct((M, 4 * Cout), jnp.float32),
        grid=(grid_m,),
        in_specs=[
            pl.BlockSpec((tm, Cin), lambda i: (i, 0)),
            pl.BlockSpec((Cin, 4 * Cout), lambda i: (0, 0)),
            pl.BlockSpec((1, 4 * Cout), lambda i: (0, 0)),
            pl.BlockSpec((1, Cout), lambda i: (0, 0)),
            pl.BlockSpec((1, Cout), lambda i: (0, 0)),
        ],
        out_specs=pl.BlockSpec((tm, 4 * Cout), lambda i: (i, 0)),
        compiler_params=_PARALLEL_1,
    )(x, w, b.reshape(1, -1), ln_w.reshape(1, -1), ln_b.reshape(1, -1))


def _fused_attn_ln_kernel(qin_ref, qpe_ref, kin_ref, kpe_ref, vin_ref,
                          qw_ref, qb_ref, kw_ref, kb_ref, vw_ref, vb_ref,
                          ow_ref, ob_ref, lnw_ref, lnb_ref, o_ref,
                          *, num_heads, eps, add_residual, add_pe):
    """out = LayerNorm( [qin +] out_proj( MHA(q_proj(qin[+qpe]), k_proj(kin[+kpe]), v_proj(vin)) ) )."""
    q_raw = qin_ref[0]                     # (Nq, C)  (also the residual when add_residual)
    k_raw = kin_ref[0]                     # (Nk, C)
    v_raw = vin_ref[0]                     # (Nk, C)
    q_src = q_raw + qpe_ref[0] if add_pe else q_raw
    k_src = k_raw + kpe_ref[0] if add_pe else k_raw
    q = jnp.dot(q_src, qw_ref[...], preferred_element_type=jnp.float32) + qb_ref[...]
    k = jnp.dot(k_src, kw_ref[...], preferred_element_type=jnp.float32) + kb_ref[...]
    v = jnp.dot(v_raw, vw_ref[...], preferred_element_type=jnp.float32) + vb_ref[...]
    D = q.shape[-1]
    hd = D // num_heads
    scale = 1.0 / math.sqrt(hd)

    out = ob_ref[...]                      # (1, C) -> broadcasts to (Nq, C)
    for h in range(num_heads):             # static unroll, all heads in one grid step
        sl = slice(h * hd, (h + 1) * hd)
        qh, kh, vh = q[:, sl], k[:, sl], v[:, sl]
        # scores: contract last dims (no k.T materialization)
        s = jax.lax.dot_general(qh, kh, (((1,), (1,)), ((), ())),
                                preferred_element_type=jnp.float32) * scale
        m = jnp.max(s, axis=-1, keepdims=True)
        p = jnp.exp(s - m)
        p = p * pl.reciprocal(jnp.sum(p, axis=-1, keepdims=True), approx=True)
        oh = jnp.dot(p, vh, preferred_element_type=jnp.float32)          # (Nq, hd)
        out = out + jnp.dot(oh, ow_ref[sl, :], preferred_element_type=jnp.float32)
    if add_residual:
        out = out + q_raw
    mu = jnp.mean(out, axis=-1, keepdims=True)
    var = jnp.mean((out - mu) ** 2, axis=-1, keepdims=True)
    o_ref[0] = (out - mu) * jax.lax.rsqrt(var + eps) * lnw_ref[...] + lnb_ref[...]


def fused_attention_ln(attn_p, ln_w, ln_b, q_in, q_pe, k_in, k_pe, v_in,
                       add_residual, add_pe, num_heads=NUM_HEADS):
    """SAM Attention module + PE adds + residual + LayerNorm as ONE pallas_call (grid over batch)."""
    B, Nq, Cd = q_in.shape
    Nk = k_in.shape[1]
    D = attn_p["q_w"].shape[1]
    kernel = functools.partial(_fused_attn_ln_kernel, num_heads=num_heads,
                               eps=1e-5, add_residual=add_residual, add_pe=add_pe)
    return pl.pallas_call(
        kernel,
        out_shape=jax.ShapeDtypeStruct((B, Nq, Cd), jnp.float32),
        grid=(B,),
        in_specs=[
            pl.BlockSpec((1, Nq, Cd), lambda b: (b, 0, 0)),   # q input (raw; also residual)
            pl.BlockSpec((1, Nq, Cd), lambda b: (b, 0, 0)),   # q positional encoding
            pl.BlockSpec((1, Nk, Cd), lambda b: (b, 0, 0)),   # k input (raw)
            pl.BlockSpec((1, Nk, Cd), lambda b: (b, 0, 0)),   # k positional encoding
            pl.BlockSpec((1, Nk, Cd), lambda b: (b, 0, 0)),   # v input
            pl.BlockSpec((Cd, D), lambda b: (0, 0)),          # q_w
            pl.BlockSpec((1, D), lambda b: (0, 0)),           # q_b
            pl.BlockSpec((Cd, D), lambda b: (0, 0)),          # k_w
            pl.BlockSpec((1, D), lambda b: (0, 0)),           # k_b
            pl.BlockSpec((Cd, D), lambda b: (0, 0)),          # v_w
            pl.BlockSpec((1, D), lambda b: (0, 0)),           # v_b
            pl.BlockSpec((D, Cd), lambda b: (0, 0)),          # o_w
            pl.BlockSpec((1, Cd), lambda b: (0, 0)),          # o_b
            pl.BlockSpec((1, Cd), lambda b: (0, 0)),          # ln_w
            pl.BlockSpec((1, Cd), lambda b: (0, 0)),          # ln_b
        ],
        out_specs=pl.BlockSpec((1, Nq, Cd), lambda b: (b, 0, 0)),
        compiler_params=_PARALLEL_1,
    )(q_in, q_pe, k_in, k_pe, v_in,
      attn_p["q_w"], attn_p["q_b"].reshape(1, -1),
      attn_p["k_w"], attn_p["k_b"].reshape(1, -1),
      attn_p["v_w"], attn_p["v_b"].reshape(1, -1),
      attn_p["o_w"], attn_p["o_b"].reshape(1, -1),
      ln_w.reshape(1, -1), ln_b.reshape(1, -1))


def _fused_mlp_ln_kernel(x_ref, w1_ref, b1_ref, w2_ref, b2_ref, lnw_ref, lnb_ref, o_ref, *, eps):
    x = x_ref[...]
    h = jnp.maximum(jnp.dot(x, w1_ref[...], preferred_element_type=jnp.float32) + b1_ref[...], 0.0)
    y = jnp.dot(h, w2_ref[...], preferred_element_type=jnp.float32) + b2_ref[...] + x
    mu = jnp.mean(y, axis=-1, keepdims=True)
    var = jnp.mean((y - mu) ** 2, axis=-1, keepdims=True)
    o_ref[...] = (y - mu) * jax.lax.rsqrt(var + eps) * lnw_ref[...] + lnb_ref[...]


def fused_mlp_ln(blk, x):
    """queries = norm3(queries + MLP(queries)) as one kernel."""
    B, Nq, Cd = x.shape
    M = B * Nq
    H = blk["mlp_w1"].shape[1]
    out = pl.pallas_call(
        functools.partial(_fused_mlp_ln_kernel, eps=1e-5),
        out_shape=jax.ShapeDtypeStruct((M, Cd), jnp.float32),
        grid=(1,),
        in_specs=[
            pl.BlockSpec((M, Cd), lambda i: (0, 0)),
            pl.BlockSpec((Cd, H), lambda i: (0, 0)),
            pl.BlockSpec((1, H), lambda i: (0, 0)),
            pl.BlockSpec((H, Cd), lambda i: (0, 0)),
            pl.BlockSpec((1, Cd), lambda i: (0, 0)),
            pl.BlockSpec((1, Cd), lambda i: (0, 0)),
            pl.BlockSpec((1, Cd), lambda i: (0, 0)),
        ],
        out_specs=pl.BlockSpec((M, Cd), lambda i: (0, 0)),
        compiler_params=pltpu.CompilerParams(dimension_semantics=("arbitrary",)),
    )(x.reshape(M, Cd), blk["mlp_w1"], blk["mlp_b1"].reshape(1, -1),
      blk["mlp_w2"], blk["mlp_b2"].reshape(1, -1),
      blk["norm3_w"].reshape(1, -1), blk["norm3_b"].reshape(1, -1))
    return out.reshape(B, Nq, Cd)


def _fused_mlp3_kernel(x_ref, w1_ref, b1_ref, w2_ref, b2_ref, w3_ref, b3_ref, o_ref):
    x = x_ref[0]
    h = jnp.maximum(jnp.dot(x, w1_ref[0], preferred_element_type=jnp.float32) + b1_ref[0], 0.0)
    h = jnp.maximum(jnp.dot(h, w2_ref[0], preferred_element_type=jnp.float32) + b2_ref[0], 0.0)
    o_ref[0] = jnp.dot(h, w3_ref[0], preferred_element_type=jnp.float32) + b3_ref[0]


def pallas_mlp3_batched(x, w1, b1, w2, b2, w3, b3):
    """Batched 3-layer MLP (ReLU between layers): x (G, M, K0) with per-group weights."""
    G, M, K0 = x.shape
    K1, K2, K3 = w1.shape[2], w2.shape[2], w3.shape[2]
    return pl.pallas_call(
        _fused_mlp3_kernel,
        out_shape=jax.ShapeDtypeStruct((G, M, K3), jnp.float32),
        grid=(G,),
        in_specs=[
            pl.BlockSpec((1, M, K0), lambda g: (g, 0, 0)),
            pl.BlockSpec((1, K0, K1), lambda g: (g, 0, 0)),
            pl.BlockSpec((1, 1, K1), lambda g: (g, 0, 0)),
            pl.BlockSpec((1, K1, K2), lambda g: (g, 0, 0)),
            pl.BlockSpec((1, 1, K2), lambda g: (g, 0, 0)),
            pl.BlockSpec((1, K2, K3), lambda g: (g, 0, 0)),
            pl.BlockSpec((1, 1, K3), lambda g: (g, 0, 0)),
        ],
        out_specs=pl.BlockSpec((1, M, K3), lambda g: (g, 0, 0)),
        compiler_params=_PARALLEL_1,
    )(x, w1, b1, w2, b2, w3, b3)


def _bmm_nt_kernel(a_ref, b_ref, o_ref):
    # a (1, M, K) , b (1, T, K) -> o (1, M, T): contract channel (last) dims.
    o_ref[0] = jax.lax.dot_general(a_ref[0], b_ref[0], (((1,), (1,)), ((), ())),
                                   preferred_element_type=jnp.float32)


def pallas_bmm_nt(a, b, tn_max=2048):
    """masks[b, m, p] = sum_c a[b, m, c] * b[b, p, c].  Lane-dense (pixels) output, tiled N."""
    B, M, K = a.shape
    P = b.shape[1]
    if P <= tn_max:
        tn, grid_n = P, 1
    else:
        tn, grid_n = tn_max, pl.cdiv(P, tn_max)
    return pl.pallas_call(
        _bmm_nt_kernel,
        out_shape=jax.ShapeDtypeStruct((B, M, P), jnp.float32),
        grid=(B, grid_n),
        in_specs=[
            pl.BlockSpec((1, M, K), lambda i, j: (i, 0, 0)),
            pl.BlockSpec((1, tn, K), lambda i, j: (i, j, 0)),
        ],
        out_specs=pl.BlockSpec((1, M, tn), lambda i, j: (i, 0, j)),
        compiler_params=_PARALLEL_2,
    )(a, b)


# ----------------------------------- model components ----------------------------------- #
def pe_encoding(coords, gaussian):
    """PositionEmbeddingRandom._pe_encoding; coords (..., 2) in [0, 1]."""
    c = 2.0 * coords - 1.0
    c = c @ gaussian                       # (..., C//2)  tiny glue matmul
    c = 2.0 * jnp.pi * c
    return jnp.concatenate([jnp.sin(c), jnp.cos(c)], axis=-1)


def build_dense_pe(gaussian, h, w):
    """prompt_encoder.get_dense_pe() -> (1, C, h, w)."""
    y = (jnp.arange(h, dtype=jnp.float32) + 0.5) / h
    x = (jnp.arange(w, dtype=jnp.float32) + 0.5) / w
    yy, xx = jnp.meshgrid(y, x, indexing="ij")
    coords = jnp.stack([xx, yy], axis=-1)          # (h, w, 2)
    pe = pe_encoding(coords, gaussian)             # (h, w, C)
    return pe.transpose(2, 0, 1)[None]             # (1, C, h, w)


def embed_boxes(p, boxes):
    boxes = boxes + 0.5
    coords = boxes.reshape(-1, 2, 2) / IMG_SIZE
    corner = pe_encoding(coords, p["pe_gaussian"])          # (B, 2, C)
    corner = corner.at[:, 0, :].add(p["point_embeddings"][2])
    corner = corner.at[:, 1, :].add(p["point_embeddings"][3])
    return corner


def two_way_attention_block(blk, queries, keys, query_pe, key_pe, skip_first_layer_pe):
    # self attention (PE add + residual handled inside the fused kernel)
    queries = fused_attention_ln(blk["self_attn"], blk["norm1_w"], blk["norm1_b"],
                                 queries, query_pe, queries, query_pe, queries,
                                 add_residual=not skip_first_layer_pe,
                                 add_pe=not skip_first_layer_pe)
    # cross attention, tokens -> image
    queries = fused_attention_ln(blk["cross_t2i"], blk["norm2_w"], blk["norm2_b"],
                                 queries, query_pe, keys, key_pe, keys,
                                 add_residual=True, add_pe=True)
    # token MLP
    queries = fused_mlp_ln(blk, queries)
    # cross attention, image -> tokens  (q = keys + key_pe, k = queries + query_pe, v = queries)
    keys = fused_attention_ln(blk["cross_i2t"], blk["norm4_w"], blk["norm4_b"],
                              keys, key_pe, queries, query_pe, queries,
                              add_residual=True, add_pe=True)
    return queries, keys


def two_way_transformer(p, image_embedding, image_pe, point_embedding):
    B, Cd, H, W = image_embedding.shape
    image_embedding = image_embedding.reshape(B, Cd, H * W).transpose(0, 2, 1)
    image_pe = image_pe.reshape(B, Cd, H * W).transpose(0, 2, 1)

    queries, keys = point_embedding, image_embedding
    for i, blk in enumerate(p["layers"]):
        queries, keys = two_way_attention_block(
            blk, queries, keys, point_embedding, image_pe, skip_first_layer_pe=(i == 0)
        )
    queries = fused_attention_ln(p["final_attn"], p["norm_final_w"], p["norm_final_b"],
                                 queries, point_embedding, keys, image_pe, keys,
                                 add_residual=True, add_pe=True)
    return queries, keys


def upscale_embedding(p, src_seq, B, Cd, H, W):
    """output_upscaling (ConvTranspose2d 2x2 s2 -> LN2d -> GELU -> ConvTranspose2d -> GELU)
    expressed as row-per-pixel matmuls; returns (B, 16*H*W, C//8) in NHWC pixel order."""
    C1, C2 = Cd // 4, Cd // 8
    x = src_seq.reshape(B * H * W, Cd)                                  # pixels x channels
    # ConvTranspose2d #1 + LayerNorm2d fused; output columns ordered (dy, dx, c)
    y1 = fused_convt2x2_ln(x, p["up1_w"], p["up1_b"], p["up_ln_w"], p["up_ln_b"], eps=1e-6)
    # TODO(synk): fuse exact (erf) GELU into the kernels once lax.erf Mosaic lowering is confirmed.
    y1 = jax.nn.gelu(y1, approximate=False)
    # 2x2 sub-pixel scatter is now a plain reshape/transpose (columns already (dy, dx, c))
    y1 = y1.reshape(B, H, W, 2, 2, C1).transpose(0, 1, 3, 2, 4, 5).reshape(B * 2 * H * 2 * W, C1)
    # ConvTranspose2d #2 as a per-pixel matmul with the same (dy, dx, c) column order
    w2 = p["up2_w"].transpose(0, 2, 3, 1).reshape(C1, 4 * C2)
    y2 = pallas_linear(y1, w2, jnp.tile(p["up2_b"], 4))
    y2 = jax.nn.gelu(y2, approximate=False)
    y2 = y2.reshape(B, 2 * H, 2 * W, 2, 2, C2).transpose(0, 1, 3, 2, 4, 5)
    return y2.reshape(B, 16 * H * W, C2)


def calculate_stability_score(masks, mask_threshold, threshold_offset):
    inter = jnp.sum(masks > (mask_threshold + threshold_offset), axis=(-1, -2)).astype(jnp.float32)
    union = jnp.sum(masks > (mask_threshold - threshold_offset), axis=(-1, -2)).astype(jnp.float32)
    return inter / union


def predict_masks(p, image_embeddings, image_pe, sparse, dense):
    B = sparse.shape[0]
    output_tokens = jnp.concatenate([p["iou_token"], p["mask_tokens"]], axis=0)   # (1+nmt, C)
    output_tokens = jnp.broadcast_to(output_tokens[None], (B,) + output_tokens.shape)
    tokens = jnp.concatenate([output_tokens, sparse], axis=1)                     # (B, Nt, C)

    src = jnp.repeat(image_embeddings, B, axis=0) + dense      # repeat_interleave(dim=0)
    pos_src = jnp.repeat(image_pe, B, axis=0)
    b, c, h, w = src.shape

    hs, src_seq = two_way_transformer(p, src, pos_src, tokens)
    iou_token_out = hs[:, 0, :]
    mask_tokens_out = hs[:, 1:1 + NUM_MASK_TOKENS, :]

    up_flat = upscale_embedding(p, src_seq, b, c, h, w)        # (B, 16*h*w, C//8)

    hyper_in = pallas_mlp3_batched(
        mask_tokens_out.transpose(1, 0, 2),                    # (nmt, B, C)
        p["hyper_w1"], p["hyper_b1"], p["hyper_w2"], p["hyper_b2"],
        p["hyper_w3"], p["hyper_b3"],
    ).transpose(1, 0, 2)                                       # (B, nmt, C//8)

    masks = pallas_bmm_nt(hyper_in, up_flat).reshape(b, NUM_MASK_TOKENS, 4 * h, 4 * w)

    iou_pred = pallas_mlp3_batched(
        iou_token_out[None],                                   # (1, B, C)
        p["iou_w1"], p["iou_b1"], p["iou_w2"], p["iou_b2"], p["iou_w3"], p["iou_b3"],
    )[0]                                                       # (B, nmt)
    return masks, iou_pred


def sam_coreml_forward(params, image_embeddings, bboxes, use_stability_score=False):
    sparse = embed_boxes(params, bboxes)                                  # (B, 2, C)
    dense = params["no_mask_embed"].reshape(1, C, 1, 1)
    image_pe = build_dense_pe(params["pe_gaussian"], EMB_H, EMB_W)        # (1, C, H, W)
    masks, iou_pred = predict_masks(params, image_embeddings, image_pe, sparse, dense)
    scores = iou_pred
    if use_stability_score:
        scores = calculate_stability_score(masks, MASK_THRESHOLD, STABILITY_SCORE_OFFSET)
    return scores, masks


# ----------------------------------- parameter init ----------------------------------- #
def init_params(key):
    ks = iter(jax.random.split(key, 1024))

    def rnd(*shape, scale=0.02):
        return (scale * jax.random.normal(next(ks), shape)).astype(jnp.float32)

    def zeros(*shape):
        return jnp.zeros(shape, jnp.float32)

    def ones(*shape):
        return jnp.ones(shape, jnp.float32)

    def attn(internal):
        return dict(
            q_w=rnd(C, internal), q_b=zeros(internal),
            k_w=rnd(C, internal), k_b=zeros(internal),
            v_w=rnd(C, internal), v_b=zeros(internal),
            o_w=rnd(internal, C), o_b=zeros(C),
        )

    def block():
        return dict(
            self_attn=attn(C),
            norm1_w=ones(C), norm1_b=zeros(C),
            cross_t2i=attn(C // DOWNSAMPLE),
            norm2_w=ones(C), norm2_b=zeros(C),
            mlp_w1=rnd(C, MLP_DIM), mlp_b1=zeros(MLP_DIM),
            mlp_w2=rnd(MLP_DIM, C), mlp_b2=zeros(C),
            norm3_w=ones(C), norm3_b=zeros(C),
            cross_i2t=attn(C // DOWNSAMPLE),
            norm4_w=ones(C), norm4_b=zeros(C),
        )

    return dict(
        # prompt encoder
        pe_gaussian=rnd(2, C // 2, scale=1.0),
        point_embeddings=rnd(4, C),
        not_a_point_embed=rnd(1, C),   # unused in box-only forward (kept for parity)
        no_mask_embed=rnd(1, C),
        # mask decoder
        iou_token=rnd(1, C),
        mask_tokens=rnd(NUM_MASK_TOKENS, C),
        layers=[block() for _ in range(DEPTH)],
        final_attn=attn(C // DOWNSAMPLE),
        norm_final_w=ones(C), norm_final_b=zeros(C),
        up1_w=rnd(C, C // 4, 2, 2), up1_b=zeros(C // 4),
        up_ln_w=ones(C // 4), up_ln_b=zeros(C // 4),
        up2_w=rnd(C // 4, C // 8, 2, 2), up2_b=zeros(C // 8),
        # hypernetwork MLPs, stacked over mask tokens so they run as one batched kernel
        hyper_w1=rnd(NUM_MASK_TOKENS, C, C), hyper_b1=zeros(NUM_MASK_TOKENS, 1, C),
        hyper_w2=rnd(NUM_MASK_TOKENS, C, C), hyper_b2=zeros(NUM_MASK_TOKENS, 1, C),
        hyper_w3=rnd(NUM_MASK_TOKENS, C, C // 8), hyper_b3=zeros(NUM_MASK_TOKENS, 1, C // 8),
        # IoU head (leading group dim of 1 so it reuses the same fused MLP kernel)
        iou_w1=rnd(1, C, IOU_HIDDEN), iou_b1=zeros(1, 1, IOU_HIDDEN),
        iou_w2=rnd(1, IOU_HIDDEN, IOU_HIDDEN), iou_b2=zeros(1, 1, IOU_HIDDEN),
        iou_w3=rnd(1, IOU_HIDDEN, NUM_MASK_TOKENS), iou_b3=zeros(1, 1, NUM_MASK_TOKENS),
    )


# ----------------------------------------- main ----------------------------------------- #
if __name__ == "__main__":
    key = jax.random.PRNGKey(0)
    k_params, k_img, k_box = jax.random.split(key, 3)

    params = init_params(k_params)
    image_embeddings = jax.random.normal(k_img, (1, C, EMB_H, EMB_W), dtype=jnp.float32)
    bboxes = jax.random.uniform(k_box, (BATCH, 4), dtype=jnp.float32, minval=0.0, maxval=IMG_SIZE)

    scores, masks = jax.jit(sam_coreml_forward)(params, image_embeddings, bboxes)
    jax.block_until_ready((scores, masks))

    assert scores.shape == (BATCH, NUM_MASK_TOKENS)
    assert masks.shape == (BATCH, NUM_MASK_TOKENS, 4 * EMB_H, 4 * EMB_W)
    print("KERNEL_OK")
</pallas_src>

<mosaic_0001>
module attributes {stable_mosaic.version = 11 : i64} {
  func.func @_fused_attn_ln_kernel(%arg0: i32, %arg1: memref<1x7x32xf32, #tpu.memory_space<vmem>>, %arg2: memref<1x7x32xf32, #tpu.memory_space<vmem>>, %arg3: memref<1x7x32xf32, #tpu.memory_space<vmem>>, %arg4: memref<1x7x32xf32, #tpu.memory_space<vmem>>, %arg5: memref<1x7x32xf32, #tpu.memory_space<vmem>>, %arg6: memref<32x32xf32, #tpu.memory_space<vmem>>, %arg7: memref<1x32xf32, #tpu.memory_space<vmem>>, %arg8: memref<32x32xf32, #tpu.memory_space<vmem>>, %arg9: memref<1x32xf32, #tpu.memory_space<vmem>>, %arg10: memref<32x32xf32, #tpu.memory_space<vmem>>, %arg11: memref<1x32xf32, #tpu.memory_space<vmem>>, %arg12: memref<32x32xf32, #tpu.memory_space<vmem>>, %arg13: memref<1x32xf32, #tpu.memory_space<vmem>>, %arg14: memref<1x32xf32, #tpu.memory_space<vmem>>, %arg15: memref<1x32xf32, #tpu.memory_space<vmem>>, %arg16: memref<1x7x32xf32, #tpu.memory_space<vmem>>) attributes {dimension_semantics = [#tpu.dimension_semantics<parallel>], iteration_bounds = array<i64: 2>, scalar_prefetch = 0 : i64, scratch_operands = 0 : i64, tpu.core_type = #tpu.core_type<tc>, window_params = [{transform_indices = @transform_0, window_bounds = array<i64: 1, 7, 32>}, {transform_indices = @transform_1, window_bounds = array<i64: 1, 7, 32>}, {transform_indices = @transform_2, window_bounds = array<i64: 1, 7, 32>}, {transform_indices = @transform_3, window_bounds = array<i64: 1, 7, 32>}, {transform_indices = @transform_4, window_bounds = array<i64: 1, 7, 32>}, {pipeline_mode = #tpu.pipeline_mode<synchronous>, transform_indices = @transform_5, window_bounds = array<i64: 32, 32>}, {pipeline_mode = #tpu.pipeline_mode<synchronous>, transform_indices = @transform_6, window_bounds = array<i64: 1, 32>}, {pipeline_mode = #tpu.pipeline_mode<synchronous>, transform_indices = @transform_7, window_bounds = array<i64: 32, 32>}, {pipeline_mode = #tpu.pipeline_mode<synchronous>, transform_indices = @transform_8, window_bounds = array<i64: 1, 32>}, {pipeline_mode = #tpu.pipeline_mode<synchronous>, transform_indices = @transform_9, window_bounds = array<i64: 32, 32>}, {pipeline_mode = #tpu.pipeline_mode<synchronous>, transform_indices = @transform_10, window_bounds = array<i64: 1, 32>}, {pipeline_mode = #tpu.pipeline_mode<synchronous>, transform_indices = @transform_11, window_bounds = array<i64: 32, 32>}, {pipeline_mode = #tpu.pipeline_mode<synchronous>, transform_indices = @transform_12, window_bounds = array<i64: 1, 32>}, {pipeline_mode = #tpu.pipeline_mode<synchronous>, transform_indices = @transform_13, window_bounds = array<i64: 1, 32>}, {pipeline_mode = #tpu.pipeline_mode<synchronous>, transform_indices = @transform_14, window_bounds = array<i64: 1, 32>}, {transform_indices = @transform_15, window_bounds = array<i64: 1, 7, 32>}]} {
    %c0 = arith.constant 0 : index
    %c0_0 = arith.constant 0 : index
    %c0_1 = arith.constant 0 : index
    %0 = vector.load %arg1[%c0, %c0_0, %c0_1] : memref<1x7x32xf32, #tpu.memory_space<vmem>>, vector<1x7x32xf32>
    %1 = vector.shape_cast %0 : vector<1x7x32xf32> to vector<7x32xf32>
    %c0_2 = arith.constant 0 : index
    %c0_3 = arith.constant 0 : index
    %c0_4 = arith.constant 0 : index
    %2 = vector.load %arg3[%c0_2, %c0_3, %c0_4] : memref<1x7x32xf32, #tpu.memory_space<vmem>>, vector<1x7x32xf32>
    %3 = vector.shape_cast %2 : vector<1x7x32xf32> to vector<7x32xf32>
    %c0_5 = arith.constant 0 : index
    %c0_6 = arith.constant 0 : index
    %c0_7 = arith.constant 0 : index
    %4 = vector.load %arg5[%c0_5, %c0_6, %c0_7] : memref<1x7x32xf32, #tpu.memory_space<vmem>>, vector<1x7x32xf32>
    %5 = vector.shape_cast %4 : vector<1x7x32xf32> to vector<7x32xf32>
    %c0_8 = arith.constant 0 : index
    %c0_9 = arith.constant 0 : index
    %6 = vector.load %arg6[%c0_8, %c0_9] : memref<32x32xf32, #tpu.memory_space<vmem>>, vector<32x32xf32>
    %cst = arith.constant dense<0.000000e+00> : vector<7x32xf32>
    %7 = tpu.matmul %1, %6, %cst {dimension_numbers = #tpu.dot_dimension_numbers<[1], [0], [0], [1], [0, 0, 1, 1], [], []>} : vector<7x32xf32>, vector<32x32xf32>, vector<7x32xf32> -> vector<7x32xf32>
    %c0_10 = arith.constant 0 : index
    %c0_11 = arith.constant 0 : index
    %8 = vector.load %arg7[%c0_10, %c0_11] : memref<1x32xf32, #tpu.memory_space<vmem>>, vector<1x32xf32>
    %9 = vector.broadcast %8 : vector<1x32xf32> to vector<7x32xf32>
    %10 = arith.addf %7, %9 : vector<7x32xf32>
    %c0_12 = arith.constant 0 : index
    %c0_13 = arith.constant 0 : index
    %11 = vector.load %arg8[%c0_12, %c0_13] : memref<32x32xf32, #tpu.memory_space<vmem>>, vector<32x32xf32>
    %cst_14 = arith.constant dense<0.000000e+00> : vector<7x32xf32>
    %12 = tpu.matmul %3, %11, %cst_14 {dimension_numbers = #tpu.dot_dimension_numbers<[1], [0], [0], [1], [0, 0, 1, 1], [], []>} : vector<7x32xf32>, vector<32x32xf32>, vector<7x32xf32> -> vector<7x32xf32>
    %c0_15 = arith.constant 0 : index
    %c0_16 = arith.constant 0 : index
    %13 = vector.load %arg9[%c0_15, %c0_16] : memref<1x32xf32, #tpu.memory_space<vmem>>, vector<1x32xf32>
    %14 = vector.broadcast %13 : vector<1x32xf32> to vector<7x32xf32>
    %15 = arith.addf %12, %14 : vector<7x32xf32>
    %c0_17 = arith.constant 0 : index
    %c0_18 = arith.constant 0 : index
    %16 = vector.load %arg10[%c0_17, %c0_18] : memref<32x32xf32, #tpu.memory_space<vmem>>, vector<32x32xf32>
    %cst_19 = arith.constant dense<0.000000e+00> : vector<7x32xf32>
    %17 = tpu.matmul %5, %16, %cst_19 {dimension_numbers = #tpu.dot_dimension_numbers<[1], [0], [0], [1], [0, 0, 1, 1], [], []>} : vector<7x32xf32>, vector<32x32xf32>, vector<7x32xf32> -> vector<7x32xf32>
    %c0_20 = arith.constant 0 : index
    %c0_21 = arith.constant 0 : index
    %18 = vector.load %arg11[%c0_20, %c0_21] : memref<1x32xf32, #tpu.memory_space<vmem>>, vector<1x32xf32>
    %19 = vector.broadcast %18 : vector<1x32xf32> to vector<7x32xf32>
    %20 = arith.addf %17, %19 : vector<7x32xf32>
    %c0_22 = arith.constant 0 : index
    %c0_23 = arith.constant 0 : index
    %21 = vector.load %arg13[%c0_22, %c0_23] : memref<1x32xf32, #tpu.memory_space<vmem>>, vector<1x32xf32>
    %22 = vector.extract_strided_slice %10 {offsets = [0, 0], sizes = [7, 16], strides = [1, 1]} : vector<7x32xf32> to vector<7x16xf32>
    %23 = vector.extract_strided_slice %15 {offsets = [0, 0], sizes = [7, 16], strides = [1, 1]} : vector<7x32xf32> to vector<7x16xf32>
    %24 = vector.extract_strided_slice %20 {offsets = [0, 0], sizes = [7, 16], strides = [1, 1]} : vector<7x32xf32> to vector<7x16xf32>
    %cst_24 = arith.constant dense<0.000000e+00> : vector<7x7xf32>
    %25 = tpu.matmul %22, %23, %cst_24 {dimension_numbers = #tpu.dot_dimension_numbers<[1], [1], [0], [0], [0, 0, 1, 0], [], []>} : vector<7x16xf32>, vector<7x16xf32>, vector<7x7xf32> -> vector<7x7xf32>
    %cst_25 = arith.constant 2.500000e-01 : f32
    %26 = vector.broadcast %cst_25 : f32 to vector<7x7xf32>
    %27 = arith.mulf %25, %26 : vector<7x7xf32>
    %cst_26 = arith.constant dense<0xFF800000> : vector<7xf32>
    %28 = vector.multi_reduction <maximumf>, %27, %cst_26 [1] : vector<7x7xf32> to vector<7xf32>
    %29 = vector.shape_cast %28 : vector<7xf32> to vector<7x1xf32>
    %30 = vector.broadcast %29 : vector<7x1xf32> to vector<7x7xf32>
    %31 = arith.subf %27, %30 : vector<7x7xf32>
    %32 = math.exp %31 : vector<7x7xf32>
    %cst_27 = arith.constant dense<0.000000e+00> : vector<7xf32>
    %33 = vector.multi_reduction <add>, %32, %cst_27 [1] : vector<7x7xf32> to vector<7xf32>
    %34 = vector.shape_cast %33 : vector<7xf32> to vector<7x1xf32>
    %35 = tpu.reciprocal %34 {approx = true} : vector<7x1xf32> -> vector<7x1xf32>
    %36 = vector.broadcast %35 : vector<7x1xf32> to vector<7x7xf32>
    %37 = arith.mulf %32, %36 : vector<7x7xf32>
    %cst_28 = arith.constant dense<0.000000e+00> : vector<7x16xf32>
    %38 = tpu.matmul %37, %24, %cst_28 {dimension_numbers = #tpu.dot_dimension_numbers<[1], [0], [0], [1], [0, 0, 1, 1], [], []>} : vector<7x7xf32>, vector<7x16xf32>, vector<7x16xf32> -> vector<7x16xf32>
    %c0_29 = arith.constant 0 : index
    %c0_30 = arith.constant 0 : index
    %39 = vector.load %arg12[%c0_29, %c0_30] : memref<32x32xf32, #tpu.memory_space<vmem>>, vector<16x32xf32>
    %cst_31 = arith.constant dense<0.000000e+00> : vector<7x32xf32>
    %40 = tpu.matmul %38, %39, %cst_31 {dimension_numbers = #tpu.dot_dimension_numbers<[1], [0], [0], [1], [0, 0, 1, 1], [], []>} : vector<7x16xf32>, vector<16x32xf32>, vector<7x32xf32> -> vector<7x32xf32>
    %41 = vector.broadcast %21 : vector<1x32xf32> to vector<7x32xf32>
    %42 = arith.addf %41, %40 : vector<7x32xf32>
    %43 = vector.extract_strided_slice %10 {offsets = [0, 16], sizes = [7, 16], strides = [1, 1]} : vector<7x32xf32> to vector<7x16xf32>
    %44 = vector.extract_strided_slice %15 {offsets = [0, 16], sizes = [7, 16], strides = [1, 1]} : vector<7x32xf32> to vector<7x16xf32>
    %45 = vector.extract_strided_slice %20 {offsets = [0, 16], sizes = [7, 16], strides = [1, 1]} : vector<7x32xf32> to vector<7x16xf32>
    %cst_32 = arith.constant dense<0.000000e+00> : vector<7x7xf32>
    %46 = tpu.matmul %43, %44, %cst_32 {dimension_numbers = #tpu.dot_dimension_numbers<[1], [1], [0], [0], [0, 0, 1, 0], [], []>} : vector<7x16xf32>, vector<7x16xf32>, vector<7x7xf32> -> vector<7x7xf32>
    %cst_33 = arith.constant 2.500000e-01 : f32
    %47 = vector.broadcast %cst_33 : f32 to vector<7x7xf32>
    %48 = arith.mulf %46, %47 : vector<7x7xf32>
    %cst_34 = arith.constant dense<0xFF800000> : vector<7xf32>
    %49 = vector.multi_reduction <maximumf>, %48, %cst_34 [1] : vector<7x7xf32> to vector<7xf32>
    %50 = vector.shape_cast %49 : vector<7xf32> to vector<7x1xf32>
    %51 = vector.broadcast %50 : vector<7x1xf32> to vector<7x7xf32>
    %52 = arith.subf %48, %51 : vector<7x7xf32>
    %53 = math.exp %52 : vector<7x7xf32>
    %cst_35 = arith.constant dense<0.000000e+00> : vector<7xf32>
    %54 = vector.multi_reduction <add>, %53, %cst_35 [1] : vector<7x7xf32> to vector<7xf32>
    %55 = vector.shape_cast %54 : vector<7xf32> to vector<7x1xf32>
    %56 = tpu.reciprocal %55 {approx = true} : vector<7x1xf32> -> vector<7x1xf32>
    %57 = vector.broadcast %56 : vector<7x1xf32> to vector<7x7xf32>
    %58 = arith.mulf %53, %57 : vector<7x7xf32>
    %cst_36 = arith.constant dense<0.000000e+00> : vector<7x16xf32>
    %59 = tpu.matmul %58, %45, %cst_36 {dimension_numbers = #tpu.dot_dimension_numbers<[1], [0], [0], [1], [0, 0, 1, 1], [], []>} : vector<7x7xf32>, vector<7x16xf32>, vector<7x16xf32> -> vector<7x16xf32>
    %c16 = arith.constant 16 : index
    %c0_37 = arith.constant 0 : index
    %60 = vector.load %arg12[%c16, %c0_37] : memref<32x32xf32, #tpu.memory_space<vmem>>, vector<16x32xf32>
    %cst_38 = arith.constant dense<0.000000e+00> : vector<7x32xf32>
    %61 = tpu.matmul %59, %60, %cst_38 {dimension_numbers = #tpu.dot_dimension_numbers<[1], [0], [0], [1], [0, 0, 1, 1], [], []>} : vector<7x16xf32>, vector<16x32xf32>, vector<7x32xf32> -> vector<7x32xf32>
    %62 = arith.addf %42, %61 : vector<7x32xf32>
    %cst_39 = arith.constant dense<0.000000e+00> : vector<7xf32>
    %63 = vector.multi_reduction <add>, %62, %cst_39 [1] : vector<7x32xf32> to vector<7xf32>
    %64 = vector.shape_cast %63 : vector<7xf32> to vector<7x1xf32>
    %cst_40 = arith.constant 3.200000e+01 : f32
    %65 = vector.broadcast %cst_40 : f32 to vector<7x1xf32>
    %66 = arith.divf %64, %65 : vector<7x1xf32>
    %67 = vector.broadcast %66 : vector<7x1xf32> to vector<7x32xf32>
    %68 = arith.subf %62, %67 : vector<7x32xf32>
    %69 = arith.mulf %68, %68 : vector<7x32xf32>
    %cst_41 = arith.constant dense<0.000000e+00> : vector<7xf32>
    %70 = vector.multi_reduction <add>, %69, %cst_41 [1] : vector<7x32xf32> to vector<7xf32>
    %71 = vector.shape_cast %70 : vector<7xf32> to vector<7x1xf32>
    %cst_42 = arith.constant 3.200000e+01 : f32
    %72 = vector.broadcast %cst_42 : f32 to vector<7x1xf32>
    %73 = arith.divf %71, %72 : vector<7x1xf32>
    %74 = vector.broadcast %66 : vector<7x1xf32> to vector<7x32xf32>
    %75 = arith.subf %62, %74 : vector<7x32xf32>
    %cst_43 = arith.constant 9.99999974E-6 : f32
    %76 = vector.broadcast %cst_43 : f32 to vector<7x1xf32>
    %77 = arith.addf %73, %76 : vector<7x1xf32>
    %78 = math.rsqrt %77 : vector<7x1xf32>
    %79 = vector.broadcast %78 : vector<7x1xf32> to vector<7x32xf32>
    %80 = arith.mulf %75, %79 : vector<7x32xf32>
    %c0_44 = arith.constant 0 : index
    %c0_45 = arith.constant 0 : index
    %81 = vector.load %arg14[%c0_44, %c0_45] : memref<1x32xf32, #tpu.memory_space<vmem>>, vector<1x32xf32>
    %82 = vector.broadcast %81 : vector<1x32xf32> to vector<7x32xf32>
    %83 = arith.mulf %80, %82 : vector<7x32xf32>
    %c0_46 = arith.constant 0 : index
    %c0_47 = arith.constant 0 : index
    %84 = vector.load %arg15[%c0_46, %c0_47] : memref<1x32xf32, #tpu.memory_space<vmem>>, vector<1x32xf32>
    %85 = vector.broadcast %84 : vector<1x32xf32> to vector<7x32xf32>
    %86 = arith.addf %83, %85 : vector<7x32xf32>
    %c0_48 = arith.constant 0 : index
    %c0_49 = arith.constant 0 : index
    %c0_50 = arith.constant 0 : index
    %87 = vector.load %arg16[%c0_48, %c0_49, %c0_50] : memref<1x7x32xf32, #tpu.memory_space<vmem>>, vector<1x7x32xf32>
    %88 = vector.shape_cast %87 : vector<1x7x32xf32> to vector<7x32xf32>
    %89 = vector.shape_cast %86 : vector<7x32xf32> to vector<1x7x32xf32>
    tpu.vector_store %arg16[%c0_48, %c0_49, %c0_50], %89 {strides = array<i32>} : memref<1x7x32xf32, #tpu.memory_space<vmem>>, vector<1x7x32xf32>,
    return
  }
  func.func @transform_0(%arg0: i32) -> (i32, i32, i32) {
    %c0_i32 = arith.constant 0 : i32
    %c0_i32_0 = arith.constant 0 : i32
    %c0_i32_1 = arith.constant 0 : i32
    return %arg0, %c0_i32, %c0_i32_0 : i32, i32, i32
  }
  func.func @transform_1(%arg0: i32) -> (i32, i32, i32) {
    %c0_i32 = arith.constant 0 : i32
    %c0_i32_0 = arith.constant 0 : i32
    %c0_i32_1 = arith.constant 0 : i32
    return %arg0, %c0_i32, %c0_i32_0 : i32, i32, i32
  }
  func.func @transform_2(%arg0: i32) -> (i32, i32, i32) {
    %c0_i32 = arith.constant 0 : i32
    %c0_i32_0 = arith.constant 0 : i32
    %c0_i32_1 = arith.constant 0 : i32
    return %arg0, %c0_i32, %c0_i32_0 : i32, i32, i32
  }
  func.func @transform_3(%arg0: i32) -> (i32, i32, i32) {
    %c0_i32 = arith.constant 0 : i32
    %c0_i32_0 = arith.constant 0 : i32
    %c0_i32_1 = arith.constant 0 : i32
    return %arg0, %c0_i32, %c0_i32_0 : i32, i32, i32
  }
  func.func @transform_4(%arg0: i32) -> (i32, i32, i32) {
    %c0_i32 = arith.constant 0 : i32
    %c0_i32_0 = arith.constant 0 : i32
    %c0_i32_1 = arith.constant 0 : i32
    return %arg0, %c0_i32, %c0_i32_0 : i32, i32, i32
  }
  func.func @transform_5(%arg0: i32) -> (i32, i32) {
    %c0_i32 = arith.constant 0 : i32
    %c0_i32_0 = arith.constant 0 : i32
    %c0_i32_1 = arith.constant 0 : i32
    return %c0_i32, %c0_i32_0 : i32, i32
  }
  func.func @transform_6(%arg0: i32) -> (i32, i32) {
    %c0_i32 = arith.constant 0 : i32
    %c0_i32_0 = arith.constant 0 : i32
    %c0_i32_1 = arith.constant 0 : i32
    return %c0_i32, %c0_i32_0 : i32, i32
  }
  func.func @transform_7(%arg0: i32) -> (i32, i32) {
    %c0_i32 = arith.constant 0 : i32
    %c0_i32_0 = arith.constant 0 : i32
    %c0_i32_1 = arith.constant 0 : i32
    return %c0_i32, %c0_i32_0 : i32, i32
  }
  func.func @transform_8(%arg0: i32) -> (i32, i32) {
    %c0_i32 = arith.constant 0 : i32
    %c0_i32_0 = arith.constant 0 : i32
    %c0_i32_1 = arith.constant 0 : i32
    return %c0_i32, %c0_i32_0 : i32, i32
  }
  func.func @transform_9(%arg0: i32) -> (i32, i32) {
    %c0_i32 = arith.constant 0 : i32
    %c0_i32_0 = arith.constant 0 : i32
    %c0_i32_1 = arith.constant 0 : i32
    return %c0_i32, %c0_i32_0 : i32, i32
  }
  func.func @transform_10(%arg0: i32) -> (i32, i32) {
    %c0_i32 = arith.constant 0 : i32
    %c0_i32_0 = arith.constant 0 : i32
    %c0_i32_1 = arith.constant 0 : i32
    return %c0_i32, %c0_i32_0 : i32, i32
  }
  func.func @transform_11(%arg0: i32) -> (i32, i32) {
    %c0_i32 = arith.constant 0 : i32
    %c0_i32_0 = arith.constant 0 : i32
    %c0_i32_1 = arith.constant 0 : i32
    return %c0_i32, %c0_i32_0 : i32, i32
  }
  func.func @transform_12(%arg0: i32) -> (i32, i32) {
    %c0_i32 = arith.constant 0 : i32
    %c0_i32_0 = arith.constant 0 : i32
    %c0_i32_1 = arith.constant 0 : i32
    return %c0_i32, %c0_i32_0 : i32, i32
  }
  func.func @transform_13(%arg0: i32) -> (i32, i32) {
    %c0_i32 = arith.constant 0 : i32
    %c0_i32_0 = arith.constant 0 : i32
    %c0_i32_1 = arith.constant 0 : i32
    return %c0_i32, %c0_i32_0 : i32, i32
  }
  func.func @transform_14(%arg0: i32) -> (i32, i32) {
    %c0_i32 = arith.constant 0 : i32
    %c0_i32_0 = arith.constant 0 : i32
    %c0_i32_1 = arith.constant 0 : i32
    return %c0_i32, %c0_i32_0 : i32, i32
  }
  func.func @transform_15(%arg0: i32) -> (i32, i32, i32) {
    %c0_i32 = arith.constant 0 : i32
    %c0_i32_0 = arith.constant 0 : i32
    %c0_i32_1 = arith.constant 0 : i32
    return %arg0, %c0_i32, %c0_i32_0 : i32, i32, i32
  }
}

module attributes {stable_mosaic.version = 11 : i64} {
  func.func @_fused_attn_ln_kernel(%arg0: i32, %arg1: memref<1x7x32xf32, #tpu.memory_space<vmem>>, %arg2: memref<1x7x32xf32, #tpu.memory_space<vmem>>, %arg3: memref<1x64x32xf32, #tpu.memory_space<vmem>>, %arg4: memref<1x64x32xf32, #tpu.memory_space<vmem>>, %arg5: memref<1x64x32xf32, #tpu.memory_space<vmem>>, %arg6: memref<32x16xf32, #tpu.memory_space<vmem>>, %arg7: memref<1x16xf32, #tpu.memory_space<vmem>>, %arg8: memref<32x16xf32, #tpu.memory_space<vmem>>, %arg9: memref<1x16xf32, #tpu.memory_space<vmem>>, %arg10: memref<32x16xf32, #tpu.memory_space<vmem>>, %arg11: memref<1x16xf32, #tpu.memory_space<vmem>>, %arg12: memref<16x32xf32, #tpu.memory_space<vmem>>, %arg13: memref<1x32xf32, #tpu.memory_space<vmem>>, %arg14: memref<1x32xf32, #tpu.memory_space<vmem>>, %arg15: memref<1x32xf32, #tpu.memory_space<vmem>>, %arg16: memref<1x7x32xf32, #tpu.memory_space<vmem>>) attributes {dimension_semantics = [#tpu.dimension_semantics<parallel>], iteration_bounds = array<i64: 2>, scalar_prefetch = 0 : i64, scratch_operands = 0 : i64, tpu.core_type = #tpu.core_type<tc>, window_params = [{transform_indices = @transform_0, window_bounds = array<i64: 1, 7, 32>}, {transform_indices = @transform_1, window_bounds = array<i64: 1, 7, 32>}, {transform_indices = @transform_2, window_bounds = array<i64: 1, 64, 32>}, {transform_indices = @transform_3, window_bounds = array<i64: 1, 64, 32>}, {transform_indices = @transform_4, window_bounds = array<i64: 1, 64, 32>}, {pipeline_mode = #tpu.pipeline_mode<synchronous>, transform_indices = @transform_5, window_bounds = array<i64: 32, 16>}, {pipeline_mode = #tpu.pipeline_mode<synchronous>, transform_indices = @transform_6, window_bounds = array<i64: 1, 16>}, {pipeline_mode = #tpu.pipeline_mode<synchronous>, transform_indices = @transform_7, window_bounds = array<i64: 32, 16>}, {pipeline_mode = #tpu.pipeline_mode<synchronous>, transform_indices = @transform_8, window_bounds = array<i64: 1, 16>}, {pipeline_mode = #tpu.pipeline_mode<synchronous>, transform_indices = @transform_9, window_bounds = array<i64: 32, 16>}, {pipeline_mode = #tpu.pipeline_mode<synchronous>, transform_indices = @transform_10, window_bounds = array<i64: 1, 16>}, {pipeline_mode = #tpu.pipeline_mode<synchronous>, transform_indices = @transform_11, window_bounds = array<i64: 16, 32>}, {pipeline_mode = #tpu.pipeline_mode<synchronous>, transform_indices = @transform_12, window_bounds = array<i64: 1, 32>}, {pipeline_mode = #tpu.pipeline_mode<synchronous>, transform_indices = @transform_13, window_bounds = array<i64: 1, 32>}, {pipeline_mode = #tpu.pipeline_mode<synchronous>, transform_indices = @transform_14, window_bounds = array<i64: 1, 32>}, {transform_indices = @transform_15, window_bounds = array<i64: 1, 7, 32>}]} {
    %c0 = arith.constant 0 : index
    %c0_0 = arith.constant 0 : index
    %c0_1 = arith.constant 0 : index
    %0 = vector.load %arg1[%c0, %c0_0, %c0_1] : memref<1x7x32xf32, #tpu.memory_space<vmem>>, vector<1x7x32xf32>
    %1 = vector.shape_cast %0 : vector<1x7x32xf32> to vector<7x32xf32>
    %c0_2 = arith.constant 0 : index
    %c0_3 = arith.constant 0 : index
    %c0_4 = arith.constant 0 : index
    %2 = vector.load %arg3[%c0_2, %c0_3, %c0_4] : memref<1x64x32xf32, #tpu.memory_space<vmem>>, vector<1x64x32xf32>
    %3 = vector.shape_cast %2 : vector<1x64x32xf32> to vector<64x32xf32>
    %c0_5 = arith.constant 0 : index
    %c0_6 = arith.constant 0 : index
    %c0_7 = arith.constant 0 : index
    %4 = vector.load %arg5[%c0_5, %c0_6, %c0_7] : memref<1x64x32xf32, #tpu.memory_space<vmem>>, vector<1x64x32xf32>
    %5 = vector.shape_cast %4 : vector<1x64x32xf32> to vector<64x32xf32>
    %c0_8 = arith.constant 0 : index
    %c0_9 = arith.constant 0 : index
    %c0_10 = arith.constant 0 : index
    %6 = vector.load %arg2[%c0_8, %c0_9, %c0_10] : memref<1x7x32xf32, #tpu.memory_space<vmem>>, vector<1x7x32xf32>
    %7 = vector.shape_cast %6 : vector<1x7x32xf32> to vector<7x32xf32>
    %8 = arith.addf %1, %7 : vector<7x32xf32>
    %c0_11 = arith.constant 0 : index
    %c0_12 = arith.constant 0 : index
    %c0_13 = arith.constant 0 : index
    %9 = vector.load %arg4[%c0_11, %c0_12, %c0_13] : memref<1x64x32xf32, #tpu.memory_space<vmem>>, vector<1x64x32xf32>
    %10 = vector.shape_cast %9 : vector<1x64x32xf32> to vector<64x32xf32>
    %11 = arith.addf %3, %10 : vector<64x32xf32>
    %c0_14 = arith.constant 0 : index
    %c0_15 = arith.constant 0 : index
    %12 = vector.load %arg6[%c0_14, %c0_15] : memref<32x16xf32, #tpu.memory_space<vmem>>, vector<32x16xf32>
    %cst = arith.constant dense<0.000000e+00> : vector<7x16xf32>
    %13 = tpu.matmul %8, %12, %cst {dimension_numbers = #tpu.dot_dimension_numbers<[1], [0], [0], [1], [0, 0, 1, 1], [], []>} : vector<7x32xf32>, vector<32x16xf32>, vector<7x16xf32> -> vector<7x16xf32>
    %c0_16 = arith.constant 0 : index
    %c0_17 = arith.constant 0 : index
    %14 = vector.load %arg7[%c0_16, %c0_17] : memref<1x16xf32, #tpu.memory_space<vmem>>, vector<1x16xf32>
    %15 = vector.broadcast %14 : vector<1x16xf32> to vector<7x16xf32>
    %16 = arith.addf %13, %15 : vector<7x16xf32>
    %c0_18 = arith.constant 0 : index
    %c0_19 = arith.constant 0 : index
    %17 = vector.load %arg8[%c0_18, %c0_19] : memref<32x16xf32, #tpu.memory_space<vmem>>, vector<32x16xf32>
    %cst_20 = arith.constant dense<0.000000e+00> : vector<64x16xf32>
    %18 = tpu.matmul %11, %17, %cst_20 {dimension_numbers = #tpu.dot_dimension_numbers<[1], [0], [0], [1], [0, 0, 1, 1], [], []>} : vector<64x32xf32>, vector<32x16xf32>, vector<64x16xf32> -> vector<64x16xf32>
    %c0_21 = arith.constant 0 : index
    %c0_22 = arith.constant 0 : index
    %19 = vector.load %arg9[%c0_21, %c0_22] : memref<1x16xf32, #tpu.memory_space<vmem>>, vector<1x16xf32>
    %20 = vector.broadcast %19 : vector<1x16xf32> to vector<64x16xf32>
    %21 = arith.addf %18, %20 : vector<64x16xf32>
    %c0_23 = arith.constant 0 : index
    %c0_24 = arith.constant 0 : index
    %22 = vector.load %arg10[%c0_23, %c0_24] : memref<32x16xf32, #tpu.memory_space<vmem>>, vector<32x16xf32>
    %cst_25 = arith.constant dense<0.000000e+00> : vector<64x16xf32>
    %23 = tpu.matmul %5, %22, %cst_25 {dimension_numbers = #tpu.dot_dimension_numbers<[1], [0], [0], [1], [0, 0, 1, 1], [], []>} : vector<64x32xf32>, vector<32x16xf32>, vector<64x16xf32> -> vector<64x16xf32>
    %c0_26 = arith.constant 0 : index
    %c0_27 = arith.constant 0 : index
    %24 = vector.load %arg11[%c0_26, %c0_27] : memref<1x16xf32, #tpu.memory_space<vmem>>, vector<1x16xf32>
    %25 = vector.broadcast %24 : vector<1x16xf32> to vector<64x16xf32>
    %26 = arith.addf %23, %25 : vector<64x16xf32>
    %c0_28 = arith.constant 0 : index
    %c0_29 = arith.constant 0 : index
    %27 = vector.load %arg13[%c0_28, %c0_29] : memref<1x32xf32, #tpu.memory_space<vmem>>, vector<1x32xf32>
    %28 = vector.extract_strided_slice %16 {offsets = [0, 0], sizes = [7, 8], strides = [1, 1]} : vector<7x16xf32> to vector<7x8xf32>
    %29 = vector.extract_strided_slice %21 {offsets = [0, 0], sizes = [64, 8], strides = [1, 1]} : vector<64x16xf32> to vector<64x8xf32>
    %30 = vector.extract_strided_slice %26 {offsets = [0, 0], sizes = [64, 8], strides = [1, 1]} : vector<64x16xf32> to vector<64x8xf32>
    %cst_30 = arith.constant dense<0.000000e+00> : vector<7x64xf32>
    %31 = tpu.matmul %28, %29, %cst_30 {dimension_numbers = #tpu.dot_dimension_numbers<[1], [1], [0], [0], [0, 0, 1, 0], [], []>} : vector<7x8xf32>, vector<64x8xf32>, vector<7x64xf32> -> vector<7x64xf32>
    %cst_31 = arith.constant 0.353553385 : f32
    %32 = vector.broadcast %cst_31 : f32 to vector<7x64xf32>
    %33 = arith.mulf %31, %32 : vector<7x64xf32>
    %cst_32 = arith.constant dense<0xFF800000> : vector<7xf32>
    %34 = vector.multi_reduction <maximumf>, %33, %cst_32 [1] : vector<7x64xf32> to vector<7xf32>
    %35 = vector.shape_cast %34 : vector<7xf32> to vector<7x1xf32>
    %36 = vector.broadcast %35 : vector<7x1xf32> to vector<7x64xf32>
    %37 = arith.subf %33, %36 : vector<7x64xf32>
    %38 = math.exp %37 : vector<7x64xf32>
    %cst_33 = arith.constant dense<0.000000e+00> : vector<7xf32>
    %39 = vector.multi_reduction <add>, %38, %cst_33 [1] : vector<7x64xf32> to vector<7xf32>
    %40 = vector.shape_cast %39 : vector<7xf32> to vector<7x1xf32>
    %41 = tpu.reciprocal %40 {approx = true} : vector<7x1xf32> -> vector<7x1xf32>
    %42 = vector.broadcast %41 : vector<7x1xf32> to vector<7x64xf32>
    %43 = arith.mulf %38, %42 : vector<7x64xf32>
    %cst_34 = arith.constant dense<0.000000e+00> : vector<7x8xf32>
    %44 = tpu.matmul %43, %30, %cst_34 {dimension_numbers = #tpu.dot_dimension_numbers<[1], [0], [0], [1], [0, 0, 1, 1], [], []>} : vector<7x64xf32>, vector<64x8xf32>, vector<7x8xf32> -> vector<7x8xf32>
    %c0_35 = arith.constant 0 : index
    %c0_36 = arith.constant 0 : index
    %45 = vector.load %arg12[%c0_35, %c0_36] : memref<16x32xf32, #tpu.memory_space<vmem>>, vector<8x32xf32>
    %cst_37 = arith.constant dense<0.000000e+00> : vector<7x32xf32>
    %46 = tpu.matmul %44, %45, %cst_37 {dimension_numbers = #tpu.dot_dimension_numbers<[1], [0], [0], [1], [0, 0, 1, 1], [], []>} : vector<7x8xf32>, vector<8x32xf32>, vector<7x32xf32> -> vector<7x32xf32>
    %47 = vector.broadcast %27 : vector<1x32xf32> to vector<7x32xf32>
    %48 = arith.addf %47, %46 : vector<7x32xf32>
    %49 = vector.extract_strided_slice %16 {offsets = [0, 8], sizes = [7, 8], strides = [1, 1]} : vector<7x16xf32> to vector<7x8xf32>
    %50 = vector.extract_strided_slice %21 {offsets = [0, 8], sizes = [64, 8], strides = [1, 1]} : vector<64x16xf32> to vector<64x8xf32>
    %51 = vector.extract_strided_slice %26 {offsets = [0, 8], sizes = [64, 8], strides = [1, 1]} : vector<64x16xf32> to vector<64x8xf32>
    %cst_38 = arith.constant dense<0.000000e+00> : vector<7x64xf32>
    %52 = tpu.matmul %49, %50, %cst_38 {dimension_numbers = #tpu.dot_dimension_numbers<[1], [1], [0], [0], [0, 0, 1, 0], [], []>} : vector<7x8xf32>, vector<64x8xf32>, vector<7x64xf32> -> vector<7x64xf32>
    %cst_39 = arith.constant 0.353553385 : f32
    %53 = vector.broadcast %cst_39 : f32 to vector<7x64xf32>
    %54 = arith.mulf %52, %53 : vector<7x64xf32>
    %cst_40 = arith.constant dense<0xFF800000> : vector<7xf32>
    %55 = vector.multi_reduction <maximumf>, %54, %cst_40 [1] : vector<7x64xf32> to vector<7xf32>
    %56 = vector.shape_cast %55 : vector<7xf32> to vector<7x1xf32>
    %57 = vector.broadcast %56 : vector<7x1xf32> to vector<7x64xf32>
    %58 = arith.subf %54, %57 : vector<7x64xf32>
    %59 = math.exp %58 : vector<7x64xf32>
    %cst_41 = arith.constant dense<0.000000e+00> : vector<7xf32>
    %60 = vector.multi_reduction <add>, %59, %cst_41 [1] : vector<7x64xf32> to vector<7xf32>
    %61 = vector.shape_cast %60 : vector<7xf32> to vector<7x1xf32>
    %62 = tpu.reciprocal %61 {approx = true} : vector<7x1xf32> -> vector<7x1xf32>
    %63 = vector.broadcast %62 : vector<7x1xf32> to vector<7x64xf32>
    %64 = arith.mulf %59, %63 : vector<7x64xf32>
    %cst_42 = arith.constant dense<0.000000e+00> : vector<7x8xf32>
    %65 = tpu.matmul %64, %51, %cst_42 {dimension_numbers = #tpu.dot_dimension_numbers<[1], [0], [0], [1], [0, 0, 1, 1], [], []>} : vector<7x64xf32>, vector<64x8xf32>, vector<7x8xf32> -> vector<7x8xf32>
    %c8 = arith.constant 8 : index
    %c0_43 = arith.constant 0 : index
    %66 = vector.load %arg12[%c8, %c0_43] : memref<16x32xf32, #tpu.memory_space<vmem>>, vector<8x32xf32>
    %cst_44 = arith.constant dense<0.000000e+00> : vector<7x32xf32>
    %67 = tpu.matmul %65, %66, %cst_44 {dimension_numbers = #tpu.dot_dimension_numbers<[1], [0], [0], [1], [0, 0, 1, 1], [], []>} : vector<7x8xf32>, vector<8x32xf32>, vector<7x32xf32> -> vector<7x32xf32>
    %68 = arith.addf %48, %67 : vector<7x32xf32>
    %69 = arith.addf %68, %1 : vector<7x32xf32>
    %cst_45 = arith.constant dense<0.000000e+00> : vector<7xf32>
    %70 = vector.multi_reduction <add>, %69, %cst_45 [1] : vector<7x32xf32> to vector<7xf32>
    %71 = vector.shape_cast %70 : vector<7xf32> to vector<7x1xf32>
    %cst_46 = arith.constant 3.200000e+01 : f32
    %72 = vector.broadcast %cst_46 : f32 to vector<7x1xf32>
    %73 = arith.divf %71, %72 : vector<7x1xf32>
    %74 = vector.broadcast %73 : vector<7x1xf32> to vector<7x32xf32>
    %75 = arith.subf %69, %74 : vector<7x32xf32>
    %76 = arith.mulf %75, %75 : vector<7x32xf32>
    %cst_47 = arith.constant dense<0.000000e+00> : vector<7xf32>
    %77 = vector.multi_reduction <add>, %76, %cst_47 [1] : vector<7x32xf32> to vector<7xf32>
    %78 = vector.shape_cast %77 : vector<7xf32> to vector<7x1xf32>
    %cst_48 = arith.constant 3.200000e+01 : f32
    %79 = vector.broadcast %cst_48 : f32 to vector<7x1xf32>
    %80 = arith.divf %78, %79 : vector<7x1xf32>
    %81 = vector.broadcast %73 : vector<7x1xf32> to vector<7x32xf32>
    %82 = arith.subf %69, %81 : vector<7x32xf32>
    %cst_49 = arith.constant 9.99999974E-6 : f32
    %83 = vector.broadcast %cst_49 : f32 to vector<7x1xf32>
    %84 = arith.addf %80, %83 : vector<7x1xf32>
    %85 = math.rsqrt %84 : vector<7x1xf32>
    %86 = vector.broadcast %85 : vector<7x1xf32> to vector<7x32xf32>
    %87 = arith.mulf %82, %86 : vector<7x32xf32>
    %c0_50 = arith.constant 0 : index
    %c0_51 = arith.constant 0 : index
    %88 = vector.load %arg14[%c0_50, %c0_51] : memref<1x32xf32, #tpu.memory_space<vmem>>, vector<1x32xf32>
    %89 = vector.broadcast %88 : vector<1x32xf32> to vector<7x32xf32>
    %90 = arith.mulf %87, %89 : vector<7x32xf32>
    %c0_52 = arith.constant 0 : index
    %c0_53 = arith.constant 0 : index
    %91 = vector.load %arg15[%c0_52, %c0_53] : memref<1x32xf32, #tpu.memory_space<vmem>>, vector<1x32xf32>
    %92 = vector.broadcast %91 : vector<1x32xf32> to vector<7x32xf32>
    %93 = arith.addf %90, %92 : vector<7x32xf32>
    %c0_54 = arith.constant 0 : index
    %c0_55 = arith.constant 0 : index
    %c0_56 = arith.constant 0 : index
    %94 = vector.load %arg16[%c0_54, %c0_55, %c0_56] : memref<1x7x32xf32, #tpu.memory_space<vmem>>, vector<1x7x32xf32>
    %95 = vector.shape_cast %94 : vector<1x7x32xf32> to vector<7x32xf32>
    %96 = vector.shape_cast %93 : vector<7x32xf32> to vector<1x7x32xf32>
    tpu.vector_store %arg16[%c0_54, %c0_55, %c0_56], %96 {strides = array<i32>} : memref<1x7x32xf32, #tpu.memory_space<vmem>>, vector<1x7x32xf32>,
    return
  }
  func.func @transform_0(%arg0: i32) -> (i32, i32, i32) {
    %c0_i32 = arith.constant 0 : i32
    %c0_i32_0 = arith.constant 0 : i32
    %c0_i32_1 = arith.constant 0 : i32
    return %arg0, %c0_i32, %c0_i32_0 : i32, i32, i32
  }
  func.func @transform_1(%arg0: i32) -> (i32, i32, i32) {
    %c0_i32 = arith.constant 0 : i32
    %c0_i32_0 = arith.constant 0 : i32
    %c0_i32_1 = arith.constant 0 : i32
    return %arg0, %c0_i32, %c0_i32_0 : i32, i32, i32
  }
  func.func @transform_2(%arg0: i32) -> (i32, i32, i32) {
    %c0_i32 = arith.constant 0 : i32
    %c0_i32_0 = arith.constant 0 : i32
    %c0_i32_1 = arith.constant 0 : i32
    return %arg0, %c0_i32, %c0_i32_0 : i32, i32, i32
  }
  func.func @transform_3(%arg0: i32) -> (i32, i32, i32) {
    %c0_i32 = arith.constant 0 : i32
    %c0_i32_0 = arith.constant 0 : i32
    %c0_i32_1 = arith.constant 0 : i32
    return %arg0, %c0_i32, %c0_i32_0 : i32, i32, i32
  }
  func.func @transform_4(%arg0: i32) -> (i32, i32, i32) {
    %c0_i32 = arith.constant 0 : i32
    %c0_i32_0 = arith.constant 0 : i32
    %c0_i32_1 = arith.constant 0 : i32
    return %arg0, %c0_i32, %c0_i32_0 : i32, i32, i32
  }
  func.func @transform_5(%arg0: i32) -> (i32, i32) {
    %c0_i32 = arith.constant 0 : i32
    %c0_i32_0 = arith.constant 0 : i32
    %c0_i32_1 = arith.constant 0 : i32
    return %c0_i32, %c0_i32_0 : i32, i32
  }
  func.func @transform_6(%arg0: i32) -> (i32, i32) {
    %c0_i32 = arith.constant 0 : i32
    %c0_i32_0 = arith.constant 0 : i32
    %c0_i32_1 = arith.constant 0 : i32
    return %c0_i32, %c0_i32_0 : i32, i32
  }
  func.func @transform_7(%arg0: i32) -> (i32, i32) {
    %c0_i32 = arith.constant 0 : i32
    %c0_i32_0 = arith.constant 0 : i32
    %c0_i32_1 = arith.constant 0 : i32
    return %c0_i32, %c0_i32_0 : i32, i32
  }
  func.func @transform_8(%arg0: i32) -> (i32, i32) {
    %c0_i32 = arith.constant 0 : i32
    %c0_i32_0 = arith.constant 0 : i32
    %c0_i32_1 = arith.constant 0 : i32
    return %c0_i32, %c0_i32_0 : i32, i32
  }
  func.func @transform_9(%arg0: i32) -> (i32, i32) {
    %c0_i32 = arith.constant 0 : i32
    %c0_i32_0 = arith.constant 0 : i32
    %c0_i32_1 = arith.constant 0 : i32
    return %c0_i32, %c0_i32_0 : i32, i32
  }
  func.func @transform_10(%arg0: i32) -> (i32, i32) {
    %c0_i32 = arith.constant 0 : i32
    %c0_i32_0 = arith.constant 0 : i32
    %c0_i32_1 = arith.constant 0 : i32
    return %c0_i32, %c0_i32_0 : i32, i32
  }
  func.func @transform_11(%arg0: i32) -> (i32, i32) {
    %c0_i32 = arith.constant 0 : i32
    %c0_i32_0 = arith.constant 0 : i32
    %c0_i32_1 = arith.constant 0 : i32
    return %c0_i32, %c0_i32_0 : i32, i32
  }
  func.func @transform_12(%arg0: i32) -> (i32, i32) {
    %c0_i32 = arith.constant 0 : i32
    %c0_i32_0 = arith.constant 0 : i32
    %c0_i32_1 = arith.constant 0 : i32
    return %c0_i32, %c0_i32_0 : i32, i32
  }
  func.func @transform_13(%arg0: i32) -> (i32, i32) {
    %c0_i32 = arith.constant 0 : i32
    %c0_i32_0 = arith.constant 0 : i32
    %c0_i32_1 = arith.constant 0 : i32
    return %c0_i32, %c0_i32_0 : i32, i32
  }
  func.func @transform_14(%arg0: i32) -> (i32, i32) {
    %c0_i32 = arith.constant 0 : i32
    %c0_i32_0 = arith.constant 0 : i32
    %c0_i32_1 = arith.constant 0 : i32
    return %c0_i32, %c0_i32_0 : i32, i32
  }
  func.func @transform_15(%arg0: i32) -> (i32, i32, i32) {
    %c0_i32 = arith.constant 0 : i32
    %c0_i32_0 = arith.constant 0 : i32
    %c0_i32_1 = arith.constant 0 : i32
    return %arg0, %c0_i32, %c0_i32_0 : i32, i32, i32
  }
}

module attributes {stable_mosaic.version = 11 : i64} {
  func.func @_fused_mlp_ln_kernel(%arg0: i32, %arg1: memref<14x32xf32, #tpu.memory_space<vmem>>, %arg2: memref<32x64xf32, #tpu.memory_space<vmem>>, %arg3: memref<1x64xf32, #tpu.memory_space<vmem>>, %arg4: memref<64x32xf32, #tpu.memory_space<vmem>>, %arg5: memref<1x32xf32, #tpu.memory_space<vmem>>, %arg6: memref<1x32xf32, #tpu.memory_space<vmem>>, %arg7: memref<1x32xf32, #tpu.memory_space<vmem>>, %arg8: memref<14x32xf32, #tpu.memory_space<vmem>>) attributes {dimension_semantics = [#tpu.dimension_semantics<arbitrary>], iteration_bounds = array<i64: 1>, scalar_prefetch = 0 : i64, scratch_operands = 0 : i64, tpu.core_type = #tpu.core_type<tc>, window_params = [{pipeline_mode = #tpu.pipeline_mode<synchronous>, transform_indices = @transform_0, window_bounds = array<i64: 14, 32>}, {pipeline_mode = #tpu.pipeline_mode<synchronous>, transform_indices = @transform_1, window_bounds = array<i64: 32, 64>}, {pipeline_mode = #tpu.pipeline_mode<synchronous>, transform_indices = @transform_2, window_bounds = array<i64: 1, 64>}, {pipeline_mode = #tpu.pipeline_mode<synchronous>, transform_indices = @transform_3, window_bounds = array<i64: 64, 32>}, {pipeline_mode = #tpu.pipeline_mode<synchronous>, transform_indices = @transform_4, window_bounds = array<i64: 1, 32>}, {pipeline_mode = #tpu.pipeline_mode<synchronous>, transform_indices = @transform_5, window_bounds = array<i64: 1, 32>}, {pipeline_mode = #tpu.pipeline_mode<synchronous>, transform_indices = @transform_6, window_bounds = array<i64: 1, 32>}, {pipeline_mode = #tpu.pipeline_mode<synchronous>, transform_indices = @transform_7, window_bounds = array<i64: 14, 32>}]} {
    %c0 = arith.constant 0 : index
    %c0_0 = arith.constant 0 : index
    %0 = vector.load %arg1[%c0, %c0_0] : memref<14x32xf32, #tpu.memory_space<vmem>>, vector<14x32xf32>
    %c0_1 = arith.constant 0 : index
    %c0_2 = arith.constant 0 : index
    %1 = vector.load %arg2[%c0_1, %c0_2] : memref<32x64xf32, #tpu.memory_space<vmem>>, vector<32x64xf32>
    %cst = arith.constant dense<0.000000e+00> : vector<14x64xf32>
    %2 = tpu.matmul %0, %1, %cst {dimension_numbers = #tpu.dot_dimension_numbers<[1], [0], [0], [1], [0, 0, 1, 1], [], []>} : vector<14x32xf32>, vector<32x64xf32>, vector<14x64xf32> -> vector<14x64xf32>
    %c0_3 = arith.constant 0 : index
    %c0_4 = arith.constant 0 : index
    %3 = vector.load %arg3[%c0_3, %c0_4] : memref<1x64xf32, #tpu.memory_space<vmem>>, vector<1x64xf32>
    %4 = vector.broadcast %3 : vector<1x64xf32> to vector<14x64xf32>
    %5 = arith.addf %2, %4 : vector<14x64xf32>
    %cst_5 = arith.constant 0.000000e+00 : f32
    %6 = vector.broadcast %cst_5 : f32 to vector<14x64xf32>
    %7 = arith.maximumf %5, %6 : vector<14x64xf32>
    %c0_6 = arith.constant 0 : index
    %c0_7 = arith.constant 0 : index
    %8 = vector.load %arg4[%c0_6, %c0_7] : memref<64x32xf32, #tpu.memory_space<vmem>>, vector<64x32xf32>
    %cst_8 = arith.constant dense<0.000000e+00> : vector<14x32xf32>
    %9 = tpu.matmul %7, %8, %cst_8 {dimension_numbers = #tpu.dot_dimension_numbers<[1], [0], [0], [1], [0, 0, 1, 1], [], []>} : vector<14x64xf32>, vector<64x32xf32>, vector<14x32xf32> -> vector<14x32xf32>
    %c0_9 = arith.constant 0 : index
    %c0_10 = arith.constant 0 : index
    %10 = vector.load %arg5[%c0_9, %c0_10] : memref<1x32xf32, #tpu.memory_space<vmem>>, vector<1x32xf32>
    %11 = vector.broadcast %10 : vector<1x32xf32> to vector<14x32xf32>
    %12 = arith.addf %9, %11 : vector<14x32xf32>
    %13 = arith.addf %12, %0 : vector<14x32xf32>
    %cst_11 = arith.constant dense<0.000000e+00> : vector<14xf32>
    %14 = vector.multi_reduction <add>, %13, %cst_11 [1] : vector<14x32xf32> to vector<14xf32>
    %15 = vector.shape_cast %14 : vector<14xf32> to vector<14x1xf32>
    %cst_12 = arith.constant 3.200000e+01 : f32
    %16 = vector.broadcast %cst_12 : f32 to vector<14x1xf32>
    %17 = arith.divf %15, %16 : vector<14x1xf32>
    %18 = vector.broadcast %17 : vector<14x1xf32> to vector<14x32xf32>
    %19 = arith.subf %13, %18 : vector<14x32xf32>
    %20 = arith.mulf %19, %19 : vector<14x32xf32>
    %cst_13 = arith.constant dense<0.000000e+00> : vector<14xf32>
    %21 = vector.multi_reduction <add>, %20, %cst_13 [1] : vector<14x32xf32> to vector<14xf32>
    %22 = vector.shape_cast %21 : vector<14xf32> to vector<14x1xf32>
    %cst_14 = arith.constant 3.200000e+01 : f32
    %23 = vector.broadcast %cst_14 : f32 to vector<14x1xf32>
    %24 = arith.divf %22, %23 : vector<14x1xf32>
    %25 = vector.broadcast %17 : vector<14x1xf32> to vector<14x32xf32>
    %26 = arith.subf %13, %25 : vector<14x32xf32>
    %cst_15 = arith.constant 9.99999974E-6 : f32
    %27 = vector.broadcast %cst_15 : f32 to vector<14x1xf32>
    %28 = arith.addf %24, %27 : vector<14x1xf32>
    %29 = math.rsqrt %28 : vector<14x1xf32>
    %30 = vector.broadcast %29 : vector<14x1xf32> to vector<14x32xf32>
    %31 = arith.mulf %26, %30 : vector<14x32xf32>
    %c0_16 = arith.constant 0 : index
    %c0_17 = arith.constant 0 : index
    %32 = vector.load %arg6[%c0_16, %c0_17] : memref<1x32xf32, #tpu.memory_space<vmem>>, vector<1x32xf32>
    %33 = vector.broadcast %32 : vector<1x32xf32> to vector<14x32xf32>
    %34 = arith.mulf %31, %33 : vector<14x32xf32>
    %c0_18 = arith.constant 0 : index
    %c0_19 = arith.constant 0 : index
    %35 = vector.load %arg7[%c0_18, %c0_19] : memref<1x32xf32, #tpu.memory_space<vmem>>, vector<1x32xf32>
    %36 = vector.broadcast %35 : vector<1x32xf32> to vector<14x32xf32>
    %37 = arith.addf %34, %36 : vector<14x32xf32>
    %c0_20 = arith.constant 0 : index
    %c0_21 = arith.constant 0 : index
    %38 = vector.load %arg8[%c0_20, %c0_21] : memref<14x32xf32, #tpu.memory_space<vmem>>, vector<14x32xf32>
    tpu.vector_store %arg8[%c0_20, %c0_21], %37 {strides = array<i32>} : memref<14x32xf32, #tpu.memory_space<vmem>>, vector<14x32xf32>,
    return
  }
  func.func @transform_0(%arg0: i32) -> (i32, i32) {
    %c0_i32 = arith.constant 0 : i32
    %c0_i32_0 = arith.constant 0 : i32
    %c0_i32_1 = arith.constant 0 : i32
    return %c0_i32, %c0_i32_0 : i32, i32
  }
  func.func @transform_1(%arg0: i32) -> (i32, i32) {
    %c0_i32 = arith.constant 0 : i32
    %c0_i32_0 = arith.constant 0 : i32
    %c0_i32_1 = arith.constant 0 : i32
    return %c0_i32, %c0_i32_0 : i32, i32
  }
  func.func @transform_2(%arg0: i32) -> (i32, i32) {
    %c0_i32 = arith.constant 0 : i32
    %c0_i32_0 = arith.constant 0 : i32
    %c0_i32_1 = arith.constant 0 : i32
    return %c0_i32, %c0_i32_0 : i32, i32
  }
  func.func @transform_3(%arg0: i32) -> (i32, i32) {
    %c0_i32 = arith.constant 0 : i32
    %c0_i32_0 = arith.constant 0 : i32
    %c0_i32_1 = arith.constant 0 : i32
    return %c0_i32, %c0_i32_0 : i32, i32
  }
  func.func @transform_4(%arg0: i32) -> (i32, i32) {
    %c0_i32 = arith.constant 0 : i32
    %c0_i32_0 = arith.constant 0 : i32
    %c0_i32_1 = arith.constant 0 : i32
    return %c0_i32, %c0_i32_0 : i32, i32
  }
  func.func @transform_5(%arg0: i32) -> (i32, i32) {
    %c0_i32 = arith.constant 0 : i32
    %c0_i32_0 = arith.constant 0 : i32
    %c0_i32_1 = arith.constant 0 : i32
    return %c0_i32, %c0_i32_0 : i32, i32
  }
  func.func @transform_6(%arg0: i32) -> (i32, i32) {
    %c0_i32 = arith.constant 0 : i32
    %c0_i32_0 = arith.constant 0 : i32
    %c0_i32_1 = arith.constant 0 : i32
    return %c0_i32, %c0_i32_0 : i32, i32
  }
  func.func @transform_7(%arg0: i32) -> (i32, i32) {
    %c0_i32 = arith.constant 0 : i32
    %c0_i32_0 = arith.constant 0 : i32
    %c0_i32_1 = arith.constant 0 : i32
    return %c0_i32, %c0_i32_0 : i32, i32
  }
}

module attributes {stable_mosaic.version = 11 : i64} {
  func.func @_fused_attn_ln_kernel(%arg0: i32, %arg1: memref<1x64x32xf32, #tpu.memory_space<vmem>>, %arg2: memref<1x64x32xf32, #tpu.memory_space<vmem>>, %arg3: memref<1x7x32xf32, #tpu.memory_space<vmem>>, %arg4: memref<1x7x32xf32, #tpu.memory_space<vmem>>, %arg5: memref<1x7x32xf32, #tpu.memory_space<vmem>>, %arg6: memref<32x16xf32, #tpu.memory_space<vmem>>, %arg7: memref<1x16xf32, #tpu.memory_space<vmem>>, %arg8: memref<32x16xf32, #tpu.memory_space<vmem>>, %arg9: memref<1x16xf32, #tpu.memory_space<vmem>>, %arg10: memref<32x16xf32, #tpu.memory_space<vmem>>, %arg11: memref<1x16xf32, #tpu.memory_space<vmem>>, %arg12: memref<16x32xf32, #tpu.memory_space<vmem>>, %arg13: memref<1x32xf32, #tpu.memory_space<vmem>>, %arg14: memref<1x32xf32, #tpu.memory_space<vmem>>, %arg15: memref<1x32xf32, #tpu.memory_space<vmem>>, %arg16: memref<1x64x32xf32, #tpu.memory_space<vmem>>) attributes {dimension_semantics = [#tpu.dimension_semantics<parallel>], iteration_bounds = array<i64: 2>, scalar_prefetch = 0 : i64, scratch_operands = 0 : i64, tpu.core_type = #tpu.core_type<tc>, window_params = [{transform_indices = @transform_0, window_bounds = array<i64: 1, 64, 32>}, {transform_indices = @transform_1, window_bounds = array<i64: 1, 64, 32>}, {transform_indices = @transform_2, window_bounds = array<i64: 1, 7, 32>}, {transform_indices = @transform_3, window_bounds = array<i64: 1, 7, 32>}, {transform_indices = @transform_4, window_bounds = array<i64: 1, 7, 32>}, {pipeline_mode = #tpu.pipeline_mode<synchronous>, transform_indices = @transform_5, window_bounds = array<i64: 32, 16>}, {pipeline_mode = #tpu.pipeline_mode<synchronous>, transform_indices = @transform_6, window_bounds = array<i64: 1, 16>}, {pipeline_mode = #tpu.pipeline_mode<synchronous>, transform_indices = @transform_7, window_bounds = array<i64: 32, 16>}, {pipeline_mode = #tpu.pipeline_mode<synchronous>, transform_indices = @transform_8, window_bounds = array<i64: 1, 16>}, {pipeline_mode = #tpu.pipeline_mode<synchronous>, transform_indices = @transform_9, window_bounds = array<i64: 32, 16>}, {pipeline_mode = #tpu.pipeline_mode<synchronous>, transform_indices = @transform_10, window_bounds = array<i64: 1, 16>}, {pipeline_mode = #tpu.pipeline_mode<synchronous>, transform_indices = @transform_11, window_bounds = array<i64: 16, 32>}, {pipeline_mode = #tpu.pipeline_mode<synchronous>, transform_indices = @transform_12, window_bounds = array<i64: 1, 32>}, {pipeline_mode = #tpu.pipeline_mode<synchronous>, transform_indices = @transform_13, window_bounds = array<i64: 1, 32>}, {pipeline_mode = #tpu.pipeline_mode<synchronous>, transform_indices = @transform_14, window_bounds = array<i64: 1, 32>}, {transform_indices = @transform_15, window_bounds = array<i64: 1, 64, 32>}]} {
    %c0 = arith.constant 0 : index
    %c0_0 = arith.constant 0 : index
    %c0_1 = arith.constant 0 : index
    %0 = vector.load %arg1[%c0, %c0_0, %c0_1] : memref<1x64x32xf32, #tpu.memory_space<vmem>>, vector<1x64x32xf32>
    %1 = vector.shape_cast %0 : vector<1x64x32xf32> to vector<64x32xf32>
    %c0_2 = arith.constant 0 : index
    %c0_3 = arith.constant 0 : index
    %c0_4 = arith.constant 0 : index
    %2 = vector.load %arg3[%c0_2, %c0_3, %c0_4] : memref<1x7x32xf32, #tpu.memory_space<vmem>>, vector<1x7x32xf32>
    %3 = vector.shape_cast %2 : vector<1x7x32xf32> to vector<7x32xf32>
    %c0_5 = arith.constant 0 : index
    %c0_6 = arith.constant 0 : index
    %c0_7 = arith.constant 0 : index
    %4 = vector.load %arg5[%c0_5, %c0_6, %c0_7] : memref<1x7x32xf32, #tpu.memory_space<vmem>>, vector<1x7x32xf32>
    %5 = vector.shape_cast %4 : vector<1x7x32xf32> to vector<7x32xf32>
    %c0_8 = arith.constant 0 : index
    %c0_9 = arith.constant 0 : index
    %c0_10 = arith.constant 0 : index
    %6 = vector.load %arg2[%c0_8, %c0_9, %c0_10] : memref<1x64x32xf32, #tpu.memory_space<vmem>>, vector<1x64x32xf32>
    %7 = vector.shape_cast %6 : vector<1x64x32xf32> to vector<64x32xf32>
    %8 = arith.addf %1, %7 : vector<64x32xf32>
    %c0_11 = arith.constant 0 : index
    %c0_12 = arith.constant 0 : index
    %c0_13 = arith.constant 0 : index
    %9 = vector.load %arg4[%c0_11, %c0_12, %c0_13] : memref<1x7x32xf32, #tpu.memory_space<vmem>>, vector<1x7x32xf32>
    %10 = vector.shape_cast %9 : vector<1x7x32xf32> to vector<7x32xf32>
    %11 = arith.addf %3, %10 : vector<7x32xf32>
    %c0_14 = arith.constant 0 : index
    %c0_15 = arith.constant 0 : index
    %12 = vector.load %arg6[%c0_14, %c0_15] : memref<32x16xf32, #tpu.memory_space<vmem>>, vector<32x16xf32>
    %cst = arith.constant dense<0.000000e+00> : vector<64x16xf32>
    %13 = tpu.matmul %8, %12, %cst {dimension_numbers = #tpu.dot_dimension_numbers<[1], [0], [0], [1], [0, 0, 1, 1], [], []>} : vector<64x32xf32>, vector<32x16xf32>, vector<64x16xf32> -> vector<64x16xf32>
    %c0_16 = arith.constant 0 : index
    %c0_17 = arith.constant 0 : index
    %14 = vector.load %arg7[%c0_16, %c0_17] : memref<1x16xf32, #tpu.memory_space<vmem>>, vector<1x16xf32>
    %15 = vector.broadcast %14 : vector<1x16xf32> to vector<64x16xf32>
    %16 = arith.addf %13, %15 : vector<64x16xf32>
    %c0_18 = arith.constant 0 : index
    %c0_19 = arith.constant 0 : index
    %17 = vector.load %arg8[%c0_18, %c0_19] : memref<32x16xf32, #tpu.memory_space<vmem>>, vector<32x16xf32>
    %cst_20 = arith.constant dense<0.000000e+00> : vector<7x16xf32>
    %18 = tpu.matmul %11, %17, %cst_20 {dimension_numbers = #tpu.dot_dimension_numbers<[1], [0], [0], [1], [0, 0, 1, 1], [], []>} : vector<7x32xf32>, vector<32x16xf32>, vector<7x16xf32> -> vector<7x16xf32>
    %c0_21 = arith.constant 0 : index
    %c0_22 = arith.constant 0 : index
    %19 = vector.load %arg9[%c0_21, %c0_22] : memref<1x16xf32, #tpu.memory_space<vmem>>, vector<1x16xf32>
    %20 = vector.broadcast %19 : vector<1x16xf32> to vector<7x16xf32>
    %21 = arith.addf %18, %20 : vector<7x16xf32>
    %c0_23 = arith.constant 0 : index
    %c0_24 = arith.constant 0 : index
    %22 = vector.load %arg10[%c0_23, %c0_24] : memref<32x16xf32, #tpu.memory_space<vmem>>, vector<32x16xf32>
    %cst_25 = arith.constant dense<0.000000e+00> : vector<7x16xf32>
    %23 = tpu.matmul %5, %22, %cst_25 {dimension_numbers = #tpu.dot_dimension_numbers<[1], [0], [0], [1], [0, 0, 1, 1], [], []>} : vector<7x32xf32>, vector<32x16xf32>, vector<7x16xf32> -> vector<7x16xf32>
    %c0_26 = arith.constant 0 : index
    %c0_27 = arith.constant 0 : index
    %24 = vector.load %arg11[%c0_26, %c0_27] : memref<1x16xf32, #tpu.memory_space<vmem>>, vector<1x16xf32>
    %25 = vector.broadcast %24 : vector<1x16xf32> to vector<7x16xf32>
    %26 = arith.addf %23, %25 : vector<7x16xf32>
    %c0_28 = arith.constant 0 : index
    %c0_29 = arith.constant 0 : index
    %27 = vector.load %arg13[%c0_28, %c0_29] : memref<1x32xf32, #tpu.memory_space<vmem>>, vector<1x32xf32>
    %28 = vector.extract_strided_slice %16 {offsets = [0, 0], sizes = [64, 8], strides = [1, 1]} : vector<64x16xf32> to vector<64x8xf32>
    %29 = vector.extract_strided_slice %21 {offsets = [0, 0], sizes = [7, 8], strides = [1, 1]} : vector<7x16xf32> to vector<7x8xf32>
    %30 = vector.extract_strided_slice %26 {offsets = [0, 0], sizes = [7, 8], strides = [1, 1]} : vector<7x16xf32> to vector<7x8xf32>
    %cst_30 = arith.constant dense<0.000000e+00> : vector<64x7xf32>
    %31 = tpu.matmul %28, %29, %cst_30 {dimension_numbers = #tpu.dot_dimension_numbers<[1], [1], [0], [0], [0, 0, 1, 0], [], []>} : vector<64x8xf32>, vector<7x8xf32>, vector<64x7xf32> -> vector<64x7xf32>
    %cst_31 = arith.constant 0.353553385 : f32
    %32 = vector.broadcast %cst_31 : f32 to vector<64x7xf32>
    %33 = arith.mulf %31, %32 : vector<64x7xf32>
    %cst_32 = arith.constant dense<0xFF800000> : vector<64xf32>
    %34 = vector.multi_reduction <maximumf>, %33, %cst_32 [1] : vector<64x7xf32> to vector<64xf32>
    %35 = vector.shape_cast %34 : vector<64xf32> to vector<64x1xf32>
    %36 = vector.broadcast %35 : vector<64x1xf32> to vector<64x7xf32>
    %37 = arith.subf %33, %36 : vector<64x7xf32>
    %38 = math.exp %37 : vector<64x7xf32>
    %cst_33 = arith.constant dense<0.000000e+00> : vector<64xf32>
    %39 = vector.multi_reduction <add>, %38, %cst_33 [1] : vector<64x7xf32> to vector<64xf32>
    %40 = vector.shape_cast %39 : vector<64xf32> to vector<64x1xf32>
    %41 = tpu.reciprocal %40 {approx = true} : vector<64x1xf32> -> vector<64x1xf32>
    %42 = vector.broadcast %41 : vector<64x1xf32> to vector<64x7xf32>
    %43 = arith.mulf %38, %42 : vector<64x7xf32>
    %cst_34 = arith.constant dense<0.000000e+00> : vector<64x8xf32>
    %44 = tpu.matmul %43, %30, %cst_34 {dimension_numbers = #tpu.dot_dimension_numbers<[1], [0], [0], [1], [0, 0, 1, 1], [], []>} : vector<64x7xf32>, vector<7x8xf32>, vector<64x8xf32> -> vector<64x8xf32>
    %c0_35 = arith.constant 0 : index
    %c0_36 = arith.constant 0 : index
    %45 = vector.load %arg12[%c0_35, %c0_36] : memref<16x32xf32, #tpu.memory_space<vmem>>, vector<8x32xf32>
    %cst_37 = arith.constant dense<0.000000e+00> : vector<64x32xf32>
    %46 = tpu.matmul %44, %45, %cst_37 {dimension_numbers = #tpu.dot_dimension_numbers<[1], [0], [0], [1], [0, 0, 1, 1], [], []>} : vector<64x8xf32>, vector<8x32xf32>, vector<64x32xf32> -> vector<64x32xf32>
    %47 = vector.broadcast %27 : vector<1x32xf32> to vector<64x32xf32>
    %48 = arith.addf %47, %46 : vector<64x32xf32>
    %49 = vector.extract_strided_slice %16 {offsets = [0, 8], sizes = [64, 8], strides = [1, 1]} : vector<64x16xf32> to vector<64x8xf32>
    %50 = vector.extract_strided_slice %21 {offsets = [0, 8], sizes = [7, 8], strides = [1, 1]} : vector<7x16xf32> to vector<7x8xf32>
    %51 = vector.extract_strided_slice %26 {offsets = [0, 8], sizes = [7, 8], strides = [1, 1]} : vector<7x16xf32> to vector<7x8xf32>
    %cst_38 = arith.constant dense<0.000000e+00> : vector<64x7xf32>
    %52 = tpu.matmul %49, %50, %cst_38 {dimension_numbers = #tpu.dot_dimension_numbers<[1], [1], [0], [0], [0, 0, 1, 0], [], []>} : vector<64x8xf32>, vector<7x8xf32>, vector<64x7xf32> -> vector<64x7xf32>
    %cst_39 = arith.constant 0.353553385 : f32
    %53 = vector.broadcast %cst_39 : f32 to vector<64x7xf32>
    %54 = arith.mulf %52, %53 : vector<64x7xf32>
    %cst_40 = arith.constant dense<0xFF800000> : vector<64xf32>
    %55 = vector.multi_reduction <maximumf>, %54, %cst_40 [1] : vector<64x7xf32> to vector<64xf32>
    %56 = vector.shape_cast %55 : vector<64xf32> to vector<64x1xf32>
    %57 = vector.broadcast %56 : vector<64x1xf32> to vector<64x7xf32>
    %58 = arith.subf %54, %57 : vector<64x7xf32>
    %59 = math.exp %58 : vector<64x7xf32>
    %cst_41 = arith.constant dense<0.000000e+00> : vector<64xf32>
    %60 = vector.multi_reduction <add>, %59, %cst_41 [1] : vector<64x7xf32> to vector<64xf32>
    %61 = vector.shape_cast %60 : vector<64xf32> to vector<64x1xf32>
    %62 = tpu.reciprocal %61 {approx = true} : vector<64x1xf32> -> vector<64x1xf32>
    %63 = vector.broadcast %62 : vector<64x1xf32> to vector<64x7xf32>
    %64 = arith.mulf %59, %63 : vector<64x7xf32>
    %cst_42 = arith.constant dense<0.000000e+00> : vector<64x8xf32>
    %65 = tpu.matmul %64, %51, %cst_42 {dimension_numbers = #tpu.dot_dimension_numbers<[1], [0], [0], [1], [0, 0, 1, 1], [], []>} : vector<64x7xf32>, vector<7x8xf32>, vector<64x8xf32> -> vector<64x8xf32>
    %c8 = arith.constant 8 : index
    %c0_43 = arith.constant 0 : index
    %66 = vector.load %arg12[%c8, %c0_43] : memref<16x32xf32, #tpu.memory_space<vmem>>, vector<8x32xf32>
    %cst_44 = arith.constant dense<0.000000e+00> : vector<64x32xf32>
    %67 = tpu.matmul %65, %66, %cst_44 {dimension_numbers = #tpu.dot_dimension_numbers<[1], [0], [0], [1], [0, 0, 1, 1], [], []>} : vector<64x8xf32>, vector<8x32xf32>, vector<64x32xf32> -> vector<64x32xf32>
    %68 = arith.addf %48, %67 : vector<64x32xf32>
    %69 = arith.addf %68, %1 : vector<64x32xf32>
    %cst_45 = arith.constant dense<0.000000e+00> : vector<64xf32>
    %70 = vector.multi_reduction <add>, %69, %cst_45 [1] : vector<64x32xf32> to vector<64xf32>
    %71 = vector.shape_cast %70 : vector<64xf32> to vector<64x1xf32>
    %cst_46 = arith.constant 3.200000e+01 : f32
    %72 = vector.broadcast %cst_46 : f32 to vector<64x1xf32>
    %73 = arith.divf %71, %72 : vector<64x1xf32>
    %74 = vector.broadcast %73 : vector<64x1xf32> to vector<64x32xf32>
    %75 = arith.subf %69, %74 : vector<64x32xf32>
    %76 = arith.mulf %75, %75 : vector<64x32xf32>
    %cst_47 = arith.constant dense<0.000000e+00> : vector<64xf32>
    %77 = vector.multi_reduction <add>, %76, %cst_47 [1] : vector<64x32xf32> to vector<64xf32>
    %78 = vector.shape_cast %77 : vector<64xf32> to vector<64x1xf32>
    %cst_48 = arith.constant 3.200000e+01 : f32
    %79 = vector.broadcast %cst_48 : f32 to vector<64x1xf32>
    %80 = arith.divf %78, %79 : vector<64x1xf32>
    %81 = vector.broadcast %73 : vector<64x1xf32> to vector<64x32xf32>
    %82 = arith.subf %69, %81 : vector<64x32xf32>
    %cst_49 = arith.constant 9.99999974E-6 : f32
    %83 = vector.broadcast %cst_49 : f32 to vector<64x1xf32>
    %84 = arith.addf %80, %83 : vector<64x1xf32>
    %85 = math.rsqrt %84 : vector<64x1xf32>
    %86 = vector.broadcast %85 : vector<64x1xf32> to vector<64x32xf32>
    %87 = arith.mulf %82, %86 : vector<64x32xf32>
    %c0_50 = arith.constant 0 : index
    %c0_51 = arith.constant 0 : index
    %88 = vector.load %arg14[%c0_50, %c0_51] : memref<1x32xf32, #tpu.memory_space<vmem>>, vector<1x32xf32>
    %89 = vector.broadcast %88 : vector<1x32xf32> to vector<64x32xf32>
    %90 = arith.mulf %87, %89 : vector<64x32xf32>
    %c0_52 = arith.constant 0 : index
    %c0_53 = arith.constant 0 : index
    %91 = vector.load %arg15[%c0_52, %c0_53] : memref<1x32xf32, #tpu.memory_space<vmem>>, vector<1x32xf32>
    %92 = vector.broadcast %91 : vector<1x32xf32> to vector<64x32xf32>
    %93 = arith.addf %90, %92 : vector<64x32xf32>
    %c0_54 = arith.constant 0 : index
    %c0_55 = arith.constant 0 : index
    %c0_56 = arith.constant 0 : index
    %94 = vector.load %arg16[%c0_54, %c0_55, %c0_56] : memref<1x64x32xf32, #tpu.memory_space<vmem>>, vector<1x64x32xf32>
    %95 = vector.shape_cast %94 : vector<1x64x32xf32> to vector<64x32xf32>
    %96 = vector.shape_cast %93 : vector<64x32xf32> to vector<1x64x32xf32>
    tpu.vector_store %arg16[%c0_54, %c0_55, %c0_56], %96 {strides = array<i32>} : memref<1x64x32xf32, #tpu.memory_space<vmem>>, vector<1x64x32xf32>,
    return
  }
  func.func @transform_0(%arg0: i32) -> (i32, i32, i32) {
    %c0_i32 = arith.constant 0 : i32
    %c0_i32_0 = arith.constant 0 : i32
    %c0_i32_1 = arith.constant 0 : i32
    return %arg0, %c0_i32, %c0_i32_0 : i32, i32, i32
  }
  func.func @transform_1(%arg0: i32) -> (i32, i32, i32) {
    %c0_i32 = arith.constant 0 : i32
    %c0_i32_0 = arith.constant 0 : i32
    %c0_i32_1 = arith.constant 0 : i32
    return %arg0, %c0_i32, %c0_i32_0 : i32, i32, i32
  }
  func.func @transform_2(%arg0: i32) -> (i32, i32, i32) {
    %c0_i32 = arith.constant 0 : i32
    %c0_i32_0 = arith.constant 0 : i32
    %c0_i32_1 = arith.constant 0 : i32
    return %arg0, %c0_i32, %c0_i32_0 : i32, i32, i32
  }
  func.func @transform_3(%arg0: i32) -> (i32, i32, i32) {
    %c0_i32 = arith.constant 0 : i32
    %c0_i32_0 = arith.constant 0 : i32
    %c0_i32_1 = arith.constant 0 : i32
    return %arg0, %c0_i32, %c0_i32_0 : i32, i32, i32
  }
  func.func @transform_4(%arg0: i32) -> (i32, i32, i32) {
    %c0_i32 = arith.constant 0 : i32
    %c0_i32_0 = arith.constant 0 : i32
    %c0_i32_1 = arith.constant 0 : i32
    return %arg0, %c0_i32, %c0_i32_0 : i32, i32, i32
  }
  func.func @transform_5(%arg0: i32) -> (i32, i32) {
    %c0_i32 = arith.constant 0 : i32
    %c0_i32_0 = arith.constant 0 : i32
    %c0_i32_1 = arith.constant 0 : i32
    return %c0_i32, %c0_i32_0 : i32, i32
  }
  func.func @transform_6(%arg0: i32) -> (i32, i32) {
    %c0_i32 = arith.constant 0 : i32
    %c0_i32_0 = arith.constant 0 : i32
    %c0_i32_1 = arith.constant 0 : i32
    return %c0_i32, %c0_i32_0 : i32, i32
  }
  func.func @transform_7(%arg0: i32) -> (i32, i32) {
    %c0_i32 = arith.constant 0 : i32
    %c0_i32_0 = arith.constant 0 : i32
    %c0_i32_1 = arith.constant 0 : i32
    return %c0_i32, %c0_i32_0 : i32, i32
  }
  func.func @transform_8(%arg0: i32) -> (i32, i32) {
    %c0_i32 = arith.constant 0 : i32
    %c0_i32_0 = arith.constant 0 : i32
    %c0_i32_1 = arith.constant 0 : i32
    return %c0_i32, %c0_i32_0 : i32, i32
  }
  func.func @transform_9(%arg0: i32) -> (i32, i32) {
    %c0_i32 = arith.constant 0 : i32
    %c0_i32_0 = arith.constant 0 : i32
    %c0_i32_1 = arith.constant 0 : i32
    return %c0_i32, %c0_i32_0 : i32, i32
  }
  func.func @transform_10(%arg0: i32) -> (i32, i32) {
    %c0_i32 = arith.constant 0 : i32
    %c0_i32_0 = arith.constant 0 : i32
    %c0_i32_1 = arith.constant 0 : i32
    return %c0_i32, %c0_i32_0 : i32, i32
  }
  func.func @transform_11(%arg0: i32) -> (i32, i32) {
    %c0_i32 = arith.constant 0 : i32
    %c0_i32_0 = arith.constant 0 : i32
    %c0_i32_1 = arith.constant 0 : i32
    return %c0_i32, %c0_i32_0 : i32, i32
  }
  func.func @transform_12(%arg0: i32) -> (i32, i32) {
    %c0_i32 = arith.constant 0 : i32
    %c0_i32_0 = arith.constant 0 : i32
    %c0_i32_1 = arith.constant 0 : i32
    return %c0_i32, %c0_i32_0 : i32, i32
  }
  func.func @transform_13(%arg0: i32) -> (i32, i32) {
    %c0_i32 = arith.constant 0 : i32
    %c0_i32_0 = arith.constant 0 : i32
    %c0_i32_1 = arith.constant 0 : i32
    return %c0_i32, %c0_i32_0 : i32, i32
  }
  func.func @transform_14(%arg0: i32) -> (i32, i32) {
    %c0_i32 = arith.constant 0 : i32
    %c0_i32_0 = arith.constant 0 : i32
    %c0_i32_1 = arith.constant 0 : i32
    return %c0_i32, %c0_i32_0 : i32, i32
  }
  func.func @transform_15(%arg0: i32) -> (i32, i32, i32) {
    %c0_i32 = arith.constant 0 : i32
    %c0_i32_0 = arith.constant 0 : i32
    %c0_i32_1 = arith.constant 0 : i32
    return %arg0, %c0_i32, %c0_i32_0 : i32, i32, i32
  }
}

module attributes {stable_mosaic.version = 11 : i64} {
  func.func @_fused_attn_ln_kernel(%arg0: i32, %arg1: memref<1x7x32xf32, #tpu.memory_space<vmem>>, %arg2: memref<1x7x32xf32, #tpu.memory_space<vmem>>, %arg3: memref<1x7x32xf32, #tpu.memory_space<vmem>>, %arg4: memref<1x7x32xf32, #tpu.memory_space<vmem>>, %arg5: memref<1x7x32xf32, #tpu.memory_space<vmem>>, %arg6: memref<32x32xf32, #tpu.memory_space<vmem>>, %arg7: memref<1x32xf32, #tpu.memory_space<vmem>>, %arg8: memref<32x32xf32, #tpu.memory_space<vmem>>, %arg9: memref<1x32xf32, #tpu.memory_space<vmem>>, %arg10: memref<32x32xf32, #tpu.memory_space<vmem>>, %arg11: memref<1x32xf32, #tpu.memory_space<vmem>>, %arg12: memref<32x32xf32, #tpu.memory_space<vmem>>, %arg13: memref<1x32xf32, #tpu.memory_space<vmem>>, %arg14: memref<1x32xf32, #tpu.memory_space<vmem>>, %arg15: memref<1x32xf32, #tpu.memory_space<vmem>>, %arg16: memref<1x7x32xf32, #tpu.memory_space<vmem>>) attributes {dimension_semantics = [#tpu.dimension_semantics<parallel>], iteration_bounds = array<i64: 2>, scalar_prefetch = 0 : i64, scratch_operands = 0 : i64, tpu.core_type = #tpu.core_type<tc>, window_params = [{transform_indices = @transform_0, window_bounds = array<i64: 1, 7, 32>}, {transform_indices = @transform_1, window_bounds = array<i64: 1, 7, 32>}, {transform_indices = @transform_2, window_bounds = array<i64: 1, 7, 32>}, {transform_indices = @transform_3, window_bounds = array<i64: 1, 7, 32>}, {transform_indices = @transform_4, window_bounds = array<i64: 1, 7, 32>}, {pipeline_mode = #tpu.pipeline_mode<synchronous>, transform_indices = @transform_5, window_bounds = array<i64: 32, 32>}, {pipeline_mode = #tpu.pipeline_mode<synchronous>, transform_indices = @transform_6, window_bounds = array<i64: 1, 32>}, {pipeline_mode = #tpu.pipeline_mode<synchronous>, transform_indices = @transform_7, window_bounds = array<i64: 32, 32>}, {pipeline_mode = #tpu.pipeline_mode<synchronous>, transform_indices = @transform_8, window_bounds = array<i64: 1, 32>}, {pipeline_mode = #tpu.pipeline_mode<synchronous>, transform_indices = @transform_9, window_bounds = array<i64: 32, 32>}, {pipeline_mode = #tpu.pipeline_mode<synchronous>, transform_indices = @transform_10, window_bounds = array<i64: 1, 32>}, {pipeline_mode = #tpu.pipeline_mode<synchronous>, transform_indices = @transform_11, window_bounds = array<i64: 32, 32>}, {pipeline_mode = #tpu.pipeline_mode<synchronous>, transform_indices = @transform_12, window_bounds = array<i64: 1, 32>}, {pipeline_mode = #tpu.pipeline_mode<synchronous>, transform_indices = @transform_13, window_bounds = array<i64: 1, 32>}, {pipeline_mode = #tpu.pipeline_mode<synchronous>, transform_indices = @transform_14, window_bounds = array<i64: 1, 32>}, {transform_indices = @transform_15, window_bounds = array<i64: 1, 7, 32>}]} {
    %c0 = arith.constant 0 : index
    %c0_0 = arith.constant 0 : index
    %c0_1 = arith.constant 0 : index
    %0 = vector.load %arg1[%c0, %c0_0, %c0_1] : memref<1x7x32xf32, #tpu.memory_space<vmem>>, vector<1x7x32xf32>
    %1 = vector.shape_cast %0 : vector<1x7x32xf32> to vector<7x32xf32>
    %c0_2 = arith.constant 0 : index
    %c0_3 = arith.constant 0 : index
    %c0_4 = arith.constant 0 : index
    %2 = vector.load %arg3[%c0_2, %c0_3, %c0_4] : memref<1x7x32xf32, #tpu.memory_space<vmem>>, vector<1x7x32xf32>
    %3 = vector.shape_cast %2 : vector<1x7x32xf32> to vector<7x32xf32>
    %c0_5 = arith.constant 0 : index
    %c0_6 = arith.constant 0 : index
    %c0_7 = arith.constant 0 : index
    %4 = vector.load %arg5[%c0_5, %c0_6, %c0_7] : memref<1x7x32xf32, #tpu.memory_space<vmem>>, vector<1x7x32xf32>
    %5 = vector.shape_cast %4 : vector<1x7x32xf32> to vector<7x32xf32>
    %c0_8 = arith.constant 0 : index
    %c0_9 = arith.constant 0 : index
    %c0_10 = arith.constant 0 : index
    %6 = vector.load %arg2[%c0_8, %c0_9, %c0_10] : memref<1x7x32xf32, #tpu.memory_space<vmem>>, vector<1x7x32xf32>
    %7 = vector.shape_cast %6 : vector<1x7x32xf32> to vector<7x32xf32>
    %8 = arith.addf %1, %7 : vector<7x32xf32>
    %c0_11 = arith.constant 0 : index
    %c0_12 = arith.constant 0 : index
    %c0_13 = arith.constant 0 : index
    %9 = vector.load %arg4[%c0_11, %c0_12, %c0_13] : memref<1x7x32xf32, #tpu.memory_space<vmem>>, vector<1x7x32xf32>
    %10 = vector.shape_cast %9 : vector<1x7x32xf32> to vector<7x32xf32>
    %11 = arith.addf %3, %10 : vector<7x32xf32>
    %c0_14 = arith.constant 0 : index
    %c0_15 = arith.constant 0 : index
    %12 = vector.load %arg6[%c0_14, %c0_15] : memref<32x32xf32, #tpu.memory_space<vmem>>, vector<32x32xf32>
    %cst = arith.constant dense<0.000000e+00> : vector<7x32xf32>
    %13 = tpu.matmul %8, %12, %cst {dimension_numbers = #tpu.dot_dimension_numbers<[1], [0], [0], [1], [0, 0, 1, 1], [], []>} : vector<7x32xf32>, vector<32x32xf32>, vector<7x32xf32> -> vector<7x32xf32>
    %c0_16 = arith.constant 0 : index
    %c0_17 = arith.constant 0 : index
    %14 = vector.load %arg7[%c0_16, %c0_17] : memref<1x32xf32, #tpu.memory_space<vmem>>, vector<1x32xf32>
    %15 = vector.broadcast %14 : vector<1x32xf32> to vector<7x32xf32>
    %16 = arith.addf %13, %15 : vector<7x32xf32>
    %c0_18 = arith.constant 0 : index
    %c0_19 = arith.constant 0 : index
    %17 = vector.load %arg8[%c0_18, %c0_19] : memref<32x32xf32, #tpu.memory_space<vmem>>, vector<32x32xf32>
    %cst_20 = arith.constant dense<0.000000e+00> : vector<7x32xf32>
    %18 = tpu.matmul %11, %17, %cst_20 {dimension_numbers = #tpu.dot_dimension_numbers<[1], [0], [0], [1], [0, 0, 1, 1], [], []>} : vector<7x32xf32>, vector<32x32xf32>, vector<7x32xf32> -> vector<7x32xf32>
    %c0_21 = arith.constant 0 : index
    %c0_22 = arith.constant 0 : index
    %19 = vector.load %arg9[%c0_21, %c0_22] : memref<1x32xf32, #tpu.memory_space<vmem>>, vector<1x32xf32>
    %20 = vector.broadcast %19 : vector<1x32xf32> to vector<7x32xf32>
    %21 = arith.addf %18, %20 : vector<7x32xf32>
    %c0_23 = arith.constant 0 : index
    %c0_24 = arith.constant 0 : index
    %22 = vector.load %arg10[%c0_23, %c0_24] : memref<32x32xf32, #tpu.memory_space<vmem>>, vector<32x32xf32>
    %cst_25 = arith.constant dense<0.000000e+00> : vector<7x32xf32>
    %23 = tpu.matmul %5, %22, %cst_25 {dimension_numbers = #tpu.dot_dimension_numbers<[1], [0], [0], [1], [0, 0, 1, 1], [], []>} : vector<7x32xf32>, vector<32x32xf32>, vector<7x32xf32> -> vector<7x32xf32>
    %c0_26 = arith.constant 0 : index
    %c0_27 = arith.constant 0 : index
    %24 = vector.load %arg11[%c0_26, %c0_27] : memref<1x32xf32, #tpu.memory_space<vmem>>, vector<1x32xf32>
    %25 = vector.broadcast %24 : vector<1x32xf32> to vector<7x32xf32>
    %26 = arith.addf %23, %25 : vector<7x32xf32>
    %c0_28 = arith.constant 0 : index
    %c0_29 = arith.constant 0 : index
    %27 = vector.load %arg13[%c0_28, %c0_29] : memref<1x32xf32, #tpu.memory_space<vmem>>, vector<1x32xf32>
    %28 = vector.extract_strided_slice %16 {offsets = [0, 0], sizes = [7, 16], strides = [1, 1]} : vector<7x32xf32> to vector<7x16xf32>
    %29 = vector.extract_strided_slice %21 {offsets = [0, 0], sizes = [7, 16], strides = [1, 1]} : vector<7x32xf32> to vector<7x16xf32>
    %30 = vector.extract_strided_slice %26 {offsets = [0, 0], sizes = [7, 16], strides = [1, 1]} : vector<7x32xf32> to vector<7x16xf32>
    %cst_30 = arith.constant dense<0.000000e+00> : vector<7x7xf32>
    %31 = tpu.matmul %28, %29, %cst_30 {dimension_numbers = #tpu.dot_dimension_numbers<[1], [1], [0], [0], [0, 0, 1, 0], [], []>} : vector<7x16xf32>, vector<7x16xf32>, vector<7x7xf32> -> vector<7x7xf32>
    %cst_31 = arith.constant 2.500000e-01 : f32
    %32 = vector.broadcast %cst_31 : f32 to vector<7x7xf32>
    %33 = arith.mulf %31, %32 : vector<7x7xf32>
    %cst_32 = arith.constant dense<0xFF800000> : vector<7xf32>
    %34 = vector.multi_reduction <maximumf>, %33, %cst_32 [1] : vector<7x7xf32> to vector<7xf32>
    %35 = vector.shape_cast %34 : vector<7xf32> to vector<7x1xf32>
    %36 = vector.broadcast %35 : vector<7x1xf32> to vector<7x7xf32>
    %37 = arith.subf %33, %36 : vector<7x7xf32>
    %38 = math.exp %37 : vector<7x7xf32>
    %cst_33 = arith.constant dense<0.000000e+00> : vector<7xf32>
    %39 = vector.multi_reduction <add>, %38, %cst_33 [1] : vector<7x7xf32> to vector<7xf32>
    %40 = vector.shape_cast %39 : vector<7xf32> to vector<7x1xf32>
    %41 = tpu.reciprocal %40 {approx = true} : vector<7x1xf32> -> vector<7x1xf32>
    %42 = vector.broadcast %41 : vector<7x1xf32> to vector<7x7xf32>
    %43 = arith.mulf %38, %42 : vector<7x7xf32>
    %cst_34 = arith.constant dense<0.000000e+00> : vector<7x16xf32>
    %44 = tpu.matmul %43, %30, %cst_34 {dimension_numbers = #tpu.dot_dimension_numbers<[1], [0], [0], [1], [0, 0, 1, 1], [], []>} : vector<7x7xf32>, vector<7x16xf32>, vector<7x16xf32> -> vector<7x16xf32>
    %c0_35 = arith.constant 0 : index
    %c0_36 = arith.constant 0 : index
    %45 = vector.load %arg12[%c0_35, %c0_36] : memref<32x32xf32, #tpu.memory_space<vmem>>, vector<16x32xf32>
    %cst_37 = arith.constant dense<0.000000e+00> : vector<7x32xf32>
    %46 = tpu.matmul %44, %45, %cst_37 {dimension_numbers = #tpu.dot_dimension_numbers<[1], [0], [0], [1], [0, 0, 1, 1], [], []>} : vector<7x16xf32>, vector<16x32xf32>, vector<7x32xf32> -> vector<7x32xf32>
    %47 = vector.broadcast %27 : vector<1x32xf32> to vector<7x32xf32>
    %48 = arith.addf %47, %46 : vector<7x32xf32>
    %49 = vector.extract_strided_slice %16 {offsets = [0, 16], sizes = [7, 16], strides = [1, 1]} : vector<7x32xf32> to vector<7x16xf32>
    %50 = vector.extract_strided_slice %21 {offsets = [0, 16], sizes = [7, 16], strides = [1, 1]} : vector<7x32xf32> to vector<7x16xf32>
    %51 = vector.extract_strided_slice %26 {offsets = [0, 16], sizes = [7, 16], strides = [1, 1]} : vector<7x32xf32> to vector<7x16xf32>
    %cst_38 = arith.constant dense<0.000000e+00> : vector<7x7xf32>
    %52 = tpu.matmul %49, %50, %cst_38 {dimension_numbers = #tpu.dot_dimension_numbers<[1], [1], [0], [0], [0, 0, 1, 0], [], []>} : vector<7x16xf32>, vector<7x16xf32>, vector<7x7xf32> -> vector<7x7xf32>
    %cst_39 = arith.constant 2.500000e-01 : f32
    %53 = vector.broadcast %cst_39 : f32 to vector<7x7xf32>
    %54 = arith.mulf %52, %53 : vector<7x7xf32>
    %cst_40 = arith.constant dense<0xFF800000> : vector<7xf32>
    %55 = vector.multi_reduction <maximumf>, %54, %cst_40 [1] : vector<7x7xf32> to vector<7xf32>
    %56 = vector.shape_cast %55 : vector<7xf32> to vector<7x1xf32>
    %57 = vector.broadcast %56 : vector<7x1xf32> to vector<7x7xf32>
    %58 = arith.subf %54, %57 : vector<7x7xf32>
    %59 = math.exp %58 : vector<7x7xf32>
    %cst_41 = arith.constant dense<0.000000e+00> : vector<7xf32>
    %60 = vector.multi_reduction <add>, %59, %cst_41 [1] : vector<7x7xf32> to vector<7xf32>
    %61 = vector.shape_cast %60 : vector<7xf32> to vector<7x1xf32>
    %62 = tpu.reciprocal %61 {approx = true} : vector<7x1xf32> -> vector<7x1xf32>
    %63 = vector.broadcast %62 : vector<7x1xf32> to vector<7x7xf32>
    %64 = arith.mulf %59, %63 : vector<7x7xf32>
    %cst_42 = arith.constant dense<0.000000e+00> : vector<7x16xf32>
    %65 = tpu.matmul %64, %51, %cst_42 {dimension_numbers = #tpu.dot_dimension_numbers<[1], [0], [0], [1], [0, 0, 1, 1], [], []>} : vector<7x7xf32>, vector<7x16xf32>, vector<7x16xf32> -> vector<7x16xf32>
    %c16 = arith.constant 16 : index
    %c0_43 = arith.constant 0 : index
    %66 = vector.load %arg12[%c16, %c0_43] : memref<32x32xf32, #tpu.memory_space<vmem>>, vector<16x32xf32>
    %cst_44 = arith.constant dense<0.000000e+00> : vector<7x32xf32>
    %67 = tpu.matmul %65, %66, %cst_44 {dimension_numbers = #tpu.dot_dimension_numbers<[1], [0], [0], [1], [0, 0, 1, 1], [], []>} : vector<7x16xf32>, vector<16x32xf32>, vector<7x32xf32> -> vector<7x32xf32>
    %68 = arith.addf %48, %67 : vector<7x32xf32>
    %69 = arith.addf %68, %1 : vector<7x32xf32>
    %cst_45 = arith.constant dense<0.000000e+00> : vector<7xf32>
    %70 = vector.multi_reduction <add>, %69, %cst_45 [1] : vector<7x32xf32> to vector<7xf32>
    %71 = vector.shape_cast %70 : vector<7xf32> to vector<7x1xf32>
    %cst_46 = arith.constant 3.200000e+01 : f32
    %72 = vector.broadcast %cst_46 : f32 to vector<7x1xf32>
    %73 = arith.divf %71, %72 : vector<7x1xf32>
    %74 = vector.broadcast %73 : vector<7x1xf32> to vector<7x32xf32>
    %75 = arith.subf %69, %74 : vector<7x32xf32>
    %76 = arith.mulf %75, %75 : vector<7x32xf32>
    %cst_47 = arith.constant dense<0.000000e+00> : vector<7xf32>
    %77 = vector.multi_reduction <add>, %76, %cst_47 [1] : vector<7x32xf32> to vector<7xf32>
    %78 = vector.shape_cast %77 : vector<7xf32> to vector<7x1xf32>
    %cst_48 = arith.constant 3.200000e+01 : f32
    %79 = vector.broadcast %cst_48 : f32 to vector<7x1xf32>
    %80 = arith.divf %78, %79 : vector<7x1xf32>
    %81 = vector.broadcast %73 : vector<7x1xf32> to vector<7x32xf32>
    %82 = arith.subf %69, %81 : vector<7x32xf32>
    %cst_49 = arith.constant 9.99999974E-6 : f32
    %83 = vector.broadcast %cst_49 : f32 to vector<7x1xf32>
    %84 = arith.addf %80, %83 : vector<7x1xf32>
    %85 = math.rsqrt %84 : vector<7x1xf32>
    %86 = vector.broadcast %85 : vector<7x1xf32> to vector<7x32xf32>
    %87 = arith.mulf %82, %86 : vector<7x32xf32>
    %c0_50 = arith.constant 0 : index
    %c0_51 = arith.constant 0 : index
    %88 = vector.load %arg14[%c0_50, %c0_51] : memref<1x32xf32, #tpu.memory_space<vmem>>, vector<1x32xf32>
    %89 = vector.broadcast %88 : vector<1x32xf32> to vector<7x32xf32>
    %90 = arith.mulf %87, %89 : vector<7x32xf32>
    %c0_52 = arith.constant 0 : index
    %c0_53 = arith.constant 0 : index
    %91 = vector.load %arg15[%c0_52, %c0_53] : memref<1x32xf32, #tpu.memory_space<vmem>>, vector<1x32xf32>
    %92 = vector.broadcast %91 : vector<1x32xf32> to vector<7x32xf32>
    %93 = arith.addf %90, %92 : vector<7x32xf32>
    %c0_54 = arith.constant 0 : index
    %c0_55 = arith.constant 0 : index
    %c0_56 = arith.constant 0 : index
    %94 = vector.load %arg16[%c0_54, %c0_55, %c0_56] : memref<1x7x32xf32, #tpu.memory_space<vmem>>, vector<1x7x32xf32>
    %95 = vector.shape_cast %94 : vector<1x7x32xf32> to vector<7x32xf32>
    %96 = vector.shape_cast %93 : vector<7x32xf32> to vector<1x7x32xf32>
    tpu.vector_store %arg16[%c0_54, %c0_55, %c0_56], %96 {strides = array<i32>} : memref<1x7x32xf32, #tpu.memory_space<vmem>>, vector<1x7x32xf32>,
    return
  }
  func.func @transform_0(%arg0: i32) -> (i32, i32, i32) {
    %c0_i32 = arith.constant 0 : i32
    %c0_i32_0 = arith.constant 0 : i32
    %c0_i32_1 = arith.constant 0 : i32
    return %arg0, %c0_i32, %c0_i32_0 : i32, i32, i32
  }
  func.func @transform_1(%arg0: i32) -> (i32, i32, i32) {
    %c0_i32 = arith.constant 0 : i32
    %c0_i32_0 = arith.constant 0 : i32
    %c0_i32_1 = arith.constant 0 : i32
    return %arg0, %c0_i32, %c0_i32_0 : i32, i32, i32
  }
  func.func @transform_2(%arg0: i32) -> (i32, i32, i32) {
    %c0_i32 = arith.constant 0 : i32
    %c0_i32_0 = arith.constant 0 : i32
    %c0_i32_1 = arith.constant 0 : i32
    return %arg0, %c0_i32, %c0_i32_0 : i32, i32, i32
  }
  func.func @transform_3(%arg0: i32) -> (i32, i32, i32) {
    %c0_i32 = arith.constant 0 : i32
    %c0_i32_0 = arith.constant 0 : i32
    %c0_i32_1 = arith.constant 0 : i32
    return %arg0, %c0_i32, %c0_i32_0 : i32, i32, i32
  }
  func.func @transform_4(%arg0: i32) -> (i32, i32, i32) {
    %c0_i32 = arith.constant 0 : i32
    %c0_i32_0 = arith.constant 0 : i32
    %c0_i32_1 = arith.constant 0 : i32
    return %arg0, %c0_i32, %c0_i32_0 : i32, i32, i32
  }
  func.func @transform_5(%arg0: i32) -> (i32, i32) {
    %c0_i32 = arith.constant 0 : i32
    %c0_i32_0 = arith.constant 0 : i32
    %c0_i32_1 = arith.constant 0 : i32
    return %c0_i32, %c0_i32_0 : i32, i32
  }
  func.func @transform_6(%arg0: i32) -> (i32, i32) {
    %c0_i32 = arith.constant 0 : i32
    %c0_i32_0 = arith.constant 0 : i32
    %c0_i32_1 = arith.constant 0 : i32
    return %c0_i32, %c0_i32_0 : i32, i32
  }
  func.func @transform_7(%arg0: i32) -> (i32, i32) {
    %c0_i32 = arith.constant 0 : i32
    %c0_i32_0 = arith.constant 0 : i32
    %c0_i32_1 = arith.constant 0 : i32
    return %c0_i32, %c0_i32_0 : i32, i32
  }
  func.func @transform_8(%arg0: i32) -> (i32, i32) {
    %c0_i32 = arith.constant 0 : i32
    %c0_i32_0 = arith.constant 0 : i32
    %c0_i32_1 = arith.constant 0 : i32
    return %c0_i32, %c0_i32_0 : i32, i32
  }
  func.func @transform_9(%arg0: i32) -> (i32, i32) {
    %c0_i32 = arith.constant 0 : i32
    %c0_i32_0 = arith.constant 0 : i32
    %c0_i32_1 = arith.constant 0 : i32
    return %c0_i32, %c0_i32_0 : i32, i32
  }
  func.func @transform_10(%arg0: i32) -> (i32, i32) {
    %c0_i32 = arith.constant 0 : i32
    %c0_i32_0 = arith.constant 0 : i32
    %c0_i32_1 = arith.constant 0 : i32
    return %c0_i32, %c0_i32_0 : i32, i32
  }
  func.func @transform_11(%arg0: i32) -> (i32, i32) {
    %c0_i32 = arith.constant 0 : i32
    %c0_i32_0 = arith.constant 0 : i32
    %c0_i32_1 = arith.constant 0 : i32
    return %c0_i32, %c0_i32_0 : i32, i32
  }
  func.func @transform_12(%arg0: i32) -> (i32, i32) {
    %c0_i32 = arith.constant 0 : i32
    %c0_i32_0 = arith.constant 0 : i32
    %c0_i32_1 = arith.constant 0 : i32
    return %c0_i32, %c0_i32_0 : i32, i32
  }
  func.func @transform_13(%arg0: i32) -> (i32, i32) {
    %c0_i32 = arith.constant 0 : i32
    %c0_i32_0 = arith.constant 0 : i32
    %c0_i32_1 = arith.constant 0 : i32
    return %c0_i32, %c0_i32_0 : i32, i32
  }
  func.func @transform_14(%arg0: i32) -> (i32, i32) {
    %c0_i32 = arith.constant 0 : i32
    %c0_i32_0 = arith.constant 0 : i32
    %c0_i32_1 = arith.constant 0 : i32
    return %c0_i32, %c0_i32_0 : i32, i32
  }
  func.func @transform_15(%arg0: i32) -> (i32, i32, i32) {
    %c0_i32 = arith.constant 0 : i32
    %c0_i32_0 = arith.constant 0 : i32
    %c0_i32_1 = arith.constant 0 : i32
    return %arg0, %c0_i32, %c0_i32_0 : i32, i32, i32
  }
}

module attributes {stable_mosaic.version = 11 : i64} {
  func.func @_convt_ln_kernel(%arg0: i32, %arg1: memref<128x32xf32, #tpu.memory_space<vmem>>, %arg2: memref<32x32xf32, #tpu.memory_space<vmem>>, %arg3: memref<1x32xf32, #tpu.memory_space<vmem>>, %arg4: memref<1x8xf32, #tpu.memory_space<vmem>>, %arg5: memref<1x8xf32, #tpu.memory_space<vmem>>, %arg6: memref<128x32xf32, #tpu.memory_space<vmem>>) attributes {dimension_semantics = [#tpu.dimension_semantics<parallel>], iteration_bounds = array<i64: 1>, scalar_prefetch = 0 : i64, scratch_operands = 0 : i64, tpu.core_type = #tpu.core_type<tc>, window_params = [{transform_indices = @transform_0, window_bounds = array<i64: 128, 32>}, {pipeline_mode = #tpu.pipeline_mode<synchronous>, transform_indices = @transform_1, window_bounds = array<i64: 32, 32>}, {pipeline_mode = #tpu.pipeline_mode<synchronous>, transform_indices = @transform_2, window_bounds = array<i64: 1, 32>}, {pipeline_mode = #tpu.pipeline_mode<synchronous>, transform_indices = @transform_3, window_bounds = array<i64: 1, 8>}, {pipeline_mode = #tpu.pipeline_mode<synchronous>, transform_indices = @transform_4, window_bounds = array<i64: 1, 8>}, {transform_indices = @transform_5, window_bounds = array<i64: 128, 32>}]} {
    %c0 = arith.constant 0 : index
    %c0_0 = arith.constant 0 : index
    %0 = vector.load %arg1[%c0, %c0_0] : memref<128x32xf32, #tpu.memory_space<vmem>>, vector<128x32xf32>
    %c0_1 = arith.constant 0 : index
    %c0_2 = arith.constant 0 : index
    %1 = vector.load %arg2[%c0_1, %c0_2] : memref<32x32xf32, #tpu.memory_space<vmem>>, vector<32x32xf32>
    %cst = arith.constant dense<0.000000e+00> : vector<128x32xf32>
    %2 = tpu.matmul %0, %1, %cst {dimension_numbers = #tpu.dot_dimension_numbers<[1], [0], [0], [1], [0, 0, 1, 1], [], []>} : vector<128x32xf32>, vector<32x32xf32>, vector<128x32xf32> -> vector<128x32xf32>
    %c0_3 = arith.constant 0 : index
    %c0_4 = arith.constant 0 : index
    %3 = vector.load %arg3[%c0_3, %c0_4] : memref<1x32xf32, #tpu.memory_space<vmem>>, vector<1x32xf32>
    %4 = vector.broadcast %3 : vector<1x32xf32> to vector<128x32xf32>
    %5 = arith.addf %2, %4 : vector<128x32xf32>
    %6 = vector.extract_strided_slice %5 {offsets = [0, 0], sizes = [128, 8], strides = [1, 1]} : vector<128x32xf32> to vector<128x8xf32>
    %cst_5 = arith.constant dense<0.000000e+00> : vector<128xf32>
    %7 = vector.multi_reduction <add>, %6, %cst_5 [1] : vector<128x8xf32> to vector<128xf32>
    %8 = vector.shape_cast %7 : vector<128xf32> to vector<128x1xf32>
    %cst_6 = arith.constant 8.000000e+00 : f32
    %9 = vector.broadcast %cst_6 : f32 to vector<128x1xf32>
    %10 = arith.divf %8, %9 : vector<128x1xf32>
    %11 = vector.broadcast %10 : vector<128x1xf32> to vector<128x8xf32>
    %12 = arith.subf %6, %11 : vector<128x8xf32>
    %13 = arith.mulf %12, %12 : vector<128x8xf32>
    %cst_7 = arith.constant dense<0.000000e+00> : vector<128xf32>
    %14 = vector.multi_reduction <add>, %13, %cst_7 [1] : vector<128x8xf32> to vector<128xf32>
    %15 = vector.shape_cast %14 : vector<128xf32> to vector<128x1xf32>
    %cst_8 = arith.constant 8.000000e+00 : f32
    %16 = vector.broadcast %cst_8 : f32 to vector<128x1xf32>
    %17 = arith.divf %15, %16 : vector<128x1xf32>
    %18 = vector.broadcast %10 : vector<128x1xf32> to vector<128x8xf32>
    %19 = arith.subf %6, %18 : vector<128x8xf32>
    %cst_9 = arith.constant 9.99999997E-7 : f32
    %20 = vector.broadcast %cst_9 : f32 to vector<128x1xf32>
    %21 = arith.addf %17, %20 : vector<128x1xf32>
    %22 = math.rsqrt %21 : vector<128x1xf32>
    %23 = vector.broadcast %22 : vector<128x1xf32> to vector<128x8xf32>
    %24 = arith.mulf %19, %23 : vector<128x8xf32>
    %c0_10 = arith.constant 0 : index
    %c0_11 = arith.constant 0 : index
    %25 = vector.load %arg4[%c0_10, %c0_11] : memref<1x8xf32, #tpu.memory_space<vmem>>, vector<1x8xf32>
    %26 = vector.broadcast %25 : vector<1x8xf32> to vector<128x8xf32>
    %27 = arith.mulf %24, %26 : vector<128x8xf32>
    %c0_12 = arith.constant 0 : index
    %c0_13 = arith.constant 0 : index
    %28 = vector.load %arg5[%c0_12, %c0_13] : memref<1x8xf32, #tpu.memory_space<vmem>>, vector<1x8xf32>
    %29 = vector.broadcast %28 : vector<1x8xf32> to vector<128x8xf32>
    %30 = arith.addf %27, %29 : vector<128x8xf32>
    %31 = vector.extract_strided_slice %5 {offsets = [0, 8], sizes = [128, 8], strides = [1, 1]} : vector<128x32xf32> to vector<128x8xf32>
    %cst_14 = arith.constant dense<0.000000e+00> : vector<128xf32>
    %32 = vector.multi_reduction <add>, %31, %cst_14 [1] : vector<128x8xf32> to vector<128xf32>
    %33 = vector.shape_cast %32 : vector<128xf32> to vector<128x1xf32>
    %cst_15 = arith.constant 8.000000e+00 : f32
    %34 = vector.broadcast %cst_15 : f32 to vector<128x1xf32>
    %35 = arith.divf %33, %34 : vector<128x1xf32>
    %36 = vector.broadcast %35 : vector<128x1xf32> to vector<128x8xf32>
    %37 = arith.subf %31, %36 : vector<128x8xf32>
    %38 = arith.mulf %37, %37 : vector<128x8xf32>
    %cst_16 = arith.constant dense<0.000000e+00> : vector<128xf32>
    %39 = vector.multi_reduction <add>, %38, %cst_16 [1] : vector<128x8xf32> to vector<128xf32>
    %40 = vector.shape_cast %39 : vector<128xf32> to vector<128x1xf32>
    %cst_17 = arith.constant 8.000000e+00 : f32
    %41 = vector.broadcast %cst_17 : f32 to vector<128x1xf32>
    %42 = arith.divf %40, %41 : vector<128x1xf32>
    %43 = vector.broadcast %35 : vector<128x1xf32> to vector<128x8xf32>
    %44 = arith.subf %31, %43 : vector<128x8xf32>
    %cst_18 = arith.constant 9.99999997E-7 : f32
    %45 = vector.broadcast %cst_18 : f32 to vector<128x1xf32>
    %46 = arith.addf %42, %45 : vector<128x1xf32>
    %47 = math.rsqrt %46 : vector<128x1xf32>
    %48 = vector.broadcast %47 : vector<128x1xf32> to vector<128x8xf32>
    %49 = arith.mulf %44, %48 : vector<128x8xf32>
    %c0_19 = arith.constant 0 : index
    %c0_20 = arith.constant 0 : index
    %50 = vector.load %arg4[%c0_19, %c0_20] : memref<1x8xf32, #tpu.memory_space<vmem>>, vector<1x8xf32>
    %51 = vector.broadcast %50 : vector<1x8xf32> to vector<128x8xf32>
    %52 = arith.mulf %49, %51 : vector<128x8xf32>
    %c0_21 = arith.constant 0 : index
    %c0_22 = arith.constant 0 : index
    %53 = vector.load %arg5[%c0_21, %c0_22] : memref<1x8xf32, #tpu.memory_space<vmem>>, vector<1x8xf32>
    %54 = vector.broadcast %53 : vector<1x8xf32> to vector<128x8xf32>
    %55 = arith.addf %52, %54 : vector<128x8xf32>
    %56 = vector.extract_strided_slice %5 {offsets = [0, 16], sizes = [128, 8], strides = [1, 1]} : vector<128x32xf32> to vector<128x8xf32>
    %cst_23 = arith.constant dense<0.000000e+00> : vector<128xf32>
    %57 = vector.multi_reduction <add>, %56, %cst_23 [1] : vector<128x8xf32> to vector<128xf32>
    %58 = vector.shape_cast %57 : vector<128xf32> to vector<128x1xf32>
    %cst_24 = arith.constant 8.000000e+00 : f32
    %59 = vector.broadcast %cst_24 : f32 to vector<128x1xf32>
    %60 = arith.divf %58, %59 : vector<128x1xf32>
    %61 = vector.broadcast %60 : vector<128x1xf32> to vector<128x8xf32>
    %62 = arith.subf %56, %61 : vector<128x8xf32>
    %63 = arith.mulf %62, %62 : vector<128x8xf32>
    %cst_25 = arith.constant dense<0.000000e+00> : vector<128xf32>
    %64 = vector.multi_reduction <add>, %63, %cst_25 [1] : vector<128x8xf32> to vector<128xf32>
    %65 = vector.shape_cast %64 : vector<128xf32> to vector<128x1xf32>
    %cst_26 = arith.constant 8.000000e+00 : f32
    %66 = vector.broadcast %cst_26 : f32 to vector<128x1xf32>
    %67 = arith.divf %65, %66 : vector<128x1xf32>
    %68 = vector.broadcast %60 : vector<128x1xf32> to vector<128x8xf32>
    %69 = arith.subf %56, %68 : vector<128x8xf32>
    %cst_27 = arith.constant 9.99999997E-7 : f32
    %70 = vector.broadcast %cst_27 : f32 to vector<128x1xf32>
    %71 = arith.addf %67, %70 : vector<128x1xf32>
    %72 = math.rsqrt %71 : vector<128x1xf32>
    %73 = vector.broadcast %72 : vector<128x1xf32> to vector<128x8xf32>
    %74 = arith.mulf %69, %73 : vector<128x8xf32>
    %c0_28 = arith.constant 0 : index
    %c0_29 = arith.constant 0 : index
    %75 = vector.load %arg4[%c0_28, %c0_29] : memref<1x8xf32, #tpu.memory_space<vmem>>, vector<1x8xf32>
    %76 = vector.broadcast %75 : vector<1x8xf32> to vector<128x8xf32>
    %77 = arith.mulf %74, %76 : vector<128x8xf32>
    %c0_30 = arith.constant 0 : index
    %c0_31 = arith.constant 0 : index
    %78 = vector.load %arg5[%c0_30, %c0_31] : memref<1x8xf32, #tpu.memory_space<vmem>>, vector<1x8xf32>
    %79 = vector.broadcast %78 : vector<1x8xf32> to vector<128x8xf32>
    %80 = arith.addf %77, %79 : vector<128x8xf32>
    %81 = vector.extract_strided_slice %5 {offsets = [0, 24], sizes = [128, 8], strides = [1, 1]} : vector<128x32xf32> to vector<128x8xf32>
    %cst_32 = arith.constant dense<0.000000e+00> : vector<128xf32>
    %82 = vector.multi_reduction <add>, %81, %cst_32 [1] : vector<128x8xf32> to vector<128xf32>
    %83 = vector.shape_cast %82 : vector<128xf32> to vector<128x1xf32>
    %cst_33 = arith.constant 8.000000e+00 : f32
    %84 = vector.broadcast %cst_33 : f32 to vector<128x1xf32>
    %85 = arith.divf %83, %84 : vector<128x1xf32>
    %86 = vector.broadcast %85 : vector<128x1xf32> to vector<128x8xf32>
    %87 = arith.subf %81, %86 : vector<128x8xf32>
    %88 = arith.mulf %87, %87 : vector<128x8xf32>
    %cst_34 = arith.constant dense<0.000000e+00> : vector<128xf32>
    %89 = vector.multi_reduction <add>, %88, %cst_34 [1] : vector<128x8xf32> to vector<128xf32>
    %90 = vector.shape_cast %89 : vector<128xf32> to vector<128x1xf32>
    %cst_35 = arith.constant 8.000000e+00 : f32
    %91 = vector.broadcast %cst_35 : f32 to vector<128x1xf32>
    %92 = arith.divf %90, %91 : vector<128x1xf32>
    %93 = vector.broadcast %85 : vector<128x1xf32> to vector<128x8xf32>
    %94 = arith.subf %81, %93 : vector<128x8xf32>
    %cst_36 = arith.constant 9.99999997E-7 : f32
    %95 = vector.broadcast %cst_36 : f32 to vector<128x1xf32>
    %96 = arith.addf %92, %95 : vector<128x1xf32>
    %97 = math.rsqrt %96 : vector<128x1xf32>
    %98 = vector.broadcast %97 : vector<128x1xf32> to vector<128x8xf32>
    %99 = arith.mulf %94, %98 : vector<128x8xf32>
    %c0_37 = arith.constant 0 : index
    %c0_38 = arith.constant 0 : index
    %100 = vector.load %arg4[%c0_37, %c0_38] : memref<1x8xf32, #tpu.memory_space<vmem>>, vector<1x8xf32>
    %101 = vector.broadcast %100 : vector<1x8xf32> to vector<128x8xf32>
    %102 = arith.mulf %99, %101 : vector<128x8xf32>
    %c0_39 = arith.constant 0 : index
    %c0_40 = arith.constant 0 : index
    %103 = vector.load %arg5[%c0_39, %c0_40] : memref<1x8xf32, #tpu.memory_space<vmem>>, vector<1x8xf32>
    %104 = vector.broadcast %103 : vector<1x8xf32> to vector<128x8xf32>
    %105 = arith.addf %102, %104 : vector<128x8xf32>
    %106 = tpu.concatenate %30, %55, %80, %105 in 1 : vector<128x8xf32>, vector<128x8xf32>, vector<128x8xf32>, vector<128x8xf32> -> vector<128x32xf32>
    %c0_41 = arith.constant 0 : index
    %c0_42 = arith.constant 0 : index
    %107 = vector.load %arg6[%c0_41, %c0_42] : memref<128x32xf32, #tpu.memory_space<vmem>>, vector<128x32xf32>
    tpu.vector_store %arg6[%c0_41, %c0_42], %106 {strides = array<i32>} : memref<128x32xf32, #tpu.memory_space<vmem>>, vector<128x32xf32>,
    return
  }
  func.func @transform_0(%arg0: i32) -> (i32, i32) {
    %c0_i32 = arith.constant 0 : i32
    %c0_i32_0 = arith.constant 0 : i32
    return %arg0, %c0_i32 : i32, i32
  }
  func.func @transform_1(%arg0: i32) -> (i32, i32) {
    %c0_i32 = arith.constant 0 : i32
    %c0_i32_0 = arith.constant 0 : i32
    %c0_i32_1 = arith.constant 0 : i32
    return %c0_i32, %c0_i32_0 : i32, i32
  }
  func.func @transform_2(%arg0: i32) -> (i32, i32) {
    %c0_i32 = arith.constant 0 : i32
    %c0_i32_0 = arith.constant 0 : i32
    %c0_i32_1 = arith.constant 0 : i32
    return %c0_i32, %c0_i32_0 : i32, i32
  }
  func.func @transform_3(%arg0: i32) -> (i32, i32) {
    %c0_i32 = arith.constant 0 : i32
    %c0_i32_0 = arith.constant 0 : i32
    %c0_i32_1 = arith.constant 0 : i32
    return %c0_i32, %c0_i32_0 : i32, i32
  }
  func.func @transform_4(%arg0: i32) -> (i32, i32) {
    %c0_i32 = arith.constant 0 : i32
    %c0_i32_0 = arith.constant 0 : i32
    %c0_i32_1 = arith.constant 0 : i32
    return %c0_i32, %c0_i32_0 : i32, i32
  }
  func.func @transform_5(%arg0: i32) -> (i32, i32) {
    %c0_i32 = arith.constant 0 : i32
    %c0_i32_0 = arith.constant 0 : i32
    return %arg0, %c0_i32 : i32, i32
  }
}

module attributes {stable_mosaic.version = 11 : i64} {
  func.func @_fused_mlp3_kernel(%arg0: i32, %arg1: memref<1x2x32xf32, #tpu.memory_space<vmem>>, %arg2: memref<1x32x32xf32, #tpu.memory_space<vmem>>, %arg3: memref<1x1x32xf32, #tpu.memory_space<vmem>>, %arg4: memref<1x32x32xf32, #tpu.memory_space<vmem>>, %arg5: memref<1x1x32xf32, #tpu.memory_space<vmem>>, %arg6: memref<1x32x4xf32, #tpu.memory_space<vmem>>, %arg7: memref<1x1x4xf32, #tpu.memory_space<vmem>>, %arg8: memref<1x2x4xf32, #tpu.memory_space<vmem>>) attributes {dimension_semantics = [#tpu.dimension_semantics<parallel>], iteration_bounds = array<i64: 1>, scalar_prefetch = 0 : i64, scratch_operands = 0 : i64, tpu.core_type = #tpu.core_type<tc>, window_params = [{transform_indices = @transform_0, window_bounds = array<i64: 1, 2, 32>}, {transform_indices = @transform_1, window_bounds = array<i64: 1, 32, 32>}, {transform_indices = @transform_2, window_bounds = array<i64: 1, 1, 32>}, {transform_indices = @transform_3, window_bounds = array<i64: 1, 32, 32>}, {transform_indices = @transform_4, window_bounds = array<i64: 1, 1, 32>}, {transform_indices = @transform_5, window_bounds = array<i64: 1, 32, 4>}, {transform_indices = @transform_6, window_bounds = array<i64: 1, 1, 4>}, {transform_indices = @transform_7, window_bounds = array<i64: 1, 2, 4>}]} {
    %c0 = arith.constant 0 : index
    %c0_0 = arith.constant 0 : index
    %c0_1 = arith.constant 0 : index
    %0 = vector.load %arg1[%c0, %c0_0, %c0_1] : memref<1x2x32xf32, #tpu.memory_space<vmem>>, vector<1x2x32xf32>
    %1 = vector.shape_cast %0 : vector<1x2x32xf32> to vector<2x32xf32>
    %c0_2 = arith.constant 0 : index
    %c0_3 = arith.constant 0 : index
    %c0_4 = arith.constant 0 : index
    %2 = vector.load %arg2[%c0_2, %c0_3, %c0_4] : memref<1x32x32xf32, #tpu.memory_space<vmem>>, vector<1x32x32xf32>
    %3 = vector.shape_cast %2 : vector<1x32x32xf32> to vector<32x32xf32>
    %cst = arith.constant dense<0.000000e+00> : vector<2x32xf32>
    %4 = tpu.matmul %1, %3, %cst {dimension_numbers = #tpu.dot_dimension_numbers<[1], [0], [0], [1], [0, 0, 1, 1], [], []>} : vector<2x32xf32>, vector<32x32xf32>, vector<2x32xf32> -> vector<2x32xf32>
    %c0_5 = arith.constant 0 : index
    %c0_6 = arith.constant 0 : index
    %c0_7 = arith.constant 0 : index
    %5 = vector.load %arg3[%c0_5, %c0_6, %c0_7] : memref<1x1x32xf32, #tpu.memory_space<vmem>>, vector<1x1x32xf32>
    %6 = vector.shape_cast %5 : vector<1x1x32xf32> to vector<1x32xf32>
    %7 = vector.broadcast %6 : vector<1x32xf32> to vector<2x32xf32>
    %8 = arith.addf %4, %7 : vector<2x32xf32>
    %cst_8 = arith.constant 0.000000e+00 : f32
    %9 = vector.broadcast %cst_8 : f32 to vector<2x32xf32>
    %10 = arith.maximumf %8, %9 : vector<2x32xf32>
    %c0_9 = arith.constant 0 : index
    %c0_10 = arith.constant 0 : index
    %c0_11 = arith.constant 0 : index
    %11 = vector.load %arg4[%c0_9, %c0_10, %c0_11] : memref<1x32x32xf32, #tpu.memory_space<vmem>>, vector<1x32x32xf32>
    %12 = vector.shape_cast %11 : vector<1x32x32xf32> to vector<32x32xf32>
    %cst_12 = arith.constant dense<0.000000e+00> : vector<2x32xf32>
    %13 = tpu.matmul %10, %12, %cst_12 {dimension_numbers = #tpu.dot_dimension_numbers<[1], [0], [0], [1], [0, 0, 1, 1], [], []>} : vector<2x32xf32>, vector<32x32xf32>, vector<2x32xf32> -> vector<2x32xf32>
    %c0_13 = arith.constant 0 : index
    %c0_14 = arith.constant 0 : index
    %c0_15 = arith.constant 0 : index
    %14 = vector.load %arg5[%c0_13, %c0_14, %c0_15] : memref<1x1x32xf32, #tpu.memory_space<vmem>>, vector<1x1x32xf32>
    %15 = vector.shape_cast %14 : vector<1x1x32xf32> to vector<1x32xf32>
    %16 = vector.broadcast %15 : vector<1x32xf32> to vector<2x32xf32>
    %17 = arith.addf %13, %16 : vector<2x32xf32>
    %cst_16 = arith.constant 0.000000e+00 : f32
    %18 = vector.broadcast %cst_16 : f32 to vector<2x32xf32>
    %19 = arith.maximumf %17, %18 : vector<2x32xf32>
    %c0_17 = arith.constant 0 : index
    %c0_18 = arith.constant 0 : index
    %c0_19 = arith.constant 0 : index
    %20 = vector.load %arg6[%c0_17, %c0_18, %c0_19] : memref<1x32x4xf32, #tpu.memory_space<vmem>>, vector<1x32x4xf32>
    %21 = vector.shape_cast %20 : vector<1x32x4xf32> to vector<32x4xf32>
    %cst_20 = arith.constant dense<0.000000e+00> : vector<2x4xf32>
    %22 = tpu.matmul %19, %21, %cst_20 {dimension_numbers = #tpu.dot_dimension_numbers<[1], [0], [0], [1], [0, 0, 1, 1], [], []>} : vector<2x32xf32>, vector<32x4xf32>, vector<2x4xf32> -> vector<2x4xf32>
    %c0_21 = arith.constant 0 : index
    %c0_22 = arith.constant 0 : index
    %c0_23 = arith.constant 0 : index
    %23 = vector.load %arg7[%c0_21, %c0_22, %c0_23] : memref<1x1x4xf32, #tpu.memory_space<vmem>>, vector<1x1x4xf32>
    %24 = vector.shape_cast %23 : vector<1x1x4xf32> to vector<1x4xf32>
    %25 = vector.broadcast %24 : vector<1x4xf32> to vector<2x4xf32>
    %26 = arith.addf %22, %25 : vector<2x4xf32>
    %c0_24 = arith.constant 0 : index
    %c0_25 = arith.constant 0 : index
    %c0_26 = arith.constant 0 : index
    %27 = vector.load %arg8[%c0_24, %c0_25, %c0_26] : memref<1x2x4xf32, #tpu.memory_space<vmem>>, vector<1x2x4xf32>
    %28 = vector.shape_cast %27 : vector<1x2x4xf32> to vector<2x4xf32>
    %29 = vector.shape_cast %26 : vector<2x4xf32> to vector<1x2x4xf32>
    tpu.vector_store %arg8[%c0_24, %c0_25, %c0_26], %29 {strides = array<i32>} : memref<1x2x4xf32, #tpu.memory_space<vmem>>, vector<1x2x4xf32>,
    return
  }
  func.func @transform_0(%arg0: i32) -> (i32, i32, i32) {
    %c0_i32 = arith.constant 0 : i32
    %c0_i32_0 = arith.constant 0 : i32
    %c0_i32_1 = arith.constant 0 : i32
    return %arg0, %c0_i32, %c0_i32_0 : i32, i32, i32
  }
  func.func @transform_1(%arg0: i32) -> (i32, i32, i32) {
    %c0_i32 = arith.constant 0 : i32
    %c0_i32_0 = arith.constant 0 : i32
    %c0_i32_1 = arith.constant 0 : i32
    return %arg0, %c0_i32, %c0_i32_0 : i32, i32, i32
  }
  func.func @transform_2(%arg0: i32) -> (i32, i32, i32) {
    %c0_i32 = arith.constant 0 : i32
    %c0_i32_0 = arith.constant 0 : i32
    %c0_i32_1 = arith.constant 0 : i32
    return %arg0, %c0_i32, %c0_i32_0 : i32, i32, i32
  }
  func.func @transform_3(%arg0: i32) -> (i32, i32, i32) {
    %c0_i32 = arith.constant 0 : i32
    %c0_i32_0 = arith.constant 0 : i32
    %c0_i32_1 = arith.constant 0 : i32
    return %arg0, %c0_i32, %c0_i32_0 : i32, i32, i32
  }
  func.func @transform_4(%arg0: i32) -> (i32, i32, i32) {
    %c0_i32 = arith.constant 0 : i32
    %c0_i32_0 = arith.constant 0 : i32
    %c0_i32_1 = arith.constant 0 : i32
    return %arg0, %c0_i32, %c0_i32_0 : i32, i32, i32
  }
  func.func @transform_5(%arg0: i32) -> (i32, i32, i32) {
    %c0_i32 = arith.constant 0 : i32
    %c0_i32_0 = arith.constant 0 : i32
    %c0_i32_1 = arith.constant 0 : i32
    return %arg0, %c0_i32, %c0_i32_0 : i32, i32, i32
  }
  func.func @transform_6(%arg0: i32) -> (i32, i32, i32) {
    %c0_i32 = arith.constant 0 : i32
    %c0_i32_0 = arith.constant 0 : i32
    %c0_i32_1 = arith.constant 0 : i32
    return %arg0, %c0_i32, %c0_i32_0 : i32, i32, i32
  }
  func.func @transform_7(%arg0: i32) -> (i32, i32, i32) {
    %c0_i32 = arith.constant 0 : i32
    %c0_i32_0 = arith.constant 0 : i32
    %c0_i32_1 = arith.constant 0 : i32
    return %arg0, %c0_i32, %c0_i32_0 : i32, i32, i32
  }
}

module attributes {stable_mosaic.version = 11 : i64} {
  func.func @_fused_mlp3_kernel(%arg0: i32, %arg1: memref<1x2x32xf32, #tpu.memory_space<vmem>>, %arg2: memref<1x32x32xf32, #tpu.memory_space<vmem>>, %arg3: memref<1x1x32xf32, #tpu.memory_space<vmem>>, %arg4: memref<1x32x32xf32, #tpu.memory_space<vmem>>, %arg5: memref<1x1x32xf32, #tpu.memory_space<vmem>>, %arg6: memref<1x32x4xf32, #tpu.memory_space<vmem>>, %arg7: memref<1x1x4xf32, #tpu.memory_space<vmem>>, %arg8: memref<1x2x4xf32, #tpu.memory_space<vmem>>) attributes {dimension_semantics = [#tpu.dimension_semantics<parallel>], iteration_bounds = array<i64: 4>, scalar_prefetch = 0 : i64, scratch_operands = 0 : i64, tpu.core_type = #tpu.core_type<tc>, window_params = [{transform_indices = @transform_0, window_bounds = array<i64: 1, 2, 32>}, {transform_indices = @transform_1, window_bounds = array<i64: 1, 32, 32>}, {transform_indices = @transform_2, window_bounds = array<i64: 1, 1, 32>}, {transform_indices = @transform_3, window_bounds = array<i64: 1, 32, 32>}, {transform_indices = @transform_4, window_bounds = array<i64: 1, 1, 32>}, {transform_indices = @transform_5, window_bounds = array<i64: 1, 32, 4>}, {transform_indices = @transform_6, window_bounds = array<i64: 1, 1, 4>}, {transform_indices = @transform_7, window_bounds = array<i64: 1, 2, 4>}]} {
    %c0 = arith.constant 0 : index
    %c0_0 = arith.constant 0 : index
    %c0_1 = arith.constant 0 : index
    %0 = vector.load %arg1[%c0, %c0_0, %c0_1] : memref<1x2x32xf32, #tpu.memory_space<vmem>>, vector<1x2x32xf32>
    %1 = vector.shape_cast %0 : vector<1x2x32xf32> to vector<2x32xf32>
    %c0_2 = arith.constant 0 : index
    %c0_3 = arith.constant 0 : index
    %c0_4 = arith.constant 0 : index
    %2 = vector.load %arg2[%c0_2, %c0_3, %c0_4] : memref<1x32x32xf32, #tpu.memory_space<vmem>>, vector<1x32x32xf32>
    %3 = vector.shape_cast %2 : vector<1x32x32xf32> to vector<32x32xf32>
    %cst = arith.constant dense<0.000000e+00> : vector<2x32xf32>
    %4 = tpu.matmul %1, %3, %cst {dimension_numbers = #tpu.dot_dimension_numbers<[1], [0], [0], [1], [0, 0, 1, 1], [], []>} : vector<2x32xf32>, vector<32x32xf32>, vector<2x32xf32> -> vector<2x32xf32>
    %c0_5 = arith.constant 0 : index
    %c0_6 = arith.constant 0 : index
    %c0_7 = arith.constant 0 : index
    %5 = vector.load %arg3[%c0_5, %c0_6, %c0_7] : memref<1x1x32xf32, #tpu.memory_space<vmem>>, vector<1x1x32xf32>
    %6 = vector.shape_cast %5 : vector<1x1x32xf32> to vector<1x32xf32>
    %7 = vector.broadcast %6 : vector<1x32xf32> to vector<2x32xf32>
    %8 = arith.addf %4, %7 : vector<2x32xf32>
    %cst_8 = arith.constant 0.000000e+00 : f32
    %9 = vector.broadcast %cst_8 : f32 to vector<2x32xf32>
    %10 = arith.maximumf %8, %9 : vector<2x32xf32>
    %c0_9 = arith.constant 0 : index
    %c0_10 = arith.constant 0 : index
    %c0_11 = arith.constant 0 : index
    %11 = vector.load %arg4[%c0_9, %c0_10, %c0_11] : memref<1x32x32xf32, #tpu.memory_space<vmem>>, vector<1x32x32xf32>
    %12 = vector.shape_cast %11 : vector<1x32x32xf32> to vector<32x32xf32>
    %cst_12 = arith.constant dense<0.000000e+00> : vector<2x32xf32>
    %13 = tpu.matmul %10, %12, %cst_12 {dimension_numbers = #tpu.dot_dimension_numbers<[1], [0], [0], [1], [0, 0, 1, 1], [], []>} : vector<2x32xf32>, vector<32x32xf32>, vector<2x32xf32> -> vector<2x32xf32>
    %c0_13 = arith.constant 0 : index
    %c0_14 = arith.constant 0 : index
    %c0_15 = arith.constant 0 : index
    %14 = vector.load %arg5[%c0_13, %c0_14, %c0_15] : memref<1x1x32xf32, #tpu.memory_space<vmem>>, vector<1x1x32xf32>
    %15 = vector.shape_cast %14 : vector<1x1x32xf32> to vector<1x32xf32>
    %16 = vector.broadcast %15 : vector<1x32xf32> to vector<2x32xf32>
    %17 = arith.addf %13, %16 : vector<2x32xf32>
    %cst_16 = arith.constant 0.000000e+00 : f32
    %18 = vector.broadcast %cst_16 : f32 to vector<2x32xf32>
    %19 = arith.maximumf %17, %18 : vector<2x32xf32>
    %c0_17 = arith.constant 0 : index
    %c0_18 = arith.constant 0 : index
    %c0_19 = arith.constant 0 : index
    %20 = vector.load %arg6[%c0_17, %c0_18, %c0_19] : memref<1x32x4xf32, #tpu.memory_space<vmem>>, vector<1x32x4xf32>
    %21 = vector.shape_cast %20 : vector<1x32x4xf32> to vector<32x4xf32>
    %cst_20 = arith.constant dense<0.000000e+00> : vector<2x4xf32>
    %22 = tpu.matmul %19, %21, %cst_20 {dimension_numbers = #tpu.dot_dimension_numbers<[1], [0], [0], [1], [0, 0, 1, 1], [], []>} : vector<2x32xf32>, vector<32x4xf32>, vector<2x4xf32> -> vector<2x4xf32>
    %c0_21 = arith.constant 0 : index
    %c0_22 = arith.constant 0 : index
    %c0_23 = arith.constant 0 : index
    %23 = vector.load %arg7[%c0_21, %c0_22, %c0_23] : memref<1x1x4xf32, #tpu.memory_space<vmem>>, vector<1x1x4xf32>
    %24 = vector.shape_cast %23 : vector<1x1x4xf32> to vector<1x4xf32>
    %25 = vector.broadcast %24 : vector<1x4xf32> to vector<2x4xf32>
    %26 = arith.addf %22, %25 : vector<2x4xf32>
    %c0_24 = arith.constant 0 : index
    %c0_25 = arith.constant 0 : index
    %c0_26 = arith.constant 0 : index
    %27 = vector.load %arg8[%c0_24, %c0_25, %c0_26] : memref<1x2x4xf32, #tpu.memory_space<vmem>>, vector<1x2x4xf32>
    %28 = vector.shape_cast %27 : vector<1x2x4xf32> to vector<2x4xf32>
    %29 = vector.shape_cast %26 : vector<2x4xf32> to vector<1x2x4xf32>
    tpu.vector_store %arg8[%c0_24, %c0_25, %c0_26], %29 {strides = array<i32>} : memref<1x2x4xf32, #tpu.memory_space<vmem>>, vector<1x2x4xf32>,
    return
  }
  func.func @transform_0(%arg0: i32) -> (i32, i32, i32) {
    %c0_i32 = arith.constant 0 : i32
    %c0_i32_0 = arith.constant 0 : i32
    %c0_i32_1 = arith.constant 0 : i32
    return %arg0, %c0_i32, %c0_i32_0 : i32, i32, i32
  }
  func.func @transform_1(%arg0: i32) -> (i32, i32, i32) {
    %c0_i32 = arith.constant 0 : i32
    %c0_i32_0 = arith.constant 0 : i32
    %c0_i32_1 = arith.constant 0 : i32
    return %arg0, %c0_i32, %c0_i32_0 : i32, i32, i32
  }
  func.func @transform_2(%arg0: i32) -> (i32, i32, i32) {
    %c0_i32 = arith.constant 0 : i32
    %c0_i32_0 = arith.constant 0 : i32
    %c0_i32_1 = arith.constant 0 : i32
    return %arg0, %c0_i32, %c0_i32_0 : i32, i32, i32
  }
  func.func @transform_3(%arg0: i32) -> (i32, i32, i32) {
    %c0_i32 = arith.constant 0 : i32
    %c0_i32_0 = arith.constant 0 : i32
    %c0_i32_1 = arith.constant 0 : i32
    return %arg0, %c0_i32, %c0_i32_0 : i32, i32, i32
  }
  func.func @transform_4(%arg0: i32) -> (i32, i32, i32) {
    %c0_i32 = arith.constant 0 : i32
    %c0_i32_0 = arith.constant 0 : i32
    %c0_i32_1 = arith.constant 0 : i32
    return %arg0, %c0_i32, %c0_i32_0 : i32, i32, i32
  }
  func.func @transform_5(%arg0: i32) -> (i32, i32, i32) {
    %c0_i32 = arith.constant 0 : i32
    %c0_i32_0 = arith.constant 0 : i32
    %c0_i32_1 = arith.constant 0 : i32
    return %arg0, %c0_i32, %c0_i32_0 : i32, i32, i32
  }
  func.func @transform_6(%arg0: i32) -> (i32, i32, i32) {
    %c0_i32 = arith.constant 0 : i32
    %c0_i32_0 = arith.constant 0 : i32
    %c0_i32_1 = arith.constant 0 : i32
    return %arg0, %c0_i32, %c0_i32_0 : i32, i32, i32
  }
  func.func @transform_7(%arg0: i32) -> (i32, i32, i32) {
    %c0_i32 = arith.constant 0 : i32
    %c0_i32_0 = arith.constant 0 : i32
    %c0_i32_1 = arith.constant 0 : i32
    return %arg0, %c0_i32, %c0_i32_0 : i32, i32, i32
  }
}

module attributes {stable_mosaic.version = 11 : i64} {
  func.func @_mm_bias_kernel(%arg0: i32, %arg1: memref<512x8xf32, #tpu.memory_space<vmem>>, %arg2: memref<8x16xf32, #tpu.memory_space<vmem>>, %arg3: memref<1x16xf32, #tpu.memory_space<vmem>>, %arg4: memref<512x16xf32, #tpu.memory_space<vmem>>) attributes {dimension_semantics = [#tpu.dimension_semantics<parallel>], iteration_bounds = array<i64: 1>, scalar_prefetch = 0 : i64, scratch_operands = 0 : i64, tpu.core_type = #tpu.core_type<tc>, window_params = [{transform_indices = @transform_0, window_bounds = array<i64: 512, 8>}, {pipeline_mode = #tpu.pipeline_mode<synchronous>, transform_indices = @transform_1, window_bounds = array<i64: 8, 16>}, {pipeline_mode = #tpu.pipeline_mode<synchronous>, transform_indices = @transform_2, window_bounds = array<i64: 1, 16>}, {transform_indices = @transform_3, window_bounds = array<i64: 512, 16>}]} {
    %c0 = arith.constant 0 : index
    %c0_0 = arith.constant 0 : index
    %0 = vector.load %arg1[%c0, %c0_0] : memref<512x8xf32, #tpu.memory_space<vmem>>, vector<512x8xf32>
    %c0_1 = arith.constant 0 : index
    %c0_2 = arith.constant 0 : index
    %1 = vector.load %arg2[%c0_1, %c0_2] : memref<8x16xf32, #tpu.memory_space<vmem>>, vector<8x16xf32>
    %cst = arith.constant dense<0.000000e+00> : vector<512x16xf32>
    %2 = tpu.matmul %0, %1, %cst {dimension_numbers = #tpu.dot_dimension_numbers<[1], [0], [0], [1], [0, 0, 1, 1], [], []>} : vector<512x8xf32>, vector<8x16xf32>, vector<512x16xf32> -> vector<512x16xf32>
    %c0_3 = arith.constant 0 : index
    %c0_4 = arith.constant 0 : index
    %3 = vector.load %arg3[%c0_3, %c0_4] : memref<1x16xf32, #tpu.memory_space<vmem>>, vector<1x16xf32>
    %4 = vector.broadcast %3 : vector<1x16xf32> to vector<512x16xf32>
    %5 = arith.addf %2, %4 : vector<512x16xf32>
    %c0_5 = arith.constant 0 : index
    %c0_6 = arith.constant 0 : index
    %6 = vector.load %arg4[%c0_5, %c0_6] : memref<512x16xf32, #tpu.memory_space<vmem>>, vector<512x16xf32>
    tpu.vector_store %arg4[%c0_5, %c0_6], %5 {strides = array<i32>} : memref<512x16xf32, #tpu.memory_space<vmem>>, vector<512x16xf32>,
    return
  }
  func.func @transform_0(%arg0: i32) -> (i32, i32) {
    %c0_i32 = arith.constant 0 : i32
    %c0_i32_0 = arith.constant 0 : i32
    return %arg0, %c0_i32 : i32, i32
  }
  func.func @transform_1(%arg0: i32) -> (i32, i32) {
    %c0_i32 = arith.constant 0 : i32
    %c0_i32_0 = arith.constant 0 : i32
    %c0_i32_1 = arith.constant 0 : i32
    return %c0_i32, %c0_i32_0 : i32, i32
  }
  func.func @transform_2(%arg0: i32) -> (i32, i32) {
    %c0_i32 = arith.constant 0 : i32
    %c0_i32_0 = arith.constant 0 : i32
    %c0_i32_1 = arith.constant 0 : i32
    return %c0_i32, %c0_i32_0 : i32, i32
  }
  func.func @transform_3(%arg0: i32) -> (i32, i32) {
    %c0_i32 = arith.constant 0 : i32
    %c0_i32_0 = arith.constant 0 : i32
    return %arg0, %c0_i32 : i32, i32
  }
}

module attributes {stable_mosaic.version = 11 : i64} {
  func.func @_bmm_nt_kernel(%arg0: i32, %arg1: i32, %arg2: memref<1x4x4xf32, #tpu.memory_space<vmem>>, %arg3: memref<1x1024x4xf32, #tpu.memory_space<vmem>>, %arg4: memref<1x4x1024xf32, #tpu.memory_space<vmem>>) attributes {dimension_semantics = [#tpu.dimension_semantics<parallel>, #tpu.dimension_semantics<parallel>], iteration_bounds = array<i64: 2, 1>, scalar_prefetch = 0 : i64, scratch_operands = 0 : i64, tpu.core_type = #tpu.core_type<tc>, window_params = [{transform_indices = @transform_0, window_bounds = array<i64: 1, 4, 4>}, {transform_indices = @transform_1, window_bounds = array<i64: 1, 1024, 4>}, {transform_indices = @transform_2, window_bounds = array<i64: 1, 4, 1024>}]} {
    %c0 = arith.constant 0 : index
    %c0_0 = arith.constant 0 : index
    %c0_1 = arith.constant 0 : index
    %0 = vector.load %arg2[%c0, %c0_0, %c0_1] : memref<1x4x4xf32, #tpu.memory_space<vmem>>, vector<1x4x4xf32>
    %1 = vector.shape_cast %0 : vector<1x4x4xf32> to vector<4x4xf32>
    %c0_2 = arith.constant 0 : index
    %c0_3 = arith.constant 0 : index
    %c0_4 = arith.constant 0 : index
    %2 = vector.load %arg3[%c0_2, %c0_3, %c0_4] : memref<1x1024x4xf32, #tpu.memory_space<vmem>>, vector<1x1024x4xf32>
    %3 = vector.shape_cast %2 : vector<1x1024x4xf32> to vector<1024x4xf32>
    %cst = arith.constant dense<0.000000e+00> : vector<4x1024xf32>
    %4 = tpu.matmul %1, %3, %cst {dimension_numbers = #tpu.dot_dimension_numbers<[1], [1], [0], [0], [0, 0, 1, 0], [], []>} : vector<4x4xf32>, vector<1024x4xf32>, vector<4x1024xf32> -> vector<4x1024xf32>
    %c0_5 = arith.constant 0 : index
    %c0_6 = arith.constant 0 : index
    %c0_7 = arith.constant 0 : index
    %5 = vector.load %arg4[%c0_5, %c0_6, %c0_7] : memref<1x4x1024xf32, #tpu.memory_space<vmem>>, vector<1x4x1024xf32>
    %6 = vector.shape_cast %5 : vector<1x4x1024xf32> to vector<4x1024xf32>
    %7 = vector.shape_cast %4 : vector<4x1024xf32> to vector<1x4x1024xf32>
    tpu.vector_store %arg4[%c0_5, %c0_6, %c0_7], %7 {strides = array<i32>} : memref<1x4x1024xf32, #tpu.memory_space<vmem>>, vector<1x4x1024xf32>,
    return
  }
  func.func @transform_0(%arg0: i32, %arg1: i32) -> (i32, i32, i32) {
    %c0_i32 = arith.constant 0 : i32
    %c0_i32_0 = arith.constant 0 : i32
    %c0_i32_1 = arith.constant 0 : i32
    return %arg0, %c0_i32, %c0_i32_0 : i32, i32, i32
  }
  func.func @transform_1(%arg0: i32, %arg1: i32) -> (i32, i32, i32) {
    %c0_i32 = arith.constant 0 : i32
    %c0_i32_0 = arith.constant 0 : i32
    return %arg0, %arg1, %c0_i32 : i32, i32, i32
  }
  func.func @transform_2(%arg0: i32, %arg1: i32) -> (i32, i32, i32) {
    %c0_i32 = arith.constant 0 : i32
    %c0_i32_0 = arith.constant 0 : i32
    return %arg0, %c0_i32, %arg1 : i32, i32, i32
  }
}

</mosaic_0001>

<bundles_post_ra>
// kernel: tile.13
= control target key start
LH: loop header
LB: loop body
LE: loop exit
PB: predicated region body
PF: predicated region fallthrough
CT: control target
= control target key end

     0   :  { %s22_s0 = inlined_call_operand.vmem [shape: f32[8], index: 0, kind: input, shape index: {}]   ;;  %s23_s1 = inlined_call_operand.vmem [shape: f32[4,8], index: 1, kind: output, shape index: {}]  }
   0x1   :  { %v4_v0 = vld [vmem:[%s22_s0] ss:$0 sm:$0xff] }
   0x2   :  { %5 = vst [vmem:[%s23_s1] sm:$0xf] %v4_v0 }

// kernel: tile.14
= control target key start
LH: loop header
LB: loop body
LE: loop exit
PB: predicated region body
PF: predicated region fallthrough
CT: control target
= control target key end

     0   :  { %vm7_vm0 = vcmask 64512   ;;  %s37_s8 = smov 8   ;;  %s38_s9 = smov 16   ;;  %vm13_vm1 = vcmask 261312   ;;  %vm19_vm2 = vcmask 195712   ;;  %vm25_vm3 = vcmask 130112   ;;  %s55_s0 = inlined_call_operand.vmem [shape: f32[4,8], index: 0, kind: input, shape index: {}]   ;;  %s56_s1 = inlined_call_operand.vmem [shape: f32[1,32], index: 1, kind: output, shape index: {}]  }
   0x1   :  { %v4_v0 = vld [vmem:[%s55_s0] sm:$0xf]  ;;  %s36_s0 = smov 24  }
   0x2   :  { %5 = vst [vmem:[#allocation1] sm:$0xf] %v4_v0 }
   0x9   :  { %v10_v1 = vld [vmem:[#allocation1 + $0x3] sm:$0x1]   ;;  %v22_v2 = vld [vmem:[#allocation1 + $0x1] sm:$0x1]   ;;  %v6_v3 = vld [vmem:[#allocation1] sm:$0x1]  }
   0xa   :  { %11 = vrot.lane.b32.xlu0 %v10_v1, %s36_s0  ;;  %23 = vrot.lane.b32.xlu1 %v22_v2, %s37_s8  ;;  %v16_v4 = vld [vmem:[#allocation1 + $0x2] sm:$0x1]   ;;  %8 = vst.msk [vmem:[#allocation0] sm:$0x1] %vm7_vm0, %v6_v3  }
   0xe   :  { %17 = vrot.lane.b32.xlu0 %v16_v4, %s38_s9 }
  0x7c   :  { %v12_v5 = vpop.permute.xlu0 %11   ;;  %v24_v6 = vpop.permute.xlu1 %23  }
  0x7d   :  { %14 = vst.msk [vmem:[#allocation0] sm:$0x1] %vm13_vm1, %v12_v5  }
  0x80   :  { %v18_v7 = vpop.permute.xlu0 %17  }
  0x81   :  { %20 = vst.msk [vmem:[#allocation0] sm:$0x1] %vm19_vm2, %v18_v7  }
  0x82   :  { %26 = vst.msk [vmem:[#allocation0] sm:$0x1] %vm25_vm3, %v24_v6  }
  0x89   :  { %v30_v8 = vld [vmem:[#allocation0] sm:$0x1] }
  0x8a   :  { %32 = vst [vmem:[%s56_s1] sm:$0x1] %v30_v8 }

// kernel: tile.19
= control target key start
LH: loop header
LB: loop body
LE: loop exit
PB: predicated region body
PF: predicated region fallthrough
CT: control target
= control target key end

     0   :  { %vm7_vm0 = vcmask 31744   ;;  %s37_s8 = smov 4   ;;  %s38_s9 = smov 8   ;;  %vm13_vm1 = vcmask 130144   ;;  %vm19_vm2 = vcmask 97344   ;;  %vm25_vm3 = vcmask 64544   ;;  %s55_s0 = inlined_call_operand.vmem [shape: f32[4,4], index: 0, kind: input, shape index: {}]   ;;  %s56_s1 = inlined_call_operand.vmem [shape: f32[1,16], index: 1, kind: output, shape index: {}]  }
   0x1   :  { %v4_v0 = vld [vmem:[%s55_s0] sm:$0xf]  ;;  %s36_s0 = smov 12  }
   0x2   :  { %5 = vst [vmem:[#allocation1] sm:$0xf] %v4_v0 }
   0x9   :  { %v10_v1 = vld [vmem:[#allocation1 + $0x3] sm:$0x1]   ;;  %v22_v2 = vld [vmem:[#allocation1 + $0x1] sm:$0x1]   ;;  %v6_v3 = vld [vmem:[#allocation1] sm:$0x1]  }
   0xa   :  { %11 = vrot.lane.b32.xlu0 %v10_v1, %s36_s0  ;;  %23 = vrot.lane.b32.xlu1 %v22_v2, %s37_s8  ;;  %v16_v4 = vld [vmem:[#allocation1 + $0x2] sm:$0x1]   ;;  %8 = vst.msk [vmem:[#allocation0] sm:$0x1] %vm7_vm0, %v6_v3  }
   0xe   :  { %17 = vrot.lane.b32.xlu0 %v16_v4, %s38_s9 }
  0x7c   :  { %v12_v5 = vpop.permute.xlu0 %11   ;;  %v24_v6 = vpop.permute.xlu1 %23  }
  0x7d   :  { %14 = vst.msk [vmem:[#allocation0] sm:$0x1] %vm13_vm1, %v12_v5  }
  0x80   :  { %v18_v7 = vpop.permute.xlu0 %17  }
  0x81   :  { %20 = vst.msk [vmem:[#allocation0] sm:$0x1] %vm19_vm2, %v18_v7  }
  0x82   :  { %26 = vst.msk [vmem:[#allocation0] sm:$0x1] %vm25_vm3, %v24_v6  }
  0x89   :  { %v30_v8 = vld [vmem:[#allocation0] sm:$0x1] }
  0x8a   :  { %32 = vst [vmem:[%s56_s1] sm:$0x1] %v30_v8 }

// kernel: tile.18
= control target key start
LH: loop header
LB: loop body
LE: loop exit
PB: predicated region body
PF: predicated region fallthrough
CT: control target
= control target key end

     0   :  { %s22_s0 = inlined_call_operand.vmem [shape: f32[4], index: 0, kind: input, shape index: {}]   ;;  %s23_s1 = inlined_call_operand.vmem [shape: f32[4,4], index: 1, kind: output, shape index: {}]  }
   0x1   :  { %v4_v0 = vld [vmem:[%s22_s0] ss:$0 sm:$0xff] }
   0x2   :  { %5 = vst [vmem:[%s23_s1] sm:$0xf] %v4_v0 }

// kernel: sam_coreml_forward.16
= control target key start
LH: loop header
LB: loop body
LE: loop exit
PB: predicated region body
PF: predicated region fallthrough
CT: control target
= control target key end

     0   :  { %vm39_vm0 = vcmask 261120   ;;  %vm138_vm1 = vcmask 523264   ;;  %vm225_vm2 = vcmask 259072   ;;  %s464_s1 = inlined_call_operand.vmem [shape: f32[32,64], index: 1, kind: input, shape index: {}]   ;;  %s465_s0 = inlined_call_operand.vmem [shape: f32[14,32], index: 0, kind: input, shape index: {}]   ;;  %s466_s3 = inlined_call_operand.vmem [shape: f32[64,32], index: 3, kind: input, shape index: {}]   ;;  %s467_s2 = inlined_call_operand.vmem [shape: f32[1,64], index: 2, kind: input, shape index: {}]   ;;  %s468_s4 = inlined_call_operand.vmem [shape: f32[1,32], index: 4, kind: input, shape index: {}]   ;;  %s469_s5 = inlined_call_operand.vmem [shape: f32[1,32], index: 5, kind: input, shape index: {}]   ;;  %s470_s6 = inlined_call_operand.vmem [shape: f32[1,32], index: 6, kind: input, shape index: {}]   ;;  %s471_s7 = inlined_call_operand.vmem [shape: f32[14,32], index: 7, kind: output, shape index: {}]  }
   0x1   :  { %v28_v0 = vld [vmem:[%s464_s1] sm:$0xff]  ;;  %v29_v1 = vld [vmem:[%s464_s1 + $0x8] sm:$0xff]  ;;  %v30_v2 = vld [vmem:[%s464_s1 + $0x10] sm:$0xff] }
   0x2   :  { %v328_v3 = vpack.c.bf16 %v29_v1, %v28_v0  ;;  %v31_v4 = vld [vmem:[%s464_s1 + $0x18] sm:$0xff]  ;;  %v26_v5 = vld [vmem:[%s465_s0] sm:$0xff]  ;;  %v124_v8 = vld [vmem:[%s466_s3 + $0x8] sm:$0xff] }
   0x3   :  { %v332_v6 = vpack.c.bf16 %v31_v4, %v30_v2  ;;  %306 = vmatprep.mubr.msk.f32.mxu0 %vm39_vm0, %v26_v5  ;;  %v123_v7 = vld [vmem:[%s466_s3] sm:$0xff]  ;;  %v125_v9 = vld [vmem:[%s466_s3 + $0x10] sm:$0xff]  ;;  %v126_v11 = vld [vmem:[%s466_s3 + $0x18] sm:$0xff] }
   0x4   :  { %329 = vmatprep.subr.bf16.mxu0 %v328_v3  ;;  %v336_v10 = vpack.c.bf16 %v124_v8, %v123_v7  ;;  %v340_v12 = vpack.c.bf16 %v126_v11, %v125_v9  ;;  %v127_v13 = vld [vmem:[%s466_s3 + $0x20] sm:$0xff]  ;;  %v128_v14 = vld [vmem:[%s466_s3 + $0x28] sm:$0xff]  ;;  %v129_v17 = vld [vmem:[%s466_s3 + $0x30] sm:$0xff] }
   0x5   :  { %331 = vmatpush3.bf16.msra.mxu0 %v328_v3  ;;  %v344_v15 = vpack.c.bf16 %v128_v14, %v127_v13  ;;  %v27_v16 = vld [vmem:[%s465_s0 + $0x8] sm:$0x3f]  ;;  %v130_v18 = vld [vmem:[%s466_s3 + $0x38] sm:$0xff]  ;;  %v274_v20 = vld [vmem:[%s467_s2] ss:$0 sm:$0xff] }
   0x6   :  { %333 = vmatprep.subr.bf16.mxu0 %v332_v6  ;;  %337 = vmatprep.subr.bf16.mxu1 %v336_v10  ;;  %v348_v19 = vpack.c.bf16 %v130_v18, %v129_v17  ;;  %v277_v27 = vld [vmem:[%s468_s4] ss:$0 sm:$0xff] }
   0x7   :  { %339 = vmatpush3.bf16.msra.mxu1 %v336_v10  ;;  %v280_v53 = vld [vmem:[%s469_s5] ss:$0 sm:$0xff] }
   0x8   :  { %341 = vmatprep.subr.bf16.mxu1 %v340_v12  ;;  %v281_v55 = vld [vmem:[%s470_s6] ss:$0 sm:$0xff] }
   0x9   :  { %335 = vmatpush3.bf16.msra.mxu0 %v332_v6 }
   0xb   :  { %343 = vmatpush3.bf16.msra.mxu1 %v340_v12 }
   0xc   :  { %307 = vmatmul.mubr.msk.f32.vlgmr.msra.gmra.mrb[0].mxu0 %vm39_vm0, %v27_v16  ;;  %345 = vmatprep.subr.bf16.mxu1 %v344_v15 }
   0xf   :  { %347 = vmatpush3.bf16.msra.mxu1 %v344_v15 }
  0x10   :  { %349 = vmatprep.subr.bf16.mxu1 %v348_v19 }
  0x13   :  { %351 = vmatpush3.bf16.msra.mxu1 %v348_v19 }
  0xdf   :  { %v308_v21 = vpop.f32.mrb[0].mxu0 }
  0xe0   :  { %v118_v22 = vadd.f32 %v308_v21, %v274_v20  ;;  %v112_v23 = vpop.f32.mrb[1].mxu0 }
  0xe1   :  { %v113_v24 = vadd.f32 %v274_v20, %v112_v23 }
  0xe2   :  { %v122_v26 = vmax.f32 %v118_v22, 0.0 }
  0xe3   :  { %v121_v25 = vmax.f32 %v113_v24, 0.0 }
  0xe5   :  { %325 = vmatprep.mubr.msk.f32.mxu1 %vm138_vm1, %v121_v25 }
  0xe6   :  { %326 = vmatmul.mubr.msk.f32.vlgmr.msra.gmra.mrb[0].mxu1 %vm138_vm1, %v122_v26 }
 0x1b9   :  { %v327_v28 = vpop.f32.mrb[0].mxu1 }
 0x1ba   :  { %v211_v29 = vpop.f32.mrb[1].mxu1  ;;  %v217_v30 = vadd.f32 %v327_v28, %v277_v27 }
 0x1bb   :  { %v212_v31 = vadd.f32 %v277_v27, %v211_v29 }
 0x1bc   :  { %v221_v34 = vadd.f32 %v217_v30, %v27_v16 }
 0x1bd   :  { %v220_v32 = vadd.f32 %v212_v31, %v26_v5 }
 0x1be   :  { %v226_v35 = vsel %vm225_vm2, %v221_v34, 0.0 }
 0x1bf   :  { %v222_v33 = vsel %vm39_vm0, %v220_v32, 0.0 }
 0x1c0   :  { %223 = vadd.xlane.f32.xlu0 %v222_v33 }
 0x1c4   :  { %227 = vadd.xlane.f32.xlu0 %v226_v35 }
 0x24d   :  { %v224_v36 = vpop.xlane.xlu0 %223 }
 0x24e   :  { %v230_v37 = vmul.f32 0.03125, %v224_v36 }
 0x250   :  { %v232_v38 = vsub.f32 %v220_v32, %v230_v37 }
 0x251   :  { %v228_v39 = vpop.xlane.xlu0 %227 }
 0x252   :  { %v231_v40 = vmul.f32 0.03125, %v228_v39  ;;  %v234_v41 = vmul.f32 %v232_v38, %v232_v38 }
 0x254   :  { %v233_v42 = vsub.f32 %v221_v34, %v231_v40  ;;  %v236_v43 = vsel %vm39_vm0, %v234_v41, 0.0 }
 0x255   :  { %237 = vadd.xlane.f32.xlu1 %v236_v43 }
 0x256   :  { %v235_v44 = vmul.f32 %v233_v42, %v233_v42 }
 0x258   :  { %v239_v45 = vsel %vm225_vm2, %v235_v44, 0.0 }
 0x259   :  { %240 = vadd.xlane.f32.xlu1 %v239_v45 }
 0x2e2   :  { %v238_v46 = vpop.xlane.xlu1 %237 }
 0x2e3   :  { %v242_v47 = vmul.f32 0.03125, %v238_v46 }
 0x2e5   :  { %v244_v48 = vadd.f32 1e-05, %v242_v47 }
 0x2e6   :  { %v241_v49 = vpop.xlane.xlu1 %240 }
 0x2e7   :  { %352 = vrsqrt.f32 %v244_v48  ;;  %v243_v50 = vmul.f32 0.03125, %v241_v49 }
 0x2e9   :  { %v245_v51 = vadd.f32 1e-05, %v243_v50 }
 0x2eb   :  { %354 = vrsqrt.f32 %v245_v51 }
 0x2f1   :  { %v353_v52 = vpop.eup %352 }
 0x2f2   :  { %v248_v54 = vmul.f32 %v353_v52, %v232_v38 }
 0x2f4   :  { %v257_v56 = vmul.f32 %v280_v53, %v248_v54 }
 0x2f5   :  { %v355_v57 = vpop.eup %354 }
 0x2f6   :  { %v266_v58 = vadd.f32 %v281_v55, %v257_v56  ;;  %v249_v59 = vmul.f32 %v355_v57, %v233_v42 }
 0x2f8   :  { %268 = vst.msk [vmem:[%s471_s7] sm:$0xff] %vm39_vm0, %v266_v58  ;;  %v258_v60 = vmul.f32 %v280_v53, %v249_v59 }
 0x2fa   :  { %v267_v61 = vadd.f32 %v281_v55, %v258_v60 }
 0x2fc   :  { %269 = vst.msk [vmem:[%s471_s7 + $0x8] sm:$0x3f] %vm225_vm2, %v267_v61 }

// kernel: sam_coreml_forward.15
= control target key start
LH: loop header
LB: loop body
LE: loop exit
PB: predicated region body
PF: predicated region fallthrough
CT: control target
= control target key end

     0   :  { %s2168_s18 = smov 0   ;;  %s2434_s0 = inlined_call_operand.vmem [shape: f32[2,7,32], index: 0, kind: input, shape index: {}]   ;;  %s2435_s1 = inlined_call_operand.vmem [shape: f32[2,7,32], index: 1, kind: input, shape index: {}]   ;;  %s2436_s2 = inlined_call_operand.vmem [shape: f32[2,64,32], index: 2, kind: input, shape index: {}, may-alias: {2,4}]   ;;  %s2437_s3 = inlined_call_operand.vmem [shape: f32[2,64,32], index: 3, kind: input, shape index: {}]   ;;  %s2438_s4 = inlined_call_operand.vmem [shape: f32[2,64,32], index: 4, kind: input, shape index: {}, may-alias: {2,4}]   ;;  %s2439_s5 = inlined_call_operand.vmem [shape: f32[32,16], index: 5, kind: input, shape index: {}]   ;;  %s2440_s6 = inlined_call_operand.vmem [shape: f32[1,16], index: 6, kind: input, shape index: {}]   ;;  %s2441_s7 = inlined_call_operand.vmem [shape: f32[32,16], index: 7, kind: input, shape index: {}]   ;;  %s2442_s8 = inlined_call_operand.vmem [shape: f32[1,16], index: 8, kind: input, shape index: {}]   ;;  %s2443_s9 = inlined_call_operand.vmem [shape: f32[32,16], index: 9, kind: input, shape index: {}]   ;;  %s2444_s10 = inlined_call_operand.vmem [shape: f32[1,16], index: 10, kind: input, shape index: {}]   ;;  %s2445_s11 = inlined_call_operand.vmem [shape: f32[16,32], index: 11, kind: input, shape index: {}]   ;;  %s2446_s12 = inlined_call_operand.vmem [shape: f32[1,32], index: 12, kind: input, shape index: {}]   ;;  %s2447_s13 = inlined_call_operand.vmem [shape: f32[1,32], index: 13, kind: input, shape index: {}]   ;;  %s2448_s14 = inlined_call_operand.vmem [shape: f32[1,32], index: 14, kind: input, shape index: {}]   ;;  %s2449_s15 = inlined_call_operand.vmem [shape: f32[2,7,32], index: 15, kind: output, shape index: {}]  }
   0x1 LB: > { %s1666_s19 = sadd.s32 4294967295, %s2082_s18   ;;  %p1670_p0 = scmp.ge.s32.totalorder %s2082_s18, 1  ;;  %s2082_s18 = sphi %s2168_s18, %s25_s18  }
   0x2   : > { %p475_p1 = scmp.lt.s32.totalorder %s2082_s18, 3 }
   0x4   : > { %p476_p2 = pnand %p1670_p0, %p475_p1 }
   0x5   : > { %v687_v0 = vld [vmem:[%s2441_s7] sm:$0xff] (!%p476_p2)  ;;  %v688_v1 = vld [vmem:[%s2441_s7 + $0x8] sm:$0xff] (!%p476_p2)  ;;  %v689_v2 = vld [vmem:[%s2441_s7 + $0x10] sm:$0xff] (!%p476_p2)  ;;  %p540_p3 = scmp.lt.s32.totalorder (!%p476_p2), %s1666_s19, 1  ;;  %v2084_v5 = vmov (!%p476_p2), 0.0|0.0   ;;  %vm2085_vm0 = vmmov (!%p476_p2), 0  }
   0x6   : > { %479 = sbr.rel (%p476_p2) target bundleno = 2105 (0x839), region = 80  ;;  %v1942_v3 = vpack.c.bf16 (!%p476_p2), %v688_v1, %v687_v0  ;;  %v690_v4 = vld [vmem:[%s2441_s7 + $0x18] sm:$0xff] (!%p476_p2)  ;;  %1936 = vmatprep.subr.bf16.mxu0 (!%p476_p2), %v2084_v5  ;;  %v602_v6 = vld [vmem:[%s2439_s5] sm:$0xff] (!%p476_p2)  ;;  %v603_v7 = vld [vmem:[%s2439_s5 + $0x8] sm:$0xff] (!%p476_p2)  ;;  %v2086_v12 = vmov (!%p476_p2), 0.0   ;;  %vm613_vm1 = vcmask (!%p476_p2), 261120  }
   0x7   : > { %v1946_v8 = vpack.c.bf16 (!%p476_p2), %v690_v4, %v689_v2  ;;  %v1937_v9 = vpack.c.bf16 (!%p476_p2), %v603_v7, %v602_v6  ;;  %v604_v10 = vld [vmem:[%s2439_s5 + $0x10] sm:$0xff] (!%p476_p2)  ;;  %v605_v11 = vld [vmem:[%s2439_s5 + $0x18] sm:$0xff] (!%p476_p2)  ;;  %1807 = vmatprep.mubr.msk.f32.mxu0 (!%p476_p2), %vm2085_vm0, %v2086_v12  ;;  %v1682_v41 = vld [vmem:[%s2442_s8] ss:$0 sm:$0xff] (!%p476_p2)  ;;  %vm968_vm2 = vcmask (!%p476_p2), 64512   ;;  %vm1067_vm4 = vcmask (!%p476_p2), 522240  }
   0x8   : > { %1943 = vmatprep.subr.bf16.mxu1 (!%p476_p2), %v1942_v3  ;;  %v1940_v13 = vpack.c.bf16 (!%p476_p2), %v605_v11, %v604_v10  ;;  %vm2264_vm3 = vmpackc.low (!%p476_p2), %vm968_vm2, %vm968_vm2  ;;  %v829_v10 = vld [vmem:[%s2443_s9 + $0x10] sm:$0xff] (!%p476_p2)  ;;  %vm1079_vm5 = vcmask (!%p476_p2), 523264   ;;  %vm1533_vm6 = vcmask (!%p476_p2), 260096  }
   0x9   : > { %1945 = vmatpush3.bf16.msra.mxu1 (!%p476_p2), %v1942_v3  ;;  %1938 = vmatpush3.bf16.msra.mxu0 (!%p476_p2), %v1937_v9  ;;  %v1680_v3 = vld [vmem:[%s2440_s6] ss:$0 sm:$0xff] (!%p476_p2)  ;;  %v828_v9 = vld [vmem:[%s2443_s9 + $0x8] sm:$0xff] (!%p476_p2) }
   0xa   : > { %1947 = vmatprep.subr.bf16.mxu1 (!%p476_p2), %v1946_v8  ;;  %1939 = vmatprep.subr.bf16.mxu0 (!%p476_p2), %v2084_v5 }
   0xd   : > { %s2453_s19 = smov (!%p540_p3, %s1666_s19), 1  ;;  %1949 = vmatpush3.bf16.msra.mxu1 %v1946_v8  ;;  %1941 = vmatpush3.bf16.msra.mxu0 %v1940_v13  ;;  %v827_v8 = vld [vmem:[%s2443_s9] sm:$0xff]  ;;  %v830_v13 = vld [vmem:[%s2443_s9 + $0x18] sm:$0xff] }
   0xe   : > { %s2203_s23 = sshll.u32 %s2453_s19, 6  ;;  %s2205_s24 = sshll.u32 %s2453_s19, 3  ;;  %1958 = vmatprep.subr.bf16.mxu1 %v2084_v5  ;;  %v1950_v11 = vpack.c.bf16 %v828_v9, %v827_v8 }
   0xf   : > { %s2211_s27 = scalar_lea.vmem %s2436_s2, %s2203_s23  ;;  %s2217_s30 = scalar_lea.vmem %s2437_s3, %s2203_s23 }
  0x10   : > { %v568_v14 = vld [vmem:[%s2211_s27] sm:$0xff]  ;;  %v569_v16 = vld [vmem:[%s2211_s27 + $0x8] sm:$0xff]  ;;  %v570_v19 = vld [vmem:[%s2211_s27 + $0x10] sm:$0xff]  ;;  %s543_s17 = scalar_lea.vmem %s2434_s0, %s2205_s24  ;;  %s547_s22 = scalar_lea.vmem %s2435_s1, %s2205_s24  ;;  %1951 = vmatprep.subr.bf16.mxu0 %v1950_v11 }
  0x11   : > { %v586_v15 = vld [vmem:[%s2217_s30] sm:$0xff]  ;;  %v587_v18 = vld [vmem:[%s2217_s30 + $0x8] sm:$0xff]  ;;  %v588_v20 = vld [vmem:[%s2217_s30 + $0x10] sm:$0xff]  ;;  %s562_s26 = scalar_lea.vmem %s2438_s4, %s2203_s23 }
  0x12   : > { %v594_v17 = vadd.f32 %v586_v15, %v568_v14  ;;  %v595_v21 = vadd.f32 %v587_v18, %v569_v16  ;;  %v596_v22 = vadd.f32 %v588_v20, %v570_v19  ;;  %v571_v23 = vld [vmem:[%s2211_s27 + $0x18] sm:$0xff]  ;;  %v572_v25 = vld [vmem:[%s2211_s27 + $0x20] sm:$0xff]  ;;  %v573_v31 = vld [vmem:[%s2211_s27 + $0x28] sm:$0xff]  ;;  %v1954_v15 = vpack.c.bf16 %v830_v13, %v829_v10 }
  0x13   : > { %v589_v24 = vld [vmem:[%s2217_s30 + $0x18] sm:$0xff]  ;;  %v590_v26 = vld [vmem:[%s2217_s30 + $0x20] sm:$0xff]  ;;  %v591_v32 = vld [vmem:[%s2217_s30 + $0x28] sm:$0xff] }
  0x14   : > { %1818 = vmatprep.mubr.msk.f32.mxu1 %vm613_vm1, %v594_v17  ;;  %v597_v27 = vadd.f32 %v589_v24, %v571_v23  ;;  %v2241_v28 = vld [vmem:[%s543_s17] sm:$0x7f]  ;;  %v598_v30 = vadd.f32 %v590_v26, %v572_v25  ;;  %v574_v34 = vld [vmem:[%s2211_s27 + $0x30] sm:$0xff]  ;;  %v599_v36 = vadd.f32 %v591_v32, %v573_v31  ;;  %v575_v38 = vld [vmem:[%s2211_s27 + $0x38] sm:$0xff]  ;;  %s2087_s27 = smov 120  }
  0x15   : > { %1819 = vmatmul.mubr.msk.f32.vlgmr.msra.gmra.mrb[0].mxu1 %vm613_vm1, %v595_v21  ;;  %v584_v29 = vld [vmem:[%s547_s22] sm:$0x7f]  ;;  %v592_v35 = vld [vmem:[%s2217_s30 + $0x30] sm:$0xff]  ;;  %v593_v39 = vld [vmem:[%s2217_s30 + $0x38] sm:$0xff]  ;;  %s566_s30 = scalar_lea.vmem %s2449_s15, %s2205_s24 }
  0x16   : > { %1821 = vmatprep.mubr.msk.f32.mxu1 %vm613_vm1, %v596_v22  ;;  %v585_v33 = vadd.f32 %v584_v29, %v2241_v28  ;;  %v600_v37 = vadd.f32 %v592_v35, %v574_v34  ;;  %v601_v40 = vadd.f32 %v593_v39, %v575_v38  ;;  %v576_v14 = vld [vmem:[%s562_s26] sm:$0xff]  ;;  %v577_v16 = vld [vmem:[%s562_s26 + $0x8] sm:$0xff]  ;;  %v578_v17 = vld [vmem:[%s562_s26 + $0x10] sm:$0xff] }
  0x17   : > { %v579_v18 = vld [vmem:[%s562_s26 + $0x18] sm:$0xff]  ;;  %v580_v19 = vld [vmem:[%s562_s26 + $0x20] sm:$0xff]  ;;  %v581_v20 = vld [vmem:[%s562_s26 + $0x28] sm:$0xff] }
  0x18   : > { %1808 = vmatmul.mubr.msk.f32.vlgmr.msra.gmra.mrb[0].mxu0 %vm613_vm1, %v585_v33  ;;  %v582_v21 = vld [vmem:[%s562_s26 + $0x30] sm:$0xff]  ;;  %v583_v22 = vld [vmem:[%s562_s26 + $0x38] sm:$0xff] }
  0x19   : > { %1822 = vmatmul.mubr.msk.f32.gmra.mrb[2].mxu1 %vm613_vm1, %v597_v27  ;;  %1838 = vmatprep.mubr.msk.f32.mxu0 %vm613_vm1, %v576_v14  ;;  %v1691_v27 = vld [vmem:[%s2444_s10] ss:$0 sm:$0xff] }
  0x1a   : > { %1824 = vmatprep.mubr.msk.f32.mxu1 %vm613_vm1, %v598_v30  ;;  %1953 = vmatpush3.bf16.msra.mxu0 %v1950_v11 }
  0x1b   : > { %1955 = vmatprep.subr.bf16.mxu0 %v1954_v15 }
  0x1d   : > { %1825 = vmatmul.mubr.msk.f32.gmra.mrb[4].mxu1 %vm613_vm1, %v599_v36 }
  0x1e   : > { %1827 = vmatprep.mubr.msk.f32.mxu1 %vm613_vm1, %v600_v37  ;;  %1957 = vmatpush3.bf16.msra.mxu0 %v1954_v15 }
  0x1f   : > { %1974 = vmatprep.subr.bf16.mxu0 %v2084_v5 }
  0x21   : > { %1828 = vmatmul.mubr.msk.f32.gmra.mrb[6].mxu1 %vm613_vm1, %v601_v40  ;;  %1839 = vmatmul.mubr.msk.f32.vlgmr.msra.gmra.mrb[2].mxu0 %vm613_vm1, %v577_v16 }
  0x22   : > { %1866 = vmatprep.mubr.msk.f32.mxu1 %vm2085_vm0, %v2086_v12  ;;  %1841 = vmatprep.mubr.msk.f32.mxu0 %vm613_vm1, %v578_v17  ;;  %v1153_v17 = vld [vmem:[%s2445_s11] sm:$0xff] }
  0x25   : > { %1842 = vmatmul.mubr.msk.f32.gmra.mrb[4].mxu0 %vm613_vm1, %v579_v18 }
  0x26   : > { %1844 = vmatprep.mubr.msk.f32.mxu0 %vm613_vm1, %v580_v19 }
  0x29   : > { %1845 = vmatmul.mubr.msk.f32.gmra.mrb[6].mxu0 %vm613_vm1, %v581_v20 }
  0x2a   : > { %1847 = vmatprep.mubr.msk.f32.mxu0 %vm613_vm1, %v582_v21 }
  0x2d   : > { %1848 = vmatmul.mubr.msk.f32.gmra.mrb[8].mxu0 %vm613_vm1, %v583_v22 }
  0x2e   : > { %1885 = vmatprep.mubr.msk.f32.mxu0 %vm2085_vm0, %v2086_v12 }
  0xe8   : > { %v1820_v42 = vpop.f32.mrb[0].mxu1 }
  0xe9   : > { %v794_v43 = vadd.f32 %v1820_v42, %v1682_v41  ;;  %v788_v44 = vpop.f32.mrb[1].mxu1 }
  0xea   : > { %v789_v45 = vadd.f32 %v1682_v41, %v788_v44 }
  0xeb   : > { %v683_v47 = vpop.f32.mrb[0].mxu0 }
  0xec   : > { %v1959_v48 = vpack.c.bf16 %v794_v43, %v789_v45  ;;  %v2026_v49 = vpack.i.bf16 %v794_v43, %v789_v45  ;;  %v1823_v50 = vpop.f32.mrb[2].mxu1  ;;  %v1809_v51 = vpop.f32.mrb[1].mxu0  ;;  %v684_v7 = vadd.f32 %v1680_v3, %v683_v47 }
  0xed   : > { %v804_v52 = vadd.f32 %v1823_v50, %v1682_v41  ;;  %v798_v53 = vpop.f32.mrb[3].mxu1 }
  0xee   : > { %2027 = vrot.lane.b32.xlu1 %v2026_v49, %s2087_s27  ;;  %1961 = vmatpush3.bf16.xpose.msk.msra.mxu1 %vm2264_vm3, %v1959_v48  ;;  %v799_v54 = vadd.f32 %v1682_v41, %v798_v53 }
  0xef   : > { %1962 = vmatprep.subr.bf16.mxu1 %v2084_v5 }
  0xf0   : > { %v2031_v55 = vpack.i.bf16 %v804_v52, %v799_v54  ;;  %v1963_v56 = vpack.c.bf16 %v804_v52, %v799_v54  ;;  %v1826_v57 = vpop.f32.mrb[4].mxu1 }
  0xf1   : > { %v2272_v58 = vadd.f32 %v1826_v57, %v1682_v41  ;;  %v808_v59 = vpop.f32.mrb[5].mxu1 }
  0xf2   : > { %2032 = vrot.lane.b32.xlu1 %v2031_v55, %s2087_s27  ;;  %v2275_v60 = vadd.f32 %v1682_v41, %v808_v59 }
  0xf4   : > { %v2036_v61 = vpack.i.bf16 %v2272_v58, %v2275_v60  ;;  %v1967_v62 = vpack.c.bf16 %v2272_v58, %v2275_v60  ;;  %v1829_v63 = vpop.f32.mrb[6].mxu1  ;;  %v1840_v29 = vpop.f32.mrb[2].mxu0 }
  0xf5   : > { %v824_v0 = vadd.f32 %v1829_v63, %v1682_v41  ;;  %v818_v1 = vpop.f32.mrb[7].mxu1  ;;  %v2329_v30 = vadd.f32 %v1840_v29, %v1691_v27  ;;  %v928_v31 = vpop.f32.mrb[3].mxu0 }
  0xf6   : > { %1965 = vmatpush3.bf16.xpose.msk.msra.mxu1 %vm2264_vm3, %v1963_v56  ;;  %v819_v2 = vadd.f32 %v1682_v41, %v818_v1  ;;  %v2331_v32 = vadd.f32 %v1691_v27, %v928_v31 }
  0xf7   : > { %1966 = vmatprep.subr.bf16.mxu1 %v2084_v5 }
  0xf8   : > { %v2041_v4 = vpack.i.bf16 %v824_v0, %v819_v2  ;;  %v1971_v6 = vpack.c.bf16 %v824_v0, %v819_v2  ;;  %v2046_v33 = vpack.i.bf16 %v2329_v30, %v2331_v32  ;;  %v1975_v34 = vpack.c.bf16 %v2329_v30, %v2331_v32  ;;  %v1843_v35 = vpop.f32.mrb[4].mxu0 }
  0xf9   : > { %v2337_v36 = vadd.f32 %v1843_v35, %v1691_v27  ;;  %v938_v37 = vpop.f32.mrb[5].mxu0 }
  0xfa   : > { %2042 = vrot.lane.b32.xlu1 %v2041_v4, %s2087_s27  ;;  %v2339_v38 = vadd.f32 %v1691_v27, %v938_v37  ;;  %1976 = vmatpush3.bf16.msra.mxu0 %v1975_v34 }
  0xfb   : > { %1977 = vmatprep.subr.bf16.mxu0 %v2084_v5 }
  0xfc   : > { %v2051_v39 = vpack.i.bf16 %v2337_v36, %v2339_v38  ;;  %v1978_v40 = vpack.c.bf16 %v2337_v36, %v2339_v38  ;;  %v1846_v41 = vpop.f32.mrb[6].mxu0 }
  0xfd   : > { %v2346_v42 = vadd.f32 %v1846_v41, %v1691_v27  ;;  %v948_v43 = vpop.f32.mrb[7].mxu0 }
  0xfe   : > { %1969 = vmatpush3.bf16.xpose.msk.msra.mxu1 %vm2264_vm3, %v1967_v62  ;;  %1234 = vrot.lane.b32.xlu1 %v684_v7, %s2087_s27  ;;  %v2348_v44 = vadd.f32 %v1691_v27, %v948_v43 }
  0xff   : > { %1970 = vmatprep.subr.bf16.mxu1 %v2084_v5  ;;  %1979 = vmatpush3.bf16.msra.mxu0 %v1978_v40 }
 0x100   : > { %1980 = vmatprep.subr.bf16.mxu0 %v2084_v5  ;;  %v2056_v45 = vpack.i.bf16 %v2346_v42, %v2348_v44  ;;  %v1981_v47 = vpack.c.bf16 %v2346_v42, %v2348_v44  ;;  %v1849_v48 = vpop.f32.mrb[8].mxu0 }
 0x101   : > { %v2355_v49 = vadd.f32 %v1849_v48, %v1691_v27  ;;  %v958_v50 = vpop.f32.mrb[9].mxu0 }
 0x102   : > { %v959_v51 = vadd.f32 %v1691_v27, %v958_v50 }
 0x103   : > { %1982 = vmatpush3.bf16.msra.mxu0 %v1981_v47 }
 0x104   : > { %1983 = vmatprep.subr.bf16.mxu0 %v2084_v5  ;;  %v2061_v52 = vpack.i.bf16 %v2355_v49, %v959_v51  ;;  %v1984_v53 = vpack.c.bf16 %v2355_v49, %v959_v51  ;;  %v1457_v51 = vld [vmem:[%s2445_s11 + $0x8] sm:$0xff] }
 0x106   : > { %1973 = vmatpush3.bf16.xpose.msk.msra.mxu1 %vm2264_vm3, %v1971_v6 }
 0x107   : > { %1888 = vmatprep.subr.mxu1 %v2086_v12  ;;  %1985 = vmatpush3.bf16.msra.mxu0 %v1984_v53 }
 0x108   : > { %1986 = vmatprep.subr.bf16.mxu0 %v2084_v5 }
 0x10d   : > { %1867 = vmatmul.mubr.msk.f32.vlgmr.msra.gmra.mrb[8].mxu1 %vm968_vm2, %v684_v7 }
 0x10e   : > { %1890 = vmatprep.mubr.msk.f32.mxu1 %vm2085_vm0, %v2086_v12  ;;  %1889 = vmatpush3.msra.mxu1 %v1153_v17 }
 0x10f   : > { %2002 = vmatprep.subr.bf16.mxu1 %v2084_v5 }
 0x160   : > { %v2028_v63 = vpop.permute.xlu1 %2027 }
 0x161   : > { %v2030_v0 = vunpack.i.h.bf16 %v2028_v63  ;;  %v2029_v1 = vunpack.i.l.bf16 %v2028_v63 }
 0x163   : > { %v1987_v4 = vpack.c.bf16 %v2030_v0, %v2029_v1 }
 0x164   : > { %v2033_v6 = vpop.permute.xlu1 %2032 }
 0x165   : > { %v2035_v58 = vunpack.i.h.bf16 %v2033_v6  ;;  %v2034_v60 = vunpack.i.l.bf16 %v2033_v6 }
 0x16c   : > { %v2043_v11 = vpop.permute.xlu1 %2042 }
 0x16d   : > { %v2045_v13 = vunpack.i.h.bf16 %v2043_v11  ;;  %v2044_v14 = vunpack.i.l.bf16 %v2043_v11 }
 0x16f   : > { %v1999_v15 = vpack.c.bf16 %v2045_v13, %v2044_v14 }
 0x170   : > { %v1235_v16 = vpop.permute.xlu1 %1234 }
 0x1e0   : > { %v1062_v23 = vpop.f32.mrb[8].mxu1 }
 0x1e1   : > { %v1066_v24 = vmul.f32 0.35355338, %v1062_v23  ;;  %v1868_v25 = vpop.f32.mrb[9].mxu1 }
 0x1e3   : > { %v1068_v26 = vsel %vm1067_vm4, %v1066_v24, -inf }
 0x1e4   : > { %1069 = vmax.xlane.f32.xlu0 %v1068_v26 }
 0x271   : > { %v1070_v54 = vpop.xlane.xlu0 %1069 }
 0x272   : > { %v1071_v55 = vsub.f32 %v1066_v24, %v1070_v54 }
 0x274   : > { %v1072_v56 = vmul.f32 1.442695, %v1071_v55 }
 0x276   : > { %2066 = vpow2.f32 %v1072_v56 }
 0x280   : > { %v2067_v57 = vpop.eup %2066 }
 0x281   : > { %v1074_v59 = vsel %vm1067_vm4, %v2067_v57, 0.0 }
 0x282   : > { %1075 = vadd.xlane.f32.xlu0 %v1074_v59 }
 0x298   : > { %2037 = vrot.lane.b32.xlu0 %v2036_v61, %s2087_s27  ;;  %v1991_v61 = vpack.c.bf16 %v2035_v58, %v2034_v60 }
 0x30f   : > { %v1076_v62 = vpop.xlane.xlu0 %1075 }
 0x310   : > { %2068 = vrcp.f32 %v1076_v62 }
 0x313   : > { %v2038_v7 = vpop.permute.xlu0 %2037 }
 0x314   : > { %v2040_v8 = vunpack.i.h.bf16 %v2038_v7  ;;  %v2039_v9 = vunpack.i.l.bf16 %v2038_v7 }
 0x316   : > { %v1995_v10 = vpack.c.bf16 %v2040_v8, %v2039_v9 }
 0x31a   : > { %v2069_v2 = vpop.eup %2068 }
 0x31b   : > { %v1078_v3 = vmul.f32 %v2069_v2, %v2067_v57 }
 0x31d   : > { %1886 = vmatmul.mubr.msk.f32.vlgmr.msra.gmra.mrb[10].mxu0 %vm1079_vm5, %v1078_v3 }
 0x31e   : > { %1989 = vmatpush3.bf16.xpose.msk.msra.mxu0 %vm2264_vm3, %v1987_v4  ;;  %1909 = vmatprep.mubr.msk.f32.mxu0 %vm2085_vm0, %v2086_v12 }
 0x31f   : > { %1990 = vmatprep.subr.bf16.mxu0 %v2084_v5 }
 0x326   : > { %1993 = vmatpush3.bf16.xpose.msk.msra.mxu0 %vm2264_vm3, %v1991_v61  ;;  %v1724_v61 = vld [vmem:[%s2448_s14] ss:$0 sm:$0xff] }
 0x327   : > { %1994 = vmatprep.subr.bf16.mxu0 %v2084_v5 }
 0x32e   : > { %1997 = vmatpush3.bf16.xpose.msk.msra.mxu0 %vm2264_vm3, %v1995_v10 }
 0x32f   : > { %1998 = vmatprep.subr.bf16.mxu0 %v2084_v5 }
 0x336   : > { %2001 = vmatpush3.bf16.xpose.msk.msra.mxu0 %vm2264_vm3, %v1999_v15 }
 0x33d   : > { %1910 = vmatmul.mubr.msk.f32.vlgmr.msra.gmra.mrb[12].mxu0 %vm968_vm2, %v1235_v16 }
 0x3f0   : > { %v1149_v18 = vpop.f32.mrb[10].mxu0 }
 0x3f1   : > { %v1887_v19 = vpop.f32.mrb[11].mxu0  ;;  %1891 = vmatmul.mubr.msk.f32.vlgmr.msra.gmra.mrb[10].mxu1 %vm968_vm2, %v1149_v18 }
 0x3f2   : > { %1928 = vmatprep.mubr.msk.f32.mxu1 %vm2085_vm0, %v2086_v12 }
 0x410   : > { %v1336_v20 = vpop.f32.mrb[12].mxu0 }
 0x411   : > { %v1340_v46 = vmul.f32 0.35355338, %v1336_v20  ;;  %v1911_v21 = vpop.f32.mrb[13].mxu0 }
 0x413   : > { %v1341_v22 = vsel %vm1067_vm4, %v1340_v46, -inf }
 0x414   : > { %1342 = vmax.xlane.f32.xlu1 %v1341_v22 }
 0x425   : > { %2047 = vrot.lane.b32.xlu1 %v2046_v33, %s2087_s27 }
 0x429   : > { %2057 = vrot.lane.b32.xlu1 %v2056_v45, %s2087_s27 }
 0x42d   : > { %2062 = vrot.lane.b32.xlu1 %v2061_v52, %s2087_s27 }
 0x4a1   : > { %v1343_v23 = vpop.xlane.xlu1 %1342 }
 0x4a2   : > { %v1344_v24 = vsub.f32 %v1340_v46, %v1343_v23 }
 0x4a4   : > { %v1345_v25 = vmul.f32 1.442695, %v1344_v24 }
 0x4a5   : > { %v2048_v26 = vpop.permute.xlu1 %2047 }
 0x4a6   : > { %2070 = vpow2.f32 %v1345_v25  ;;  %v2050_v27 = vunpack.i.h.bf16 %v2048_v26  ;;  %v2049_v29 = vunpack.i.l.bf16 %v2048_v26 }
 0x4a8   : > { %v2003_v31 = vpack.c.bf16 %v2050_v27, %v2049_v29 }
 0x4a9   : > { %v2058_v37 = vpop.permute.xlu1 %2057 }
 0x4aa   : > { %2004 = vmatpush3.bf16.msra.mxu1 %v2003_v31  ;;  %v2060_v43 = vunpack.i.h.bf16 %v2058_v37  ;;  %v2059_v44 = vunpack.i.l.bf16 %v2058_v37 }
 0x4ab   : > { %2005 = vmatprep.subr.bf16.mxu1 %v2084_v5 }
 0x4ac   : > { %v2009_v48 = vpack.c.bf16 %v2060_v43, %v2059_v44 }
 0x4ad   : > { %v2063_v47 = vpop.permute.xlu1 %2062 }
 0x4ae   : > { %v2065_v49 = vunpack.i.h.bf16 %v2063_v47  ;;  %v2064_v50 = vunpack.i.l.bf16 %v2063_v47 }
 0x4b0   : > { %v2071_v30 = vpop.eup %2070  ;;  %v2012_v38 = vpack.c.bf16 %v2065_v49, %v2064_v50 }
 0x4b1   : > { %v1347_v32 = vsel %vm1067_vm4, %v2071_v30, 0.0 }
 0x4b2   : > { %1348 = vadd.xlane.f32.xlu0 %v1347_v32 }
 0x4c4   : > { %v1223_v33 = vpop.f32.mrb[10].mxu1 }
 0x4c5   : > { %v1892_v34 = vpop.f32.mrb[11].mxu1 }
 0x4c8   : > { %2052 = vrot.lane.b32.xlu0 %v2051_v39, %s2087_s27 }
 0x53f   : > { %v1349_v35 = vpop.xlane.xlu0 %1348 }
 0x540   : > { %2072 = vrcp.f32 %v1349_v35 }
 0x543   : > { %v2053_v40 = vpop.permute.xlu0 %2052 }
 0x544   : > { %v2055_v41 = vunpack.i.h.bf16 %v2053_v40  ;;  %v2054_v42 = vunpack.i.l.bf16 %v2053_v40 }
 0x546   : > { %v2006_v45 = vpack.c.bf16 %v2055_v41, %v2054_v42 }
 0x548   : > { %2007 = vmatpush3.bf16.msra.mxu1 %v2006_v45 }
 0x549   : > { %2008 = vmatprep.subr.bf16.mxu1 %v2084_v5 }
 0x54a   : > { %v2073_v36 = vpop.eup %2072 }
 0x54b   : > { %v1351_v39 = vmul.f32 %v2073_v36, %v2071_v30 }
 0x54c   : > { %2010 = vmatpush3.bf16.msra.mxu1 %v2009_v48 }
 0x54d   : > { %2011 = vmatprep.subr.bf16.mxu1 %v2084_v5  ;;  %v1711_v5 = vld [vmem:[%s2446_s12] ss:$0 sm:$0xff] }
 0x54e   : > { %v1233_v54 = vadd.f32 %v1711_v5, %v1223_v33 }
 0x550   : > { %2013 = vmatpush3.bf16.msra.mxu1 %v2012_v38 }
 0x551   : > { %1931 = vmatprep.subr.mxu1 %v2086_v12 }
 0x553   : > { %1929 = vmatmul.mubr.msk.f32.vlgmr.msra.gmra.mrb[12].mxu1 %vm1079_vm5, %v1351_v39 }
 0x554   : > { %1932 = vmatpush3.msra.mxu1 %v1457_v51  ;;  %1933 = vmatprep.mubr.msk.f32.mxu1 %vm2085_vm0, %v2086_v12 }
 0x626   : > { %v1453_v52 = vpop.f32.mrb[12].mxu1 }
 0x627   : > { %v1930_v53 = vpop.f32.mrb[13].mxu1  ;;  %1934 = vmatmul.mubr.msk.f32.vlgmr.msra.gmra.mrb[14].mxu1 %vm968_vm2, %v1453_v52 }
 0x6fa   : > { %v1527_v55 = vpop.f32.mrb[14].mxu1 }
 0x6fb   : > { %v1531_v56 = vadd.f32 %v1527_v55, %v1233_v54  ;;  %v1935_v57 = vpop.f32.mrb[15].mxu1 }
 0x6fd   : > { %v1532_v59 = vadd.f32 %v1531_v56, %v2241_v28  ;;  %v1723_v28 = vld [vmem:[%s2447_s13] ss:$0 sm:$0xff] }
 0x6ff   : > { %v1534_v62 = vsel %vm1533_vm6, %v1532_v59, 0.0 }
 0x700   : > { %1535 = vadd.xlane.f32.xlu1 %v1534_v62 }
 0x78d   : > { %v1536_v12 = vpop.xlane.xlu1 %1535 }
 0x78e   : > { %v1538_v63 = vmul.f32 0.03125, %v1536_v12 }
 0x790   : > { %v1539_v0 = vsub.f32 %v1532_v59, %v1538_v63 }
 0x792   : > { %v1540_v1 = vmul.f32 %v1539_v0, %v1539_v0 }
 0x794   : > { %v1541_v2 = vsel %vm1533_vm6, %v1540_v1, 0.0 }
 0x795   : > { %1542 = vadd.xlane.f32.xlu0 %v1541_v2 }
 0x822   : > { %v1543_v3 = vpop.xlane.xlu0 %1542 }
 0x823   : > { %v1544_v4 = vmul.f32 0.03125, %v1543_v3 }
 0x825   : > { %v1545_v6 = vadd.f32 1e-05, %v1544_v4 }
 0x827   : > { %2074 = vrsqrt.f32 %v1545_v6 }
 0x831   : > { %v2075_v58 = vpop.eup %2074 }
 0x832   : > { %v1547_v60 = vmul.f32 %v2075_v58, %v1539_v0 }
 0x834   : > { %v1555_v7 = vmul.f32 %v1723_v28, %v1547_v60 }
 0x836   : > { %v1563_v8 = vadd.f32 %v1724_v61, %v1555_v7 }
 0x838   : > { %1564 = vst.msk [vmem:[%s566_s30] sm:$0x7f] %vm1533_vm6, %v1563_v8 }
 0x839 PF: > { %s25_s18 = sadd.s32 1, %s2082_s18  }
 0x83a   : > { %p22_p4 = scmp.ge.s32.totalorder %s25_s18, 4  }
 0x83c   :  { %24 = sbr.rel (!%p22_p4) target bundleno = 1 (0x1), region = 122 }

// kernel: sam_coreml_forward.14
= control target key start
LH: loop header
LB: loop body
LE: loop exit
PB: predicated region body
PF: predicated region fallthrough
CT: control target
= control target key end

     0   :  { %s1707_s16 = smov 0   ;;  %s1855_s0 = inlined_call_operand.vmem [shape: f32[2,7,32], index: 0, kind: input, shape index: {}, may-alias: {0,1,2,3,4}]   ;;  %s1856_s1 = inlined_call_operand.vmem [shape: f32[2,7,32], index: 1, kind: input, shape index: {}, may-alias: {0,1,2,3,4}]   ;;  %s1857_s2 = inlined_call_operand.vmem [shape: f32[2,7,32], index: 2, kind: input, shape index: {}, may-alias: {0,1,2,3,4}]   ;;  %s1858_s3 = inlined_call_operand.vmem [shape: f32[2,7,32], index: 3, kind: input, shape index: {}, may-alias: {0,1,2,3,4}]   ;;  %s1859_s4 = inlined_call_operand.vmem [shape: f32[2,7,32], index: 4, kind: input, shape index: {}, may-alias: {0,1,2,3,4}]   ;;  %s1860_s5 = inlined_call_operand.vmem [shape: f32[32,32], index: 5, kind: input, shape index: {}]   ;;  %s1861_s6 = inlined_call_operand.vmem [shape: f32[1,32], index: 6, kind: input, shape index: {}]   ;;  %s1862_s7 = inlined_call_operand.vmem [shape: f32[32,32], index: 7, kind: input, shape index: {}]   ;;  %s1863_s8 = inlined_call_operand.vmem [shape: f32[1,32], index: 8, kind: input, shape index: {}]   ;;  %s1864_s9 = inlined_call_operand.vmem [shape: f32[32,32], index: 9, kind: input, shape index: {}]   ;;  %s1865_s10 = inlined_call_operand.vmem [shape: f32[1,32], index: 10, kind: input, shape index: {}]   ;;  %s1866_s11 = inlined_call_operand.vmem [shape: f32[32,32], index: 11, kind: input, shape index: {}]   ;;  %s1867_s12 = inlined_call_operand.vmem [shape: f32[1,32], index: 12, kind: input, shape index: {}]   ;;  %s1868_s13 = inlined_call_operand.vmem [shape: f32[1,32], index: 13, kind: input, shape index: {}]   ;;  %s1869_s14 = inlined_call_operand.vmem [shape: f32[1,32], index: 14, kind: input, shape index: {}]   ;;  %s1870_s15 = inlined_call_operand.vmem [shape: f32[2,7,32], index: 15, kind: output, shape index: {}]  }
   0x1 LB: > { %s1441_s17 = sadd.s32 4294967295, %s1621_s16   ;;  %p1445_p0 = scmp.ge.s32.totalorder %s1621_s16, 1  ;;  %s1621_s16 = sphi %s1707_s16, %s25_s16  }
   0x2   : > { %p472_p1 = scmp.lt.s32.totalorder %s1621_s16, 3 }
   0x4   : > { %p473_p2 = pnand %p1445_p0, %p472_p1 }
   0x5   : > { %v646_v0 = vld [vmem:[%s1862_s7] sm:$0xff] (!%p473_p2)  ;;  %v647_v1 = vld [vmem:[%s1862_s7 + $0x8] sm:$0xff] (!%p473_p2)  ;;  %v1623_v3 = vmov (!%p473_p2), 0.0|0.0   ;;  %v648_v6 = vld [vmem:[%s1862_s7 + $0x10] sm:$0xff] (!%p473_p2)  ;;  %p534_p3 = scmp.lt.s32.totalorder (!%p473_p2), %s1441_s17, 1  ;;  %vm1624_vm0 = vmmov (!%p473_p2), 0  }
   0x6   : > { %476 = sbr.rel (%p473_p2) target bundleno = 2246 (0x8c6), region = 80  ;;  %v561_v2 = vld [vmem:[%s1860_s5] sm:$0xff] (!%p473_p2)  ;;  %1573 = vmatprep.subr.bf16.mxu1 (!%p473_p2), %v1623_v3  ;;  %v1574_v4 = vpack.c.bf16 (!%p473_p2), %v647_v1, %v646_v0  ;;  %1567 = vmatprep.subr.bf16.mxu0 (!%p473_p2), %v1623_v3  ;;  %v562_v5 = vld [vmem:[%s1860_s5 + $0x8] sm:$0xff] (!%p473_p2)  ;;  %v649_v7 = vld [vmem:[%s1862_s7 + $0x18] sm:$0xff] (!%p473_p2)  ;;  %v1625_v9 = vmov (!%p473_p2), 0.0   ;;  %vm572_vm1 = vcmask (!%p473_p2), 261120  }
   0x7   : > { %v1568_v8 = vpack.c.bf16 (!%p473_p2), %v562_v5, %v561_v2  ;;  %1519 = vmatprep.mubr.msk.f32.mxu1 (!%p473_p2), %vm1624_vm0, %v1625_v9  ;;  %v563_v10 = vld [vmem:[%s1860_s5 + $0x10] sm:$0xff] (!%p473_p2)  ;;  %v564_v11 = vld [vmem:[%s1860_s5 + $0x18] sm:$0xff] (!%p473_p2)  ;;  %1508 = vmatprep.mubr.msk.f32.mxu0 (!%p473_p2), %vm1624_vm0, %v1625_v9  ;;  %v1577_v12 = vpack.c.bf16 (!%p473_p2), %v649_v7, %v648_v6  ;;  %v1452_v16 = vld [vmem:[%s1863_s8] ss:$0 sm:$0xff] (!%p473_p2)  ;;  %vm815_vm2 = vcmask (!%p473_p2), 130048   ;;  %s1626_s27 = smov (!%p473_p2), 112  }
   0x8   : > { %1575 = vmatpush3.bf16.msra.mxu1 (!%p473_p2), %v1574_v4  ;;  %v1571_v13 = vpack.c.bf16 (!%p473_p2), %v564_v11, %v563_v10  ;;  %v1450_v17 = vld [vmem:[%s1861_s6] ss:$0 sm:$0xff] (!%p473_p2)  ;;  %v731_v25 = vld [vmem:[%s1864_s9 + $0x8] sm:$0xff] (!%p473_p2)  ;;  %v732_v26 = vld [vmem:[%s1864_s9 + $0x10] sm:$0xff] (!%p473_p2)  ;;  %vm893_vm3 = vcmask (!%p473_p2), 55296   ;;  %vm909_vm4 = vcmask (!%p473_p2), 1046528  }
   0x9   : > { %1569 = vmatpush3.bf16.msra.mxu0 (!%p473_p2), %v1568_v8  ;;  %1576 = vmatprep.subr.bf16.mxu1 (!%p473_p2), %v1623_v3  ;;  %v730_v24 = vld [vmem:[%s1864_s9] sm:$0xff] (!%p473_p2)  ;;  %v733_v28 = vld [vmem:[%s1864_s9 + $0x18] sm:$0xff] (!%p473_p2)  ;;  %v984_v46 = vld [vmem:[%s1866_s11 + $0x8] sm:$0xff] (!%p473_p2)  ;;  %vm905_vm5 = vcmask (!%p473_p2), 56320   ;;  %vm1308_vm6 = vcmask (!%p473_p2), 260096  }
   0xa   : > { %1570 = vmatprep.subr.bf16.mxu0 (!%p473_p2), %v1623_v3  ;;  %v1580_v27 = vpack.c.bf16 (!%p473_p2), %v731_v25, %v730_v24  ;;  %v1583_v29 = vpack.c.bf16 (!%p473_p2), %v733_v28, %v732_v26  ;;  %v1454_v41 = vld [vmem:[%s1865_s10] ss:$0 sm:$0xff] (!%p473_p2)  ;;  %v1232_v4 = vld [vmem:[%s1866_s11 + $0x10] sm:$0xff] (!%p473_p2)  ;;  %v1233_v5 = vld [vmem:[%s1866_s11 + $0x18] sm:$0xff] (!%p473_p2) }
   0xb   : > { %v983_v45 = vld [vmem:[%s1866_s11] sm:$0xff] (!%p473_p2)  ;;  %v1589_v7 = vpack.c.bf16 (!%p473_p2), %v1233_v5, %v1232_v4 }
   0xc   : > { %1578 = vmatpush3.bf16.msra.mxu1 (!%p473_p2), %v1577_v12  ;;  %v1586_v48 = vpack.c.bf16 (!%p473_p2), %v984_v46, %v983_v45  ;;  %v1461_v11 = vld [vmem:[%s1867_s12] ss:$0 sm:$0xff] (!%p473_p2) }
   0xd   : > { %s1872_s17 = smov (!%p534_p3, %s1441_s17), 1  ;;  %1572 = vmatpush3.bf16.msra.mxu0 %v1571_v13  ;;  %1533 = vmatprep.subr.mxu1 %v1625_v9  ;;  %v1467_v25 = vld [vmem:[%s1868_s13] ss:$0 sm:$0xff] }
   0xe   : > { %s1747_s18 = sshll.u32 %s1872_s17, 3  ;;  %1579 = vmatprep.subr.bf16.mxu0 %v1623_v3 }
   0xf   : > { %s545_s3 = scalar_lea.vmem %s1857_s2, %s1747_s18  ;;  %s537_s23 = scalar_lea.vmem %s1855_s0, %s1747_s18 }
  0x10   : > { %v559_v14 = vld [vmem:[%s545_s3] sm:$0x7f]  ;;  %s553_s17 = scalar_lea.vmem %s1859_s4, %s1747_s18  ;;  %s557_s28 = scalar_lea.vmem %s1870_s15, %s1747_s18 }
  0x11   : > { %v558_v15 = vld [vmem:[%s537_s23] sm:$0x7f]  ;;  %1520 = vmatmul.mubr.msk.f32.vlgmr.msra.gmra.mrb[0].mxu1 %vm572_vm1, %v559_v14 }
  0x12   : > { %1509 = vmatmul.mubr.msk.f32.vlgmr.msra.gmra.mrb[0].mxu0 %vm572_vm1, %v558_v15  ;;  %1535 = vmatprep.mubr.msk.f32.mxu1 %vm1624_vm0, %v1625_v9  ;;  %v560_v30 = vld [vmem:[%s553_s17] sm:$0x7f] }
  0x13   : > { %1530 = vmatprep.mubr.msk.f32.mxu0 %vm1624_vm0, %v1625_v9  ;;  %1581 = vmatpush3.bf16.msra.mxu0 %v1580_v27  ;;  %v1468_v27 = vld [vmem:[%s1869_s14] ss:$0 sm:$0xff] }
  0x14   : > { %1582 = vmatprep.subr.bf16.mxu0 %v1623_v3 }
  0x17   : > { %1584 = vmatpush3.bf16.msra.mxu0 %v1583_v29 }
  0x18   : > { %1555 = vmatprep.subr.mxu0 %v1625_v9 }
  0x1a   : > { %1531 = vmatmul.mubr.msk.f32.vlgmr.msra.gmra.mrb[2].mxu0 %vm572_vm1, %v560_v30 }
  0x1b   : > { %1557 = vmatprep.mubr.msk.f32.mxu0 %vm1624_vm0, %v1625_v9 }
  0xe4   : > { %v726_v18 = vpop.f32.mrb[0].mxu1 }
  0xe5   : > { %v727_v19 = vadd.f32 %v1452_v16, %v726_v18  ;;  %v1521_v20 = vpop.f32.mrb[1].mxu1  ;;  %v642_v21 = vpop.f32.mrb[0].mxu0 }
  0xe6   : > { %v643_v22 = vadd.f32 %v1450_v17, %v642_v21  ;;  %v1510_v23 = vpop.f32.mrb[1].mxu0 }
  0xe7   : > { %1067 = vrot.lane.b32.xlu1 %v727_v19, %s1626_s27  ;;  %1534 = vmatpush3.xpose.msk.msra.mxu1 %vm815_vm2, %v727_v19 }
  0xe8   : > { %1538 = vmatprep.subr.mxu1 %v1625_v9 }
  0xea   : > { %1536 = vmatmul.mubr.msk.f32.vlgmr.msra.gmra.mrb[2].mxu1 %vm815_vm2, %v643_v22 }
  0xeb   : > { %1065 = vrot.lane.b32.xlu1 %v643_v22, %s1626_s27  ;;  %1540 = vmatprep.mubr.msk.f32.mxu1 %vm1624_vm0, %v1625_v9 }
  0xed   : > { %v810_v40 = vpop.f32.mrb[2].mxu0 }
  0xee   : > { %v1532_v42 = vpop.f32.mrb[3].mxu0  ;;  %v811_v43 = vadd.f32 %v1454_v41, %v810_v40 }
  0xf0   : > { %1539 = vmatpush3.msk.msra.mxu1 %vm909_vm4, %v811_v43 }
  0xf1   : > { %1585 = vmatprep.subr.bf16.mxu1 %v1623_v3 }
 0x159   : > { %v1068_v50 = vpop.permute.xlu1 %1067 }
 0x15d   : > { %v1066_v53 = vpop.permute.xlu1 %1065 }
 0x1bd   : > { %v888_v31 = vpop.f32.mrb[2].mxu1 }
 0x1be   : > { %v892_v32 = vmul.f32 0.25, %v888_v31  ;;  %v1537_v33 = vpop.f32.mrb[3].mxu1 }
 0x1c0   : > { %v894_v34 = vsel %vm893_vm3, %v892_v32, -inf }
 0x1c1   : > { %895 = vmax.xlane.f32.xlu0 %v894_v34 }
 0x24e   : > { %v896_v35 = vpop.xlane.xlu0 %895 }
 0x24f   : > { %v897_v36 = vsub.f32 %v892_v32, %v896_v35 }
 0x251   : > { %v898_v37 = vmul.f32 1.442695, %v897_v36 }
 0x253   : > { %1605 = vpow2.f32 %v898_v37 }
 0x25d   : > { %v1606_v38 = vpop.eup %1605 }
 0x25e   : > { %v900_v39 = vsel %vm893_vm3, %v1606_v38, 0.0 }
 0x25f   : > { %901 = vadd.xlane.f32.xlu0 %v900_v39 }
 0x2ec   : > { %v902_v44 = vpop.xlane.xlu0 %901 }
 0x2ed   : > { %1607 = vrcp.f32 %v902_v44 }
 0x2f7   : > { %v1608_v47 = vpop.eup %1607 }
 0x2f8   : > { %v904_v49 = vmul.f32 %v1608_v47, %v1606_v38 }
 0x2fa   : > { %1541 = vmatmul.mubr.msk.f32.vlgmr.msra.gmra.mrb[4].mxu1 %vm905_vm5, %v904_v49 }
 0x2fb   : > { %1587 = vmatpush3.bf16.msra.mxu1 %v1586_v48  ;;  %1547 = vmatprep.mubr.msk.f32.mxu1 %vm1624_vm0, %v1625_v9 }
 0x2fc   : > { %1550 = vmatprep.subr.mxu1 %v1625_v9 }
 0x3cd   : > { %v979_v51 = vpop.f32.mrb[4].mxu1 }
 0x3ce   : > { %v1542_v52 = vpop.f32.mrb[5].mxu1  ;;  %1548 = vmatmul.mubr.msk.f32.vlgmr.msra.gmra.mrb[6].mxu1 %vm815_vm2, %v979_v51 }
 0x3cf   : > { %1551 = vmatpush3.xpose.msk.msra.mxu1 %vm815_vm2, %v1068_v50  ;;  %1552 = vmatprep.mubr.msk.f32.mxu1 %vm1624_vm0, %v1625_v9 }
 0x3d2   : > { %1553 = vmatmul.mubr.msk.f32.vlgmr.msra.gmra.mrb[8].mxu1 %vm815_vm2, %v1066_v53 }
 0x4a1   : > { %v1054_v54 = vpop.f32.mrb[6].mxu1 }
 0x4a2   : > { %v1549_v55 = vpop.f32.mrb[7].mxu1  ;;  %v1064_v12 = vadd.f32 %v1461_v11, %v1054_v54 }
 0x4a5   : > { %v1139_v56 = vpop.f32.mrb[8].mxu1 }
 0x4a6   : > { %v1143_v57 = vmul.f32 0.25, %v1139_v56  ;;  %v1554_v58 = vpop.f32.mrb[9].mxu1 }
 0x4a8   : > { %v1144_v59 = vsel %vm893_vm3, %v1143_v57, -inf }
 0x4a9   : > { %1145 = vmax.xlane.f32.xlu0 %v1144_v59 }
 0x4bf   : > { %1155 = vrot.lane.b32.xlu0 %v811_v43, %s1626_s27 }
 0x536   : > { %v1146_v60 = vpop.xlane.xlu0 %1145 }
 0x537   : > { %v1147_v61 = vsub.f32 %v1143_v57, %v1146_v60 }
 0x539   : > { %v1148_v62 = vmul.f32 1.442695, %v1147_v61 }
 0x53a   : > { %v1156_v63 = vpop.permute.xlu0 %1155 }
 0x53b   : > { %1609 = vpow2.f32 %v1148_v62  ;;  %1556 = vmatpush3.msk.msra.mxu0 %vm909_vm4, %v1156_v63 }
 0x53c   : > { %1588 = vmatprep.subr.bf16.mxu0 %v1623_v3 }
 0x545   : > { %v1610_v0 = vpop.eup %1609 }
 0x546   : > { %v1150_v1 = vsel %vm893_vm3, %v1610_v0, 0.0 }
 0x547   : > { %1151 = vadd.xlane.f32.xlu1 %v1150_v1 }
 0x5d4   : > { %v1152_v2 = vpop.xlane.xlu1 %1151 }
 0x5d5   : > { %1611 = vrcp.f32 %v1152_v2 }
 0x5df   : > { %v1612_v6 = vpop.eup %1611 }
 0x5e0   : > { %v1154_v8 = vmul.f32 %v1612_v6, %v1610_v0 }
 0x5e2   : > { %1558 = vmatmul.mubr.msk.f32.vlgmr.msra.gmra.mrb[4].mxu0 %vm905_vm5, %v1154_v8 }
 0x5e3   : > { %1590 = vmatpush3.bf16.msra.mxu0 %v1589_v7  ;;  %1564 = vmatprep.mubr.msk.f32.mxu0 %vm1624_vm0, %v1625_v9 }
 0x6b5   : > { %v1228_v3 = vpop.f32.mrb[4].mxu0 }
 0x6b6   : > { %v1559_v10 = vpop.f32.mrb[5].mxu0  ;;  %1565 = vmatmul.mubr.msk.f32.vlgmr.msra.gmra.mrb[6].mxu0 %vm815_vm2, %v1228_v3 }
 0x789   : > { %v1303_v13 = vpop.f32.mrb[6].mxu0 }
 0x78a   : > { %v1307_v14 = vadd.f32 %v1303_v13, %v1064_v12  ;;  %v1566_v15 = vpop.f32.mrb[7].mxu0 }
 0x78c   : > { %v1309_v16 = vsel %vm1308_vm6, %v1307_v14, 0.0 }
 0x78d   : > { %1310 = vadd.xlane.f32.xlu0 %v1309_v16 }
 0x81a   : > { %v1311_v17 = vpop.xlane.xlu0 %1310 }
 0x81b   : > { %v1313_v18 = vmul.f32 0.03125, %v1311_v17 }
 0x81d   : > { %v1314_v9 = vsub.f32 %v1307_v14, %v1313_v18 }
 0x81f   : > { %v1315_v19 = vmul.f32 %v1314_v9, %v1314_v9 }
 0x821   : > { %v1316_v20 = vsel %vm1308_vm6, %v1315_v19, 0.0 }
 0x822   : > { %1317 = vadd.xlane.f32.xlu1 %v1316_v20 }
 0x8af   : > { %v1318_v21 = vpop.xlane.xlu1 %1317 }
 0x8b0   : > { %v1319_v22 = vmul.f32 0.03125, %v1318_v21 }
 0x8b2   : > { %v1320_v23 = vadd.f32 1e-05, %v1319_v22 }
 0x8b4   : > { %1613 = vrsqrt.f32 %v1320_v23 }
 0x8be   : > { %v1614_v24 = vpop.eup %1613 }
 0x8bf   : > { %v1322_v26 = vmul.f32 %v1614_v24, %v1314_v9 }
 0x8c1   : > { %v1330_v28 = vmul.f32 %v1467_v25, %v1322_v26 }
 0x8c3   : > { %v1338_v29 = vadd.f32 %v1468_v27, %v1330_v28 }
 0x8c5   : > { %1339 = vst.msk [vmem:[%s557_s28] sm:$0x7f] %vm1308_vm6, %v1338_v29 }
 0x8c6 PF: > { %s25_s16 = sadd.s32 1, %s1621_s16  }
 0x8c7   : > { %p22_p4 = scmp.ge.s32.totalorder %s25_s16, 4  }
 0x8c9   :  { %24 = sbr.rel (!%p22_p4) target bundleno = 1 (0x1), region = 122 }

// kernel: sam_coreml_forward.18
= control target key start
LH: loop header
LB: loop body
LE: loop exit
PB: predicated region body
PF: predicated region fallthrough
CT: control target
= control target key end

     0   :  { %s1712_s18 = smov 0   ;;  %s1872_s0 = inlined_call_operand.vmem [shape: f32[2,7,32], index: 0, kind: input, shape index: {}, may-alias: {0,2,4}]   ;;  %s1873_s1 = inlined_call_operand.vmem [shape: f32[2,7,32], index: 1, kind: input, shape index: {}, may-alias: {1,3}]   ;;  %s1874_s2 = inlined_call_operand.vmem [shape: f32[2,7,32], index: 2, kind: input, shape index: {}, may-alias: {0,2,4}]   ;;  %s1875_s3 = inlined_call_operand.vmem [shape: f32[2,7,32], index: 3, kind: input, shape index: {}, may-alias: {1,3}]   ;;  %s1876_s4 = inlined_call_operand.vmem [shape: f32[2,7,32], index: 4, kind: input, shape index: {}, may-alias: {0,2,4}]   ;;  %s1877_s5 = inlined_call_operand.vmem [shape: f32[32,32], index: 5, kind: input, shape index: {}]   ;;  %s1878_s6 = inlined_call_operand.vmem [shape: f32[1,32], index: 6, kind: input, shape index: {}]   ;;  %s1879_s7 = inlined_call_operand.vmem [shape: f32[32,32], index: 7, kind: input, shape index: {}]   ;;  %s1880_s8 = inlined_call_operand.vmem [shape: f32[1,32], index: 8, kind: input, shape index: {}]   ;;  %s1881_s9 = inlined_call_operand.vmem [shape: f32[32,32], index: 9, kind: input, shape index: {}]   ;;  %s1882_s10 = inlined_call_operand.vmem [shape: f32[1,32], index: 10, kind: input, shape index: {}]   ;;  %s1883_s11 = inlined_call_operand.vmem [shape: f32[32,32], index: 11, kind: input, shape index: {}]   ;;  %s1884_s12 = inlined_call_operand.vmem [shape: f32[1,32], index: 12, kind: input, shape index: {}]   ;;  %s1885_s13 = inlined_call_operand.vmem [shape: f32[1,32], index: 13, kind: input, shape index: {}]   ;;  %s1886_s14 = inlined_call_operand.vmem [shape: f32[1,32], index: 14, kind: input, shape index: {}]   ;;  %s1887_s15 = inlined_call_operand.vmem [shape: f32[2,7,32], index: 15, kind: output, shape index: {}]  }
   0x1 LB: > { %s1446_s19 = sadd.s32 4294967295, %s1626_s18   ;;  %p1450_p0 = scmp.ge.s32.totalorder %s1626_s18, 1  ;;  %s1626_s18 = sphi %s1712_s18, %s25_s18  }
   0x2   : > { %p472_p1 = scmp.lt.s32.totalorder %s1626_s18, 3 }
   0x4   : > { %p473_p2 = pnand %p1450_p0, %p472_p1 }
   0x5   : > { %v650_v0 = vld [vmem:[%s1879_s7] sm:$0xff] (!%p473_p2)  ;;  %v651_v1 = vld [vmem:[%s1879_s7 + $0x8] sm:$0xff] (!%p473_p2)  ;;  %v1628_v3 = vmov (!%p473_p2), 0.0|0.0   ;;  %v652_v6 = vld [vmem:[%s1879_s7 + $0x10] sm:$0xff] (!%p473_p2)  ;;  %p534_p3 = scmp.lt.s32.totalorder (!%p473_p2), %s1446_s19, 1  ;;  %vm1629_vm0 = vmmov (!%p473_p2), 0  }
   0x6   : > { %476 = sbr.rel (%p473_p2) target bundleno = 2039 (0x7f7), region = 80  ;;  %v565_v2 = vld [vmem:[%s1877_s5] sm:$0xff] (!%p473_p2)  ;;  %1580 = vmatprep.subr.bf16.mxu1 (!%p473_p2), %v1628_v3  ;;  %v1581_v4 = vpack.c.bf16 (!%p473_p2), %v651_v1, %v650_v0  ;;  %1574 = vmatprep.subr.bf16.mxu0 (!%p473_p2), %v1628_v3  ;;  %v566_v5 = vld [vmem:[%s1877_s5 + $0x8] sm:$0xff] (!%p473_p2)  ;;  %v653_v7 = vld [vmem:[%s1879_s7 + $0x18] sm:$0xff] (!%p473_p2)  ;;  %v1630_v9 = vmov (!%p473_p2), 0.0   ;;  %vm576_vm1 = vcmask (!%p473_p2), 261120  }
   0x7   : > { %v1575_v8 = vpack.c.bf16 (!%p473_p2), %v566_v5, %v565_v2  ;;  %1526 = vmatprep.mubr.msk.f32.mxu1 (!%p473_p2), %vm1629_vm0, %v1630_v9  ;;  %v567_v10 = vld [vmem:[%s1877_s5 + $0x10] sm:$0xff] (!%p473_p2)  ;;  %v568_v11 = vld [vmem:[%s1877_s5 + $0x18] sm:$0xff] (!%p473_p2)  ;;  %1515 = vmatprep.mubr.msk.f32.mxu0 (!%p473_p2), %vm1629_vm0, %v1630_v9  ;;  %v1584_v12 = vpack.c.bf16 (!%p473_p2), %v653_v7, %v652_v6  ;;  %v1459_v20 = vld [vmem:[%s1880_s8] ss:$0 sm:$0xff] (!%p473_p2)  ;;  %vm819_vm2 = vcmask (!%p473_p2), 130048   ;;  %s1631_s27 = smov (!%p473_p2), 112  }
   0x8   : > { %1582 = vmatpush3.bf16.msra.mxu1 (!%p473_p2), %v1581_v4  ;;  %v1578_v13 = vpack.c.bf16 (!%p473_p2), %v568_v11, %v567_v10  ;;  %v1457_v21 = vld [vmem:[%s1878_s6] ss:$0 sm:$0xff] (!%p473_p2)  ;;  %v735_v29 = vld [vmem:[%s1881_s9 + $0x8] sm:$0xff] (!%p473_p2)  ;;  %v736_v30 = vld [vmem:[%s1881_s9 + $0x10] sm:$0xff] (!%p473_p2)  ;;  %vm897_vm3 = vcmask (!%p473_p2), 55296   ;;  %vm913_vm4 = vcmask (!%p473_p2), 1046528  }
   0x9   : > { %1576 = vmatpush3.bf16.msra.mxu0 (!%p473_p2), %v1575_v8  ;;  %1583 = vmatprep.subr.bf16.mxu1 (!%p473_p2), %v1628_v3  ;;  %v734_v28 = vld [vmem:[%s1881_s9] sm:$0xff] (!%p473_p2)  ;;  %v737_v32 = vld [vmem:[%s1881_s9 + $0x18] sm:$0xff] (!%p473_p2)  ;;  %v988_v49 = vld [vmem:[%s1883_s11 + $0x8] sm:$0xff] (!%p473_p2)  ;;  %vm909_vm5 = vcmask (!%p473_p2), 56320   ;;  %vm1313_vm6 = vcmask (!%p473_p2), 260096  }
   0xa   : > { %1577 = vmatprep.subr.bf16.mxu0 (!%p473_p2), %v1628_v3  ;;  %v1587_v31 = vpack.c.bf16 (!%p473_p2), %v735_v29, %v734_v28  ;;  %v1590_v33 = vpack.c.bf16 (!%p473_p2), %v737_v32, %v736_v30  ;;  %v1461_v44 = vld [vmem:[%s1882_s10] ss:$0 sm:$0xff] (!%p473_p2)  ;;  %v1236_v4 = vld [vmem:[%s1883_s11 + $0x10] sm:$0xff] (!%p473_p2)  ;;  %v1237_v5 = vld [vmem:[%s1883_s11 + $0x18] sm:$0xff] (!%p473_p2) }
   0xb   : > { %v987_v48 = vld [vmem:[%s1883_s11] sm:$0xff] (!%p473_p2)  ;;  %v1596_v6 = vpack.c.bf16 (!%p473_p2), %v1237_v5, %v1236_v4 }
   0xc   : > { %1585 = vmatpush3.bf16.msra.mxu1 (!%p473_p2), %v1584_v12  ;;  %v1593_v50 = vpack.c.bf16 (!%p473_p2), %v988_v49, %v987_v48  ;;  %v1475_v32 = vld [vmem:[%s1886_s14] ss:$0 sm:$0xff] (!%p473_p2) }
   0xd   : > { %s1889_s19 = smov (!%p534_p3, %s1446_s19), 1  ;;  %1579 = vmatpush3.bf16.msra.mxu0 %v1578_v13  ;;  %1540 = vmatprep.subr.mxu1 %v1630_v9 }
   0xe   : > { %s1752_s23 = sshll.u32 %s1889_s19, 3  ;;  %1586 = vmatprep.subr.bf16.mxu0 %v1628_v3 }
   0xf   : > { %s545_s26 = scalar_lea.vmem %s1874_s2, %s1752_s23  ;;  %s549_s29 = scalar_lea.vmem %s1875_s3, %s1752_s23 }
  0x10   : > { %v559_v14 = vld [vmem:[%s545_s26] sm:$0x7f]  ;;  %s537_s19 = scalar_lea.vmem %s1872_s0, %s1752_s23  ;;  %s541_s21 = scalar_lea.vmem %s1873_s1, %s1752_s23 }
  0x11   : > { %v563_v15 = vld [vmem:[%s549_s29] sm:$0x7f]  ;;  %s553_s25 = scalar_lea.vmem %s1876_s4, %s1752_s23 }
  0x12   : > { %v564_v16 = vadd.f32 %v563_v15, %v559_v14  ;;  %v1770_v17 = vld [vmem:[%s537_s19] sm:$0x7f]  ;;  %s557_s19 = scalar_lea.vmem %s1887_s15, %s1752_s23 }
  0x13   : > { %v561_v18 = vld [vmem:[%s541_s21] sm:$0x7f] }
  0x14   : > { %v562_v19 = vadd.f32 %v561_v18, %v1770_v17  ;;  %1527 = vmatmul.mubr.msk.f32.vlgmr.msra.gmra.mrb[0].mxu1 %vm576_vm1, %v564_v16  ;;  %v560_v34 = vld [vmem:[%s553_s25] sm:$0x7f] }
  0x15   : > { %1542 = vmatprep.mubr.msk.f32.mxu1 %vm1629_vm0, %v1630_v9  ;;  %v1468_v14 = vld [vmem:[%s1884_s12] ss:$0 sm:$0xff] }
  0x16   : > { %1516 = vmatmul.mubr.msk.f32.vlgmr.msra.gmra.mrb[0].mxu0 %vm576_vm1, %v562_v19 }
  0x17   : > { %1537 = vmatprep.mubr.msk.f32.mxu0 %vm1629_vm0, %v1630_v9  ;;  %1588 = vmatpush3.bf16.msra.mxu0 %v1587_v31 }
  0x18   : > { %1589 = vmatprep.subr.bf16.mxu0 %v1628_v3 }
  0x1b   : > { %1591 = vmatpush3.bf16.msra.mxu0 %v1590_v33 }
  0x1c   : > { %1592 = vmatprep.subr.bf16.mxu0 %v1628_v3 }
  0x1e   : > { %1538 = vmatmul.mubr.msk.f32.vlgmr.msra.gmra.mrb[2].mxu0 %vm576_vm1, %v560_v34 }
  0x1f   : > { %1554 = vmatprep.mubr.msk.f32.mxu0 %vm1629_vm0, %v1630_v9  ;;  %1594 = vmatpush3.bf16.msra.mxu0 %v1593_v50 }
  0x20   : > { %1562 = vmatprep.subr.mxu0 %v1630_v9 }
  0xe7   : > { %v730_v22 = vpop.f32.mrb[0].mxu1 }
  0xe8   : > { %v731_v23 = vadd.f32 %v1459_v20, %v730_v22  ;;  %v1528_v24 = vpop.f32.mrb[1].mxu1 }
  0xe9   : > { %v646_v25 = vpop.f32.mrb[0].mxu0 }
  0xea   : > { %v647_v26 = vadd.f32 %v1457_v21, %v646_v25  ;;  %v1517_v27 = vpop.f32.mrb[1].mxu0  ;;  %1071 = vrot.lane.b32.xlu1 %v731_v23, %s1631_s27  ;;  %1541 = vmatpush3.xpose.msk.msra.mxu1 %vm819_vm2, %v731_v23 }
  0xeb   : > { %1545 = vmatprep.subr.mxu1 %v1630_v9 }
  0xed   : > { %1543 = vmatmul.mubr.msk.f32.vlgmr.msra.gmra.mrb[2].mxu1 %vm819_vm2, %v647_v26 }
  0xee   : > { %1069 = vrot.lane.b32.xlu1 %v647_v26, %s1631_s27  ;;  %1547 = vmatprep.mubr.msk.f32.mxu1 %vm1629_vm0, %v1630_v9 }
  0xf1   : > { %v814_v45 = vpop.f32.mrb[2].mxu0 }
  0xf2   : > { %v815_v46 = vadd.f32 %v1461_v44, %v814_v45  ;;  %v1539_v47 = vpop.f32.mrb[3].mxu0 }
  0xf4   : > { %1546 = vmatpush3.msk.msra.mxu1 %vm913_vm4, %v815_v46 }
  0xf5   : > { %1557 = vmatprep.subr.mxu1 %v1630_v9 }
 0x15c   : > { %v1072_v53 = vpop.permute.xlu1 %1071 }
 0x160   : > { %v1070_v55 = vpop.permute.xlu1 %1069 }
 0x1c0   : > { %v892_v35 = vpop.f32.mrb[2].mxu1 }
 0x1c1   : > { %v896_v36 = vmul.f32 0.25, %v892_v35  ;;  %v1544_v37 = vpop.f32.mrb[3].mxu1 }
 0x1c3   : > { %v898_v38 = vsel %vm897_vm3, %v896_v36, -inf }
 0x1c4   : > { %899 = vmax.xlane.f32.xlu0 %v898_v38 }
 0x251   : > { %v900_v39 = vpop.xlane.xlu0 %899 }
 0x252   : > { %v901_v40 = vsub.f32 %v896_v36, %v900_v39 }
 0x254   : > { %v902_v41 = vmul.f32 1.442695, %v901_v40 }
 0x256   : > { %1610 = vpow2.f32 %v902_v41 }
 0x260   : > { %v1611_v42 = vpop.eup %1610 }
 0x261   : > { %v904_v43 = vsel %vm897_vm3, %v1611_v42, 0.0 }
 0x262   : > { %905 = vadd.xlane.f32.xlu0 %v904_v43 }
 0x2ef   : > { %v906_v51 = vpop.xlane.xlu0 %905 }
 0x2f0   : > { %1612 = vrcp.f32 %v906_v51 }
 0x2fa   : > { %v1613_v52 = vpop.eup %1612 }
 0x2fb   : > { %v908_v54 = vmul.f32 %v1613_v52, %v1611_v42 }
 0x2fd   : > { %1548 = vmatmul.mubr.msk.f32.vlgmr.msra.gmra.mrb[4].mxu1 %vm909_vm5, %v908_v54 }
 0x2fe   : > { %1558 = vmatpush3.xpose.msk.msra.mxu1 %vm819_vm2, %v1072_v53  ;;  %1559 = vmatprep.mubr.msk.f32.mxu1 %vm1629_vm0, %v1630_v9 }
 0x2ff   : > { %1595 = vmatprep.subr.bf16.mxu1 %v1628_v3 }
 0x301   : > { %1560 = vmatmul.mubr.msk.f32.vlgmr.msra.gmra.mrb[6].mxu1 %vm819_vm2, %v1070_v55 }
 0x302   : > { %1571 = vmatprep.mubr.msk.f32.mxu1 %vm1629_vm0, %v1630_v9  ;;  %1597 = vmatpush3.bf16.msra.mxu1 %v1596_v6 }
 0x3d0   : > { %v983_v56 = vpop.f32.mrb[4].mxu1 }
 0x3d1   : > { %v1549_v57 = vpop.f32.mrb[5].mxu1  ;;  %1555 = vmatmul.mubr.msk.f32.vlgmr.msra.gmra.mrb[4].mxu0 %vm819_vm2, %v983_v56 }
 0x3d2   : > { %1564 = vmatprep.mubr.msk.f32.mxu0 %vm1629_vm0, %v1630_v9 }
 0x3d4   : > { %v1143_v58 = vpop.f32.mrb[6].mxu1 }
 0x3d5   : > { %v1147_v59 = vmul.f32 0.25, %v1143_v58  ;;  %v1561_v60 = vpop.f32.mrb[7].mxu1 }
 0x3d7   : > { %v1148_v61 = vsel %vm897_vm3, %v1147_v59, -inf }
 0x3d8   : > { %1149 = vmax.xlane.f32.xlu0 %v1148_v61 }
 0x3ee   : > { %1159 = vrot.lane.b32.xlu0 %v815_v46, %s1631_s27 }
 0x465   : > { %v1150_v62 = vpop.xlane.xlu0 %1149 }
 0x466   : > { %v1151_v63 = vsub.f32 %v1147_v59, %v1150_v62 }
 0x468   : > { %v1152_v0 = vmul.f32 1.442695, %v1151_v63 }
 0x469   : > { %v1160_v1 = vpop.permute.xlu0 %1159 }
 0x46a   : > { %1614 = vpow2.f32 %v1152_v0  ;;  %1563 = vmatpush3.msk.msra.mxu0 %vm913_vm4, %v1160_v1 }
 0x474   : > { %v1615_v2 = vpop.eup %1614 }
 0x475   : > { %v1154_v3 = vsel %vm897_vm3, %v1615_v2, 0.0 }
 0x476   : > { %1155 = vadd.xlane.f32.xlu1 %v1154_v3 }
 0x4a4   : > { %v1058_v7 = vpop.f32.mrb[4].mxu0 }
 0x4a5   : > { %v1556_v8 = vpop.f32.mrb[5].mxu0  ;;  %v1068_v15 = vadd.f32 %v1468_v14, %v1058_v7 }
 0x503   : > { %v1156_v9 = vpop.xlane.xlu1 %1155 }
 0x504   : > { %1616 = vrcp.f32 %v1156_v9 }
 0x50e   : > { %v1617_v10 = vpop.eup %1616 }
 0x50f   : > { %v1158_v11 = vmul.f32 %v1617_v10, %v1615_v2 }
 0x511   : > { %1565 = vmatmul.mubr.msk.f32.vlgmr.msra.gmra.mrb[6].mxu0 %vm909_vm5, %v1158_v11 }
 0x5e4   : > { %v1232_v12 = vpop.f32.mrb[6].mxu0 }
 0x5e5   : > { %v1566_v13 = vpop.f32.mrb[7].mxu0  ;;  %1572 = vmatmul.mubr.msk.f32.vlgmr.msra.gmra.mrb[8].mxu1 %vm819_vm2, %v1232_v12 }
 0x6b8   : > { %v1307_v16 = vpop.f32.mrb[8].mxu1 }
 0x6b9   : > { %v1311_v18 = vadd.f32 %v1307_v16, %v1068_v15  ;;  %v1573_v19 = vpop.f32.mrb[9].mxu1 }
 0x6bb   : > { %v1312_v20 = vadd.f32 %v1311_v18, %v1770_v17  ;;  %v1474_v17 = vld [vmem:[%s1885_s13] ss:$0 sm:$0xff] }
 0x6bd   : > { %v1314_v21 = vsel %vm1313_vm6, %v1312_v20, 0.0 }
 0x6be   : > { %1315 = vadd.xlane.f32.xlu0 %v1314_v21 }
 0x74b   : > { %v1316_v22 = vpop.xlane.xlu0 %1315 }
 0x74c   : > { %v1318_v23 = vmul.f32 0.03125, %v1316_v22 }
 0x74e   : > { %v1319_v24 = vsub.f32 %v1312_v20, %v1318_v23 }
 0x750   : > { %v1320_v25 = vmul.f32 %v1319_v24, %v1319_v24 }
 0x752   : > { %v1321_v26 = vsel %vm1313_vm6, %v1320_v25, 0.0 }
 0x753   : > { %1322 = vadd.xlane.f32.xlu1 %v1321_v26 }
 0x7e0   : > { %v1323_v27 = vpop.xlane.xlu1 %1322 }
 0x7e1   : > { %v1324_v28 = vmul.f32 0.03125, %v1323_v27 }
 0x7e3   : > { %v1325_v29 = vadd.f32 1e-05, %v1324_v28 }
 0x7e5   : > { %1618 = vrsqrt.f32 %v1325_v29 }
 0x7ef   : > { %v1619_v30 = vpop.eup %1618 }
 0x7f0   : > { %v1327_v31 = vmul.f32 %v1619_v30, %v1319_v24 }
 0x7f2   : > { %v1335_v33 = vmul.f32 %v1474_v17, %v1327_v31 }
 0x7f4   : > { %v1343_v34 = vadd.f32 %v1475_v32, %v1335_v33 }
 0x7f6   : > { %1344 = vst.msk [vmem:[%s557_s19] sm:$0x7f] %vm1313_vm6, %v1343_v34 }
 0x7f7 PF: > { %s25_s18 = sadd.s32 1, %s1626_s18  }
 0x7f8   : > { %p22_p4 = scmp.ge.s32.totalorder %s25_s18, 4  }
 0x7fa   :  { %24 = sbr.rel (!%p22_p4) target bundleno = 1 (0x1), region = 122 }

// kernel: sam_coreml_forward.23
= control target key start
LH: loop header
LB: loop body
LE: loop exit
PB: predicated region body
PF: predicated region fallthrough
CT: control target
= control target key end

     0   :  { %vm47_vm0 = vcmask 261120   ;;  %s1876_s8 = smov 8   ;;  %vm241_vm1 = vcmask 64512   ;;  %s1879_s13 = smov 104   ;;  %vm1603_vm2 = vcmask 130048   ;;  %vm1620_vm3 = vcmask 195584   ;;  %s3303_s1 = inlined_call_operand.vmem [shape: f32[32,32], index: 1, kind: input, shape index: {}]   ;;  %s3304_s0 = inlined_call_operand.vmem [shape: f32[128,32], index: 0, kind: input, shape index: {}]   ;;  %s3305_s3 = inlined_call_operand.vmem [shape: f32[1,8], index: 3, kind: input, shape index: {}]   ;;  %s3306_s4 = inlined_call_operand.vmem [shape: f32[1,8], index: 4, kind: input, shape index: {}]   ;;  %s3307_s2 = inlined_call_operand.vmem [shape: f32[1,32], index: 2, kind: input, shape index: {}]   ;;  %s3308_s5 = inlined_call_operand.vmem [shape: f32[128,32], index: 5, kind: output, shape index: {}]  }
   0x1   :  { %v36_v0 = vld [vmem:[%s3303_s1] sm:$0xff]  ;;  %v37_v1 = vld [vmem:[%s3303_s1 + $0x8] sm:$0xff]  ;;  %v38_v2 = vld [vmem:[%s3303_s1 + $0x10] sm:$0xff]  ;;  %s1880_s16 = smov 16   ;;  %s1881_s17 = smov 24  }
   0x2   :  { %v1728_v3 = vpack.c.bf16 %v37_v1, %v36_v0  ;;  %v39_v4 = vld [vmem:[%s3303_s1 + $0x18] sm:$0xff]  ;;  %v20_v5 = vld [vmem:[%s3304_s0] sm:$0xff]  ;;  %v21_v10 = vld [vmem:[%s3304_s0 + $0x8] sm:$0xff] }
   0x3   :  { %v1732_v6 = vpack.c.bf16 %v39_v4, %v38_v2  ;;  %1704 = vmatprep.mubr.msk.f32.mxu0 %vm47_vm0, %v20_v5  ;;  %v28_v7 = vld [vmem:[%s3304_s0 + $0x40] sm:$0xff]  ;;  %v29_v11 = vld [vmem:[%s3304_s0 + $0x48] sm:$0xff]  ;;  %v22_v12 = vld [vmem:[%s3304_s0 + $0x10] sm:$0xff] }
   0x4   :  { %1729 = vmatprep.subr.bf16.mxu0 %v1728_v3  ;;  %1736 = vmatprep.subr.bf16.mxu1 %v1728_v3  ;;  %v1674_v8 = vld [vmem:[%s3305_s3] ss:$0 sm:$0xff]  ;;  %v30_v13 = vld [vmem:[%s3304_s0 + $0x50] sm:$0xff]  ;;  %v23_v14 = vld [vmem:[%s3304_s0 + $0x18] sm:$0xff] }
   0x5   :  { %1731 = vmatpush3.bf16.msra.mxu0 %v1728_v3  ;;  %1738 = vmatpush3.bf16.msra.mxu1 %v1728_v3  ;;  %v1675_v9 = vld [vmem:[%s3306_s4] ss:$0 sm:$0xff]  ;;  %v31_v15 = vld [vmem:[%s3304_s0 + $0x58] sm:$0xff]  ;;  %v25_v18 = vld [vmem:[%s3304_s0 + $0x28] sm:$0xff] }
   0x6   :  { %1733 = vmatprep.subr.bf16.mxu0 %v1732_v6  ;;  %1737 = vmatprep.subr.bf16.mxu1 %v1732_v6  ;;  %v24_v16 = vld [vmem:[%s3304_s0 + $0x20] sm:$0xff]  ;;  %v33_v19 = vld [vmem:[%s3304_s0 + $0x68] sm:$0xff]  ;;  %v26_v20 = vld [vmem:[%s3304_s0 + $0x30] sm:$0xff] }
   0x7   :  { %1716 = vmatprep.mubr.msk.f32.mxu1 %vm47_vm0, %v28_v7  ;;  %833 = vrot.lane.b32.xlu0 %v1674_v8, %s1876_s8  ;;  %v32_v17 = vld [vmem:[%s3304_s0 + $0x60] sm:$0xff]  ;;  %v27_v21 = vld [vmem:[%s3304_s0 + $0x38] sm:$0xff]  ;;  %v34_v22 = vld [vmem:[%s3304_s0 + $0x70] sm:$0xff] }
   0x8   :  { %852 = vrot.lane.b32.xlu1 %v1675_v9, %s1876_s8  ;;  %v35_v23 = vld [vmem:[%s3304_s0 + $0x78] sm:$0xff]  ;;  %v1997_v24 = vld [vmem:[%s3307_s2] ss:$0 sm:$0xff]  ;;  %s1877_s0 = smov 120   ;;  %s1878_s2 = smov 112  }
   0x9   :  { %1735 = vmatpush3.bf16.msra.mxu0 %v1732_v6  ;;  %1739 = vmatpush3.bf16.msra.mxu1 %v1732_v6 }
   0xc   :  { %1705 = vmatmul.mubr.msk.f32.vlgmr.msra.gmra.mrb[0].mxu0 %vm47_vm0, %v21_v10  ;;  %1717 = vmatmul.mubr.msk.f32.vlgmr.msra.gmra.mrb[0].mxu1 %vm47_vm0, %v29_v11 }
   0xd   :  { %1707 = vmatprep.mubr.msk.f32.mxu0 %vm47_vm0, %v22_v12  ;;  %1719 = vmatprep.mubr.msk.f32.mxu1 %vm47_vm0, %v30_v13 }
  0x10   :  { %1708 = vmatmul.mubr.msk.f32.gmra.mrb[2].mxu0 %vm47_vm0, %v23_v14  ;;  %1720 = vmatmul.mubr.msk.f32.gmra.mrb[2].mxu1 %vm47_vm0, %v31_v15 }
  0x11   :  { %1710 = vmatprep.mubr.msk.f32.mxu0 %vm47_vm0, %v24_v16  ;;  %1722 = vmatprep.mubr.msk.f32.mxu1 %vm47_vm0, %v32_v17 }
  0x14   :  { %1711 = vmatmul.mubr.msk.f32.gmra.mrb[4].mxu0 %vm47_vm0, %v25_v18  ;;  %1723 = vmatmul.mubr.msk.f32.gmra.mrb[4].mxu1 %vm47_vm0, %v33_v19 }
  0x15   :  { %1713 = vmatprep.mubr.msk.f32.mxu0 %vm47_vm0, %v26_v20  ;;  %1725 = vmatprep.mubr.msk.f32.mxu1 %vm47_vm0, %v34_v22 }
  0x18   :  { %1714 = vmatmul.mubr.msk.f32.gmra.mrb[6].mxu0 %vm47_vm0, %v27_v21  ;;  %1726 = vmatmul.mubr.msk.f32.gmra.mrb[6].mxu1 %vm47_vm0, %v35_v23 }
  0x79   :  { %v2151_v5 = vpop.permute.xlu0 %833 }
  0x7a   :  { %v2127_v63 = vpop.permute.xlu1 %852 }
  0xdf   :  { %v1706_v25 = vpop.f32.mrb[0].mxu0  ;;  %v1718_v26 = vpop.f32.mrb[0].mxu1 }
  0xe0   :  { %v2000_v27 = vadd.f32 %v1706_v25, %v1997_v24  ;;  %v162_v28 = vpop.f32.mrb[1].mxu0  ;;  %v202_v29 = vpop.f32.mrb[1].mxu1  ;;  %v2003_v30 = vadd.f32 %v1718_v26, %v1997_v24 }
  0xe1   :  { %v2020_v36 = vadd.f32 %v1997_v24, %v162_v28  ;;  %v2025_v37 = vadd.f32 %v1997_v24, %v202_v29 }
  0xe2   :  { %515 = vrot.lane.b32.xlu1 %v2000_v27, %s1877_s0  ;;  %v245_v31 = vsel %vm241_vm1, %v2000_v27, 0.0  ;;  %v269_v42 = vsel %vm241_vm1, %v2003_v30, 0.0 }
  0xe3   :  { %246 = vadd.xlane.f32.xlu0 %v245_v31  ;;  %v1709_v32 = vpop.f32.mrb[2].mxu0  ;;  %v1721_v33 = vpop.f32.mrb[2].mxu1  ;;  %v242_v43 = vsel %vm241_vm1, %v2020_v36, 0.0  ;;  %v266_v45 = vsel %vm241_vm1, %v2025_v37, 0.0 }
  0xe4   :  { %v172_v34 = vpop.f32.mrb[3].mxu0  ;;  %v212_v35 = vpop.f32.mrb[3].mxu1  ;;  %v2040_v44 = vadd.f32 %v1709_v32, %v1997_v24  ;;  %v2047_v46 = vadd.f32 %v1721_v33, %v1997_v24 }
  0xe5   :  { %v2060_v47 = vadd.f32 %v1997_v24, %v212_v35  ;;  %v2067_v48 = vadd.f32 %v1997_v24, %v172_v34 }
  0xe6   :  { %531 = vrot.lane.b32.xlu1 %v2003_v30, %s1877_s0  ;;  %v251_v53 = vsel %vm241_vm1, %v2040_v44, 0.0  ;;  %v275_v54 = vsel %vm241_vm1, %v2047_v46, 0.0 }
  0xe7   :  { %v1712_v38 = vpop.f32.mrb[4].mxu0  ;;  %v1724_v40 = vpop.f32.mrb[4].mxu1  ;;  %v272_v55 = vsel %vm241_vm1, %v2060_v47, 0.0  ;;  %v248_v58 = vsel %vm241_vm1, %v2067_v48, 0.0 }
  0xe8   :  { %v182_v39 = vpop.f32.mrb[5].mxu0  ;;  %v222_v41 = vpop.f32.mrb[5].mxu1  ;;  %v2110_v59 = vadd.f32 %v1712_v38, %v1997_v24  ;;  %v2115_v61 = vadd.f32 %v1724_v40, %v1997_v24 }
  0xe9   :  { %v2088_v56 = vadd.f32 %v1997_v24, %v182_v39  ;;  %v2095_v57 = vadd.f32 %v1997_v24, %v222_v41 }
  0xea   :  { %873 = vrot.lane.b32.xlu1 %v2000_v27, %s1878_s2  ;;  %v257_v12 = vsel %vm241_vm1, %v2110_v59, 0.0  ;;  %v281_v15 = vsel %vm241_vm1, %v2115_v61, 0.0 }
  0xeb   :  { %v2073_v49 = vpop.f32.mrb[6].mxu0  ;;  %v2077_v51 = vpop.f32.mrb[6].mxu1  ;;  %v254_v60 = vsel %vm241_vm1, %v2088_v56, 0.0  ;;  %v278_v62 = vsel %vm241_vm1, %v2095_v57, 0.0 }
  0xec   :  { %v192_v50 = vpop.f32.mrb[7].mxu0  ;;  %v232_v52 = vpop.f32.mrb[7].mxu1  ;;  %v2175_v20 = vadd.f32 %v2073_v49, %v1997_v24  ;;  %v2185_v25 = vadd.f32 %v2077_v51, %v1997_v24 }
  0xed   :  { %v2136_v1 = vadd.f32 %v1997_v24, %v192_v50  ;;  %v2141_v2 = vadd.f32 %v1997_v24, %v232_v52 }
  0xee   :  { %889 = vrot.lane.b32.xlu1 %v2003_v30, %s1878_s2 }
  0xef   :  { %v260_v23 = vsel %vm241_vm1, %v2136_v1, 0.0  ;;  %v284_v26 = vsel %vm241_vm1, %v2141_v2, 0.0 }
  0xf2   :  { %1231 = vrot.lane.b32.xlu1 %v2000_v27, %s1879_s13 }
  0xf6   :  { %1247 = vrot.lane.b32.xlu1 %v2003_v30, %s1879_s13 }
  0xf9   :  { %513 = vrot.lane.b32.xlu0 %v2020_v36, %s1877_s0 }
  0xfd   :  { %529 = vrot.lane.b32.xlu0 %v2025_v37, %s1877_s0 }
 0x101   :  { %887 = vrot.lane.b32.xlu0 %v2025_v37, %s1878_s2 }
 0x105   :  { %1229 = vrot.lane.b32.xlu0 %v2020_v36, %s1879_s13 }
 0x109   :  { %1245 = vrot.lane.b32.xlu0 %v2025_v37, %s1879_s13 }
 0x11a   :  { %270 = vadd.xlane.f32.xlu1 %v269_v42 }
 0x128   :  { %243 = vadd.xlane.f32.xlu0 %v242_v43 }
 0x12b   :  { %871 = vrot.lane.b32.xlu1 %v2020_v36, %s1878_s2 }
 0x12c   :  { %267 = vadd.xlane.f32.xlu0 %v266_v45 }
 0x12f   :  { %519 = vrot.lane.b32.xlu1 %v2040_v44, %s1877_s0 }
 0x133   :  { %535 = vrot.lane.b32.xlu1 %v2047_v46, %s1877_s0 }
 0x137   :  { %877 = vrot.lane.b32.xlu1 %v2040_v44, %s1878_s2 }
 0x13b   :  { %893 = vrot.lane.b32.xlu1 %v2047_v46, %s1878_s2 }
 0x13f   :  { %1235 = vrot.lane.b32.xlu1 %v2040_v44, %s1879_s13 }
 0x142   :  { %533 = vrot.lane.b32.xlu0 %v2060_v47, %s1877_s0 }
 0x143   :  { %1251 = vrot.lane.b32.xlu1 %v2047_v46, %s1879_s13 }
 0x146   :  { %875 = vrot.lane.b32.xlu0 %v2067_v48, %s1878_s2 }
 0x14a   :  { %891 = vrot.lane.b32.xlu0 %v2060_v47, %s1878_s2 }
 0x14e   :  { %1249 = vrot.lane.b32.xlu0 %v2060_v47, %s1879_s13 }
 0x154   :  { %v2133_v0 = vpop.permute.xlu1 %515 }
 0x158   :  { %v2143_v3 = vpop.permute.xlu1 %531 }
 0x15c   :  { %v2147_v4 = vpop.permute.xlu1 %873 }
 0x160   :  { %v2155_v6 = vpop.permute.xlu1 %889 }
 0x164   :  { %v2161_v8 = vpop.permute.xlu1 %1231 }
 0x167   :  { %252 = vadd.xlane.f32.xlu1 %v251_v53 }
 0x168   :  { %v2165_v10 = vpop.permute.xlu1 %1247 }
 0x16b   :  { %276 = vadd.xlane.f32.xlu1 %v275_v54 }
 0x16d   :  { %273 = vadd.xlane.f32.xlu0 %v272_v55 }
 0x170   :  { %v2157_v7 = vpop.xlane.xlu0 %246 }
 0x174   :  { %v514_v9 = vpop.permute.xlu0 %513 }
 0x175   :  { %v561_v24 = vsel %vm241_vm1, %v514_v9, 0.0 }
 0x178   :  { %v530_v11 = vpop.permute.xlu0 %529 }
 0x179   :  { %v585_v33 = vsel %vm241_vm1, %v530_v11, 0.0 }
 0x17c   :  { %517 = vrot.lane.b32.xlu1 %v2067_v48, %s1877_s0  ;;  %v888_v14 = vpop.permute.xlu0 %887 }
 0x17d   :  { %v943_v39 = vsel %vm241_vm1, %v888_v14, 0.0 }
 0x180   :  { %1233 = vrot.lane.b32.xlu1 %v2067_v48, %s1879_s13  ;;  %v1230_v17 = vpop.permute.xlu0 %1229 }
 0x181   :  { %v1277_v42 = vsel %vm241_vm1, %v1230_v17, 0.0 }
 0x183   :  { %521 = vrot.lane.b32.xlu0 %v2088_v56, %s1877_s0 }
 0x184   :  { %v1246_v19 = vpop.permute.xlu0 %1245 }
 0x185   :  { %v1301_v49 = vsel %vm241_vm1, %v1246_v19, 0.0  ;;  %v263_v19 = vsel %vm241_vm1, %v2175_v20, 0.0 }
 0x187   :  { %537 = vrot.lane.b32.xlu0 %v2095_v57, %s1877_s0 }
 0x18b   :  { %879 = vrot.lane.b32.xlu0 %v2088_v56, %s1878_s2 }
 0x18f   :  { %895 = vrot.lane.b32.xlu0 %v2095_v57, %s1878_s2 }
 0x193   :  { %1237 = vrot.lane.b32.xlu0 %v2088_v56, %s1879_s13 }
 0x197   :  { %1253 = vrot.lane.b32.xlu0 %v2095_v57, %s1879_s13 }
 0x1a4   :  { %249 = vadd.xlane.f32.xlu1 %v248_v58 }
 0x1a7   :  { %v2169_v13 = vpop.xlane.xlu1 %270 }
 0x1ab   :  { %v872_v16 = vpop.permute.xlu1 %871 }
 0x1ac   :  { %v919_v38 = vsel %vm241_vm1, %v872_v16, 0.0 }
 0x1af   :  { %v520_v18 = vpop.permute.xlu1 %519 }
 0x1b0   :  { %v570_v52 = vsel %vm241_vm1, %v520_v18, 0.0 }
 0x1b3   :  { %v2177_v21 = vpop.permute.xlu1 %535 }
 0x1b5   :  { %523 = vrot.lane.b32.xlu1 %v2110_v59, %s1877_s0  ;;  %v2179_v22 = vpop.xlane.xlu0 %243 }
 0x1b6   :  { %255 = vadd.xlane.f32.xlu0 %v254_v60 }
 0x1b7   :  { %v878_v28 = vpop.permute.xlu1 %877 }
 0x1b8   :  { %v928_v54 = vsel %vm241_vm1, %v878_v28, 0.0 }
 0x1b9   :  { %539 = vrot.lane.b32.xlu1 %v2115_v61, %s1877_s0  ;;  %v2191_v29 = vpop.xlane.xlu0 %267 }
 0x1ba   :  { %279 = vadd.xlane.f32.xlu0 %v278_v62 }
 0x1bb   :  { %v2198_v31 = vpop.permute.xlu1 %893 }
 0x1bd   :  { %881 = vrot.lane.b32.xlu1 %v2110_v59, %s1878_s2  ;;  %v534_v32 = vpop.permute.xlu0 %533 }
 0x1be   :  { %v591_v9 = vsel %vm241_vm1, %v534_v32, 0.0 }
 0x1bf   :  { %v2203_v34 = vpop.permute.xlu1 %1235 }
 0x1c1   :  { %897 = vrot.lane.b32.xlu1 %v2115_v61, %s1878_s2  ;;  %v876_v35 = vpop.permute.xlu0 %875 }
 0x1c2   :  { %v925_v14 = vsel %vm241_vm1, %v876_v35, 0.0  ;;  %v564_v35 = vsel %vm241_vm1, %v2133_v0, 0.0 }
 0x1c3   :  { %v2211_v40 = vpop.permute.xlu1 %1251 }
 0x1c5   :  { %1239 = vrot.lane.b32.xlu1 %v2110_v59, %s1879_s13  ;;  %v892_v41 = vpop.permute.xlu0 %891 }
 0x1c6   :  { %v949_v16 = vsel %vm241_vm1, %v892_v41, 0.0  ;;  %v588_v41 = vsel %vm241_vm1, %v2143_v3, 0.0 }
 0x1c9   :  { %1255 = vrot.lane.b32.xlu1 %v2115_v61, %s1879_s13  ;;  %v1250_v45 = vpop.permute.xlu0 %1249 }
 0x1ca   :  { %v1307_v32 = vsel %vm241_vm1, %v1250_v45, 0.0  ;;  %v922_v45 = vsel %vm241_vm1, %v2147_v4, 0.0 }
 0x1d0   :  { %525 = vrot.lane.b32.xlu0 %v2136_v1, %s1877_s0 }
 0x1d4   :  { %541 = vrot.lane.b32.xlu0 %v2141_v2, %s1877_s0 }
 0x1d8   :  { %883 = vrot.lane.b32.xlu0 %v2136_v1, %s1878_s2 }
 0x1dc   :  { %899 = vrot.lane.b32.xlu0 %v2141_v2, %s1878_s2 }
 0x1e0   :  { %1241 = vrot.lane.b32.xlu0 %v2136_v1, %s1879_s13 }
 0x1e4   :  { %1257 = vrot.lane.b32.xlu0 %v2141_v2, %s1879_s13 }
 0x1ed   :  { %258 = vadd.xlane.f32.xlu1 %v257_v12 }
 0x1f1   :  { %282 = vadd.xlane.f32.xlu1 %v281_v15 }
 0x1f4   :  { %v2214_v43 = vpop.xlane.xlu1 %252 }
 0x1f8   :  { %v2217_v50 = vpop.xlane.xlu1 %276 }
 0x1fa   :  { %v2219_v51 = vpop.xlane.xlu0 %273 }
 0x1fc   :  { %v518_v55 = vpop.permute.xlu1 %517 }
 0x1fd   :  { %v567_v58 = vsel %vm241_vm1, %v518_v55, 0.0 }
 0x1fe   :  { %v522_v53 = vpop.permute.xlu0 %521 }
 0x200   :  { %v1234_v62 = vpop.permute.xlu1 %1233 }
 0x202   :  { %527 = vrot.lane.b32.xlu1 %v2175_v20, %s1877_s0  ;;  %v538_v60 = vpop.permute.xlu0 %537 }
 0x203   :  { %261 = vadd.xlane.f32.xlu0 %v260_v23  ;;  %v1283_v23 = vsel %vm241_vm1, %v1234_v62, 0.0  ;;  %v597_v0 = vsel %vm241_vm1, %v538_v60, 0.0  ;;  %v594_v62 = vsel %vm241_vm1, %v2177_v21, 0.0 }
 0x206   :  { %543 = vrot.lane.b32.xlu1 %v2185_v25, %s1877_s0  ;;  %v880_v11 = vpop.permute.xlu0 %879 }
 0x207   :  { %285 = vadd.xlane.f32.xlu0 %v284_v26  ;;  %v931_v3 = vsel %vm241_vm1, %v880_v11, 0.0  ;;  %v952_v11 = vsel %vm241_vm1, %v2198_v31, 0.0 }
 0x20a   :  { %885 = vrot.lane.b32.xlu1 %v2175_v20, %s1878_s2  ;;  %v896_v17 = vpop.permute.xlu0 %895 }
 0x20b   :  { %562 = vadd.xlane.f32.xlu0 %v561_v24  ;;  %v287_v24 = vsel %vm241_vm1, %v2185_v25, 0.0  ;;  %v955_v4 = vsel %vm241_vm1, %v896_v17, 0.0 }
 0x20e   :  { %901 = vrot.lane.b32.xlu1 %v2185_v25, %s1878_s2  ;;  %v1238_v26 = vpop.permute.xlu0 %1237 }
 0x20f   :  { %586 = vadd.xlane.f32.xlu0 %v585_v33  ;;  %v1289_v60 = vsel %vm241_vm1, %v1238_v26, 0.0 }
 0x212   :  { %1243 = vrot.lane.b32.xlu1 %v2175_v20, %s1879_s13 }
 0x213   :  { %920 = vadd.xlane.f32.xlu0 %v919_v38 }
 0x216   :  { %1259 = vrot.lane.b32.xlu1 %v2185_v25, %s1879_s13 }
 0x217   :  { %944 = vadd.xlane.f32.xlu0 %v943_v39  ;;  %v1254_v39 = vpop.permute.xlu0 %1253 }
 0x21b   :  { %1278 = vadd.xlane.f32.xlu0 %v1277_v42  ;;  %v573_v42 = vsel %vm241_vm1, %v522_v53, 0.0  ;;  %v1280_v53 = vsel %vm241_vm1, %v2161_v8, 0.0 }
 0x21f   :  { %1302 = vadd.xlane.f32.xlu0 %v1301_v49 }
 0x223   :  { %571 = vadd.xlane.f32.xlu0 %v570_v52 }
 0x227   :  { %929 = vadd.xlane.f32.xlu0 %v928_v54  ;;  %v946_v54 = vsel %vm241_vm1, %v2155_v6, 0.0 }
 0x22b   :  { %568 = vadd.xlane.f32.xlu0 %v567_v58  ;;  %v1304_v58 = vsel %vm241_vm1, %v2165_v10, 0.0 }
 0x22f   :  { %592 = vadd.xlane.f32.xlu0 %v591_v9  ;;  %v1313_v9 = vsel %vm241_vm1, %v1254_v39, 0.0  ;;  %v301_v39 = vmul.f32 0.125, %v2219_v51 }
 0x231   :  { %v2225_v12 = vpop.xlane.xlu1 %249 }
 0x233   :  { %926 = vadd.xlane.f32.xlu0 %v925_v14 }
 0x235   :  { %v2228_v15 = vpop.permute.xlu1 %523 }
 0x236   :  { %v576_v26 = vsel %vm241_vm1, %v2228_v15, 0.0 }
 0x237   :  { %950 = vadd.xlane.f32.xlu0 %v949_v16  ;;  %v1286_v16 = vsel %vm241_vm1, %v2203_v34, 0.0 }
 0x239   :  { %v2231_v18 = vpop.permute.xlu1 %539 }
 0x23a   :  { %264 = vadd.xlane.f32.xlu1 %v263_v19  ;;  %v1310_v19 = vsel %vm241_vm1, %v2211_v40, 0.0 }
 0x23b   :  { %1284 = vadd.xlane.f32.xlu0 %v1283_v23  ;;  %v291_v23 = vmul.f32 0.125, %v2179_v22  ;;  %v600_v22 = vsel %vm241_vm1, %v2231_v18, 0.0 }
 0x23d   :  { %v2236_v28 = vpop.permute.xlu1 %881  ;;  %v2280_v34 = vsub.f32 %v2020_v36, %v291_v23  ;;  %v292_v23 = vmul.f32 0.125, %v2157_v7 }
 0x23e   :  { %288 = vadd.xlane.f32.xlu1 %v287_v24 }
 0x23f   :  { %1308 = vadd.xlane.f32.xlu0 %v1307_v32  ;;  %v299_v32 = vmul.f32 0.125, %v2191_v29  ;;  %v323_v15 = vmul.f32 %v2280_v34, %v2280_v34  ;;  %v934_v29 = vsel %vm241_vm1, %v2236_v28, 0.0 }
 0x241   :  { %v898_v33 = vpop.permute.xlu1 %897  ;;  %v2287_v40 = vsub.f32 %v2025_v37, %v299_v32  ;;  %v339_v18 = vsel %vm241_vm1, %v323_v15, 0.0 }
 0x242   :  { %565 = vadd.xlane.f32.xlu1 %v564_v35  ;;  %v958_v38 = vsel %vm241_vm1, %v898_v33, 0.0  ;;  %v293_v35 = vmul.f32 0.125, %v2225_v12 }
 0x243   :  { %959 = vadd.xlane.f32.xlu0 %v958_v38  ;;  %v2247_v49 = vpop.xlane.xlu0 %255  ;;  %v331_v12 = vmul.f32 %v2287_v40, %v2287_v40 }
 0x245   :  { %v1240_v38 = vpop.permute.xlu1 %1239  ;;  %v363_v51 = vsel %vm241_vm1, %v331_v12, 0.0 }
 0x246   :  { %589 = vadd.xlane.f32.xlu1 %v588_v41  ;;  %v2296_v41 = vsub.f32 %v2067_v48, %v293_v35 }
 0x247   :  { %574 = vadd.xlane.f32.xlu0 %v573_v42  ;;  %v2252_v52 = vpop.xlane.xlu0 %279  ;;  %v1292_v42 = vsel %vm241_vm1, %v1240_v38, 0.0 }
 0x249   :  { %v1256_v28 = vpop.permute.xlu1 %1255 }
 0x24a   :  { %923 = vadd.xlane.f32.xlu1 %v922_v45  ;;  %v2303_v45 = vsub.f32 %v2060_v47, %v301_v39 }
 0x24b   :  { %598 = vadd.xlane.f32.xlu0 %v597_v0  ;;  %v526_v55 = vpop.permute.xlu0 %525  ;;  %v295_v0 = vmul.f32 0.125, %v2247_v49 }
 0x24c   :  { %v579_v8 = vsel %vm241_vm1, %v526_v55, 0.0 }
 0x24e   :  { %947 = vadd.xlane.f32.xlu1 %v946_v54  ;;  %v325_v54 = vmul.f32 %v2296_v41, %v2296_v41 }
 0x24f   :  { %932 = vadd.xlane.f32.xlu0 %v931_v3  ;;  %v542_v6 = vpop.permute.xlu0 %541  ;;  %v2310_v3 = vsub.f32 %v2088_v56, %v295_v0  ;;  %v1316_v0 = vsel %vm241_vm1, %v1256_v28, 0.0 }
 0x250   :  { %v603_v10 = vsel %vm241_vm1, %v542_v6, 0.0 }
 0x252   :  { %1281 = vadd.xlane.f32.xlu1 %v1280_v53  ;;  %v303_v53 = vmul.f32 0.125, %v2252_v52 }
 0x253   :  { %956 = vadd.xlane.f32.xlu0 %v955_v4  ;;  %v884_v14 = vpop.permute.xlu0 %883  ;;  %v345_v4 = vsel %vm241_vm1, %v325_v54, 0.0 }
 0x254   :  { %v937_v17 = vsel %vm241_vm1, %v884_v14, 0.0  ;;  %v2317_v49 = vsub.f32 %v2095_v57, %v303_v53 }
 0x256   :  { %1305 = vadd.xlane.f32.xlu1 %v1304_v58  ;;  %v333_v58 = vmul.f32 %v2303_v45, %v2303_v45 }
 0x257   :  { %1290 = vadd.xlane.f32.xlu0 %v1289_v60  ;;  %v900_v21 = vpop.permute.xlu0 %899 }
 0x258   :  { %v961_v31 = vsel %vm241_vm1, %v900_v21, 0.0  ;;  %v369_v6 = vsel %vm241_vm1, %v333_v58, 0.0 }
 0x25a   :  { %595 = vadd.xlane.f32.xlu1 %v594_v62  ;;  %v327_v62 = vmul.f32 %v2310_v3, %v2310_v3 }
 0x25b   :  { %1314 = vadd.xlane.f32.xlu0 %v1313_v9  ;;  %v1242_v24 = vpop.permute.xlu0 %1241 }
 0x25c   :  { %v1295_v33 = vsel %vm241_vm1, %v1242_v24, 0.0  ;;  %v351_v52 = vsel %vm241_vm1, %v327_v62, 0.0 }
 0x25e   :  { %953 = vadd.xlane.f32.xlu1 %v952_v11 }
 0x25f   :  { %580 = vadd.xlane.f32.xlu0 %v579_v8  ;;  %v335_v8 = vmul.f32 %v2317_v49, %v2317_v49 }
 0x262   :  { %1287 = vadd.xlane.f32.xlu1 %v1286_v16 }
 0x263   :  { %604 = vadd.xlane.f32.xlu0 %v603_v10  ;;  %v375_v10 = vsel %vm241_vm1, %v335_v8, 0.0 }
 0x266   :  { %1311 = vadd.xlane.f32.xlu1 %v1310_v19  ;;  %v1258_v19 = vpop.permute.xlu0 %1257 }
 0x267   :  { %938 = vadd.xlane.f32.xlu0 %v937_v17 }
 0x26a   :  { %577 = vadd.xlane.f32.xlu1 %v576_v26 }
 0x26b   :  { %962 = vadd.xlane.f32.xlu0 %v961_v31 }
 0x26e   :  { %601 = vadd.xlane.f32.xlu1 %v600_v22  ;;  %v300_v22 = vmul.f32 0.125, %v2169_v13  ;;  %v294_v13 = vmul.f32 0.125, %v2214_v43  ;;  %v302_v43 = vmul.f32 0.125, %v2217_v50 }
 0x26f   :  { %1296 = vadd.xlane.f32.xlu0 %v1295_v33  ;;  %v2332_v33 = vsub.f32 %v2000_v27, %v292_v23 }
 0x270   :  { %v2357_v58 = vsub.f32 %v2040_v44, %v294_v13 }
 0x271   :  { %v324_v12 = vmul.f32 %v2332_v33, %v2332_v33 }
 0x272   :  { %935 = vadd.xlane.f32.xlu1 %v934_v29 }
 0x273   :  { %340 = vadd.xlane.f32.xlu0 %v339_v18  ;;  %v2342_v18 = vsub.f32 %v2003_v30, %v300_v22 }
 0x276   :  { %1293 = vadd.xlane.f32.xlu1 %v1292_v42 }
 0x277   :  { %364 = vadd.xlane.f32.xlu0 %v363_v51 }
 0x27a   :  { %v259_v55 = vpop.xlane.xlu1 %258 }
 0x27b   :  { %346 = vadd.xlane.f32.xlu0 %v345_v4  ;;  %v332_v4 = vmul.f32 %v2342_v18, %v2342_v18  ;;  %v296_v8 = vmul.f32 0.125, %v259_v55 }
 0x27e   :  { %v283_v60 = vpop.xlane.xlu1 %282 }
 0x27f   :  { %370 = vadd.xlane.f32.xlu0 %v369_v6  ;;  %v342_v6 = vsel %vm241_vm1, %v324_v12, 0.0 }
 0x282   :  { %v528_v9 = vpop.permute.xlu1 %527 }
 0x283   :  { %352 = vadd.xlane.f32.xlu0 %v351_v52  ;;  %v582_v11 = vsel %vm241_vm1, %v528_v9, 0.0  ;;  %v366_v9 = vsel %vm241_vm1, %v332_v4, 0.0  ;;  %v2364_v52 = vsub.f32 %v2047_v46, %v302_v43 }
 0x284   :  { %583 = vadd.xlane.f32.xlu1 %v582_v11  ;;  %v1319_v11 = vsel %vm241_vm1, %v1258_v19, 0.0 }
 0x286   :  { %v544_v14 = vpop.permute.xlu1 %543 }
 0x287   :  { %376 = vadd.xlane.f32.xlu0 %v375_v10  ;;  %v606_v16 = vsel %vm241_vm1, %v544_v14, 0.0  ;;  %v326_v14 = vmul.f32 %v2357_v58, %v2357_v58  ;;  %v2370_v10 = vsub.f32 %v2110_v59, %v296_v8 }
 0x288   :  { %607 = vadd.xlane.f32.xlu1 %v606_v16  ;;  %v304_v16 = vmul.f32 0.125, %v283_v60 }
 0x28a   :  { %v886_v21 = vpop.permute.xlu1 %885  ;;  %v2376_v55 = vsub.f32 %v2115_v61, %v304_v16 }
 0x28b   :  { %v940_v17 = vsel %vm241_vm1, %v886_v21, 0.0  ;;  %v348_v21 = vsel %vm241_vm1, %v326_v14, 0.0 }
 0x28c   :  { %941 = vadd.xlane.f32.xlu1 %v940_v17  ;;  %v334_v17 = vmul.f32 %v2364_v52, %v2364_v52  ;;  %v336_v60 = vmul.f32 %v2376_v55, %v2376_v55 }
 0x28e   :  { %v902_v31 = vpop.permute.xlu1 %901  ;;  %v372_v19 = vsel %vm241_vm1, %v334_v17, 0.0 }
 0x28f   :  { %v964_v26 = vsel %vm241_vm1, %v902_v31, 0.0  ;;  %v328_v31 = vmul.f32 %v2370_v10, %v2370_v10 }
 0x290   :  { %965 = vadd.xlane.f32.xlu1 %v964_v26  ;;  %v262_v24 = vpop.xlane.xlu0 %261 }
 0x291   :  { %v297_v32 = vmul.f32 0.125, %v262_v24  ;;  %v354_v24 = vsel %vm241_vm1, %v328_v31, 0.0 }
 0x292   :  { %v1244_v35 = vpop.permute.xlu1 %1243 }
 0x293   :  { %v2336_v15 = vsub.f32 %v2136_v1, %v297_v32  ;;  %v1298_v38 = vsel %vm241_vm1, %v1244_v35, 0.0  ;;  %v378_v35 = vsel %vm241_vm1, %v336_v60, 0.0 }
 0x294   :  { %1299 = vadd.xlane.f32.xlu1 %v1298_v38  ;;  %v286_v29 = vpop.xlane.xlu0 %285 }
 0x295   :  { %v305_v7 = vmul.f32 0.125, %v286_v29  ;;  %v329_v39 = vmul.f32 %v2336_v15, %v2336_v15 }
 0x297   :  { %v2348_v42 = vsub.f32 %v2141_v2, %v305_v7  ;;  %v357_v51 = vsel %vm241_vm1, %v329_v39, 0.0 }
 0x298   :  { %1317 = vadd.xlane.f32.xlu1 %v1316_v0  ;;  %358 = vadd.xlane.f32.xlu0 %v357_v51  ;;  %v563_v54 = vpop.xlane.xlu0 %562 }
 0x299   :  { %v337_v53 = vmul.f32 %v2348_v42, %v2348_v42  ;;  %v609_v32 = vmul.f32 0.125, %v563_v54 }
 0x29b   :  { %v381_v28 = vsel %vm241_vm1, %v337_v53, 0.0  ;;  %v2388_v38 = vsub.f32 %v2020_v36, %v609_v32 }
 0x29c   :  { %343 = vadd.xlane.f32.xlu1 %v342_v6  ;;  %382 = vadd.xlane.f32.xlu0 %v381_v28  ;;  %v587_v62 = vpop.xlane.xlu0 %586 }
 0x29d   :  { %v617_v29 = vmul.f32 0.125, %v587_v62  ;;  %v641_v39 = vmul.f32 %v2388_v38, %v2388_v38 }
 0x29f   :  { %v2395_v12 = vsub.f32 %v2025_v37, %v617_v29 }
 0x2a0   :  { %367 = vadd.xlane.f32.xlu1 %v366_v9  ;;  %1320 = vadd.xlane.f32.xlu0 %v1319_v11  ;;  %v921_v50 = vpop.xlane.xlu0 %920 }
 0x2a1   :  { %v967_v13 = vmul.f32 0.125, %v921_v50  ;;  %v649_v51 = vmul.f32 %v2395_v12, %v2395_v12  ;;  %v1260_v50 = vpop.permute.xlu1 %1259 }
 0x2a3   :  { %v2403_v54 = vsub.f32 %v2020_v36, %v967_v13 }
 0x2a4   :  { %349 = vadd.xlane.f32.xlu1 %v348_v21  ;;  %v945_v23 = vpop.xlane.xlu0 %944 }
 0x2a5   :  { %3354 = vst [vmem:[#allocation2_spill] sm:$0xff] %v2403_v54  ;;  %v975_v53 = vmul.f32 0.125, %v945_v23  ;;  %v999_v43 = vmul.f32 %v2403_v54, %v2403_v54 }
 0x2a7   :  { %v2411_v6 = vsub.f32 %v2025_v37, %v975_v53 }
 0x2a8   :  { %373 = vadd.xlane.f32.xlu1 %v372_v19  ;;  %v1279_v26 = vpop.xlane.xlu0 %1278 }
 0x2a9   :  { %3355 = vst [vmem:[#allocation3_spill] sm:$0xff] %v2411_v6  ;;  %v1325_v28 = vmul.f32 0.125, %v1279_v26  ;;  %v1007_v9 = vmul.f32 %v2411_v6, %v2411_v6 }
 0x2ab   :  { %v2417_v8 = vsub.f32 %v2020_v36, %v1325_v28 }
 0x2ac   :  { %355 = vadd.xlane.f32.xlu1 %v354_v24  ;;  %v2384_v22 = vpop.xlane.xlu0 %1302 }
 0x2ad   :  { %3356 = vst [vmem:[#allocation4_spill] sm:$0xff] %v2417_v8  ;;  %v1357_v16 = vmul.f32 %v2417_v8, %v2417_v8 }
 0x2b0   :  { %379 = vadd.xlane.f32.xlu1 %v378_v35  ;;  %v2390_v7 = vpop.xlane.xlu0 %571 }
 0x2b4   :  { %v2397_v0 = vpop.xlane.xlu0 %929 }
 0x2b6   :  { %673 = vrot.lane.b32.xlu0 %v641_v39, %s1877_s0 }
 0x2b8   :  { %v2405_v4 = vpop.xlane.xlu0 %568 }
 0x2ba   :  { %689 = vrot.lane.b32.xlu0 %v649_v51, %s1877_s0 }
 0x2bc   :  { %v593_v62 = vpop.xlane.xlu0 %592 }
 0x2bd   :  { %v619_v11 = vmul.f32 0.125, %v593_v62 }
 0x2be   :  { %1031 = vrot.lane.b32.xlu0 %v999_v43, %s1878_s2 }
 0x2bf   :  { %v2425_v21 = vsub.f32 %v2060_v47, %v619_v11 }
 0x2c0   :  { %v2419_v14 = vpop.xlane.xlu0 %926 }
 0x2c1   :  { %3357 = vst [vmem:[#allocation5_spill] sm:$0xff] %v2425_v21  ;;  %v651_v36 = vmul.f32 %v2425_v21, %v2425_v21 }
 0x2c2   :  { %1047 = vrot.lane.b32.xlu0 %v1007_v9, %s1878_s2 }
 0x2c4   :  { %v951_v17 = vpop.xlane.xlu0 %950 }
 0x2c5   :  { %v977_v23 = vmul.f32 0.125, %v951_v17 }
 0x2c6   :  { %1389 = vrot.lane.b32.xlu0 %v1357_v16, %s1879_s13 }
 0x2c7   :  { %v265_v19 = vpop.xlane.xlu1 %264  ;;  %v2431_v31 = vsub.f32 %v2060_v47, %v977_v23 }
 0x2c8   :  { %v298_v26 = vmul.f32 0.125, %v265_v19  ;;  %v1285_v24 = vpop.xlane.xlu0 %1284 }
 0x2c9   :  { %3358 = vst [vmem:[#allocation6_spill] sm:$0xff] %v2431_v31  ;;  %v1327_v60 = vmul.f32 0.125, %v1285_v24  ;;  %v1009_v29 = vmul.f32 %v2431_v31, %v2431_v31 }
 0x2ca   :  { %v2434_v32 = vsub.f32 %v2175_v20, %v298_v26  ;;  %693 = vrot.lane.b32.xlu0 %v651_v36, %s1877_s0  ;;  %v1322_v26 = vsel %vm241_vm1, %v1260_v50, 0.0 }
 0x2cb   :  { %v289_v35 = vpop.xlane.xlu1 %288  ;;  %v2440_v39 = vsub.f32 %v2067_v48, %v1327_v60 }
 0x2cc   :  { %v306_v13 = vmul.f32 0.125, %v289_v35  ;;  %v2442_v51 = vpop.xlane.xlu0 %1308  ;;  %v330_v53 = vmul.f32 %v2434_v32, %v2434_v32 }
 0x2cd   :  { %3359 = vst [vmem:[#allocation7_spill] sm:$0xff] %v2440_v39  ;;  %v1359_v9 = vmul.f32 %v2440_v39, %v2440_v39 }
 0x2ce   :  { %v2447_v43 = vsub.f32 %v2185_v25, %v306_v13  ;;  %1051 = vrot.lane.b32.xlu0 %v1009_v29, %s1878_s2  ;;  %v360_v28 = vsel %vm241_vm1, %v330_v53, 0.0 }
 0x2cf   :  { %361 = vadd.xlane.f32.xlu1 %v360_v28  ;;  %v566_v62 = vpop.xlane.xlu1 %565 }
 0x2d0   :  { %v2453_v11 = vpop.xlane.xlu0 %959  ;;  %v338_v16 = vmul.f32 %v2447_v43, %v2447_v43 }
 0x2d2   :  { %1393 = vrot.lane.b32.xlu0 %v1359_v9, %s1879_s13  ;;  %v384_v17 = vsel %vm241_vm1, %v338_v16, 0.0 }
 0x2d3   :  { %385 = vadd.xlane.f32.xlu1 %v384_v17  ;;  %v590_v23 = vpop.xlane.xlu1 %589  ;;  %v610_v17 = vmul.f32 0.125, %v566_v62 }
 0x2d4   :  { %v575_v19 = vpop.xlane.xlu0 %574 }
 0x2d5   :  { %v613_v36 = vmul.f32 0.125, %v575_v19  ;;  %v2478_v39 = vsub.f32 %v2000_v27, %v610_v17 }
 0x2d7   :  { %v2461_v24 = vsub.f32 %v2088_v56, %v613_v36  ;;  %1323 = vadd.xlane.f32.xlu1 %v1322_v26  ;;  %v924_v60 = vpop.xlane.xlu1 %923  ;;  %3363 = vst [vmem:[#allocation11_spill] sm:$0xff] %v2478_v39 }
 0x2d8   :  { %v599_v35 = vpop.xlane.xlu0 %598 }
 0x2d9   :  { %3360 = vst [vmem:[#allocation8_spill] sm:$0xff] %v2461_v24  ;;  %v645_v29 = vmul.f32 %v2461_v24, %v2461_v24  ;;  %v621_v13 = vmul.f32 0.125, %v599_v35 }
 0x2db   :  { %v2466_v53 = vsub.f32 %v2095_v57, %v621_v13  ;;  %v948_v28 = vpop.xlane.xlu1 %947  ;;  %681 = vrot.lane.b32.xlu0 %v645_v29, %s1877_s0  ;;  %v618_v29 = vmul.f32 0.125, %v590_v23  ;;  %v968_v23 = vmul.f32 0.125, %v924_v60 }
 0x2dc   :  { %v933_v9 = vpop.xlane.xlu0 %932 }
 0x2dd   :  { %3361 = vst [vmem:[#allocation9_spill] sm:$0xff] %v2466_v53  ;;  %v653_v50 = vmul.f32 %v2466_v53, %v2466_v53  ;;  %v971_v16 = vmul.f32 0.125, %v933_v9  ;;  %v2492_v17 = vsub.f32 %v2003_v30, %v618_v29  ;;  %v2507_v60 = vsub.f32 %v2000_v27, %v968_v23 }
 0x2df   :  { %v2472_v19 = vsub.f32 %v2088_v56, %v971_v16  ;;  %v1282_v36 = vpop.xlane.xlu1 %1281  ;;  %697 = vrot.lane.b32.xlu0 %v653_v50, %s1877_s0  ;;  %v1333_v16 = vmul.f32 0.125, %v2384_v22  ;;  %3365 = vst [vmem:[#allocation13_spill] sm:$0xff] %v2492_v17  ;;  %v650_v29 = vmul.f32 %v2492_v17, %v2492_v17  ;;  %3368 = vst [vmem:[#allocation16_spill] sm:$0xff] %v2507_v60 }
 0x2e0   :  { %v957_v26 = vpop.xlane.xlu0 %956 }
 0x2e1   :  { %3362 = vst [vmem:[#allocation10_spill] sm:$0xff] %v2472_v19  ;;  %v1003_v35 = vmul.f32 %v2472_v19, %v2472_v19  ;;  %v979_v13 = vmul.f32 0.125, %v957_v26  ;;  %v642_v26 = vmul.f32 %v2478_v39, %v2478_v39  ;;  %v2500_v6 = vsub.f32 %v2025_v37, %v1333_v16 }
 0x2e2   :  { %v1000_v16 = vmul.f32 %v2507_v60, %v2507_v60 }
 0x2e3   :  { %v2481_v8 = vsub.f32 %v2095_v57, %v979_v13  ;;  %v2483_v9 = vpop.xlane.xlu1 %1305  ;;  %1039 = vrot.lane.b32.xlu0 %v1003_v35, %s1878_s2  ;;  %3367 = vst [vmem:[#allocation15_spill] sm:$0xff] %v2500_v6 }
 0x2e4   :  { %v1291_v62 = vpop.xlane.xlu0 %1290 }
 0x2e5   :  { %3364 = vst [vmem:[#allocation12_spill] sm:$0xff] %v2481_v8  ;;  %v1011_v50 = vmul.f32 %v2481_v8, %v2481_v8  ;;  %v1329_v31 = vmul.f32 0.125, %v1291_v62 }
 0x2e7   :  { %v2495_v13 = vsub.f32 %v2088_v56, %v1329_v31  ;;  %1055 = vrot.lane.b32.xlu0 %v1011_v50, %s1878_s2  ;;  %v596_v35 = vpop.xlane.xlu1 %595  ;;  %v976_v56 = vmul.f32 0.125, %v948_v28  ;;  %v1365_v50 = vmul.f32 %v2500_v6, %v2500_v6 }
 0x2e8   :  { %675 = vrot.lane.b32.xlu1 %v642_v26, %s1877_s0  ;;  %v1315_v22 = vpop.xlane.xlu0 %1314 }
 0x2e9   :  { %3366 = vst [vmem:[#allocation14_spill] sm:$0xff] %v2495_v13  ;;  %v1361_v62 = vmul.f32 %v2495_v13, %v2495_v13  ;;  %v2516_v26 = vsub.f32 %v2003_v30, %v976_v56  ;;  %v1326_v13 = vmul.f32 0.125, %v1282_v36 }
 0x2eb   :  { %1397 = vrot.lane.b32.xlu0 %v1361_v62, %s1879_s13  ;;  %3369 = vst [vmem:[#allocation17_spill] sm:$0xff] %v2516_v26  ;;  %v954_v8 = vpop.xlane.xlu1 %953  ;;  %v1008_v56 = vmul.f32 %v2516_v26, %v2516_v26  ;;  %v2529_v36 = vsub.f32 %v2000_v27, %v1326_v13  ;;  %v620_v13 = vmul.f32 0.125, %v596_v35 }
 0x2ec   :  { %691 = vrot.lane.b32.xlu1 %v650_v29, %s1877_s0  ;;  %v581_v31 = vpop.xlane.xlu0 %580  ;;  %v978_v19 = vmul.f32 0.125, %v954_v8 }
 0x2ed   :  { %v615_v37 = vmul.f32 0.125, %v581_v31  ;;  %v612_v31 = vmul.f32 0.125, %v2390_v7  ;;  %3371 = vst [vmem:[#allocation19_spill] sm:$0xff] %v2529_v36  ;;  %v1358_v27 = vmul.f32 %v2529_v36, %v2529_v36  ;;  %v2554_v36 = vsub.f32 %v2047_v46, %v620_v13 }
 0x2ee   :  { %v2584_v8 = vsub.f32 %v2047_v46, %v978_v19 }
 0x2ef   :  { %v2519_v23 = vsub.f32 %v2136_v1, %v615_v37  ;;  %1405 = vrot.lane.b32.xlu0 %v1365_v50, %s1879_s13  ;;  %v1288_v50 = vpop.xlane.xlu1 %1287  ;;  %v2539_v7 = vsub.f32 %v2040_v44, %v612_v31  ;;  %3374 = vst [vmem:[#allocation22_spill] sm:$0xff] %v2554_v36  ;;  %v652_v13 = vmul.f32 %v2554_v36, %v2554_v36 }
 0x2f0   :  { %1033 = vrot.lane.b32.xlu1 %v1000_v16, %s1878_s2  ;;  %v605_v28 = vpop.xlane.xlu0 %604  ;;  %3379 = vst [vmem:[#allocation27_spill] sm:$0xff] %v2584_v8 }
 0x2f1   :  { %3370 = vst [vmem:[#allocation18_spill] sm:$0xff] %v2519_v23  ;;  %v647_v62 = vmul.f32 %v2519_v23, %v2519_v23  ;;  %v623_v29 = vmul.f32 0.125, %v605_v28  ;;  %v644_v31 = vmul.f32 %v2539_v7, %v2539_v7 }
 0x2f3   :  { %v2532_v37 = vsub.f32 %v2141_v2, %v623_v29  ;;  %685 = vrot.lane.b32.xlu0 %v647_v62, %s1877_s0  ;;  %v2556_v35 = vpop.xlane.xlu1 %1311 }
 0x2f4   :  { %1049 = vrot.lane.b32.xlu1 %v1008_v56, %s1878_s2  ;;  %v939_v16 = vpop.xlane.xlu0 %938 }
 0x2f5   :  { %3372 = vst [vmem:[#allocation20_spill] sm:$0xff] %v2532_v37  ;;  %v655_v28 = vmul.f32 %v2532_v37, %v2532_v37  ;;  %v973_v6 = vmul.f32 0.125, %v939_v16  ;;  %v970_v16 = vmul.f32 0.125, %v2397_v0 }
 0x2f7   :  { %v2544_v29 = vsub.f32 %v2136_v1, %v973_v6  ;;  %701 = vrot.lane.b32.xlu0 %v655_v28, %s1877_s0  ;;  %v2567_v0 = vsub.f32 %v2040_v44, %v970_v16 }
 0x2f8   :  { %1391 = vrot.lane.b32.xlu1 %v1358_v27, %s1879_s13  ;;  %v963_v62 = vpop.xlane.xlu0 %962  ;;  %v1335_v27 = vmul.f32 0.125, %v2442_v51 }
 0x2f9   :  { %3373 = vst [vmem:[#allocation21_spill] sm:$0xff] %v2544_v29  ;;  %v1005_v56 = vmul.f32 %v2544_v29, %v2544_v29  ;;  %v981_v26 = vmul.f32 0.125, %v963_v62  ;;  %3376 = vst [vmem:[#allocation24_spill] sm:$0xff] %v2567_v0 }
 0x2fa   :  { %v2577_v51 = vsub.f32 %v2060_v47, %v1335_v27  ;;  %v611_v27 = vmul.f32 0.125, %v2405_v4  ;;  %v969_v4 = vmul.f32 0.125, %v2419_v14 }
 0x2fb   :  { %v2559_v6 = vsub.f32 %v2141_v2, %v981_v26  ;;  %1043 = vrot.lane.b32.xlu0 %v1005_v56, %s1878_s2  ;;  %v578_v56 = vpop.xlane.xlu1 %577 }
 0x2fc   :  { %679 = vrot.lane.b32.xlu1 %v644_v31, %s1877_s0  ;;  %v1297_v28 = vpop.xlane.xlu0 %1296  ;;  %3378 = vst [vmem:[#allocation26_spill] sm:$0xff] %v2577_v51  ;;  %v1337_v31 = vmul.f32 0.125, %v1315_v22  ;;  %v1367_v47 = vmul.f32 %v2577_v51, %v2577_v51  ;;  %v980_v51 = vmul.f32 0.125, %v2453_v11 }
 0x2fd   :  { %3375 = vst [vmem:[#allocation23_spill] sm:$0xff] %v2559_v6  ;;  %v1013_v62 = vmul.f32 %v2559_v6, %v2559_v6  ;;  %v1331_v29 = vmul.f32 0.125, %v1297_v28  ;;  %v1002_v28 = vmul.f32 %v2567_v0, %v2567_v0 }
 0x2fe   :  { %v2593_v22 = vsub.f32 %v2095_v57, %v1337_v31  ;;  %v2608_v57 = vsub.f32 %v2067_v48, %v611_v27 }
 0x2ff   :  { %v2572_v26 = vsub.f32 %v2136_v1, %v1331_v29  ;;  %1059 = vrot.lane.b32.xlu0 %v1013_v62, %s1878_s2  ;;  %v1328_v1 = vmul.f32 0.125, %v1288_v50  ;;  %v1010_v62 = vmul.f32 %v2584_v8, %v2584_v8  ;;  %v602_v50 = vpop.xlane.xlu1 %601 }
 0x300   :  { %695 = vrot.lane.b32.xlu1 %v652_v13, %s1877_s0  ;;  %v2586_v29 = vpop.xlane.xlu0 %340  ;;  %3380 = vst [vmem:[#allocation28_spill] sm:$0xff] %v2593_v22  ;;  %v1369_v13 = vmul.f32 %v2593_v22, %v2593_v22  ;;  %3382 = vst [vmem:[#allocation30_spill] sm:$0xff] %v2608_v57 }
 0x301   :  { %3377 = vst [vmem:[#allocation25_spill] sm:$0xff] %v2572_v26  ;;  %v1363_v16 = vmul.f32 %v2572_v26, %v2572_v26  ;;  %v2599_v19 = vsub.f32 %v2040_v44, %v1328_v1  ;;  %v2618_v1 = vsub.f32 %v2067_v48, %v969_v4 }
 0x303   :  { %1401 = vrot.lane.b32.xlu0 %v1363_v16, %s1879_s13  ;;  %3381 = vst [vmem:[#allocation29_spill] sm:$0xff] %v2599_v19  ;;  %v1360_v31 = vmul.f32 %v2599_v19, %v2599_v19  ;;  %v936_v44 = vpop.xlane.xlu1 %935  ;;  %3383 = vst [vmem:[#allocation31_spill] sm:$0xff] %v2618_v1  ;;  %v1001_v14 = vmul.f32 %v2618_v1, %v2618_v1 }
 0x304   :  { %1037 = vrot.lane.b32.xlu1 %v1002_v28, %s1878_s2  ;;  %v2605_v16 = vpop.xlane.xlu0 %364  ;;  %v643_v28 = vmul.f32 %v2608_v57, %v2608_v57  ;;  %v972_v4 = vmul.f32 0.125, %v936_v44 }
 0x307   :  { %1409 = vrot.lane.b32.xlu0 %v1367_v47, %s1879_s13  ;;  %v614_v47 = vmul.f32 0.125, %v578_v56  ;;  %v1294_v22 = vpop.xlane.xlu1 %1293 }
 0x308   :  { %1053 = vrot.lane.b32.xlu1 %v1010_v62, %s1878_s2  ;;  %v2620_v62 = vpop.xlane.xlu0 %346 }
 0x309   :  { %v2626_v27 = vsub.f32 %v2110_v59, %v614_v47  ;;  %v2641_v47 = vsub.f32 %v2110_v59, %v972_v4 }
 0x30b   :  { %1413 = vrot.lane.b32.xlu0 %v1369_v13, %s1879_s13  ;;  %3384 = vst [vmem:[#allocation32_spill] sm:$0xff] %v2626_v27  ;;  %v622_v13 = vmul.f32 0.125, %v602_v50  ;;  %v646_v48 = vmul.f32 %v2626_v27, %v2626_v27  ;;  %3386 = vst [vmem:[#allocation34_spill] sm:$0xff] %v2641_v47  ;;  %v1004_v44 = vmul.f32 %v2641_v47, %v2641_v47 }
 0x30c   :  { %1395 = vrot.lane.b32.xlu1 %v1360_v31, %s1879_s13  ;;  %v2629_v31 = vpop.xlane.xlu0 %370 }
 0x30d   :  { %v2634_v56 = vsub.f32 %v2115_v61, %v622_v13  ;;  %v2647_v13 = vsub.f32 %v2115_v61, %v980_v51 }
 0x30f   :  { %3385 = vst [vmem:[#allocation33_spill] sm:$0xff] %v2634_v56  ;;  %v654_v50 = vmul.f32 %v2634_v56, %v2634_v56  ;;  %3387 = vst [vmem:[#allocation35_spill] sm:$0xff] %v2647_v13  ;;  %v1012_v4 = vmul.f32 %v2647_v13, %v2647_v13 }
 0x310   :  { %677 = vrot.lane.b32.xlu1 %v643_v28, %s1877_s0 }
 0x311   :  { %v584_v28 = vpop.xlane.xlu1 %583 }
 0x312   :  { %v616_v6 = vmul.f32 0.125, %v584_v28 }
 0x314   :  { %1035 = vrot.lane.b32.xlu1 %v1001_v14, %s1878_s2  ;;  %v2643_v14 = vpop.xlane.xlu0 %352 }
 0x315   :  { %v608_v26 = vpop.xlane.xlu1 %607 }
 0x318   :  { %683 = vrot.lane.b32.xlu1 %v646_v48, %s1877_s0  ;;  %v1330_v48 = vmul.f32 0.125, %v1294_v22  ;;  %v2652_v11 = vpop.xlane.xlu0 %376  ;;  %v2665_v22 = vsub.f32 %v2175_v20, %v616_v6 }
 0x319   :  { %v942_v8 = vpop.xlane.xlu1 %941 }
 0x31a   :  { %v2657_v19 = vsub.f32 %v2110_v59, %v1330_v48  ;;  %3389 = vst [vmem:[#allocation37_spill] sm:$0xff] %v2665_v22  ;;  %v648_v59 = vmul.f32 %v2665_v22, %v2665_v22  ;;  %v974_v48 = vmul.f32 0.125, %v942_v8 }
 0x31c   :  { %699 = vrot.lane.b32.xlu1 %v654_v50, %s1877_s0  ;;  %3388 = vst [vmem:[#allocation36_spill] sm:$0xff] %v2657_v19  ;;  %v1362_v50 = vmul.f32 %v2657_v19, %v2657_v19 }
 0x31d   :  { %v966_v47 = vpop.xlane.xlu1 %965 }
 0x31e   :  { %v982_v19 = vmul.f32 0.125, %v966_v47 }
 0x320   :  { %1041 = vrot.lane.b32.xlu1 %v1004_v44, %s1878_s2  ;;  %v624_v44 = vmul.f32 0.125, %v608_v26  ;;  %v2679_v26 = vsub.f32 %v2175_v20, %v974_v48 }
 0x322   :  { %v2673_v28 = vsub.f32 %v2185_v25, %v624_v44  ;;  %3391 = vst [vmem:[#allocation39_spill] sm:$0xff] %v2679_v26  ;;  %v1006_v8 = vmul.f32 %v2679_v26, %v2679_v26  ;;  %v2688_v44 = vsub.f32 %v2185_v25, %v982_v19 }
 0x324   :  { %1057 = vrot.lane.b32.xlu1 %v1012_v4, %s1878_s2  ;;  %3390 = vst [vmem:[#allocation38_spill] sm:$0xff] %v2673_v28  ;;  %v656_v6 = vmul.f32 %v2673_v28, %v2673_v28  ;;  %3393 = vst [vmem:[#allocation41_spill] sm:$0xff] %v2688_v44 }
 0x325   :  { %v2660_v51 = vpop.xlane.xlu0 %358 }
 0x328   :  { %1399 = vrot.lane.b32.xlu1 %v1362_v50, %s1879_s13  ;;  %v1300_v50 = vpop.xlane.xlu1 %1299 }
 0x329   :  { %v2668_v13 = vpop.xlane.xlu0 %382 }
 0x32c   :  { %687 = vrot.lane.b32.xlu1 %v648_v59, %s1877_s0  ;;  %v1332_v59 = vmul.f32 0.125, %v1300_v50  ;;  %v1318_v48 = vpop.xlane.xlu1 %1317 }
 0x32d   :  { %v1321_v4 = vpop.xlane.xlu0 %1320 }
 0x32e   :  { %v1339_v37 = vmul.f32 0.125, %v1321_v4  ;;  %v2698_v47 = vsub.f32 %v2175_v20, %v1332_v59  ;;  %v1336_v4 = vmul.f32 0.125, %v2556_v35 }
 0x330   :  { %v2682_v23 = vsub.f32 %v2141_v2, %v1339_v37  ;;  %703 = vrot.lane.b32.xlu1 %v656_v6, %s1877_s0  ;;  %v1334_v2 = vmul.f32 0.125, %v2483_v9  ;;  %v1014_v37 = vmul.f32 %v2688_v44, %v2688_v44  ;;  %3394 = vst [vmem:[#allocation42_spill] sm:$0xff] %v2698_v47  ;;  %v1364_v6 = vmul.f32 %v2698_v47, %v2698_v47  ;;  %v2707_v50 = vpop.xlane.xlu1 %343 }
 0x331   :  { %v2713_v20 = vsub.f32 %v2047_v46, %v1336_v4  ;;  %v674_v46 = vpop.permute.xlu0 %673 }
 0x332   :  { %3392 = vst [vmem:[#allocation40_spill] sm:$0xff] %v2682_v23  ;;  %v1371_v28 = vmul.f32 %v2682_v23, %v2682_v23  ;;  %v2702_v19 = vsub.f32 %v2003_v30, %v1334_v2  ;;  %v721_v4 = vsel %vm241_vm1, %v674_v46, 0.0 }
 0x333   :  { %3396 = vst [vmem:[#allocation44_spill] sm:$0xff] %v2713_v20  ;;  %v1368_v30 = vmul.f32 %v2713_v20, %v2713_v20 }
 0x334   :  { %1045 = vrot.lane.b32.xlu1 %v1006_v8, %s1878_s2  ;;  %1417 = vrot.lane.b32.xlu0 %v1371_v28, %s1879_s13  ;;  %3395 = vst [vmem:[#allocation43_spill] sm:$0xff] %v2702_v19  ;;  %v1366_v9 = vmul.f32 %v2702_v19, %v2702_v19  ;;  %v1338_v28 = vmul.f32 0.125, %v1318_v48  ;;  %v2715_v8 = vpop.xlane.xlu1 %367 }
 0x336   :  { %v2721_v35 = vsub.f32 %v2115_v61, %v1338_v28 }
 0x338   :  { %1061 = vrot.lane.b32.xlu1 %v1014_v37, %s1878_s2  ;;  %3397 = vst [vmem:[#allocation45_spill] sm:$0xff] %v2721_v35  ;;  %v1370_v59 = vmul.f32 %v2721_v35, %v2721_v35  ;;  %v2726_v2 = vpop.xlane.xlu1 %349  ;;  %v690_v37 = vpop.permute.xlu0 %689 }
 0x339   :  { %v745_v61 = vsel %vm241_vm1, %v690_v37, 0.0 }
 0x33c   :  { %1403 = vrot.lane.b32.xlu1 %v1364_v6, %s1879_s13  ;;  %v2729_v48 = vpop.xlane.xlu1 %373 }
 0x340   :  { %1407 = vrot.lane.b32.xlu1 %v1366_v9, %s1879_s13  ;;  %v2732_v6 = vpop.xlane.xlu1 %355  ;;  %v1032_v9 = vpop.permute.xlu0 %1031 }
 0x344   :  { %1411 = vrot.lane.b32.xlu1 %v1368_v30, %s1879_s13  ;;  %v2735_v28 = vpop.xlane.xlu1 %379  ;;  %v1079_v30 = vsel %vm241_vm1, %v1032_v9, 0.0 }
 0x348   :  { %1415 = vrot.lane.b32.xlu1 %v1370_v59, %s1879_s13  ;;  %v2740_v59 = vpop.permute.xlu0 %1047 }
 0x34c   :  { %v2744_v20 = vpop.permute.xlu0 %1389 }
 0x350   :  { %v694_v47 = vpop.permute.xlu0 %693 }
 0x353   :  { %722 = vadd.xlane.f32.xlu0 %v721_v4 }
 0x357   :  { %746 = vadd.xlane.f32.xlu0 %v745_v61 }
 0x35b   :  { %1080 = vadd.xlane.f32.xlu0 %v1079_v30  ;;  %v2752_v30 = vpop.permute.xlu0 %1051 }
 0x35c   :  { %v2738_v35 = vpop.xlane.xlu1 %361 }
 0x35f   :  { %v2756_v22 = vpop.permute.xlu0 %1393 }
 0x360   :  { %v2742_v23 = vpop.xlane.xlu1 %385 }
 0x364   :  { %v1324_v46 = vpop.xlane.xlu1 %1323 }
 0x365   :  { %v1340_v19 = vmul.f32 0.125, %v1324_v46  ;;  %v682_v46 = vpop.permute.xlu0 %681 }
 0x367   :  { %v2747_v4 = vsub.f32 %v2185_v25, %v1340_v19 }
 0x368   :  { %v676_v37 = vpop.permute.xlu1 %675 }
 0x369   :  { %3398 = vst [vmem:[#allocation46_spill] sm:$0xff] %v2747_v4  ;;  %v1372_v61 = vmul.f32 %v2747_v4, %v2747_v4  ;;  %v698_v4 = vpop.permute.xlu0 %697  ;;  %v724_v21 = vsel %vm241_vm1, %v676_v37, 0.0 }
 0x36b   :  { %1419 = vrot.lane.b32.xlu1 %v1372_v61, %s1879_s13 }
 0x36c   :  { %v692_v9 = vpop.permute.xlu1 %691 }
 0x36d   :  { %v1040_v24 = vpop.permute.xlu0 %1039 }
 0x370   :  { %v1034_v44 = vpop.permute.xlu1 %1033 }
 0x371   :  { %v1056_v36 = vpop.permute.xlu0 %1055  ;;  %v1082_v57 = vsel %vm241_vm1, %v1034_v44, 0.0 }
 0x374   :  { %v2754_v26 = vpop.permute.xlu1 %1049 }
 0x378   :  { %v2758_v56 = vpop.permute.xlu1 %1391 }
 0x37c   :  { %v680_v25 = vpop.permute.xlu1 %679 }
 0x37d   :  { %v730_v19 = vsel %vm241_vm1, %v680_v25, 0.0  ;;  %v748_v25 = vsel %vm241_vm1, %v692_v9, 0.0  ;;  %v733_v9 = vsel %vm241_vm1, %v682_v46, 0.0 }
 0x37e   :  { %731 = vadd.xlane.f32.xlu0 %v730_v19  ;;  %v2769_v19 = vpop.permute.xlu0 %1397 }
 0x380   :  { %v696_v53 = vpop.permute.xlu1 %695 }
 0x384   :  { %v1038_v27 = vpop.permute.xlu1 %1037 }
 0x385   :  { %v1088_v61 = vsel %vm241_vm1, %v1038_v27, 0.0 }
 0x386   :  { %1089 = vadd.xlane.f32.xlu0 %v1088_v61  ;;  %v751_v61 = vsel %vm241_vm1, %v694_v47, 0.0 }
 0x388   :  { %v2762_v1 = vpop.permute.xlu1 %1053 }
 0x38c   :  { %v2764_v60 = vpop.permute.xlu1 %1395 }
 0x38f   :  { %725 = vadd.xlane.f32.xlu1 %v724_v21  ;;  %v2774_v21 = vpop.permute.xlu0 %1405 }
 0x390   :  { %v678_v0 = vpop.permute.xlu1 %677 }
 0x391   :  { %v727_v17 = vsel %vm241_vm1, %v678_v0, 0.0  ;;  %v754_v0 = vsel %vm241_vm1, %v696_v53, 0.0 }
 0x392   :  { %728 = vadd.xlane.f32.xlu0 %v727_v17 }
 0x393   :  { %749 = vadd.xlane.f32.xlu1 %v748_v25  ;;  %v686_v47 = vpop.permute.xlu0 %685 }
 0x394   :  { %v1036_v27 = vpop.permute.xlu1 %1035  ;;  %v739_v53 = vsel %vm241_vm1, %v686_v47, 0.0  ;;  %v1103_v47 = vsel %vm241_vm1, %v2740_v59, 0.0 }
 0x395   :  { %v1085_v37 = vsel %vm241_vm1, %v1036_v27, 0.0 }
 0x396   :  { %752 = vadd.xlane.f32.xlu0 %v751_v61 }
 0x397   :  { %1083 = vadd.xlane.f32.xlu1 %v1082_v57  ;;  %v757_v57 = vsel %vm241_vm1, %v698_v4, 0.0 }
 0x398   :  { %v684_v54 = vpop.permute.xlu1 %683 }
 0x399   :  { %v736_v25 = vsel %vm241_vm1, %v684_v54, 0.0 }
 0x39a   :  { %1086 = vadd.xlane.f32.xlu0 %v1085_v37  ;;  %v702_v37 = vpop.permute.xlu0 %701 }
 0x39b   :  { %755 = vadd.xlane.f32.xlu1 %v754_v0  ;;  %v763_v46 = vsel %vm241_vm1, %v702_v37, 0.0 }
 0x39c   :  { %v700_v17 = vpop.permute.xlu1 %699 }
 0x39d   :  { %v760_v61 = vsel %vm241_vm1, %v700_v17, 0.0 }
 0x39e   :  { %734 = vadd.xlane.f32.xlu0 %v733_v9  ;;  %v1091_v9 = vsel %vm241_vm1, %v1040_v24, 0.0  ;;  %v1044_v39 = vpop.permute.xlu0 %1043  ;;  %v1109_v24 = vsel %vm241_vm1, %v2752_v30, 0.0  ;;  %v1437_v30 = vsel %vm241_vm1, %v2744_v20, 0.0 }
 0x39f   :  { %737 = vadd.xlane.f32.xlu1 %v736_v25  ;;  %v1097_v17 = vsel %vm241_vm1, %v1044_v39, 0.0  ;;  %v1115_v39 = vsel %vm241_vm1, %v1056_v36, 0.0  ;;  %v1443_v36 = vsel %vm241_vm1, %v2756_v22, 0.0 }
 0x3a0   :  { %v1042_v44 = vpop.permute.xlu1 %1041 }
 0x3a2   :  { %758 = vadd.xlane.f32.xlu0 %v757_v57 }
 0x3a3   :  { %761 = vadd.xlane.f32.xlu1 %v760_v61  ;;  %v1094_v61 = vsel %vm241_vm1, %v1042_v44, 0.0  ;;  %v1112_v44 = vsel %vm241_vm1, %v2762_v1, 0.0  ;;  %v1449_v1 = vsel %vm241_vm1, %v2769_v19, 0.0 }
 0x3a4   :  { %v1058_v27 = vpop.permute.xlu1 %1057 }
 0x3a6   :  { %740 = vadd.xlane.f32.xlu0 %v739_v53 }
 0x3a8   :  { %v1400_v0 = vpop.permute.xlu1 %1399 }
 0x3a9   :  { %v1452_v19 = vsel %vm241_vm1, %v1400_v0, 0.0 }
 0x3aa   :  { %764 = vadd.xlane.f32.xlu0 %v763_v46  ;;  %v1106_v46 = vsel %vm241_vm1, %v2754_v26, 0.0 }
 0x3ac   :  { %v688_v54 = vpop.permute.xlu1 %687 }
 0x3ad   :  { %v742_v25 = vsel %vm241_vm1, %v688_v54, 0.0  ;;  %v1060_v54 = vpop.permute.xlu0 %1059 }
 0x3ae   :  { %743 = vadd.xlane.f32.xlu1 %v742_v25  ;;  %1092 = vadd.xlane.f32.xlu0 %v1091_v9  ;;  %v1121_v59 = vsel %vm241_vm1, %v1060_v54, 0.0  ;;  %v1118_v9 = vsel %vm241_vm1, %v1058_v27, 0.0 }
 0x3b0   :  { %v704_v4 = vpop.permute.xlu1 %703 }
 0x3b1   :  { %v766_v57 = vsel %vm241_vm1, %v704_v4, 0.0  ;;  %v1440_v4 = vsel %vm241_vm1, %v2758_v56, 0.0 }
 0x3b2   :  { %767 = vadd.xlane.f32.xlu1 %v766_v57  ;;  %1098 = vadd.xlane.f32.xlu0 %v1097_v17  ;;  %v1402_v17 = vpop.permute.xlu0 %1401  ;;  %v1446_v57 = vsel %vm241_vm1, %v2764_v60, 0.0 }
 0x3b3   :  { %v1455_v27 = vsel %vm241_vm1, %v1402_v17, 0.0  ;;  %v387_v17 = vmul.f32 0.125, %v2586_v29 }
 0x3b4   :  { %v1046_v53 = vpop.permute.xlu1 %1045 }
 0x3b5   :  { %v1100_v37 = vsel %vm241_vm1, %v1046_v53, 0.0 }
 0x3b6   :  { %1095 = vadd.xlane.f32.xlu1 %v1094_v61  ;;  %1104 = vadd.xlane.f32.xlu0 %v1103_v47  ;;  %v1410_v22 = vpop.permute.xlu0 %1409  ;;  %v1461_v47 = vsel %vm241_vm1, %v2774_v21, 0.0 }
 0x3b7   :  { %v1467_v56 = vsel %vm241_vm1, %v1410_v22, 0.0  ;;  %v397_v22 = vmul.f32 0.125, %v2629_v31 }
 0x3b8   :  { %v1062_v25 = vpop.permute.xlu1 %1061 }
 0x3b9   :  { %v1124_v26 = vsel %vm241_vm1, %v1062_v25, 0.0  ;;  %v2833_v25 = vld [vmem:[%s3306_s4] ss:$0 sm:$0xff] }
 0x3ba   :  { %1101 = vadd.xlane.f32.xlu1 %v1100_v37  ;;  %1110 = vadd.xlane.f32.xlu0 %v1109_v24  ;;  %v1414_v24 = vpop.permute.xlu0 %1413 }
 0x3bb   :  { %v1473_v60 = vsel %vm241_vm1, %v1414_v24, 0.0 }
 0x3bc   :  { %v1404_v20 = vpop.permute.xlu1 %1403 }
 0x3bd   :  { %v1458_v53 = vsel %vm241_vm1, %v1404_v20, 0.0  ;;  %v395_v20 = vmul.f32 0.125, %v2605_v16  ;;  %v413_v16 = vadd.f32 1e-06, %v397_v22  ;;  %v402_v22 = vmul.f32 0.125, %v2742_v23 }
 0x3be   :  { %1107 = vadd.xlane.f32.xlu1 %v1106_v46  ;;  %1116 = vadd.xlane.f32.xlu0 %v1115_v39  ;;  %v1418_v46 = vpop.permute.xlu0 %1417 }
 0x3bf   :  { %v1479_v21 = vsel %vm241_vm1, %v1418_v46, 0.0 }
 0x3c0   :  { %v1408_v61 = vpop.permute.xlu1 %1407 }
 0x3c1   :  { %v1464_v39 = vsel %vm241_vm1, %v1408_v61, 0.0  ;;  %v391_v61 = vmul.f32 0.125, %v2643_v14  ;;  %v396_v14 = vmul.f32 0.125, %v2715_v8  ;;  %v400_v8 = vmul.f32 0.125, %v2735_v28 }
 0x3c2   :  { %1113 = vadd.xlane.f32.xlu1 %v1112_v44  ;;  %1122 = vadd.xlane.f32.xlu0 %v1121_v59 }
 0x3c3   :  { %v407_v31 = vadd.f32 1e-06, %v391_v61 }
 0x3c4   :  { %v1412_v37 = vpop.permute.xlu1 %1411 }
 0x3c5   :  { %v1470_v0 = vsel %vm241_vm1, %v1412_v37, 0.0  ;;  %v393_v37 = vmul.f32 0.125, %v2660_v51 }
 0x3c6   :  { %1119 = vadd.xlane.f32.xlu1 %v1118_v9  ;;  %1438 = vadd.xlane.f32.xlu0 %v1437_v30  ;;  %v2826_v9 = vld [vmem:[%s3305_s3] ss:$0 sm:$0xff] }
 0x3c8   :  { %v1416_v54 = vpop.permute.xlu1 %1415 }
 0x3c9   :  { %v1476_v59 = vsel %vm241_vm1, %v1416_v54, 0.0 }
 0x3ca   :  { %1125 = vadd.xlane.f32.xlu1 %v1124_v26  ;;  %1444 = vadd.xlane.f32.xlu0 %v1443_v36 }
 0x3ce   :  { %1441 = vadd.xlane.f32.xlu1 %v1440_v4  ;;  %1450 = vadd.xlane.f32.xlu0 %v1449_v1 }
 0x3d2   :  { %1447 = vadd.xlane.f32.xlu1 %v1446_v57  ;;  %1456 = vadd.xlane.f32.xlu0 %v1455_v27  ;;  %v389_v27 = vmul.f32 0.125, %v2620_v62  ;;  %v388_v62 = vmul.f32 0.125, %v2707_v50  ;;  %v398_v50 = vmul.f32 0.125, %v2729_v48 }
 0x3d4   :  { %v405_v24 = vadd.f32 1e-06, %v389_v27 }
 0x3d6   :  { %1453 = vadd.xlane.f32.xlu1 %v1452_v19  ;;  %1462 = vadd.xlane.f32.xlu0 %v1461_v47  ;;  %v403_v19 = vadd.f32 1e-06, %v387_v17 }
 0x3d8   :  { %1746 = vrsqrt.f32 %v403_v19 }
 0x3da   :  { %1459 = vadd.xlane.f32.xlu1 %v1458_v53  ;;  %1468 = vadd.xlane.f32.xlu0 %v1467_v56  ;;  %v411_v56 = vadd.f32 1e-06, %v395_v20  ;;  %v399_v53 = vmul.f32 0.125, %v2652_v11  ;;  %v409_v11 = vadd.f32 1e-06, %v393_v37 }
 0x3db   :  { %v414_v20 = vadd.f32 1e-06, %v398_v50 }
 0x3dc   :  { %1748 = vrsqrt.f32 %v411_v56  ;;  %v415_v46 = vadd.f32 1e-06, %v399_v53 }
 0x3dd   :  { %v1420_v44 = vpop.permute.xlu1 %1419  ;;  %1750 = vrsqrt.f32 %v405_v24 }
 0x3de   :  { %1465 = vadd.xlane.f32.xlu1 %v1464_v39  ;;  %1474 = vadd.xlane.f32.xlu0 %v1473_v60  ;;  %v1482_v30 = vsel %vm241_vm1, %v1420_v44, 0.0  ;;  %v401_v39 = vmul.f32 0.125, %v2668_v13  ;;  %1752 = vrsqrt.f32 %v413_v16  ;;  %v412_v13 = vadd.f32 1e-06, %v396_v14 }
 0x3df   :  { %1754 = vrsqrt.f32 %v407_v31 }
 0x3e0   :  { %v723_v36 = vpop.xlane.xlu0 %722  ;;  %v417_v54 = vadd.f32 1e-06, %v401_v39  ;;  %1756 = vrsqrt.f32 %v415_v46 }
 0x3e1   :  { %1758 = vrsqrt.f32 %v409_v11  ;;  %v769_v27 = vmul.f32 0.125, %v723_v36  ;;  %v418_v36 = vadd.f32 1e-06, %v402_v22 }
 0x3e2   :  { %1471 = vadd.xlane.f32.xlu1 %v1470_v0  ;;  %1480 = vadd.xlane.f32.xlu0 %v1479_v21  ;;  %v390_v21 = vmul.f32 0.125, %v2726_v2  ;;  %v404_v0 = vadd.f32 1e-06, %v388_v62  ;;  %v394_v2 = vmul.f32 0.125, %v2738_v35  ;;  %v1747_v61 = vpop.eup %1746 }
 0x3e3   :  { %v785_v37 = vadd.f32 1e-06, %v769_v27  ;;  %v435_v14 = vmul.f32 %v1747_v61, %v2280_v34 }
 0x3e4   :  { %v747_v26 = vpop.xlane.xlu0 %746  ;;  %1760 = vrsqrt.f32 %v404_v0  ;;  %v410_v56 = vadd.f32 1e-06, %v394_v2 }
 0x3e5   :  { %1762 = vrsqrt.f32 %v417_v54  ;;  %v777_v19 = vmul.f32 0.125, %v747_v26  ;;  %v458_v27 = vmul.f32 %v2826_v9, %v435_v14 }
 0x3e6   :  { %1477 = vadd.xlane.f32.xlu1 %v1476_v59  ;;  %v392_v59 = vmul.f32 0.125, %v2732_v6  ;;  %1764 = vrsqrt.f32 %v412_v13  ;;  %v416_v6 = vadd.f32 1e-06, %v400_v8  ;;  %v1749_v35 = vpop.eup %1748 }
 0x3e7   :  { %v1751_v16 = vpop.eup %1750  ;;  %v793_v23 = vadd.f32 1e-06, %v777_v19  ;;  %v443_v50 = vmul.f32 %v1749_v35, %v2287_v40 }
 0x3e8   :  { %v2837_v1 = vpop.xlane.xlu0 %1080  ;;  %v408_v48 = vadd.f32 1e-06, %v392_v59  ;;  %v1753_v62 = vpop.eup %1752  ;;  %v437_v59 = vmul.f32 %v1751_v16, %v2296_v41  ;;  %v2903_v16 = vadd.f32 %v2833_v25, %v458_v27 }
 0x3e9   :  { %v1755_v31 = vpop.eup %1754  ;;  %v445_v13 = vmul.f32 %v1753_v62, %v2303_v45  ;;  %v1127_v40 = vmul.f32 0.125, %v2837_v1  ;;  %v466_v41 = vmul.f32 %v2826_v9, %v443_v50 }
 0x3ea   :  { %1483 = vadd.xlane.f32.xlu1 %v1482_v30  ;;  %v406_v30 = vadd.f32 1e-06, %v390_v21  ;;  %v1757_v46 = vpop.eup %1756  ;;  %v439_v8 = vmul.f32 %v1755_v31, %v2310_v3 }
 0x3eb   :  { %v447_v2 = vmul.f32 %v1757_v46, %v2317_v49  ;;  %v468_v19 = vmul.f32 %v2826_v9, %v445_v13  ;;  %v1143_v62 = vadd.f32 1e-06, %v1127_v40  ;;  %v2907_v31 = vadd.f32 %v2833_v25, %v466_v41 }
 0x3ec   :  { %1766 = vrsqrt.f32 %v406_v30  ;;  %v462_v49 = vmul.f32 %v2826_v9, %v439_v8 }
 0x3ed   :  { %1768 = vrsqrt.f32 %v414_v20  ;;  %v470_v1 = vmul.f32 %v2826_v9, %v447_v2  ;;  %v2915_v14 = vadd.f32 %v2833_v25, %v468_v19 }
 0x3ee   :  { %1770 = vrsqrt.f32 %v408_v48 }
 0x3ef   :  { %1772 = vrsqrt.f32 %v416_v6  ;;  %v460_v6 = vmul.f32 %v2826_v9, %v437_v59 }
 0x3f0   :  { %1774 = vrsqrt.f32 %v410_v56 }
 0x3f1   :  { %1776 = vrsqrt.f32 %v785_v37 }
 0x3f2   :  { %1778 = vrsqrt.f32 %v418_v36 }
 0x3f3   :  { %1780 = vrsqrt.f32 %v793_v23 }
 0x3f8   :  { %1191 = vrot.lane.b32.xlu0 %v2826_v9, %s1880_s16 }
 0x3fb   :  { %1549 = vrot.lane.b32.xlu1 %v2826_v9, %s1881_s17 }
 0x3ff   :  { %1210 = vrot.lane.b32.xlu1 %v2833_v25, %s1880_s16 }
 0x403   :  { %1568 = vrot.lane.b32.xlu1 %v2833_v25, %s1881_s17 }
 0x40b   :  { %v732_v4 = vpop.xlane.xlu0 %731 }
 0x40c   :  { %v772_v28 = vmul.f32 0.125, %v732_v4  ;;  %v1759_v4 = vpop.eup %1758 }
 0x40d   :  { %v1761_v0 = vpop.eup %1760 }
 0x40e   :  { %v788_v26 = vadd.f32 1e-06, %v772_v28  ;;  %v1763_v54 = vpop.eup %1762  ;;  %v436_v35 = vmul.f32 %v1761_v0, %v2332_v33 }
 0x40f   :  { %v1765_v34 = vpop.eup %1764  ;;  %v449_v36 = vmul.f32 %v1763_v54, %v2348_v42  ;;  %v2918_v42 = vadd.f32 %v2833_v25, %v462_v49 }
 0x410   :  { %1782 = vrsqrt.f32 %v788_v26  ;;  %v1767_v20 = vpop.eup %1766  ;;  %v444_v26 = vmul.f32 %v1765_v34, %v2342_v18  ;;  %v459_v59 = vmul.f32 %v2826_v9, %v436_v35 }
 0x411   :  { %v1769_v22 = vpop.eup %1768  ;;  %v438_v46 = vmul.f32 %v1767_v20, %v2357_v58  ;;  %v2926_v58 = vadd.f32 %v2833_v25, %v470_v1  ;;  %v472_v34 = vmul.f32 %v2826_v9, %v449_v36 }
 0x412   :  { %v1771_v3 = vpop.eup %1770  ;;  %v446_v2 = vmul.f32 %v1769_v22, %v2364_v52 }
 0x413   :  { %v2842_v57 = vpop.xlane.xlu0 %1089  ;;  %v1773_v56 = vpop.eup %1772  ;;  %v461_v20 = vmul.f32 %v2826_v9, %v438_v46  ;;  %v440_v27 = vmul.f32 %v1771_v3, %v2370_v10  ;;  %v2949_v10 = vadd.f32 %v2833_v25, %v459_v59  ;;  %v2955_v3 = vadd.f32 %v2833_v25, %v472_v34 }
 0x414   :  { %v1775_v37 = vpop.eup %1774  ;;  %v448_v40 = vmul.f32 %v1773_v56, %v2376_v55  ;;  %v469_v55 = vmul.f32 %v2826_v9, %v446_v2 }
 0x415   :  { %v1777_v23 = vpop.eup %1776 }
 0x416   :  { %v1779_v33 = vpop.eup %1778  ;;  %v471_v56 = vmul.f32 %v2826_v9, %v448_v40 }
 0x417   :  { %v1781_v18 = vpop.eup %1780 }
 0x418   :  { %v825_v22 = vmul.f32 %v1781_v18, %v2395_v12  ;;  %v463_v12 = vmul.f32 %v2826_v9, %v440_v27 }
 0x41a   :  { %v1783_v8 = vpop.eup %1782  ;;  %v844_v36 = vmul.f32 %v2151_v5, %v825_v22  ;;  %v3400_v22 = vld [vmem:[#allocation2_spill] sm:$0xff] }
 0x41b   :  { %v820_v19 = vmul.f32 %v1783_v8, %v2539_v7 }
 0x41c   :  { %v2845_v47 = vpop.xlane.xlu1 %725 }
 0x41d   :  { %v770_v11 = vmul.f32 0.125, %v2845_v47  ;;  %v441_v47 = vmul.f32 %v1759_v4, %v2336_v15 }
 0x41f   :  { %v2850_v29 = vpop.xlane.xlu0 %728  ;;  %v786_v48 = vadd.f32 1e-06, %v770_v11  ;;  %v464_v28 = vmul.f32 %v2826_v9, %v441_v47  ;;  %v1130_v11 = vmul.f32 0.125, %v2842_v57  ;;  %v817_v57 = vmul.f32 %v1777_v23, %v2388_v38 }
 0x420   :  { %v2853_v60 = vpop.xlane.xlu1 %749  ;;  %v771_v45 = vmul.f32 0.125, %v2850_v29  ;;  %v467_v47 = vmul.f32 %v2826_v9, %v444_v26  ;;  %v450_v38 = vmul.f32 %v1779_v33, %v2447_v43  ;;  %v3399_v33 = vld [vmem:[#allocation11_spill] sm:$0xff] }
 0x421   :  { %v778_v29 = vmul.f32 0.125, %v2853_v60  ;;  %1784 = vrsqrt.f32 %v786_v48  ;;  %v2912_v60 = vadd.f32 %v2833_v25, %v460_v6  ;;  %v2929_v54 = vadd.f32 %v2833_v25, %v464_v28 }
 0x422   :  { %v787_v4 = vadd.f32 1e-06, %v771_v45  ;;  %1786 = vrsqrt.f32 %v1143_v62  ;;  %v442_v48 = vmul.f32 %v1775_v37, %v2434_v32  ;;  %v1146_v41 = vadd.f32 1e-06, %v1130_v11 }
 0x423   :  { %v2858_v51 = vpop.xlane.xlu0 %752  ;;  %v794_v13 = vadd.f32 1e-06, %v778_v29  ;;  %v836_v32 = vmul.f32 %v2151_v5, %v817_v57  ;;  %v2958_v49 = vadd.f32 %v2833_v25, %v467_v47  ;;  %v473_v37 = vmul.f32 %v2826_v9, %v450_v38 }
 0x424   :  { %v2862_v44 = vpop.xlane.xlu1 %1083  ;;  %1788 = vrsqrt.f32 %v787_v4  ;;  %v779_v45 = vmul.f32 0.125, %v2858_v51  ;;  %v465_v1 = vmul.f32 %v2826_v9, %v442_v48  ;;  %v839_v62 = vmul.f32 %v2151_v5, %v820_v19 }
 0x425   :  { %1790 = vrsqrt.f32 %v794_v13  ;;  %v1128_v43 = vmul.f32 0.125, %v2862_v44  ;;  %v2971_v44 = vadd.f32 %v2833_v25, %v469_v55  ;;  %v855_v23 = vadd.f32 %v2127_v63, %v836_v32  ;;  %v3401_v55 = vld [vmem:[#allocation30_spill] sm:$0xff] }
 0x426   :  { %1792 = vrsqrt.f32 %v1146_v41  ;;  %v795_v28 = vadd.f32 1e-06, %v779_v45  ;;  %v2976_v4 = vadd.f32 %v2833_v25, %v463_v12  ;;  %v2981_v13 = vadd.f32 %v2833_v25, %v471_v56 }
 0x427   :  { %v2866_v17 = vpop.xlane.xlu0 %1086  ;;  %v1144_v18 = vadd.f32 1e-06, %v1128_v43  ;;  %v2984_v8 = vadd.f32 %v2833_v25, %v465_v1  ;;  %v2988_v47 = vadd.f32 %v2833_v25, %v473_v37  ;;  %v2995_v40 = vsel %vm241_vm1, %v2903_v16, %v855_v23  ;;  %v3402_v1 = vld [vmem:[#allocation13_spill] sm:$0xff] }
 0x428   :  { %v2869_v53 = vpop.xlane.xlu1 %755  ;;  %v1129_v26 = vmul.f32 0.125, %v2866_v17  ;;  %1794 = vrsqrt.f32 %v795_v28 }
 0x429   :  { %v780_v51 = vmul.f32 0.125, %v2869_v53  ;;  %v484_v53 = vadd.f32 %v2833_v25, %v461_v20  ;;  %v863_v20 = vadd.f32 %v2127_v63, %v844_v36 }
 0x42a   :  { %v1145_v48 = vadd.f32 1e-06, %v1129_v26 }
 0x42b   :  { %v2871_v24 = vpop.xlane.xlu0 %734  ;;  %v1785_v7 = vpop.eup %1784  ;;  %v796_v46 = vadd.f32 1e-06, %v780_v51 }
 0x42c   :  { %v2877_v21 = vpop.xlane.xlu1 %737  ;;  %v818_v11 = vmul.f32 %v1785_v7, %v3399_v33  ;;  %v773_v9 = vmul.f32 0.125, %v2871_v24  ;;  %v1787_v59 = vpop.eup %1786  ;;  %v858_v24 = vadd.f32 %v2127_v63, %v839_v62  ;;  %v3403_v33 = vld [vmem:[#allocation24_spill] sm:$0xff] }
 0x42d   :  { %v774_v34 = vmul.f32 0.125, %v2877_v21  ;;  %1796 = vrsqrt.f32 %v796_v46  ;;  %v3001_v19 = vmul.f32 %v1787_v59, %v3400_v22 }
 0x42e   :  { %v1789_v57 = vpop.eup %1788  ;;  %v837_v45 = vmul.f32 %v2151_v5, %v818_v11  ;;  %1798 = vrsqrt.f32 %v1144_v18  ;;  %v789_v25 = vadd.f32 1e-06, %v773_v9  ;;  %v3010_v43 = vsel %vm241_vm1, %v484_v53, %v858_v24 }
 0x42f   :  { %v2873_v39 = vpop.xlane.xlu0 %758  ;;  %v1791_v41 = vpop.eup %1790  ;;  %v790_v32 = vadd.f32 1e-06, %v774_v34  ;;  %1800 = vrsqrt.f32 %v1145_v48 }
 0x430   :  { %v2894_v61 = vpop.xlane.xlu1 %761  ;;  %v781_v27 = vmul.f32 0.125, %v2873_v39  ;;  %v819_v39 = vmul.f32 %v1789_v57, %v3401_v55  ;;  %v1793_v56 = vpop.eup %1792  ;;  %v826_v28 = vmul.f32 %v1791_v41, %v3402_v1  ;;  %1802 = vrsqrt.f32 %v789_v25  ;;  %v3404_v25 = vld [vmem:[#allocation5_spill] sm:$0xff] }
 0x431   :  { %v782_v21 = vmul.f32 0.125, %v2894_v61  ;;  %v3007_v61 = vsel %vm241_vm1, %v2907_v31, %v863_v20  ;;  %1804 = vrsqrt.f32 %v790_v32  ;;  %v3020_v11 = vmul.f32 %v1793_v56, %v3403_v33 }
 0x432   :  { %v797_v7 = vadd.f32 1e-06, %v781_v27  ;;  %v838_v23 = vmul.f32 %v2151_v5, %v819_v39  ;;  %v1795_v9 = vpop.eup %1794  ;;  %v845_v59 = vmul.f32 %v2151_v5, %v826_v28 }
 0x433   :  { %v2883_v30 = vpop.xlane.xlu0 %740  ;;  %v798_v37 = vadd.f32 1e-06, %v782_v21 }
 0x434   :  { %v775_v38 = vmul.f32 0.125, %v2883_v30  ;;  %1806 = vrsqrt.f32 %v797_v7  ;;  %v857_v27 = vadd.f32 %v2127_v63, %v838_v23 }
 0x435   :  { %1808 = vrsqrt.f32 %v798_v37 }
 0x436   :  { %v791_v62 = vadd.f32 1e-06, %v775_v38  ;;  %v827_v38 = vmul.f32 %v1795_v9, %v3404_v25  ;;  %v3038_v23 = vsel %vm241_vm1, %v2912_v60, %v857_v27 }
 0x437   :  { %v2896_v15 = vpop.xlane.xlu0 %764  ;;  %v1797_v24 = vpop.eup %1796 }
 0x438   :  { %v783_v16 = vmul.f32 0.125, %v2896_v15  ;;  %v856_v15 = vadd.f32 %v2127_v63, %v837_v45  ;;  %1810 = vrsqrt.f32 %v791_v62  ;;  %v1799_v45 = vpop.eup %1798 }
 0x43a   :  { %v799_v53 = vadd.f32 1e-06, %v783_v16  ;;  %v3026_v57 = vsel %vm241_vm1, %v2949_v10, %v856_v15  ;;  %v864_v10 = vadd.f32 %v2127_v63, %v845_v59  ;;  %v846_v15 = vmul.f32 %v2151_v5, %v827_v38  ;;  %v3408_v38 = vld [vmem:[#allocation8_spill] sm:$0xff] }
 0x43b   :  { %v2921_v0 = vpop.xlane.xlu1 %743  ;;  %v2923_v50 = vpop.xlane.xlu0 %1092 }
 0x43c   :  { %v776_v30 = vmul.f32 0.125, %v2921_v0  ;;  %v1131_v36 = vmul.f32 0.125, %v2923_v50  ;;  %1812 = vrsqrt.f32 %v799_v53  ;;  %v3043_v9 = vsel %vm241_vm1, %v2958_v49, %v864_v10 }
 0x43e   :  { %v792_v18 = vadd.f32 1e-06, %v776_v30  ;;  %v1147_v34 = vadd.f32 1e-06, %v1131_v36  ;;  %v1801_v30 = vpop.eup %1800 }
 0x43f   :  { %v2941_v6 = vpop.xlane.xlu1 %767  ;;  %v2943_v52 = vpop.xlane.xlu0 %1098 }
 0x440   :  { %v784_v31 = vmul.f32 0.125, %v2941_v6  ;;  %v1133_v26 = vmul.f32 0.125, %v2943_v52  ;;  %1814 = vrsqrt.f32 %v792_v18 }
 0x441   :  { %1816 = vrsqrt.f32 %v1147_v34 }
 0x442   :  { %v800_v52 = vadd.f32 1e-06, %v784_v31  ;;  %v1149_v48 = vadd.f32 1e-06, %v1133_v26 }
 0x443   :  { %v1096_v35 = vpop.xlane.xlu1 %1095  ;;  %v2964_v29 = vpop.xlane.xlu0 %1104 }
 0x444   :  { %v1132_v50 = vmul.f32 0.125, %v1096_v35  ;;  %v1135_v6 = vmul.f32 0.125, %v2964_v29  ;;  %1818 = vrsqrt.f32 %v800_v52 }
 0x445   :  { %1820 = vrsqrt.f32 %v1149_v48 }
 0x446   :  { %v1148_v29 = vadd.f32 1e-06, %v1132_v50  ;;  %v1151_v55 = vadd.f32 1e-06, %v1135_v6 }
 0x447   :  { %v1102_v17 = vpop.xlane.xlu1 %1101  ;;  %v1111_v2 = vpop.xlane.xlu0 %1110 }
 0x448   :  { %v1134_v20 = vmul.f32 0.125, %v1102_v17  ;;  %v1137_v35 = vmul.f32 0.125, %v1111_v2  ;;  %v3405_v17 = vld [vmem:[#allocation22_spill] sm:$0xff]  ;;  %v3406_v2 = vld [vmem:[#allocation16_spill] sm:$0xff]  ;;  %1822 = vrsqrt.f32 %v1148_v29 }
 0x449   :  { %v828_v32 = vmul.f32 %v1797_v24, %v3405_v17  ;;  %v3033_v56 = vmul.f32 %v1799_v45, %v3406_v2  ;;  %1824 = vrsqrt.f32 %v1151_v55  ;;  %v3409_v55 = vld [vmem:[#allocation32_spill] sm:$0xff]  ;;  %v3410_v17 = vld [vmem:[#allocation9_spill] sm:$0xff] }
 0x44a   :  { %v1150_v16 = vadd.f32 1e-06, %v1134_v20  ;;  %v1153_v1 = vadd.f32 1e-06, %v1137_v35  ;;  %v3046_v20 = vadd.f32 %v2127_v63, %v846_v15  ;;  %v3407_v35 = vld [vmem:[#allocation31_spill] sm:$0xff] }
 0x44b   :  { %v1108_v51 = vpop.xlane.xlu1 %1107  ;;  %v1117_v12 = vpop.xlane.xlu0 %1116  ;;  %v847_v33 = vmul.f32 %v2151_v5, %v828_v32 }
 0x44c   :  { %v1136_v22 = vmul.f32 0.125, %v1108_v51  ;;  %v1139_v39 = vmul.f32 0.125, %v1117_v12  ;;  %v1803_v51 = vpop.eup %1802  ;;  %1826 = vrsqrt.f32 %v1150_v16 }
 0x44d   :  { %v1805_v31 = vpop.eup %1804  ;;  %1828 = vrsqrt.f32 %v1153_v1  ;;  %v3052_v25 = vadd.f32 %v2127_v63, %v847_v33  ;;  %v821_v29 = vmul.f32 %v1803_v51, %v3408_v38  ;;  %v3411_v51 = vld [vmem:[#allocation33_spill] sm:$0xff] }
 0x44e   :  { %v1152_v62 = vadd.f32 1e-06, %v1136_v22  ;;  %v1155_v53 = vadd.f32 1e-06, %v1139_v39  ;;  %v822_v39 = vmul.f32 %v1805_v31, %v3409_v55 }
 0x44f   :  { %v1114_v0 = vpop.xlane.xlu1 %1113  ;;  %v1123_v46 = vpop.xlane.xlu0 %1122 }
 0x450   :  { %v1138_v7 = vmul.f32 0.125, %v1114_v0  ;;  %v1141_v28 = vmul.f32 0.125, %v1123_v46  ;;  %v1807_v0 = vpop.eup %1806  ;;  %1830 = vrsqrt.f32 %v1152_v62  ;;  %v3412_v62 = vld [vmem:[#allocation18_spill] sm:$0xff] }
 0x451   :  { %v1809_v50 = vpop.eup %1808  ;;  %1832 = vrsqrt.f32 %v1155_v53  ;;  %v829_v32 = vmul.f32 %v1807_v0, %v3410_v17  ;;  %v3413_v0 = vld [vmem:[#allocation20_spill] sm:$0xff] }
 0x452   :  { %v1154_v46 = vadd.f32 1e-06, %v1138_v7  ;;  %v1157_v59 = vadd.f32 1e-06, %v1141_v28  ;;  %v1811_v52 = vpop.eup %1810  ;;  %v830_v15 = vmul.f32 %v1809_v50, %v3411_v51 }
 0x453   :  { %v1120_v21 = vpop.xlane.xlu1 %1119  ;;  %v1439_v41 = vpop.xlane.xlu0 %1438  ;;  %v848_v38 = vmul.f32 %v2151_v5, %v829_v32 }
 0x454   :  { %v1140_v12 = vmul.f32 0.125, %v1120_v21  ;;  %v1485_v26 = vmul.f32 0.125, %v1439_v41  ;;  %v1813_v48 = vpop.eup %1812  ;;  %v3049_v21 = vmul.f32 %v1801_v30, %v3407_v35  ;;  %1834 = vrsqrt.f32 %v1154_v46 }
 0x455   :  { %v1815_v45 = vpop.eup %1814  ;;  %1836 = vrsqrt.f32 %v1157_v59  ;;  %v831_v33 = vmul.f32 %v1813_v48, %v3413_v0  ;;  %v841_v59 = vmul.f32 %v2151_v5, %v822_v39 }
 0x456   :  { %v1156_v24 = vadd.f32 1e-06, %v1140_v12  ;;  %v1501_v41 = vadd.f32 1e-06, %v1485_v26  ;;  %v3055_v10 = vpop.eup %1816  ;;  %v823_v12 = vmul.f32 %v1811_v52, %v3412_v62  ;;  %v840_v26 = vmul.f32 %v2151_v5, %v821_v29 }
 0x457   :  { %v1126_v37 = vpop.xlane.xlu1 %1125  ;;  %v1445_v36 = vpop.xlane.xlu0 %1444  ;;  %v849_v29 = vmul.f32 %v2151_v5, %v830_v15  ;;  %v850_v55 = vmul.f32 %v2151_v5, %v831_v33  ;;  %v3092_v33 = vsel %vm241_vm1, %v2915_v14, %v3046_v20 }
 0x458   :  { %v1142_v18 = vmul.f32 0.125, %v1126_v37  ;;  %v1487_v34 = vmul.f32 0.125, %v1445_v36  ;;  %v1819_v2 = vpop.eup %1818  ;;  %1838 = vrsqrt.f32 %v1156_v24 }
 0x459   :  { %v3059_v36 = vpop.eup %1820  ;;  %1840 = vrsqrt.f32 %v1501_v41 }
 0x45a   :  { %v1158_v22 = vadd.f32 1e-06, %v1142_v18  ;;  %v1503_v16 = vadd.f32 1e-06, %v1487_v34  ;;  %v3063_v31 = vpop.eup %1822  ;;  %v3414_v34 = vld [vmem:[#allocation37_spill] sm:$0xff] }
 0x45b   :  { %v1442_v6 = vpop.xlane.xlu1 %1441  ;;  %v1451_v60 = vpop.xlane.xlu0 %1450 }
 0x45c   :  { %v1486_v27 = vmul.f32 0.125, %v1442_v6  ;;  %v1489_v49 = vmul.f32 0.125, %v1451_v60  ;;  %1842 = vrsqrt.f32 %v1158_v22  ;;  %v3067_v18 = vpop.eup %1824  ;;  %v824_v6 = vmul.f32 %v1815_v45, %v3414_v34 }
 0x45d   :  { %1844 = vrsqrt.f32 %v1503_v16  ;;  %v3071_v24 = vpop.eup %1826  ;;  %v842_v22 = vmul.f32 %v2151_v5, %v823_v12  ;;  %v867_v12 = vadd.f32 %v2127_v63, %v848_v38 }
 0x45e   :  { %v1502_v1 = vadd.f32 1e-06, %v1486_v27  ;;  %v1505_v53 = vadd.f32 1e-06, %v1489_v49  ;;  %v3415_v27 = vld [vmem:[#allocation38_spill] sm:$0xff]  ;;  %v3074_v48 = vpop.eup %1828 }
 0x45f   :  { %v1448_v7 = vpop.xlane.xlu1 %1447  ;;  %v1457_v30 = vpop.xlane.xlu0 %1456  ;;  %v832_v35 = vmul.f32 %v1819_v2, %v3415_v27  ;;  %v843_v2 = vmul.f32 %v2151_v5, %v824_v6  ;;  %v3098_v6 = vsel %vm241_vm1, %v2971_v44, %v3052_v25  ;;  %v3112_v25 = vsel %vm241_vm1, %v2926_v58, %v867_v12  ;;  %v3424_v12 = vld [vmem:[#allocation39_spill] sm:$0xff] }
 0x460   :  { %v1488_v28 = vmul.f32 0.125, %v1448_v7  ;;  %v1491_v37 = vmul.f32 0.125, %v1457_v30  ;;  %1846 = vrsqrt.f32 %v1502_v1  ;;  %v3079_v45 = vpop.eup %1830  ;;  %v859_v7 = vadd.f32 %v2127_v63, %v840_v26  ;;  %3416 = vst [vmem:[#allocation11_spill] sm:$0xff] %v3112_v25 }
 0x461   :  { %1848 = vrsqrt.f32 %v1505_v53  ;;  %v1833_v16 = vpop.eup %1832  ;;  %v860_v30 = vadd.f32 %v2127_v63, %v841_v59  ;;  %v868_v53 = vadd.f32 %v2127_v63, %v849_v29  ;;  %v861_v26 = vadd.f32 %v2127_v63, %v842_v22  ;;  %v3419_v29 = vld [vmem:[#allocation10_spill] sm:$0xff] }
 0x462   :  { %v1504_v46 = vadd.f32 1e-06, %v1488_v28  ;;  %v1507_v50 = vadd.f32 1e-06, %v1491_v37  ;;  %v1835_v28 = vpop.eup %1834  ;;  %v851_v37 = vmul.f32 %v2151_v5, %v832_v35  ;;  %v862_v14 = vadd.f32 %v2127_v63, %v843_v2  ;;  %v3422_v2 = vld [vmem:[#allocation3_spill] sm:$0xff] }
 0x463   :  { %v1454_v60 = vpop.xlane.xlu1 %1453  ;;  %v1463_v52 = vpop.xlane.xlu0 %1462  ;;  %v1179_v22 = vmul.f32 %v3055_v10, %v3419_v29  ;;  %v3430_v29 = vld [vmem:[#allocation35_spill] sm:$0xff] }
 0x464   :  { %v1490_v41 = vmul.f32 0.125, %v1454_v60  ;;  %v1493_v49 = vmul.f32 0.125, %v1463_v52  ;;  %1850 = vrsqrt.f32 %v1504_v46  ;;  %v1837_v62 = vpop.eup %1836  ;;  %v869_v46 = vadd.f32 %v2127_v63, %v850_v55 }
 0x465   :  { %1852 = vrsqrt.f32 %v1507_v50  ;;  %v1839_v0 = vpop.eup %1838  ;;  %v3102_v50 = vsel %vm241_vm1, %v2918_v42, %v859_v7  ;;  %v3106_v60 = vsel %vm241_vm1, %v2976_v4, %v860_v30  ;;  %v870_v35 = vadd.f32 %v2127_v63, %v851_v37  ;;  %v3421_v7 = vld [vmem:[#allocation34_spill] sm:$0xff] }
 0x466   :  { %v1506_v39 = vadd.f32 1e-06, %v1490_v41  ;;  %v1509_v17 = vadd.f32 1e-06, %v1493_v49  ;;  %v1841_v34 = vpop.eup %1840  ;;  %v3116_v42 = vsel %vm241_vm1, %v2981_v13, %v868_v53  ;;  %v3120_v4 = vsel %vm241_vm1, %v2929_v54, %v861_v26  ;;  %v3425_v53 = vld [vmem:[#allocation6_spill] sm:$0xff]  ;;  %v3426_v26 = vld [vmem:[#allocation17_spill] sm:$0xff] }
 0x467   :  { %v1460_v32 = vpop.xlane.xlu1 %1459  ;;  %v1469_v1 = vpop.xlane.xlu0 %1468  ;;  %3417 = vst [vmem:[#allocation2_spill] sm:$0xff] %v3116_v42  ;;  %v3124_v63 = vsel %vm241_vm1, %v2955_v3, %v869_v46  ;;  %v3130_v13 = vsel %vm241_vm1, %v2984_v8, %v862_v14  ;;  %v1180_v30 = vmul.f32 %v3063_v31, %v3421_v7  ;;  %v1183_v3 = vmul.f32 %v3067_v18, %v3422_v2  ;;  %v3428_v14 = vld [vmem:[#allocation27_spill] sm:$0xff]  ;;  %v3432_v7 = vld [vmem:[#allocation41_spill] sm:$0xff] }
 0x468   :  { %1854 = vrsqrt.f32 %v1506_v39  ;;  %v1492_v51 = vmul.f32 0.125, %v1460_v32  ;;  %v1495_v15 = vmul.f32 0.125, %v1469_v1  ;;  %v1843_v27 = vpop.eup %1842  ;;  %3418 = vst [vmem:[#allocation30_spill] sm:$0xff] %v3124_v63  ;;  %v3140_v10 = vsel %vm241_vm1, %v2988_v47, %v870_v35 }
 0x469   :  { %1856 = vrsqrt.f32 %v1509_v17  ;;  %v1845_v44 = vpop.eup %1844  ;;  %v3420_v17 = vld [vmem:[#allocation21_spill] sm:$0xff]  ;;  %3423 = vst [vmem:[#allocation13_spill] sm:$0xff] %v3140_v10  ;;  %v1185_v31 = vmul.f32 %v3074_v48, %v3425_v53  ;;  %v1184_v18 = vmul.f32 %v3079_v45, %v3426_v26  ;;  %v1186_v47 = vmul.f32 %v1835_v28, %v3428_v14  ;;  %v3433_v45 = vld [vmem:[#allocation7_spill] sm:$0xff]  ;;  %v3435_v28 = vld [vmem:[#allocation14_spill] sm:$0xff] }
 0x46a   :  { %v1508_v5 = vadd.f32 1e-06, %v1492_v51  ;;  %v1511_v59 = vadd.f32 1e-06, %v1495_v15  ;;  %v1847_v38 = vpop.eup %1846  ;;  %v1181_v54 = vmul.f32 %v3059_v36, %v3420_v17  ;;  %v1182_v36 = vmul.f32 %v3071_v24, %v3424_v12  ;;  %v3431_v24 = vld [vmem:[#allocation4_spill] sm:$0xff]  ;;  %v3437_v26 = vld [vmem:[#allocation25_spill] sm:$0xff] }
 0x46b   :  { %v1466_v20 = vpop.xlane.xlu1 %1465  ;;  %v1475_v52 = vpop.xlane.xlu0 %1474  ;;  %v1533_v17 = vmul.f32 %v1841_v34, %v3431_v24  ;;  %v1190_v48 = vmul.f32 %v1843_v27, %v3432_v7  ;;  %v3439_v14 = vld [vmem:[#allocation15_spill] sm:$0xff]  ;;  %v3440_v7 = vld [vmem:[#allocation42_spill] sm:$0xff] }
 0x46c   :  { %1858 = vrsqrt.f32 %v1508_v5  ;;  %v1494_v41 = vmul.f32 0.125, %v1466_v20  ;;  %v1497_v49 = vmul.f32 0.125, %v1475_v52  ;;  %v1849_v39 = vpop.eup %1848  ;;  %v3427_v5 = vld [vmem:[#allocation12_spill] sm:$0xff] }
 0x46d   :  { %1860 = vrsqrt.f32 %v1511_v59  ;;  %v1187_v59 = vmul.f32 %v1833_v16, %v3427_v5  ;;  %v3438_v5 = vld [vmem:[#allocation36_spill] sm:$0xff] }
 0x46e   :  { %v1510_v55 = vadd.f32 1e-06, %v1494_v41  ;;  %v1513_v58 = vadd.f32 1e-06, %v1497_v49  ;;  %v1851_v37 = vpop.eup %1850  ;;  %v3429_v41 = vld [vmem:[#allocation23_spill] sm:$0xff] }
 0x46f   :  { %v1472_v32 = vpop.xlane.xlu1 %1471  ;;  %v1481_v1 = vpop.xlane.xlu0 %1480  ;;  %v1189_v49 = vmul.f32 %v1837_v62, %v3429_v41 }
 0x470   :  { %1862 = vrsqrt.f32 %v1510_v55  ;;  %v1496_v51 = vmul.f32 0.125, %v1472_v32  ;;  %v1499_v8 = vmul.f32 0.125, %v1481_v1  ;;  %v1853_v15 = vpop.eup %1852  ;;  %v1188_v55 = vmul.f32 %v1839_v0, %v3430_v29  ;;  %v3434_v1 = vld [vmem:[#allocation19_spill] sm:$0xff] }
 0x471   :  { %1864 = vrsqrt.f32 %v1513_v58  ;;  %v1535_v58 = vmul.f32 %v1845_v44, %v3433_v45  ;;  %v1534_v12 = vmul.f32 %v1847_v38, %v3434_v1  ;;  %v1539_v62 = vmul.f32 %v1853_v15, %v3437_v26 }
 0x472   :  { %v1855_v46 = vpop.eup %1854  ;;  %v1512_v20 = vadd.f32 1e-06, %v1496_v51  ;;  %v1515_v52 = vadd.f32 1e-06, %v1499_v8  ;;  %v1537_v51 = vmul.f32 %v1849_v39, %v3435_v28  ;;  %v3436_v8 = vld [vmem:[#allocation29_spill] sm:$0xff] }
 0x473   :  { %v1857_v35 = vpop.eup %1856  ;;  %v1478_v2 = vpop.xlane.xlu1 %1477  ;;  %v1536_v53 = vmul.f32 %v1851_v37, %v3436_v8  ;;  %v1538_v34 = vmul.f32 %v1855_v46, %v3438_v5  ;;  %v3441_v46 = vld [vmem:[#allocation26_spill] sm:$0xff]  ;;  %v3442_v5 = vld [vmem:[#allocation43_spill] sm:$0xff] }
 0x474   :  { %v1192_v32 = vpop.permute.xlu0 %1191  ;;  %1866 = vrsqrt.f32 %v1512_v20  ;;  %v1498_v16 = vmul.f32 0.125, %v1478_v2  ;;  %v1541_v27 = vmul.f32 %v1857_v35, %v3439_v14 }
 0x475   :  { %1868 = vrsqrt.f32 %v1515_v52  ;;  %v1194_v29 = vmul.f32 %v1192_v32, %v3001_v19  ;;  %v1195_v38 = vmul.f32 %v1192_v32, %v3033_v56  ;;  %v1196_v20 = vmul.f32 %v1192_v32, %v3049_v21 }
 0x476   :  { %v1859_v0 = vpop.eup %1858  ;;  %v1514_v41 = vadd.f32 1e-06, %v1498_v16  ;;  %v1197_v39 = vmul.f32 %v1192_v32, %v3020_v11  ;;  %v1198_v24 = vmul.f32 %v1192_v32, %v1179_v22  ;;  %v1199_v52 = vmul.f32 %v1192_v32, %v1180_v30  ;;  %v3443_v30 = vld [vmem:[#allocation28_spill] sm:$0xff] }
 0x477   :  { %v1861_v44 = vpop.eup %1860  ;;  %v1484_v37 = vpop.xlane.xlu1 %1483  ;;  %v1540_v15 = vmul.f32 %v1859_v0, %v3440_v7  ;;  %v1200_v2 = vmul.f32 %v1192_v32, %v1181_v54  ;;  %v1201_v35 = vmul.f32 %v1192_v32, %v1182_v36  ;;  %v1202_v1 = vmul.f32 %v1192_v32, %v1183_v3 }
 0x478   :  { %1870 = vrsqrt.f32 %v1514_v41  ;;  %v1543_v45 = vmul.f32 %v1861_v44, %v3441_v46  ;;  %v1203_v16 = vmul.f32 %v1192_v32, %v1184_v18  ;;  %v1204_v28 = vmul.f32 %v1192_v32, %v1185_v31  ;;  %v3444_v44 = vld [vmem:[#allocation44_spill] sm:$0xff] }
 0x479   :  { %v1205_v8 = vmul.f32 %v1192_v32, %v1186_v47  ;;  %v1206_v56 = vmul.f32 %v1192_v32, %v1187_v59  ;;  %v1500_v26 = vmul.f32 0.125, %v1484_v37  ;;  %v1207_v22 = vmul.f32 %v1192_v32, %v1188_v55 }
 0x47a   :  { %v1863_v19 = vpop.eup %1862  ;;  %v1208_v14 = vmul.f32 %v1192_v32, %v1189_v49  ;;  %v1209_v10 = vmul.f32 %v1192_v32, %v1190_v48 }
 0x47b   :  { %v1865_v21 = vpop.eup %1864  ;;  %v1542_v11 = vmul.f32 %v1863_v19, %v3442_v5  ;;  %v3168_v0 = vpop.permute.xlu1 %1549  ;;  %v1516_v41 = vadd.f32 1e-06, %v1500_v26 }
 0x47c   :  { %v1545_v54 = vmul.f32 %v1865_v21, %v3443_v30  ;;  %v1553_v36 = vmul.f32 %v3168_v0, %v1534_v12  ;;  %v1555_v3 = vmul.f32 %v3168_v0, %v1536_v53  ;;  %v1557_v31 = vmul.f32 %v3168_v0, %v1538_v34 }
 0x47d   :  { %v1559_v18 = vmul.f32 %v3168_v0, %v1540_v15  ;;  %v1561_v59 = vmul.f32 %v3168_v0, %v1542_v11  ;;  %v1552_v47 = vmul.f32 %v3168_v0, %v1533_v17  ;;  %1872 = vrsqrt.f32 %v1516_v41  ;;  %v3445_v17 = vld [vmem:[#allocation40_spill] sm:$0xff] }
 0x47e   :  { %v1867_v55 = vpop.eup %1866  ;;  %v1554_v49 = vmul.f32 %v3168_v0, %v1535_v58  ;;  %v1556_v48 = vmul.f32 %v3168_v0, %v1537_v51  ;;  %v1558_v32 = vmul.f32 %v3168_v0, %v1539_v62  ;;  %v1560_v34 = vmul.f32 %v3168_v0, %v1541_v27  ;;  %v3446_v27 = vld [vmem:[#allocation45_spill] sm:$0xff] }
 0x47f   :  { %v1869_v12 = vpop.eup %1868  ;;  %v1544_v53 = vmul.f32 %v1867_v55, %v3444_v44  ;;  %v1211_v37 = vpop.permute.xlu1 %1210  ;;  %v1562_v7 = vmul.f32 %v3168_v0, %v1543_v45  ;;  %v1564_v15 = vmul.f32 %v3168_v0, %v1545_v54 }
 0x480   :  { %v1547_v46 = vmul.f32 %v1869_v12, %v3445_v17  ;;  %v1213_v19 = vadd.f32 %v1211_v37, %v1194_v29  ;;  %v1214_v26 = vadd.f32 %v1211_v37, %v1195_v38  ;;  %v1215_v21 = vadd.f32 %v1211_v37, %v1196_v20 }
 0x481   :  { %v1216_v58 = vadd.f32 %v1211_v37, %v1197_v39  ;;  %v1217_v5 = vadd.f32 %v1211_v37, %v1198_v24  ;;  %v1218_v51 = vadd.f32 %v1211_v37, %v1199_v52  ;;  %v1219_v11 = vadd.f32 %v1211_v37, %v1200_v2 }
 0x482   :  { %v1871_v62 = vpop.eup %1870  ;;  %v1220_v30 = vadd.f32 %v1211_v37, %v1201_v35  ;;  %v1221_v41 = vadd.f32 %v1211_v37, %v1202_v1  ;;  %v1222_v55 = vadd.f32 %v1211_v37, %v1203_v16  ;;  %v1223_v44 = vadd.f32 %v1211_v37, %v1204_v28 }
 0x483   :  { %v1546_v63 = vmul.f32 %v1871_v62, %v3446_v27  ;;  %v1224_v45 = vadd.f32 %v1211_v37, %v1205_v8  ;;  %v1225_v42 = vadd.f32 %v1211_v37, %v1206_v56  ;;  %v1226_v54 = vadd.f32 %v1211_v37, %v1207_v22  ;;  %v1569_v25 = vpop.permute.xlu1 %1568  ;;  %v3447_v27 = vld [vmem:[#allocation46_spill] sm:$0xff] }
 0x484   :  { %v1227_v12 = vadd.f32 %v1211_v37, %v1208_v14  ;;  %v1228_v29 = vadd.f32 %v1211_v37, %v1209_v10  ;;  %v1563_v38 = vmul.f32 %v3168_v0, %v1544_v53  ;;  %v1566_v20 = vmul.f32 %v3168_v0, %v1547_v46 }
 0x485   :  { %v1565_v39 = vmul.f32 %v3168_v0, %v1546_v63  ;;  %v1571_v24 = vadd.f32 %v1569_v25, %v1552_v47  ;;  %v1572_v52 = vadd.f32 %v1569_v25, %v1553_v36  ;;  %v1573_v2 = vadd.f32 %v1569_v25, %v1554_v49  ;;  %v3448_v49 = vld [vmem:[#allocation11_spill] sm:$0xff] }
 0x486   :  { %v1574_v35 = vadd.f32 %v1569_v25, %v1555_v3  ;;  %v1575_v1 = vadd.f32 %v1569_v25, %v1556_v48  ;;  %v1576_v16 = vadd.f32 %v1569_v25, %v1557_v31  ;;  %v1577_v28 = vadd.f32 %v1569_v25, %v1558_v32  ;;  %v3449_v48 = vld [vmem:[#allocation2_spill] sm:$0xff] }
 0x487   :  { %v1578_v17 = vadd.f32 %v1569_v25, %v1559_v18  ;;  %v1579_v8 = vadd.f32 %v1569_v25, %v1560_v34  ;;  %v1580_v56 = vadd.f32 %v1569_v25, %v1561_v59  ;;  %v1581_v22 = vadd.f32 %v1569_v25, %v1562_v7  ;;  %v1873_v62 = vpop.eup %1872 }
 0x488   :  { %v1582_v14 = vadd.f32 %v1569_v25, %v1563_v38  ;;  %v1583_v10 = vadd.f32 %v1569_v25, %v1564_v15  ;;  %v1584_v37 = vadd.f32 %v1569_v25, %v1565_v39  ;;  %v1585_v53 = vadd.f32 %v1569_v25, %v1566_v20 }
 0x489   :  { %v1548_v46 = vmul.f32 %v1873_v62, %v3447_v27  ;;  %v1604_v63 = vsel %vm1603_vm2, %v2995_v40, %v1213_v19  ;;  %v1605_v36 = vsel %vm1603_vm2, %v3026_v57, %v1214_v26  ;;  %v1606_v3 = vsel %vm1603_vm2, %v3038_v23, %v1215_v21 }
 0x48a   :  { %v1607_v31 = vsel %vm1603_vm2, %v3010_v43, %v1216_v58  ;;  %v1608_v18 = vsel %vm1603_vm2, %v3102_v50, %v1217_v5  ;;  %v1609_v59 = vsel %vm1603_vm2, %v3106_v60, %v1218_v51  ;;  %v1610_v47 = vsel %vm1603_vm2, %v3120_v4, %v1219_v11 }
 0x48b   :  { %v1567_v40 = vmul.f32 %v3168_v0, %v1548_v46  ;;  %v1611_v57 = vsel %vm1603_vm2, %v3130_v13, %v1220_v30  ;;  %v1612_v23 = vsel %vm1603_vm2, %v3007_v61, %v1221_v41  ;;  %v1613_v43 = vsel %vm1603_vm2, %v3043_v9, %v1222_v55  ;;  %v3450_v13 = vld [vmem:[#allocation30_spill] sm:$0xff]  ;;  %v3451_v61 = vld [vmem:[#allocation13_spill] sm:$0xff] }
 0x48c   :  { %v1614_v50 = vsel %vm1603_vm2, %v3092_v33, %v1223_v44  ;;  %v1615_v60 = vsel %vm1603_vm2, %v3098_v6, %v1224_v45  ;;  %v1616_v4 = vsel %vm1603_vm2, %v3448_v49, %v1225_v42  ;;  %v1617_v0 = vsel %vm1603_vm2, %v3449_v48, %v1226_v54 }
 0x48d   :  { %v1586_v32 = vadd.f32 %v1569_v25, %v1567_v40  ;;  %v1618_v34 = vsel %vm1603_vm2, %v3450_v13, %v1227_v12  ;;  %v1619_v7 = vsel %vm1603_vm2, %v3451_v61, %v1228_v29  ;;  %v1621_v9 = vsel %vm1620_vm3, %v1604_v63, %v1571_v24 }
 0x48e   :  { %v1622_v33 = vsel %vm1620_vm3, %v1605_v36, %v1572_v52  ;;  %v1623_v15 = vsel %vm1620_vm3, %v1606_v3, %v1573_v2  ;;  %v1624_v6 = vsel %vm1620_vm3, %v1607_v31, %v1574_v35  ;;  %v1625_v42 = vsel %vm1620_vm3, %v1608_v18, %v1575_v1  ;;  %1637 = vst.msk [vmem:[%s3308_s5] sm:$0xff] %vm47_vm0, %v1621_v9 }
 0x48f   :  { %v1626_v25 = vsel %vm1620_vm3, %v1609_v59, %v1576_v16  ;;  %v1627_v19 = vsel %vm1620_vm3, %v1610_v47, %v1577_v28  ;;  %v1628_v26 = vsel %vm1620_vm3, %v1611_v57, %v1578_v17  ;;  %v1629_v21 = vsel %vm1620_vm3, %v1612_v23, %v1579_v8  ;;  %1638 = vst.msk [vmem:[%s3308_s5 + $0x8] sm:$0xff] %vm47_vm0, %v1622_v33 }
 0x490   :  { %1639 = vst.msk [vmem:[%s3308_s5 + $0x10] sm:$0xff] %vm47_vm0, %v1623_v15  ;;  %1640 = vst.msk [vmem:[%s3308_s5 + $0x18] sm:$0xff] %vm47_vm0, %v1624_v6  ;;  %v1630_v58 = vsel %vm1620_vm3, %v1613_v43, %v1580_v56  ;;  %v1631_v5 = vsel %vm1620_vm3, %v1614_v50, %v1581_v22  ;;  %v1632_v51 = vsel %vm1620_vm3, %v1615_v60, %v1582_v14 }
 0x491   :  { %1641 = vst.msk [vmem:[%s3308_s5 + $0x20] sm:$0xff] %vm47_vm0, %v1625_v42  ;;  %v1633_v11 = vsel %vm1620_vm3, %v1616_v4, %v1583_v10  ;;  %1642 = vst.msk [vmem:[%s3308_s5 + $0x28] sm:$0xff] %vm47_vm0, %v1626_v25  ;;  %v1634_v30 = vsel %vm1620_vm3, %v1617_v0, %v1584_v37  ;;  %v1635_v41 = vsel %vm1620_vm3, %v1618_v34, %v1585_v53 }
 0x492   :  { %1643 = vst.msk [vmem:[%s3308_s5 + $0x30] sm:$0xff] %vm47_vm0, %v1627_v19  ;;  %1644 = vst.msk [vmem:[%s3308_s5 + $0x38] sm:$0xff] %vm47_vm0, %v1628_v26  ;;  %v1636_v55 = vsel %vm1620_vm3, %v1619_v7, %v1586_v32 }
 0x493   :  { %1645 = vst.msk [vmem:[%s3308_s5 + $0x40] sm:$0xff] %vm47_vm0, %v1629_v21  ;;  %1646 = vst.msk [vmem:[%s3308_s5 + $0x48] sm:$0xff] %vm47_vm0, %v1630_v58 }
 0x494   :  { %1647 = vst.msk [vmem:[%s3308_s5 + $0x50] sm:$0xff] %vm47_vm0, %v1631_v5  ;;  %1648 = vst.msk [vmem:[%s3308_s5 + $0x58] sm:$0xff] %vm47_vm0, %v1632_v51 }
 0x495   :  { %1649 = vst.msk [vmem:[%s3308_s5 + $0x60] sm:$0xff] %vm47_vm0, %v1633_v11  ;;  %1650 = vst.msk [vmem:[%s3308_s5 + $0x68] sm:$0xff] %vm47_vm0, %v1634_v30 }
 0x496   :  { %1651 = vst.msk [vmem:[%s3308_s5 + $0x70] sm:$0xff] %vm47_vm0, %v1635_v41  ;;  %1652 = vst.msk [vmem:[%s3308_s5 + $0x78] sm:$0xff] %vm47_vm0, %v1636_v55 }

// kernel: sam_coreml_forward.17
= control target key start
LH: loop header
LB: loop body
LE: loop exit
PB: predicated region body
PF: predicated region fallthrough
CT: control target
= control target key end

     0   :  { %s2682_s18 = smov 0   ;;  %s3083_s0 = inlined_call_operand.vmem [shape: f32[2,64,32], index: 0, kind: input, shape index: {}]   ;;  %s3084_s1 = inlined_call_operand.vmem [shape: f32[2,64,32], index: 1, kind: input, shape index: {}]   ;;  %s3085_s2 = inlined_call_operand.vmem [shape: f32[2,7,32], index: 2, kind: input, shape index: {}, may-alias: {2,4}]   ;;  %s3086_s3 = inlined_call_operand.vmem [shape: f32[2,7,32], index: 3, kind: input, shape index: {}]   ;;  %s3087_s4 = inlined_call_operand.vmem [shape: f32[2,7,32], index: 4, kind: input, shape index: {}, may-alias: {2,4}]   ;;  %s3088_s5 = inlined_call_operand.vmem [shape: f32[32,16], index: 5, kind: input, shape index: {}]   ;;  %s3089_s6 = inlined_call_operand.vmem [shape: f32[1,16], index: 6, kind: input, shape index: {}]   ;;  %s3090_s7 = inlined_call_operand.vmem [shape: f32[32,16], index: 7, kind: input, shape index: {}]   ;;  %s3091_s8 = inlined_call_operand.vmem [shape: f32[1,16], index: 8, kind: input, shape index: {}]   ;;  %s3092_s9 = inlined_call_operand.vmem [shape: f32[32,16], index: 9, kind: input, shape index: {}]   ;;  %s3093_s10 = inlined_call_operand.vmem [shape: f32[1,16], index: 10, kind: input, shape index: {}]   ;;  %s3094_s11 = inlined_call_operand.vmem [shape: f32[16,32], index: 11, kind: input, shape index: {}]   ;;  %s3095_s12 = inlined_call_operand.vmem [shape: f32[1,32], index: 12, kind: input, shape index: {}]   ;;  %s3096_s13 = inlined_call_operand.vmem [shape: f32[1,32], index: 13, kind: input, shape index: {}]   ;;  %s3097_s14 = inlined_call_operand.vmem [shape: f32[1,32], index: 14, kind: input, shape index: {}]   ;;  %s3098_s15 = inlined_call_operand.vmem [shape: f32[2,64,32], index: 15, kind: output, shape index: {}]  }
   0x1 LB: > { %s2173_s19 = sadd.s32 4294967295, %s2596_s18   ;;  %p2177_p0 = scmp.ge.s32.totalorder %s2596_s18, 1  ;;  %s2596_s18 = sphi %s2682_s18, %s25_s18  }
   0x2   : > { %p474_p1 = scmp.lt.s32.totalorder %s2596_s18, 3 }
   0x4   : > { %p475_p2 = pnand %p2177_p0, %p474_p1 }
   0x5   : > { %v594_v0 = vld [vmem:[%s3088_s5] sm:$0xff] (!%p475_p2)  ;;  %v595_v1 = vld [vmem:[%s3088_s5 + $0x8] sm:$0xff] (!%p475_p2)  ;;  %v2598_v3 = vmov (!%p475_p2), 0.0|0.0   ;;  %v596_v6 = vld [vmem:[%s3088_s5 + $0x10] sm:$0xff] (!%p475_p2)  ;;  %vm2599_vm0 = vmmov (!%p475_p2), 0   ;;  %v2600_v8 = vmov (!%p475_p2), 0.0  }
   0x6   : > { %478 = sbr.rel (%p475_p2) target bundleno = 2091 (0x82b), region = 80  ;;  %v735_v2 = vld [vmem:[%s3090_s7] sm:$0xff] (!%p475_p2)  ;;  %2470 = vmatprep.subr.bf16.mxu1 (!%p475_p2), %v2598_v3  ;;  %v2462_v4 = vpack.c.bf16 (!%p475_p2), %v595_v1, %v594_v0  ;;  %v736_v5 = vld [vmem:[%s3090_s7 + $0x8] sm:$0xff] (!%p475_p2)  ;;  %v597_v7 = vld [vmem:[%s3088_s5 + $0x18] sm:$0xff] (!%p475_p2)  ;;  %2364 = vmatprep.mubr.msk.f32.mxu1 (!%p475_p2), %vm2599_vm0, %v2600_v8  ;;  %p539_p3 = scmp.lt.s32.totalorder (!%p475_p2), %s2173_s19, 1  ;;  %vm605_vm1 = vcmask (!%p475_p2), 261120  }
   0x7   : > { %v2471_v9 = vpack.c.bf16 (!%p475_p2), %v736_v5, %v735_v2  ;;  %v2466_v10 = vpack.c.bf16 (!%p475_p2), %v597_v7, %v596_v6  ;;  %v737_v11 = vld [vmem:[%s3090_s7 + $0x10] sm:$0xff] (!%p475_p2)  ;;  %v738_v12 = vld [vmem:[%s3090_s7 + $0x18] sm:$0xff] (!%p475_p2)  ;;  %v2196_v41 = vld [vmem:[%s3091_s8] ss:$0 sm:$0xff] (!%p475_p2)  ;;  %vm904_vm2 = vcmask (!%p475_p2), 64512   ;;  %vm1045_vm3 = vcmask (!%p475_p2), 56320  }
   0x8   : > { %2463 = vmatprep.subr.bf16.mxu0 (!%p475_p2), %v2462_v4  ;;  %v2474_v13 = vpack.c.bf16 (!%p475_p2), %v738_v12, %v737_v11  ;;  %v2187_v42 = vld [vmem:[%s3089_s6] ss:$0 sm:$0xff] (!%p475_p2)  ;;  %v820_v63 = vld [vmem:[%s3092_s9 + $0x8] sm:$0xff] (!%p475_p2)  ;;  %v821_v0 = vld [vmem:[%s3092_s9 + $0x10] sm:$0xff] (!%p475_p2)  ;;  %vm1158_vm4 = vcmask (!%p475_p2), 1046528  }
   0x9   : > { %2472 = vmatpush3.bf16.msra.mxu1 (!%p475_p2), %v2471_v9  ;;  %2465 = vmatpush3.bf16.msra.mxu0 (!%p475_p2), %v2462_v4  ;;  %v819_v62 = vld [vmem:[%s3092_s9] sm:$0xff] (!%p475_p2)  ;;  %v822_v2 = vld [vmem:[%s3092_s9 + $0x18] sm:$0xff] (!%p475_p2) }
   0xa   : > { %2473 = vmatprep.subr.bf16.mxu1 (!%p475_p2), %v2598_v3  ;;  %2467 = vmatprep.subr.bf16.mxu0 (!%p475_p2), %v2466_v10  ;;  %v2477_v1 = vpack.c.bf16 (!%p475_p2), %v820_v63, %v819_v62  ;;  %v2480_v4 = vpack.c.bf16 (!%p475_p2), %v822_v2, %v821_v0 }
   0xd   : > { %s3100_s19 = smov (!%p539_p3, %s2173_s19), 1  ;;  %2475 = vmatpush3.bf16.msra.mxu1 %v2474_v13  ;;  %2469 = vmatpush3.bf16.msra.mxu0 %v2466_v10 }
   0xe   : > { %s2717_s23 = sshll.u32 %s3100_s19, 6  ;;  %s2719_s24 = sshll.u32 %s3100_s19, 3  ;;  %2476 = vmatprep.subr.bf16.mxu1 %v2598_v3 }
   0xf   : > { %s2725_s27 = scalar_lea.vmem %s3083_s0, %s2717_s23  ;;  %s2731_s30 = scalar_lea.vmem %s3084_s1, %s2717_s23 }
  0x10   : > { %v2734_v14 = vld [vmem:[%s2725_s27] sm:$0xff]  ;;  %s552_s17 = scalar_lea.vmem %s3085_s2, %s2719_s24  ;;  %v2742_v16 = vld [vmem:[%s2725_s27 + $0x8] sm:$0xff]  ;;  %s556_s22 = scalar_lea.vmem %s3086_s3, %s2719_s24  ;;  %v2751_v20 = vld [vmem:[%s2725_s27 + $0x10] sm:$0xff] }
  0x11   : > { %v576_v15 = vld [vmem:[%s2731_s30] sm:$0xff]  ;;  %v577_v19 = vld [vmem:[%s2731_s30 + $0x8] sm:$0xff]  ;;  %v578_v23 = vld [vmem:[%s2731_s30 + $0x10] sm:$0xff]  ;;  %s560_s28 = scalar_lea.vmem %s3087_s4, %s2719_s24 }
  0x12   : > { %v584_v17 = vadd.f32 %v576_v15, %v2734_v14  ;;  %v574_v18 = vld [vmem:[%s552_s17] sm:$0x7f]  ;;  %v585_v22 = vadd.f32 %v577_v19, %v2742_v16  ;;  %v2756_v24 = vld [vmem:[%s2725_s27 + $0x18] sm:$0xff]  ;;  %v586_v26 = vadd.f32 %v578_v23, %v2751_v20  ;;  %v2772_v32 = vld [vmem:[%s2725_s27 + $0x28] sm:$0xff] }
  0x13   : > { %v592_v21 = vld [vmem:[%s556_s22] sm:$0x7f]  ;;  %v579_v27 = vld [vmem:[%s2731_s30 + $0x18] sm:$0xff]  ;;  %v581_v33 = vld [vmem:[%s2731_s30 + $0x28] sm:$0xff] }
  0x14   : > { %2344 = vmatprep.mubr.msk.f32.mxu0 %vm605_vm1, %v584_v17  ;;  %v593_v25 = vadd.f32 %v592_v21, %v574_v18  ;;  %v2763_v28 = vld [vmem:[%s2725_s27 + $0x20] sm:$0xff]  ;;  %v587_v30 = vadd.f32 %v579_v27, %v2756_v24  ;;  %v2776_v34 = vld [vmem:[%s2725_s27 + $0x30] sm:$0xff]  ;;  %v589_v36 = vadd.f32 %v581_v33, %v2772_v32  ;;  %v2785_v38 = vld [vmem:[%s2725_s27 + $0x38] sm:$0xff]  ;;  %s2601_s27 = smov 120  }
  0x15   : > { %v580_v29 = vld [vmem:[%s2731_s30 + $0x20] sm:$0xff]  ;;  %2345 = vmatmul.mubr.msk.f32.vlgmr.msra.gmra.mrb[0].mxu0 %vm605_vm1, %v585_v22  ;;  %v582_v35 = vld [vmem:[%s2731_s30 + $0x30] sm:$0xff]  ;;  %v583_v39 = vld [vmem:[%s2731_s30 + $0x38] sm:$0xff] }
  0x16   : > { %2365 = vmatmul.mubr.msk.f32.vlgmr.msra.gmra.mrb[0].mxu1 %vm605_vm1, %v593_v25  ;;  %2347 = vmatprep.mubr.msk.f32.mxu0 %vm605_vm1, %v586_v26  ;;  %v588_v31 = vadd.f32 %v580_v29, %v2763_v28  ;;  %v590_v37 = vadd.f32 %v582_v35, %v2776_v34  ;;  %v591_v40 = vadd.f32 %v583_v39, %v2785_v38  ;;  %v575_v5 = vld [vmem:[%s560_s28] sm:$0x7f] }
  0x17   : > { %2375 = vmatprep.mubr.msk.f32.mxu1 %vm2599_vm0, %v2600_v8  ;;  %2478 = vmatpush3.bf16.msra.mxu1 %v2477_v1 }
  0x18   : > { %2479 = vmatprep.subr.bf16.mxu1 %v2598_v3 }
  0x19   : > { %2348 = vmatmul.mubr.msk.f32.gmra.mrb[2].mxu0 %vm605_vm1, %v587_v30 }
  0x1a   : > { %2350 = vmatprep.mubr.msk.f32.mxu0 %vm605_vm1, %v588_v31 }
  0x1b   : > { %2481 = vmatpush3.bf16.msra.mxu1 %v2480_v4 }
  0x1d   : > { %2351 = vmatmul.mubr.msk.f32.gmra.mrb[4].mxu0 %vm605_vm1, %v589_v36 }
  0x1e   : > { %2353 = vmatprep.mubr.msk.f32.mxu0 %vm605_vm1, %v590_v37  ;;  %2376 = vmatmul.mubr.msk.f32.vlgmr.msra.gmra.mrb[2].mxu1 %vm605_vm1, %v575_v5 }
  0x21   : > { %2354 = vmatmul.mubr.msk.f32.gmra.mrb[6].mxu0 %vm605_vm1, %v591_v40 }
  0xe8   : > { %v2346_v43 = vpop.f32.mrb[0].mxu0 }
  0xe9   : > { %v815_v44 = vpop.f32.mrb[0].mxu1  ;;  %v696_v45 = vpop.f32.mrb[1].mxu0  ;;  %v2808_v51 = vadd.f32 %v2346_v43, %v2187_v42 }
  0xea   : > { %v2798_v46 = vadd.f32 %v2196_v41, %v815_v44  ;;  %v2366_v47 = vpop.f32.mrb[1].mxu1  ;;  %v2800_v48 = vadd.f32 %v2187_v42, %v696_v45 }
  0xec   : > { %2378 = vmatprep.subr.msk.mxu0 %vm904_vm2, %v2798_v46  ;;  %v2349_v49 = vpop.f32.mrb[2].mxu0  ;;  %2380 = vmatprep.mubr.msk.f32.mxu0 %vm904_vm2, %v2800_v48 }
  0xed   : > { %2379 = vmatpush3.xpose.msk.msra.mxu0 %vm904_vm2, %v2798_v46  ;;  %v706_v50 = vpop.f32.mrb[3].mxu0  ;;  %v2816_v55 = vadd.f32 %v2349_v49, %v2187_v42 }
  0xee   : > { %v2810_v52 = vadd.f32 %v2187_v42, %v706_v50 }
  0xf0   : > { %2381 = vmatmul.mubr.msk.f32.vlgmr.msra.gmra.mrb[8].mxu0 %vm904_vm2, %v2808_v51  ;;  %v2352_v53 = vpop.f32.mrb[4].mxu0 }
  0xf1   : > { %2383 = vmatprep.mubr.msk.f32.mxu0 %vm904_vm2, %v2810_v52  ;;  %v716_v54 = vpop.f32.mrb[5].mxu0  ;;  %v2820_v57 = vadd.f32 %v2352_v53, %v2187_v42 }
  0xf2   : > { %v2818_v56 = vadd.f32 %v2187_v42, %v716_v54 }
  0xf4   : > { %2384 = vmatmul.mubr.msk.f32.gmra.mrb[10].mxu0 %vm904_vm2, %v2816_v55  ;;  %v2355_v58 = vpop.f32.mrb[6].mxu0 }
  0xf5   : > { %2386 = vmatprep.mubr.msk.f32.mxu0 %vm904_vm2, %v2818_v56  ;;  %v726_v59 = vpop.f32.mrb[7].mxu0  ;;  %v2828_v61 = vadd.f32 %v2355_v58, %v2187_v42 }
  0xf6   : > { %v2826_v60 = vadd.f32 %v2187_v42, %v726_v59 }
  0xf8   : > { %2387 = vmatmul.mubr.msk.f32.gmra.mrb[12].mxu0 %vm904_vm2, %v2820_v57 }
  0xf9   : > { %2389 = vmatprep.mubr.msk.f32.mxu0 %vm904_vm2, %v2826_v60 }
  0xfc   : > { %2390 = vmatmul.mubr.msk.f32.gmra.mrb[14].mxu0 %vm904_vm2, %v2828_v61 }
 0x1c3   : > { %v2382_v6 = vpop.f32.mrb[8].mxu0 }
 0x1c4   : > { %v998_v7 = vpop.f32.mrb[9].mxu0  ;;  %v1038_v9 = vmul.f32 0.35355338, %v2382_v6 }
 0x1c5   : > { %v1037_v8 = vmul.f32 0.35355338, %v998_v7 }
 0x1c6   : > { %v1049_v17 = vsel %vm1045_vm3, %v1038_v9, -inf }
 0x1c7   : > { %v2385_v10 = vpop.f32.mrb[10].mxu0  ;;  %v1046_v11 = vsel %vm1045_vm3, %v1037_v8, -inf }
 0x1c8   : > { %1047 = vmax.xlane.f32.xlu0 %v1046_v11  ;;  %v1008_v12 = vpop.f32.mrb[11].mxu0  ;;  %v1040_v3 = vmul.f32 0.35355338, %v2385_v10 }
 0x1c9   : > { %v1039_v13 = vmul.f32 0.35355338, %v1008_v12 }
 0x1ca   : > { %v1055_v25 = vsel %vm1045_vm3, %v1040_v3, -inf }
 0x1cb   : > { %v2388_v15 = vpop.f32.mrb[12].mxu0  ;;  %v1052_v18 = vsel %vm1045_vm3, %v1039_v13, -inf }
 0x1cc   : > { %1050 = vmax.xlane.f32.xlu0 %v1049_v17  ;;  %1053 = vmax.xlane.f32.xlu1 %v1052_v18  ;;  %v1018_v19 = vpop.f32.mrb[13].mxu0  ;;  %v1042_v22 = vmul.f32 0.35355338, %v2388_v15 }
 0x1cd   : > { %v1041_v21 = vmul.f32 0.35355338, %v1018_v19 }
 0x1ce   : > { %v1061_v31 = vsel %vm1045_vm3, %v1042_v22, -inf }
 0x1cf   : > { %v2391_v23 = vpop.f32.mrb[14].mxu0  ;;  %v1058_v26 = vsel %vm1045_vm3, %v1041_v21, -inf }
 0x1d0   : > { %1056 = vmax.xlane.f32.xlu1 %v1055_v25  ;;  %1059 = vmax.xlane.f32.xlu0 %v1058_v26  ;;  %v1028_v27 = vpop.f32.mrb[15].mxu0  ;;  %v1044_v30 = vmul.f32 0.35355338, %v2391_v23  ;;  %v2198_v26 = vld [vmem:[%s3093_s10] ss:$0 sm:$0xff] }
 0x1d1   : > { %v1043_v29 = vmul.f32 0.35355338, %v1028_v27  ;;  %v899_v27 = vpop.f32.mrb[2].mxu1 }
 0x1d2   : > { %v1067_v35 = vsel %vm1045_vm3, %v1044_v30, -inf }
 0x1d3   : > { %v1064_v33 = vsel %vm1045_vm3, %v1043_v29, -inf }
 0x1d4   : > { %1062 = vmax.xlane.f32.xlu1 %v1061_v31  ;;  %1065 = vmax.xlane.f32.xlu0 %v1064_v33 }
 0x1d8   : > { %1068 = vmax.xlane.f32.xlu1 %v1067_v35 }
 0x255   : > { %v1048_v36 = vpop.xlane.xlu0 %1047 }
 0x256   : > { %v1070_v37 = vsub.f32 %v1037_v8, %v1048_v36 }
 0x258   : > { %v1078_v39 = vmul.f32 1.442695, %v1070_v37 }
 0x259   : > { %v1051_v40 = vpop.xlane.xlu0 %1050  ;;  %v1054_v41 = vpop.xlane.xlu1 %1053 }
 0x25a   : > { %2510 = vpow2.f32 %v1078_v39  ;;  %v1071_v42 = vsub.f32 %v1038_v9, %v1051_v40  ;;  %v1072_v43 = vsub.f32 %v1039_v13, %v1054_v41 }
 0x25c   : > { %v1080_v44 = vmul.f32 1.442695, %v1071_v42  ;;  %v1082_v45 = vmul.f32 1.442695, %v1072_v43 }
 0x25d   : > { %v1057_v47 = vpop.xlane.xlu1 %1056  ;;  %v1060_v49 = vpop.xlane.xlu0 %1059 }
 0x25e   : > { %2512 = vpow2.f32 %v1080_v44  ;;  %v1073_v50 = vsub.f32 %v1040_v3, %v1057_v47  ;;  %v1074_v53 = vsub.f32 %v1041_v21, %v1060_v49 }
 0x25f   : > { %2514 = vpow2.f32 %v1082_v45 }
 0x260   : > { %v1084_v54 = vmul.f32 1.442695, %v1073_v50  ;;  %v1086_v58 = vmul.f32 1.442695, %v1074_v53 }
 0x261   : > { %v1063_v59 = vpop.xlane.xlu1 %1062  ;;  %v1066_v62 = vpop.xlane.xlu0 %1065 }
 0x262   : > { %2516 = vpow2.f32 %v1084_v54  ;;  %v1075_v63 = vsub.f32 %v1042_v22, %v1063_v59  ;;  %v1076_v0 = vsub.f32 %v1043_v29, %v1066_v62  ;;  %v2888_v29 = vadd.f32 %v2198_v26, %v899_v27 }
 0x263   : > { %2518 = vpow2.f32 %v1086_v58 }
 0x264   : > { %v2511_v1 = vpop.eup %2510  ;;  %v1088_v2 = vmul.f32 1.442695, %v1075_v63  ;;  %v1090_v4 = vmul.f32 1.442695, %v1076_v0  ;;  %2392 = vmatprep.subr.msk.mxu0 %vm1158_vm4, %v2888_v29 }
 0x265   : > { %v1069_v5 = vpop.xlane.xlu1 %1068  ;;  %v1094_v6 = vsel %vm1045_vm3, %v2511_v1, 0.0  ;;  %2393 = vmatpush3.msk.msra.mxu0 %vm1158_vm4, %v2888_v29 }
 0x266   : > { %2520 = vpow2.f32 %v1088_v2  ;;  %v1077_v7 = vsub.f32 %v1044_v30, %v1069_v5  ;;  %1095 = vadd.xlane.f32.xlu0 %v1094_v6  ;;  %v2377_v30 = vpop.f32.mrb[3].mxu1 }
 0x267   : > { %2522 = vpow2.f32 %v1090_v4  ;;  %v1267_v4 = vld [vmem:[%s3094_s11] sm:$0xff] }
 0x268   : > { %v2513_v8 = vpop.eup %2512  ;;  %v1092_v9 = vmul.f32 1.442695, %v1077_v7  ;;  %2406 = vmatprep.subr.mxu1 %v1267_v4 }
 0x269   : > { %v2515_v10 = vpop.eup %2514  ;;  %v1097_v11 = vsel %vm1045_vm3, %v2513_v8, 0.0  ;;  %2407 = vmatpush3.msra.mxu1 %v1267_v4 }
 0x26a   : > { %2524 = vpow2.f32 %v1092_v9  ;;  %1098 = vadd.xlane.f32.xlu1 %v1097_v11  ;;  %v1100_v12 = vsel %vm1045_vm3, %v2515_v10, 0.0 }
 0x26b   : > { %1101 = vadd.xlane.f32.xlu0 %v1100_v12 }
 0x26c   : > { %v2865_v13 = vpop.eup %2516 }
 0x26d   : > { %v2867_v3 = vpop.eup %2518  ;;  %v1103_v15 = vsel %vm1045_vm3, %v2865_v13, 0.0 }
 0x26e   : > { %1104 = vadd.xlane.f32.xlu1 %v1103_v15  ;;  %v1106_v17 = vsel %vm1045_vm3, %v2867_v3, 0.0 }
 0x26f   : > { %1107 = vadd.xlane.f32.xlu0 %v1106_v17 }
 0x270   : > { %v2873_v18 = vpop.eup %2520 }
 0x271   : > { %v2875_v19 = vpop.eup %2522  ;;  %v1109_v21 = vsel %vm1045_vm3, %v2873_v18, 0.0 }
 0x272   : > { %1110 = vadd.xlane.f32.xlu1 %v1109_v21  ;;  %v1112_v22 = vsel %vm1045_vm3, %v2875_v19, 0.0 }
 0x273   : > { %1113 = vadd.xlane.f32.xlu0 %v1112_v22 }
 0x274   : > { %v2881_v23 = vpop.eup %2524 }
 0x275   : > { %v1115_v25 = vsel %vm1045_vm3, %v2881_v23, 0.0 }
 0x276   : > { %1116 = vadd.xlane.f32.xlu1 %v1115_v25 }
 0x287   : > { %1411 = vrot.lane.b32.xlu1 %v2800_v48, %s2601_s27 }
 0x289   : > { %1427 = vrot.lane.b32.xlu0 %v2798_v46, %s2601_s27 }
 0x28b   : > { %1413 = vrot.lane.b32.xlu1 %v2808_v51, %s2601_s27 }
 0x28d   : > { %1417 = vrot.lane.b32.xlu0 %v2816_v55, %s2601_s27 }
 0x28f   : > { %1415 = vrot.lane.b32.xlu1 %v2810_v52, %s2601_s27 }
 0x291   : > { %1421 = vrot.lane.b32.xlu0 %v2820_v57, %s2601_s27 }
 0x293   : > { %1419 = vrot.lane.b32.xlu1 %v2818_v56, %s2601_s27 }
 0x295   : > { %1425 = vrot.lane.b32.xlu0 %v2828_v61, %s2601_s27 }
 0x297   : > { %1423 = vrot.lane.b32.xlu1 %v2826_v60, %s2601_s27 }
 0x2f3   : > { %v1096_v46 = vpop.xlane.xlu0 %1095 }
 0x2f4   : > { %2526 = vrcp.f32 %v1096_v46 }
 0x2f7   : > { %v1099_v48 = vpop.xlane.xlu1 %1098 }
 0x2f8   : > { %2528 = vrcp.f32 %v1099_v48  ;;  %v1102_v51 = vpop.xlane.xlu0 %1101 }
 0x2f9   : > { %2530 = vrcp.f32 %v1102_v51 }
 0x2fb   : > { %v1105_v55 = vpop.xlane.xlu1 %1104 }
 0x2fc   : > { %2532 = vrcp.f32 %v1105_v55  ;;  %v1108_v52 = vpop.xlane.xlu0 %1107 }
 0x2fd   : > { %2534 = vrcp.f32 %v1108_v52 }
 0x2fe   : > { %v2527_v57 = vpop.eup %2526 }
 0x2ff   : > { %v1111_v31 = vpop.xlane.xlu1 %1110  ;;  %v1126_v33 = vmul.f32 %v2527_v57, %v2511_v1 }
 0x300   : > { %2536 = vrcp.f32 %v1111_v31  ;;  %v1114_v56 = vpop.xlane.xlu0 %1113 }
 0x301   : > { %2538 = vrcp.f32 %v1114_v56  ;;  %2394 = vmatprep.mubr.msk.f32.mxu0 %vm1045_vm3, %v1126_v33 }
 0x302   : > { %v2529_v61 = vpop.eup %2528 }
 0x303   : > { %v2531_v60 = vpop.eup %2530  ;;  %v1127_v35 = vmul.f32 %v2529_v61, %v2513_v8  ;;  %v1117_v36 = vpop.xlane.xlu1 %1116 }
 0x304   : > { %2540 = vrcp.f32 %v1117_v36  ;;  %v1428_v37 = vpop.permute.xlu0 %1427  ;;  %v1128_v39 = vmul.f32 %v2531_v60, %v2515_v10 }
 0x305   : > { %2420 = vmatprep.subr.msk.mxu0 %vm904_vm2, %v1428_v37  ;;  %2395 = vmatmul.mubr.msk.f32.vlgmr.msra.gmra.mrb[16].mxu0 %vm1045_vm3, %v1127_v35 }
 0x306   : > { %v2533_v40 = vpop.eup %2532  ;;  %2421 = vmatpush3.xpose.msk.msra.mxu0 %vm904_vm2, %v1428_v37  ;;  %2397 = vmatprep.mubr.msk.f32.mxu0 %vm1045_vm3, %v1128_v39 }
 0x307   : > { %v2535_v41 = vpop.eup %2534  ;;  %v1412_v42 = vpop.permute.xlu1 %1411  ;;  %v1129_v43 = vmul.f32 %v2533_v40, %v2865_v13 }
 0x308   : > { %v1130_v44 = vmul.f32 %v2535_v41, %v2867_v3  ;;  %v1418_v62 = vpop.permute.xlu0 %1417 }
 0x309   : > { %2398 = vmatmul.mubr.msk.f32.gmra.mrb[18].mxu0 %vm1045_vm3, %v1129_v43 }
 0x30a   : > { %v2537_v45 = vpop.eup %2536  ;;  %2400 = vmatprep.mubr.msk.f32.mxu0 %vm1045_vm3, %v1130_v44 }
 0x30b   : > { %v2539_v47 = vpop.eup %2538  ;;  %v1414_v49 = vpop.permute.xlu1 %1413  ;;  %v1131_v50 = vmul.f32 %v2537_v45, %v2873_v18 }
 0x30c   : > { %v1132_v53 = vmul.f32 %v2539_v47, %v2875_v19  ;;  %v1422_v0 = vpop.permute.xlu0 %1421 }
 0x30d   : > { %2401 = vmatmul.mubr.msk.f32.gmra.mrb[20].mxu0 %vm1045_vm3, %v1131_v50 }
 0x30e   : > { %v2541_v54 = vpop.eup %2540  ;;  %2403 = vmatprep.mubr.msk.f32.mxu0 %vm1045_vm3, %v1132_v53 }
 0x30f   : > { %v1133_v58 = vmul.f32 %v2541_v54, %v2881_v23  ;;  %v1416_v59 = vpop.permute.xlu1 %1415 }
 0x310   : > { %v1426_v2 = vpop.permute.xlu0 %1425 }
 0x311   : > { %2404 = vmatmul.mubr.msk.f32.gmra.mrb[22].mxu0 %vm1045_vm3, %v1133_v58 }
 0x312   : > { %2422 = vmatprep.mubr.msk.f32.mxu0 %vm904_vm2, %v1412_v42 }
 0x313   : > { %v1420_v63 = vpop.permute.xlu1 %1419 }
 0x315   : > { %2423 = vmatmul.mubr.msk.f32.vlgmr.msra.gmra.mrb[24].mxu0 %vm904_vm2, %v1414_v49 }
 0x316   : > { %2425 = vmatprep.mubr.msk.f32.mxu0 %vm904_vm2, %v1416_v59 }
 0x317   : > { %v1424_v1 = vpop.permute.xlu1 %1423 }
 0x319   : > { %2426 = vmatmul.mubr.msk.f32.gmra.mrb[26].mxu0 %vm904_vm2, %v1418_v62 }
 0x31a   : > { %2428 = vmatprep.mubr.msk.f32.mxu0 %vm904_vm2, %v1420_v63 }
 0x31d   : > { %2429 = vmatmul.mubr.msk.f32.gmra.mrb[28].mxu0 %vm904_vm2, %v1422_v0 }
 0x31e   : > { %2431 = vmatprep.mubr.msk.f32.mxu0 %vm904_vm2, %v1424_v1 }
 0x321   : > { %2432 = vmatmul.mubr.msk.f32.gmra.mrb[30].mxu0 %vm904_vm2, %v1426_v2 }
 0x3d8   : > { %v2396_v5 = vpop.f32.mrb[16].mxu0 }
 0x3d9   : > { %v1228_v6 = vpop.f32.mrb[17].mxu0 }
 0x3da   : > { %2408 = vmatprep.mubr.msk.f32.mxu1 %vm904_vm2, %v1228_v6 }
 0x3db   : > { %2409 = vmatmul.mubr.msk.f32.vlgmr.msra.gmra.mrb[4].mxu1 %vm904_vm2, %v2396_v5 }
 0x3dc   : > { %v2399_v7 = vpop.f32.mrb[18].mxu0 }
 0x3dd   : > { %v1238_v8 = vpop.f32.mrb[19].mxu0 }
 0x3de   : > { %2411 = vmatprep.mubr.msk.f32.mxu1 %vm904_vm2, %v1238_v8 }
 0x3df   : > { %2412 = vmatmul.mubr.msk.f32.gmra.mrb[6].mxu1 %vm904_vm2, %v2399_v7 }
 0x3e0   : > { %v2402_v9 = vpop.f32.mrb[20].mxu0 }
 0x3e1   : > { %v1248_v10 = vpop.f32.mrb[21].mxu0 }
 0x3e2   : > { %2414 = vmatprep.mubr.msk.f32.mxu1 %vm904_vm2, %v1248_v10 }
 0x3e3   : > { %2415 = vmatmul.mubr.msk.f32.gmra.mrb[8].mxu1 %vm904_vm2, %v2402_v9 }
 0x3e4   : > { %v2405_v11 = vpop.f32.mrb[22].mxu0 }
 0x3e5   : > { %v1258_v12 = vpop.f32.mrb[23].mxu0 }
 0x3e6   : > { %2417 = vmatprep.mubr.msk.f32.mxu1 %vm904_vm2, %v1258_v12 }
 0x3e7   : > { %2418 = vmatmul.mubr.msk.f32.gmra.mrb[10].mxu1 %vm904_vm2, %v2405_v11 }
 0x3e8   : > { %v2424_v13 = vpop.f32.mrb[24].mxu0 }
 0x3e9   : > { %v1553_v3 = vmul.f32 0.35355338, %v2424_v13  ;;  %v1513_v15 = vpop.f32.mrb[25].mxu0 }
 0x3ea   : > { %v1552_v17 = vmul.f32 0.35355338, %v1513_v15 }
 0x3eb   : > { %v1563_v18 = vsel %vm1045_vm3, %v1553_v3, -inf }
 0x3ec   : > { %1564 = vmax.xlane.f32.xlu0 %v1563_v18  ;;  %v2427_v19 = vpop.f32.mrb[26].mxu0  ;;  %v1560_v21 = vsel %vm1045_vm3, %v1552_v17, -inf }
 0x3ed   : > { %1561 = vmax.xlane.f32.xlu1 %v1560_v21  ;;  %v1523_v22 = vpop.f32.mrb[27].mxu0  ;;  %v1555_v25 = vmul.f32 0.35355338, %v2427_v19 }
 0x3ee   : > { %v1554_v23 = vmul.f32 0.35355338, %v1523_v22 }
 0x3ef   : > { %v1569_v55 = vsel %vm1045_vm3, %v1555_v25, -inf }
 0x3f0   : > { %v2430_v26 = vpop.f32.mrb[28].mxu0  ;;  %v1566_v27 = vsel %vm1045_vm3, %v1554_v23, -inf }
 0x3f1   : > { %1567 = vmax.xlane.f32.xlu0 %v1566_v27  ;;  %v1533_v30 = vpop.f32.mrb[29].mxu0  ;;  %v1557_v48 = vmul.f32 0.35355338, %v2430_v26 }
 0x3f2   : > { %v1556_v46 = vmul.f32 0.35355338, %v1533_v30 }
 0x3f3   : > { %v1575_v56 = vsel %vm1045_vm3, %v1557_v48, -inf }
 0x3f4   : > { %v2433_v51 = vpop.f32.mrb[30].mxu0  ;;  %v1572_v52 = vsel %vm1045_vm3, %v1556_v46, -inf }
 0x3f5   : > { %1570 = vmax.xlane.f32.xlu0 %v1569_v55  ;;  %1573 = vmax.xlane.f32.xlu1 %v1572_v52  ;;  %v1543_v57 = vpop.f32.mrb[31].mxu0  ;;  %v1559_v33 = vmul.f32 0.35355338, %v2433_v51 }
 0x3f6   : > { %v1558_v31 = vmul.f32 0.35355338, %v1543_v57 }
 0x3f7   : > { %v1581_v60 = vsel %vm1045_vm3, %v1559_v33, -inf }
 0x3f8   : > { %v1578_v61 = vsel %vm1045_vm3, %v1558_v31, -inf }
 0x3f9   : > { %1576 = vmax.xlane.f32.xlu0 %v1575_v56  ;;  %1579 = vmax.xlane.f32.xlu1 %v1578_v61 }
 0x3fd   : > { %1582 = vmax.xlane.f32.xlu0 %v1581_v60 }
 0x479   : > { %v1565_v35 = vpop.xlane.xlu0 %1564 }
 0x47a   : > { %v1585_v36 = vsub.f32 %v1553_v3, %v1565_v35  ;;  %v1562_v37 = vpop.xlane.xlu1 %1561 }
 0x47b   : > { %v1584_v39 = vsub.f32 %v1552_v17, %v1562_v37 }
 0x47c   : > { %v1594_v40 = vmul.f32 1.442695, %v1585_v36 }
 0x47d   : > { %v1592_v41 = vmul.f32 1.442695, %v1584_v39 }
 0x47e   : > { %2542 = vpow2.f32 %v1594_v40  ;;  %v1568_v42 = vpop.xlane.xlu0 %1567 }
 0x47f   : > { %2544 = vpow2.f32 %v1592_v41  ;;  %v1586_v43 = vsub.f32 %v1554_v23, %v1568_v42 }
 0x481   : > { %v1596_v44 = vmul.f32 1.442695, %v1586_v43 }
 0x482   : > { %v1574_v45 = vpop.xlane.xlu1 %1573  ;;  %v1571_v47 = vpop.xlane.xlu0 %1570 }
 0x483   : > { %2546 = vpow2.f32 %v1596_v44  ;;  %v1588_v49 = vsub.f32 %v1556_v46, %v1574_v45  ;;  %v1587_v50 = vsub.f32 %v1555_v25, %v1571_v47  ;;  %v1781_v45 = vld [vmem:[%s3094_s11 + $0x8] sm:$0xff] }
 0x485   : > { %v1600_v53 = vmul.f32 1.442695, %v1588_v49  ;;  %v1598_v54 = vmul.f32 1.442695, %v1587_v50 }
 0x486   : > { %v1580_v58 = vpop.xlane.xlu1 %1579  ;;  %v1577_v59 = vpop.xlane.xlu0 %1576 }
 0x487   : > { %2548 = vpow2.f32 %v1600_v53  ;;  %v1590_v62 = vsub.f32 %v1558_v31, %v1580_v58  ;;  %v1589_v63 = vsub.f32 %v1557_v48, %v1577_v59 }
 0x488   : > { %v2543_v0 = vpop.eup %2542  ;;  %2550 = vpow2.f32 %v1598_v54 }
 0x489   : > { %v2545_v1 = vpop.eup %2544  ;;  %v1604_v2 = vmul.f32 1.442695, %v1590_v62  ;;  %v1602_v4 = vmul.f32 1.442695, %v1589_v63  ;;  %v1611_v5 = vsel %vm1045_vm3, %v2543_v0, 0.0 }
 0x48a   : > { %1612 = vadd.xlane.f32.xlu0 %v1611_v5  ;;  %v1583_v6 = vpop.xlane.xlu0 %1582  ;;  %v1608_v7 = vsel %vm1045_vm3, %v2545_v1, 0.0  ;;  %v2226_v63 = vld [vmem:[%s3095_s12] ss:$0 sm:$0xff] }
 0x48b   : > { %2552 = vpow2.f32 %v1604_v2  ;;  %v1591_v8 = vsub.f32 %v1559_v33, %v1583_v6  ;;  %1609 = vadd.xlane.f32.xlu1 %v1608_v7 }
 0x48c   : > { %2554 = vpow2.f32 %v1602_v4 }
 0x48d   : > { %v2547_v9 = vpop.eup %2546  ;;  %v1606_v10 = vmul.f32 1.442695, %v1591_v8 }
 0x48e   : > { %v1614_v11 = vsel %vm1045_vm3, %v2547_v9, 0.0 }
 0x48f   : > { %2556 = vpow2.f32 %v1606_v10  ;;  %1615 = vadd.xlane.f32.xlu1 %v1614_v11 }
 0x491   : > { %v2549_v12 = vpop.eup %2548 }
 0x492   : > { %v2551_v13 = vpop.eup %2550  ;;  %v1620_v3 = vsel %vm1045_vm3, %v2549_v12, 0.0 }
 0x493   : > { %1621 = vadd.xlane.f32.xlu1 %v1620_v3  ;;  %v1617_v15 = vsel %vm1045_vm3, %v2551_v13, 0.0 }
 0x494   : > { %1618 = vadd.xlane.f32.xlu0 %v1617_v15 }
 0x495   : > { %v2553_v17 = vpop.eup %2552 }
 0x496   : > { %v2555_v18 = vpop.eup %2554  ;;  %v1626_v19 = vsel %vm1045_vm3, %v2553_v17, 0.0 }
 0x497   : > { %1627 = vadd.xlane.f32.xlu1 %v1626_v19  ;;  %v1623_v21 = vsel %vm1045_vm3, %v2555_v18, 0.0 }
 0x498   : > { %1624 = vadd.xlane.f32.xlu0 %v1623_v21 }
 0x499   : > { %v2557_v22 = vpop.eup %2556 }
 0x49a   : > { %v1629_v23 = vsel %vm1045_vm3, %v2557_v22, 0.0 }
 0x49c   : > { %1630 = vadd.xlane.f32.xlu0 %v1629_v23 }
 0x4a8   : > { %1648 = vrot.lane.b32.xlu1 %v2888_v29, %s2601_s27  ;;  %s3055_s27 = scalar_lea.vmem %s3098_s15, %s2717_s23 }
 0x517   : > { %v1613_v26 = vpop.xlane.xlu0 %1612 }
 0x518   : > { %v1610_v25 = vpop.xlane.xlu1 %1609 }
 0x519   : > { %2558 = vrcp.f32 %v1610_v25 }
 0x51a   : > { %2560 = vrcp.f32 %v1613_v26 }
 0x51c   : > { %v1616_v27 = vpop.xlane.xlu1 %1615 }
 0x51d   : > { %2562 = vrcp.f32 %v1616_v27 }
 0x520   : > { %v1622_v30 = vpop.xlane.xlu1 %1621 }
 0x521   : > { %2564 = vrcp.f32 %v1622_v30  ;;  %v1619_v46 = vpop.xlane.xlu0 %1618 }
 0x522   : > { %2566 = vrcp.f32 %v1619_v46 }
 0x523   : > { %v2559_v48 = vpop.eup %2558 }
 0x524   : > { %v1628_v51 = vpop.xlane.xlu1 %1627  ;;  %v1640_v55 = vmul.f32 %v2559_v48, %v2545_v1  ;;  %v2561_v57 = vpop.eup %2560 }
 0x525   : > { %2568 = vrcp.f32 %v1628_v51  ;;  %v1625_v52 = vpop.xlane.xlu0 %1624  ;;  %v1641_v33 = vmul.f32 %v2561_v57, %v2543_v0 }
 0x526   : > { %2570 = vrcp.f32 %v1625_v52  ;;  %2436 = vmatprep.mubr.msk.f32.mxu1 %vm1045_vm3, %v1640_v55 }
 0x527   : > { %v2563_v29 = vpop.eup %2562 }
 0x528   : > { %v1649_v31 = vpop.permute.xlu1 %1648  ;;  %v1642_v61 = vmul.f32 %v2563_v29, %v2547_v9 }
 0x529   : > { %v1631_v56 = vpop.xlane.xlu0 %1630  ;;  %2434 = vmatprep.subr.msk.mxu1 %vm1158_vm4, %v1649_v31 }
 0x52a   : > { %2572 = vrcp.f32 %v1631_v56  ;;  %2435 = vmatpush3.msk.msra.mxu1 %vm1158_vm4, %v1649_v31 }
 0x52b   : > { %v2565_v60 = vpop.eup %2564  ;;  %2437 = vmatmul.mubr.msk.f32.vlgmr.msra.gmra.mrb[12].mxu1 %vm1045_vm3, %v1641_v33  ;;  %2448 = vmatprep.subr.mxu1 %v1781_v45 }
 0x52c   : > { %v2567_v35 = vpop.eup %2566  ;;  %2439 = vmatprep.mubr.msk.f32.mxu1 %vm1045_vm3, %v1642_v61  ;;  %v1644_v37 = vmul.f32 %v2565_v60, %v2549_v12  ;;  %2449 = vmatpush3.msra.mxu1 %v1781_v45 }
 0x52d   : > { %v1643_v36 = vmul.f32 %v2567_v35, %v2551_v13 }
 0x52f   : > { %v2569_v39 = vpop.eup %2568  ;;  %2440 = vmatmul.mubr.msk.f32.gmra.mrb[14].mxu1 %vm1045_vm3, %v1643_v36 }
 0x530   : > { %v2571_v40 = vpop.eup %2570  ;;  %2442 = vmatprep.mubr.msk.f32.mxu1 %vm1045_vm3, %v1644_v37  ;;  %v1646_v42 = vmul.f32 %v2569_v39, %v2553_v17 }
 0x531   : > { %v1645_v41 = vmul.f32 %v2571_v40, %v2555_v18 }
 0x533   : > { %2443 = vmatmul.mubr.msk.f32.gmra.mrb[16].mxu1 %vm1045_vm3, %v1645_v41 }
 0x534   : > { %v2573_v43 = vpop.eup %2572  ;;  %2445 = vmatprep.mubr.msk.f32.mxu1 %vm1045_vm3, %v1646_v42 }
 0x535   : > { %v1647_v44 = vmul.f32 %v2573_v43, %v2557_v22 }
 0x537   : > { %2446 = vmatmul.mubr.msk.f32.gmra.mrb[18].mxu1 %vm1045_vm3, %v1647_v44 }
 0x5fe   : > { %v2438_v47 = vpop.f32.mrb[12].mxu1 }
 0x5ff   : > { %v1742_v49 = vpop.f32.mrb[13].mxu1 }
 0x600   : > { %2450 = vmatprep.mubr.msk.f32.mxu1 %vm904_vm2, %v1742_v49 }
 0x601   : > { %2451 = vmatmul.mubr.msk.f32.vlgmr.msra.gmra.mrb[4].mxu1 %vm904_vm2, %v2438_v47 }
 0x602   : > { %v2441_v50 = vpop.f32.mrb[14].mxu1 }
 0x603   : > { %v1752_v53 = vpop.f32.mrb[15].mxu1 }
 0x604   : > { %2453 = vmatprep.mubr.msk.f32.mxu1 %vm904_vm2, %v1752_v53 }
 0x605   : > { %2454 = vmatmul.mubr.msk.f32.gmra.mrb[6].mxu1 %vm904_vm2, %v2441_v50 }
 0x606   : > { %v2444_v54 = vpop.f32.mrb[16].mxu1 }
 0x607   : > { %v1762_v58 = vpop.f32.mrb[17].mxu1 }
 0x608   : > { %2456 = vmatprep.mubr.msk.f32.mxu1 %vm904_vm2, %v1762_v58 }
 0x609   : > { %2457 = vmatmul.mubr.msk.f32.gmra.mrb[8].mxu1 %vm904_vm2, %v2444_v54 }
 0x60a   : > { %v2447_v59 = vpop.f32.mrb[18].mxu1 }
 0x60b   : > { %v1772_v62 = vpop.f32.mrb[19].mxu1 }
 0x60c   : > { %2459 = vmatprep.mubr.msk.f32.mxu1 %vm904_vm2, %v1772_v62 }
 0x60d   : > { %2460 = vmatmul.mubr.msk.f32.gmra.mrb[10].mxu1 %vm904_vm2, %v2447_v59 }
 0x6d4   : > { %v2452_v0 = vpop.f32.mrb[4].mxu1 }
 0x6d5   : > { %v2482_v1 = vadd.f32 %v2452_v0, %v2226_v63  ;;  %v1872_v2 = vpop.f32.mrb[5].mxu1 }
 0x6d6   : > { %v2483_v4 = vadd.f32 %v2226_v63, %v1872_v2 }
 0x6d7   : > { %v1920_v5 = vadd.f32 %v2482_v1, %v2742_v16 }
 0x6d8   : > { %v2455_v6 = vpop.f32.mrb[6].mxu1  ;;  %v1919_v10 = vadd.f32 %v2483_v4, %v2734_v14 }
 0x6d9   : > { %v2484_v7 = vadd.f32 %v2455_v6, %v2226_v63  ;;  %v1882_v8 = vpop.f32.mrb[7].mxu1  ;;  %v1930_v9 = vsel %vm605_vm1, %v1920_v5, 0.0 }
 0x6da   : > { %1931 = vadd.xlane.f32.xlu0 %v1930_v9  ;;  %v2485_v12 = vadd.f32 %v2226_v63, %v1882_v8  ;;  %v1927_v3 = vsel %vm605_vm1, %v1919_v10, 0.0 }
 0x6db   : > { %v1922_v15 = vadd.f32 %v2484_v7, %v2756_v24 }
 0x6dc   : > { %v2458_v11 = vpop.f32.mrb[8].mxu1  ;;  %v1921_v23 = vadd.f32 %v2485_v12, %v2751_v20 }
 0x6dd   : > { %v1892_v13 = vpop.f32.mrb[9].mxu1  ;;  %v2486_v19 = vadd.f32 %v2458_v11, %v2226_v63  ;;  %v1936_v22 = vsel %vm605_vm1, %v1922_v15, 0.0 }
 0x6de   : > { %v2487_v17 = vadd.f32 %v2226_v63, %v1892_v13  ;;  %1928 = vadd.xlane.f32.xlu0 %v1927_v3  ;;  %v1933_v26 = vsel %vm605_vm1, %v1921_v23, 0.0 }
 0x6df   : > { %v1924_v24 = vadd.f32 %v2486_v19, %v2772_v32 }
 0x6e0   : > { %v2461_v18 = vpop.f32.mrb[10].mxu1  ;;  %v1923_v16 = vadd.f32 %v2487_v17, %v2763_v28 }
 0x6e1   : > { %v1902_v21 = vpop.f32.mrb[11].mxu1  ;;  %v2488_v27 = vadd.f32 %v2461_v18, %v2226_v63  ;;  %v1942_v30 = vsel %vm605_vm1, %v1924_v24, 0.0 }
 0x6e2   : > { %1937 = vadd.xlane.f32.xlu0 %v1936_v22  ;;  %v1939_v14 = vsel %vm605_vm1, %v1923_v16, 0.0  ;;  %v2489_v25 = vadd.f32 %v2226_v63, %v1902_v21  ;;  %v2253_v22 = vld [vmem:[%s3096_s13] ss:$0 sm:$0xff] }
 0x6e3   : > { %1940 = vadd.xlane.f32.xlu1 %v1939_v14  ;;  %v1926_v20 = vadd.f32 %v2488_v27, %v2785_v38 }
 0x6e4   : > { %v1925_v28 = vadd.f32 %v2489_v25, %v2776_v34 }
 0x6e5   : > { %v1948_v48 = vsel %vm605_vm1, %v1926_v20, 0.0 }
 0x6e6   : > { %1934 = vadd.xlane.f32.xlu0 %v1933_v26  ;;  %v1945_v46 = vsel %vm605_vm1, %v1925_v28, 0.0  ;;  %v2254_v26 = vld [vmem:[%s3097_s14] ss:$0 sm:$0xff] }
 0x6ea   : > { %1943 = vadd.xlane.f32.xlu0 %v1942_v30 }
 0x6ee   : > { %1946 = vadd.xlane.f32.xlu0 %v1945_v46 }
 0x6f2   : > { %1949 = vadd.xlane.f32.xlu0 %v1948_v48 }
 0x767   : > { %v1932_v51 = vpop.xlane.xlu0 %1931 }
 0x768   : > { %v1953_v55 = vmul.f32 0.03125, %v1932_v51 }
 0x76a   : > { %v3004_v52 = vsub.f32 %v1920_v5, %v1953_v55 }
 0x76b   : > { %v1929_v32 = vpop.xlane.xlu0 %1928 }
 0x76c   : > { %v1952_v57 = vmul.f32 0.03125, %v1929_v32  ;;  %v1969_v29 = vmul.f32 %v3004_v52, %v3004_v52 }
 0x76e   : > { %v3008_v31 = vsub.f32 %v1919_v10, %v1952_v57  ;;  %v1979_v34 = vsel %vm605_vm1, %v1969_v29, 0.0 }
 0x76f   : > { %v1938_v33 = vpop.xlane.xlu0 %1937  ;;  %1980 = vadd.xlane.f32.xlu0 %v1979_v34 }
 0x770   : > { %v1955_v38 = vmul.f32 0.03125, %v1938_v33  ;;  %v1968_v56 = vmul.f32 %v3008_v31, %v3008_v31  ;;  %v1941_v35 = vpop.xlane.xlu1 %1940 }
 0x771   : > { %v1956_v40 = vmul.f32 0.03125, %v1941_v35 }
 0x772   : > { %v3013_v61 = vsub.f32 %v1922_v15, %v1955_v38  ;;  %v1976_v60 = vsel %vm605_vm1, %v1968_v56, 0.0 }
 0x773   : > { %v1935_v36 = vpop.xlane.xlu0 %1934  ;;  %1977 = vadd.xlane.f32.xlu0 %v1976_v60  ;;  %v3023_v47 = vsub.f32 %v1923_v16, %v1956_v40 }
 0x774   : > { %v1954_v37 = vmul.f32 0.03125, %v1935_v36  ;;  %v1971_v39 = vmul.f32 %v3013_v61, %v3013_v61 }
 0x775   : > { %v1972_v63 = vmul.f32 %v3023_v47, %v3023_v47 }
 0x776   : > { %v3018_v41 = vsub.f32 %v1921_v23, %v1954_v37  ;;  %v1985_v42 = vsel %vm605_vm1, %v1971_v39, 0.0 }
 0x777   : > { %v1944_v43 = vpop.xlane.xlu0 %1943  ;;  %1986 = vadd.xlane.f32.xlu0 %v1985_v42  ;;  %v1988_v5 = vsel %vm605_vm1, %v1972_v63, 0.0 }
 0x778   : > { %v1957_v44 = vmul.f32 0.03125, %v1944_v43  ;;  %v1970_v45 = vmul.f32 %v3018_v41, %v3018_v41 }
 0x77a   : > { %v3025_v49 = vsub.f32 %v1924_v24, %v1957_v44  ;;  %v1982_v50 = vsel %vm605_vm1, %v1970_v45, 0.0 }
 0x77b   : > { %1983 = vadd.xlane.f32.xlu0 %v1982_v50  ;;  %v1947_v53 = vpop.xlane.xlu0 %1946 }
 0x77c   : > { %v1958_v54 = vmul.f32 0.03125, %v1947_v53  ;;  %v1973_v58 = vmul.f32 %v3025_v49, %v3025_v49 }
 0x77e   : > { %v3030_v59 = vsub.f32 %v1925_v28, %v1958_v54  ;;  %v1991_v62 = vsel %vm605_vm1, %v1973_v58, 0.0 }
 0x77f   : > { %1992 = vadd.xlane.f32.xlu0 %v1991_v62  ;;  %v1950_v0 = vpop.xlane.xlu0 %1949 }
 0x780   : > { %v1959_v1 = vmul.f32 0.03125, %v1950_v0  ;;  %v1974_v2 = vmul.f32 %v3030_v59, %v3030_v59 }
 0x782   : > { %v3037_v4 = vsub.f32 %v1926_v20, %v1959_v1  ;;  %v1994_v6 = vsel %vm605_vm1, %v1974_v2, 0.0 }
 0x783   : > { %1989 = vadd.xlane.f32.xlu0 %v1988_v5  ;;  %1995 = vadd.xlane.f32.xlu1 %v1994_v6 }
 0x784   : > { %v1975_v7 = vmul.f32 %v3037_v4, %v3037_v4 }
 0x786   : > { %v1997_v8 = vsel %vm605_vm1, %v1975_v7, 0.0 }
 0x787   : > { %1998 = vadd.xlane.f32.xlu0 %v1997_v8 }
 0x7fc   : > { %v1981_v9 = vpop.xlane.xlu0 %1980 }
 0x7fd   : > { %v2001_v10 = vmul.f32 0.03125, %v1981_v9 }
 0x7ff   : > { %v2009_v11 = vadd.f32 1e-05, %v2001_v10 }
 0x800   : > { %v1978_v12 = vpop.xlane.xlu0 %1977 }
 0x801   : > { %2574 = vrsqrt.f32 %v2009_v11  ;;  %v2000_v13 = vmul.f32 0.03125, %v1978_v12 }
 0x803   : > { %v2008_v3 = vadd.f32 1e-05, %v2000_v13 }
 0x804   : > { %v1987_v15 = vpop.xlane.xlu0 %1986 }
 0x805   : > { %2576 = vrsqrt.f32 %v2008_v3  ;;  %v2003_v17 = vmul.f32 0.03125, %v1987_v15 }
 0x807   : > { %v2011_v18 = vadd.f32 1e-05, %v2003_v17 }
 0x808   : > { %v1984_v16 = vpop.xlane.xlu0 %1983 }
 0x809   : > { %2578 = vrsqrt.f32 %v2011_v18  ;;  %v2002_v19 = vmul.f32 0.03125, %v1984_v16 }
 0x80b   : > { %v2575_v21 = vpop.eup %2574  ;;  %v2010_v23 = vadd.f32 1e-05, %v2002_v19 }
 0x80c   : > { %v2025_v14 = vmul.f32 %v2575_v21, %v3004_v52  ;;  %v1993_v25 = vpop.xlane.xlu0 %1992 }
 0x80d   : > { %2580 = vrsqrt.f32 %v2010_v23  ;;  %v2005_v24 = vmul.f32 0.03125, %v1993_v25 }
 0x80e   : > { %v2040_v27 = vmul.f32 %v2253_v22, %v2025_v14 }
 0x80f   : > { %v2577_v30 = vpop.eup %2576  ;;  %v2013_v28 = vadd.f32 1e-05, %v2005_v24 }
 0x810   : > { %v2055_v46 = vadd.f32 %v2254_v26, %v2040_v27  ;;  %v2024_v20 = vmul.f32 %v2577_v30, %v3008_v31  ;;  %v1996_v48 = vpop.xlane.xlu1 %1995  ;;  %v1990_v51 = vpop.xlane.xlu0 %1989 }
 0x811   : > { %2582 = vrsqrt.f32 %v2013_v28  ;;  %v2006_v55 = vmul.f32 0.03125, %v1996_v48  ;;  %v2004_v52 = vmul.f32 0.03125, %v1990_v51 }
 0x812   : > { %2063 = vst.msk [vmem:[%s3055_s27 + $0x8] sm:$0xff] %vm605_vm1, %v2055_v46  ;;  %v2039_v32 = vmul.f32 %v2253_v22, %v2024_v20 }
 0x813   : > { %v2579_v57 = vpop.eup %2578  ;;  %v2014_v29 = vadd.f32 1e-05, %v2006_v55  ;;  %v2012_v34 = vadd.f32 1e-05, %v2004_v52 }
 0x814   : > { %v2054_v33 = vadd.f32 %v2254_v26, %v2039_v32  ;;  %v2027_v38 = vmul.f32 %v2579_v57, %v3013_v61  ;;  %v1999_v56 = vpop.xlane.xlu0 %1998 }
 0x815   : > { %2584 = vrsqrt.f32 %v2014_v29  ;;  %v2007_v31 = vmul.f32 0.03125, %v1999_v56 }
 0x816   : > { %2062 = vst.msk [vmem:[%s3055_s27] sm:$0xff] %vm605_vm1, %v2054_v33  ;;  %v2042_v60 = vmul.f32 %v2253_v22, %v2027_v38  ;;  %2586 = vrsqrt.f32 %v2012_v34 }
 0x817   : > { %v2581_v35 = vpop.eup %2580  ;;  %v2015_v36 = vadd.f32 1e-05, %v2007_v31 }
 0x818   : > { %v2057_v37 = vadd.f32 %v2254_v26, %v2042_v60  ;;  %v2026_v39 = vmul.f32 %v2581_v35, %v3018_v41 }
 0x819   : > { %2588 = vrsqrt.f32 %v2015_v36 }
 0x81a   : > { %2065 = vst.msk [vmem:[%s3055_s27 + $0x18] sm:$0xff] %vm605_vm1, %v2057_v37  ;;  %v2041_v40 = vmul.f32 %v2253_v22, %v2026_v39 }
 0x81b   : > { %v2583_v42 = vpop.eup %2582 }
 0x81c   : > { %v2056_v61 = vadd.f32 %v2254_v26, %v2041_v40  ;;  %v2029_v43 = vmul.f32 %v2583_v42, %v3025_v49 }
 0x81e   : > { %2064 = vst.msk [vmem:[%s3055_s27 + $0x10] sm:$0xff] %vm605_vm1, %v2056_v61  ;;  %v2044_v44 = vmul.f32 %v2253_v22, %v2029_v43 }
 0x81f   : > { %v2585_v45 = vpop.eup %2584 }
 0x820   : > { %v2587_v50 = vpop.eup %2586  ;;  %v2059_v53 = vadd.f32 %v2254_v26, %v2044_v44  ;;  %v2030_v54 = vmul.f32 %v2585_v45, %v3030_v59 }
 0x821   : > { %v2028_v41 = vmul.f32 %v2587_v50, %v3023_v47 }
 0x822   : > { %2067 = vst.msk [vmem:[%s3055_s27 + $0x28] sm:$0xff] %vm605_vm1, %v2059_v53  ;;  %v2045_v58 = vmul.f32 %v2253_v22, %v2030_v54 }
 0x823   : > { %v2589_v62 = vpop.eup %2588  ;;  %v2043_v63 = vmul.f32 %v2253_v22, %v2028_v41 }
 0x824   : > { %v2060_v0 = vadd.f32 %v2254_v26, %v2045_v58  ;;  %v2031_v49 = vmul.f32 %v2589_v62, %v3037_v4 }
 0x825   : > { %v2058_v1 = vadd.f32 %v2254_v26, %v2043_v63 }
 0x826   : > { %2068 = vst.msk [vmem:[%s3055_s27 + $0x30] sm:$0xff] %vm605_vm1, %v2060_v0  ;;  %v2046_v2 = vmul.f32 %v2253_v22, %v2031_v49 }
 0x827   : > { %2066 = vst.msk [vmem:[%s3055_s27 + $0x20] sm:$0xff] %vm605_vm1, %v2058_v1 }
 0x828   : > { %v2061_v5 = vadd.f32 %v2254_v26, %v2046_v2 }
 0x82a   : > { %2069 = vst.msk [vmem:[%s3055_s27 + $0x38] sm:$0xff] %vm605_vm1, %v2061_v5 }
 0x82b PF: > { %s25_s18 = sadd.s32 1, %s2596_s18  }
 0x82c   : > { %p22_p4 = scmp.ge.s32.totalorder %s25_s18, 4  }
 0x82e   :  { %24 = sbr.rel (!%p22_p4) target bundleno = 1 (0x1), region = 122 }

// kernel: sam_coreml_forward.27
= control target key start
LH: loop header
LB: loop body
LE: loop exit
PB: predicated region body
PF: predicated region fallthrough
CT: control target
= control target key end

     0   :  { %v399_v3 = vmov 0.0|0.0   ;;  %vm400_vm0 = vmmov 0   ;;  %v401_v6 = vmov 0.0   ;;  %s509_s0 = inlined_call_operand.vmem [shape: f32[1,2,32], index: 0, kind: input, shape index: {}]   ;;  %s510_s1 = inlined_call_operand.vmem [shape: f32[1,32,32], index: 1, kind: input, shape index: {}]   ;;  %s511_s2 = inlined_call_operand.vmem [shape: f32[1,1,32], index: 2, kind: input, shape index: {}]   ;;  %s512_s3 = inlined_call_operand.vmem [shape: f32[1,32,32], index: 3, kind: input, shape index: {}]   ;;  %s513_s4 = inlined_call_operand.vmem [shape: f32[1,1,32], index: 4, kind: input, shape index: {}]   ;;  %s514_s5 = inlined_call_operand.vmem [shape: f32[1,32,4], index: 5, kind: input, shape index: {}]   ;;  %s515_s6 = inlined_call_operand.vmem [shape: f32[1,1,4], index: 6, kind: input, shape index: {}]   ;;  %s516_s7 = inlined_call_operand.hbm [shape: f32[1,2,4], index: 7, kind: output, shape index: {}]  }
   0x1   :  { %v28_v0 = vld [vmem:[%s510_s1] sm:$0xff]  ;;  %v29_v1 = vld [vmem:[%s510_s1 + $0x8] sm:$0xff]  ;;  %v30_v2 = vld [vmem:[%s510_s1 + $0x10] sm:$0xff]  ;;  %353 = vmatprep.subr.bf16.mxu0 %v399_v3  ;;  %328 = vmatprep.mubr.msk.f32.mxu0 %vm400_vm0, %v401_v6 }
   0x2   :  { %v354_v4 = vpack.c.bf16 %v29_v1, %v28_v0  ;;  %v31_v5 = vld [vmem:[%s510_s1 + $0x18] sm:$0xff]  ;;  %v114_v7 = vld [vmem:[%s512_s3] sm:$0xff]  ;;  %359 = vmatprep.subr.bf16.mxu1 %v399_v3  ;;  %v115_v8 = vld [vmem:[%s512_s3 + $0x8] sm:$0xff]  ;;  %339 = vmatprep.mubr.msk.f32.mxu1 %vm400_vm0, %v401_v6 }
   0x3   :  { %12 = vsyncpa [#allocation3], 0  ;;  %v357_v9 = vpack.c.bf16 %v31_v5, %v30_v2  ;;  %v360_v10 = vpack.c.bf16 %v115_v8, %v114_v7  ;;  %v27_v11 = vld [vmem:[%s509_s0] sm:$0x3]  ;;  %vm39_vm1 = vcmask 261120   ;;  %v116_v12 = vld [vmem:[%s512_s3 + $0x10] sm:$0xff] }
   0x4   :  { %355 = vmatpush3.bf16.msra.mxu0 %v354_v4  ;;  %v117_v13 = vld [vmem:[%s512_s3 + $0x18] sm:$0xff]  ;;  %v199_v15 = vld [vmem:[%s514_s5] sm:$0xff]  ;;  %v200_v16 = vld [vmem:[%s514_s5 + $0x8] sm:$0xff]  ;;  %s402_s29 = smov [#allocation2]   ;;  %vm283_vm2 = vcmask 25600  }
   0x5   :  { %356 = vmatprep.subr.bf16.mxu0 %v399_v3  ;;  %361 = vmatpush3.bf16.msra.mxu1 %v360_v10  ;;  %v363_v14 = vpack.c.bf16 %v117_v13, %v116_v12  ;;  %v366_v17 = vpack.c.bf16 %v200_v16, %v199_v15  ;;  %v299_v18 = vld [vmem:[%s511_s2] ss:$0 sm:$0xff]  ;;  %v201_v23 = vld [vmem:[%s514_s5 + $0x10] sm:$0xff]  ;;  %v202_v24 = vld [vmem:[%s514_s5 + $0x18] sm:$0xff]  ;;  %s291_s30 = sshll.u32 %s402_s29, 4  ;;  %s292_s30 = int_to_ptr.vmem [resolvable:$true] %s291_s30 }
   0x6   :  { %362 = vmatprep.subr.bf16.mxu1 %v399_v3  ;;  %v369_v25 = vpack.c.bf16 %v202_v24, %v201_v23  ;;  %v301_v26 = vld [vmem:[%s513_s4] ss:$0 sm:$0xff]  ;;  %s375_s5 = scalar_lea.vmem %s292_s30, 32  ;;  %p380_p1 = scmp.lt.s32.totalorder %s292_s30, %s292_s30 }
   0x7   :  { %v303_v31 = vld [vmem:[%s515_s6] ss:$0 sm:$0xff]  ;;  %p376_p0 = scmp.ne.s32.totalorder %s292_s30, %s375_s5  ;;  %p381_p2 = scmp.lt.s32.totalorder %s375_s5, %s375_s5 }
   0x8   :  { %358 = vmatpush3.bf16.msra.mxu0 %v357_v9 }
   0x9   :  { %365 = vmatprep.subr.bf16.mxu0 %v399_v3  ;;  %364 = vmatpush3.bf16.msra.mxu1 %v363_v14  ;;  %p382_p3 = por %p381_p2, %p380_p1 }
   0xb   :  { %329 = vmatmul.mubr.msk.f32.vlgmr.msra.gmra.mrb[0].mxu0 %vm39_vm1, %v27_v11  ;;  %p383_p4 = pnand %p382_p3, %p376_p0 }
   0xc   :  { %350 = vmatprep.mubr.msk.f32.mxu0 %vm400_vm0, %v401_v6  ;;  %367 = vmatpush3.bf16.msra.mxu0 %v366_v17 }
   0xd   :  { %368 = vmatprep.subr.bf16.mxu0 %v399_v3 }
  0x10   :  { %370 = vmatpush3.bf16.msra.mxu0 %v369_v25 }
  0xde   :  { %v109_v19 = vpop.f32.mrb[0].mxu0 }
  0xdf   :  { %v110_v20 = vadd.f32 %v299_v18, %v109_v19  ;;  %v330_v21 = vpop.f32.mrb[1].mxu0 }
  0xe1   :  { %v113_v22 = vmax.f32 %v110_v20, 0.0 }
  0xe3   :  { %340 = vmatmul.mubr.msk.f32.vlgmr.msra.gmra.mrb[0].mxu1 %vm39_vm1, %v113_v22 }
 0x1b6   :  { %v194_v27 = vpop.f32.mrb[0].mxu1 }
 0x1b7   :  { %v195_v28 = vadd.f32 %v301_v26, %v194_v27  ;;  %v341_v29 = vpop.f32.mrb[1].mxu1 }
 0x1b9   :  { %v198_v30 = vmax.f32 %v195_v28, 0.0 }
 0x1bb   :  { %351 = vmatmul.mubr.msk.f32.vlgmr.msra.gmra.mrb[2].mxu0 %vm39_vm1, %v198_v30 }
 0x28e   :  { %v279_v32 = vpop.f32.mrb[2].mxu0 }
 0x28f   :  { %v280_v33 = vadd.f32 %v303_v31, %v279_v32  ;;  %v352_v34 = vpop.f32.mrb[3].mxu0 }
 0x291   :  { %284 = vst.msk [vmem:[#allocation2] sm:$0x3] %vm283_vm2, %v280_v33 }
 0x292   :  { %386 = shalt.err (!%p383_p4)
}
 0x293   :  { %s387_s9 = scalar_lea.hbm %s516_s7, 32 }
 0x294   :  { %p388_p5 = scmp.ne.s32.totalorder %s516_s7, %s387_s9  ;;  %p391_p6 = scmp.lt.u32.totalorder %s387_s9, %s516_s7 }
 0x296   :  { %p393_p7 = pnand %p391_p6, %p388_p5 }
 0x298   :  { %396 = shalt.err (!%p393_p7)
}
 0x299   :  { %294 = dma.vmem_to_hbm [thread:$0]  %s292_s30, 32, %s516_s7, [#allocation3]  }
 0x29a   :  { %397 = dma.done.wait [#allocation3], 32  }
 0x29b   :  { %398 = vsyncadd [#allocation3], 4294967264 }
 0x29c   :  { %298 = vsyncpa [#allocation3], 1 }

// kernel: sam_coreml_forward.25
= control target key start
LH: loop header
LB: loop body
LE: loop exit
PB: predicated region body
PF: predicated region fallthrough
CT: control target
= control target key end

     0   :  { %s902_s24 = smov 0   ;;  %s954_s0 = inlined_call_operand.vmem [shape: f32[4,2,32], index: 0, kind: input, shape index: {}]   ;;  %s955_s1 = inlined_call_operand.vmem [shape: f32[4,32,32], index: 1, kind: input, shape index: {}]   ;;  %s956_s2 = inlined_call_operand.vmem [shape: f32[4,1,32], index: 2, kind: input, shape index: {}]   ;;  %s957_s3 = inlined_call_operand.vmem [shape: f32[4,32,32], index: 3, kind: input, shape index: {}]   ;;  %s958_s4 = inlined_call_operand.vmem [shape: f32[4,1,32], index: 4, kind: input, shape index: {}]   ;;  %s959_s5 = inlined_call_operand.vmem [shape: f32[4,32,4], index: 5, kind: input, shape index: {}]   ;;  %s960_s6 = inlined_call_operand.vmem [shape: f32[4,1,4], index: 6, kind: input, shape index: {}]   ;;  %s961_s7 = inlined_call_operand.vmem [shape: f32[4,2,4], index: 7, kind: output, shape index: {}]  }
   0x1 LB: > { %s750_s25 = sadd.s32 4294967295, %s857_s24   ;;  %p754_p0 = scmp.ge.s32.totalorder %s857_s24, 1  ;;  %s857_s24 = sphi %s902_s24, %s17_s24  }
   0x2   : > { %p290_p1 = scmp.lt.s32.totalorder %s857_s24, 5 }
   0x4   : > { %p291_p2 = pnand %p754_p0, %p290_p1 }
   0x5   : > { %p344_p3 = scmp.lt.s32.totalorder (!%p291_p2), %s750_s25, 3  ;;  %v859_v0 = vmov (!%p291_p2), 0.0|0.0   ;;  %vm860_vm0 = vmmov (!%p291_p2), 0   ;;  %v861_v1 = vmov (!%p291_p2), 0.0   ;;  %vm388_vm1 = vcmask (!%p291_p2), 261120  }
   0x6   : > { %294 = sbr.rel (%p291_p2) target bundleno = 673 (0x2a1), region = 48  ;;  %822 = vmatprep.subr.bf16.mxu0 (!%p291_p2), %v859_v0  ;;  %797 = vmatprep.mubr.msk.f32.mxu0 (!%p291_p2), %vm860_vm0, %v861_v1  ;;  %vm632_vm2 = vcmask (!%p291_p2), 25600  }
   0x7   : > { %828 = vmatprep.subr.bf16.mxu1 (!%p291_p2), %v859_v0  ;;  %808 = vmatprep.mubr.msk.f32.mxu1 (!%p291_p2), %vm860_vm0, %v861_v1 }
   0xd   : > { %s963_s25 = smov (!%p344_p3, %s750_s25), 3 }
   0xe   : > { %s771_s26 = sshll.u32 %s963_s25, 5  ;;  %s755_s30 = sshll.u32 %s963_s25, 1 }
   0xf   : > { %s352_s29 = scalar_lea.vmem %s955_s1, %s771_s26  ;;  %s360_s10 = scalar_lea.vmem %s957_s3, %s771_s26 }
  0x10   : > { %v377_v2 = vld [vmem:[%s352_s29] sm:$0xff]  ;;  %v378_v3 = vld [vmem:[%s352_s29 + $0x8] sm:$0xff]  ;;  %v379_v4 = vld [vmem:[%s352_s29 + $0x10] sm:$0xff]  ;;  %s347_s13 = scalar_lea.vmem %s954_s0, %s755_s30  ;;  %s368_s16 = scalar_lea.vmem %s959_s5, %s771_s26 }
  0x11   : > { %v823_v5 = vpack.c.bf16 %v378_v3, %v377_v2  ;;  %v380_v6 = vld [vmem:[%s352_s29 + $0x18] sm:$0xff]  ;;  %v463_v7 = vld [vmem:[%s360_s10] sm:$0xff]  ;;  %v464_v8 = vld [vmem:[%s360_s10 + $0x8] sm:$0xff]  ;;  %s355_s19 = scalar_lea.vmem %s956_s2, %s963_s25  ;;  %s363_s22 = scalar_lea.vmem %s958_s4, %s963_s25 }
  0x12   : > { %v826_v9 = vpack.c.bf16 %v380_v6, %v379_v4  ;;  %v829_v10 = vpack.c.bf16 %v464_v8, %v463_v7  ;;  %v376_v11 = vld [vmem:[%s347_s13] sm:$0x3]  ;;  %v465_v12 = vld [vmem:[%s360_s10 + $0x10] sm:$0xff]  ;;  %v466_v13 = vld [vmem:[%s360_s10 + $0x18] sm:$0xff]  ;;  %s371_s27 = scalar_lea.vmem %s960_s6, %s963_s25  ;;  %s375_s8 = scalar_lea.vmem %s961_s7, %s755_s30 }
  0x13   : > { %824 = vmatpush3.bf16.msra.mxu0 %v823_v5  ;;  %v832_v14 = vpack.c.bf16 %v466_v13, %v465_v12  ;;  %v548_v15 = vld [vmem:[%s368_s16] sm:$0xff]  ;;  %v549_v16 = vld [vmem:[%s368_s16 + $0x8] sm:$0xff]  ;;  %v550_v23 = vld [vmem:[%s368_s16 + $0x10] sm:$0xff] }
  0x14   : > { %825 = vmatprep.subr.bf16.mxu0 %v859_v0  ;;  %830 = vmatpush3.bf16.msra.mxu1 %v829_v10  ;;  %v835_v17 = vpack.c.bf16 %v549_v16, %v548_v15  ;;  %v763_v18 = vld [vmem:[%s355_s19] ss:$0 sm:$0xff]  ;;  %v551_v24 = vld [vmem:[%s368_s16 + $0x18] sm:$0xff] }
  0x15   : > { %831 = vmatprep.subr.bf16.mxu1 %v859_v0  ;;  %v838_v25 = vpack.c.bf16 %v551_v24, %v550_v23  ;;  %v765_v26 = vld [vmem:[%s363_s22] ss:$0 sm:$0xff] }
  0x16   : > { %v767_v31 = vld [vmem:[%s371_s27] ss:$0 sm:$0xff] }
  0x17   : > { %827 = vmatpush3.bf16.msra.mxu0 %v826_v9 }
  0x18   : > { %834 = vmatprep.subr.bf16.mxu0 %v859_v0  ;;  %833 = vmatpush3.bf16.msra.mxu1 %v832_v14 }
  0x1a   : > { %798 = vmatmul.mubr.msk.f32.vlgmr.msra.gmra.mrb[0].mxu0 %vm388_vm1, %v376_v11 }
  0x1b   : > { %819 = vmatprep.mubr.msk.f32.mxu0 %vm860_vm0, %v861_v1  ;;  %836 = vmatpush3.bf16.msra.mxu0 %v835_v17 }
  0x1c   : > { %837 = vmatprep.subr.bf16.mxu0 %v859_v0 }
  0x1f   : > { %839 = vmatpush3.bf16.msra.mxu0 %v838_v25 }
  0xed   : > { %v458_v19 = vpop.f32.mrb[0].mxu0 }
  0xee   : > { %v459_v20 = vadd.f32 %v763_v18, %v458_v19  ;;  %v799_v21 = vpop.f32.mrb[1].mxu0 }
  0xf0   : > { %v462_v22 = vmax.f32 %v459_v20, 0.0 }
  0xf2   : > { %809 = vmatmul.mubr.msk.f32.vlgmr.msra.gmra.mrb[0].mxu1 %vm388_vm1, %v462_v22 }
 0x1c5   : > { %v543_v27 = vpop.f32.mrb[0].mxu1 }
 0x1c6   : > { %v544_v28 = vadd.f32 %v765_v26, %v543_v27  ;;  %v810_v29 = vpop.f32.mrb[1].mxu1 }
 0x1c8   : > { %v547_v30 = vmax.f32 %v544_v28, 0.0 }
 0x1ca   : > { %820 = vmatmul.mubr.msk.f32.vlgmr.msra.gmra.mrb[2].mxu0 %vm388_vm1, %v547_v30 }
 0x29d   : > { %v628_v32 = vpop.f32.mrb[2].mxu0 }
 0x29e   : > { %v629_v33 = vadd.f32 %v767_v31, %v628_v32  ;;  %v821_v34 = vpop.f32.mrb[3].mxu0 }
 0x2a0   : > { %633 = vst.msk [vmem:[%s375_s8] sm:$0x3] %vm632_vm2, %v629_v33 }
 0x2a1 PF: > { %s17_s24 = sadd.s32 1, %s857_s24  }
 0x2a2   : > { %p14_p4 = scmp.ge.s32.totalorder %s17_s24, 6  }
 0x2a4   :  { %16 = sbr.rel (!%p14_p4) target bundleno = 1 (0x1), region = 96 }

// kernel: sam_coreml_forward.24
= control target key start
LH: loop header
LB: loop body
LE: loop exit
PB: predicated region body
PF: predicated region fallthrough
CT: control target
= control target key end

     0   :  { %vm86_vm0 = vcmask 64512   ;;  %vm664_vm1 = vcmask 130048   ;;  %s1567_s1 = inlined_call_operand.vmem [shape: f32[8,16], index: 1, kind: input, shape index: {}]   ;;  %s1568_s0 = inlined_call_operand.vmem [shape: f32[512,8], index: 0, kind: input, shape index: {}]   ;;  %s1569_s2 = inlined_call_operand.vmem [shape: f32[1,16], index: 2, kind: input, shape index: {}]   ;;  %s1570_s3 = inlined_call_operand.vmem [shape: f32[512,16], index: 3, kind: output, shape index: {}]  }
   0x1   :  { %v78_v0 = vld [vmem:[%s1567_s1] sm:$0xff]  ;;  %v15_v3 = vld [vmem:[%s1568_s0 + $0x8] sm:$0xff]  ;;  %v16_v5 = vld [vmem:[%s1568_s0 + $0x10] sm:$0xff] }
   0x2   :  { %v14_v1 = vld [vmem:[%s1568_s0] sm:$0xff]  ;;  %863 = vmatprep.subr.mxu0 %v78_v0  ;;  %961 = vmatprep.subr.mxu1 %v78_v0  ;;  %v47_v4 = vld [vmem:[%s1568_s0 + $0x108] sm:$0xff]  ;;  %v48_v6 = vld [vmem:[%s1568_s0 + $0x110] sm:$0xff] }
   0x3   :  { %v46_v2 = vld [vmem:[%s1568_s0 + $0x100] sm:$0xff]  ;;  %864 = vmatpush3.msra.mxu0 %v78_v0  ;;  %962 = vmatpush3.msra.mxu1 %v78_v0  ;;  %v17_v7 = vld [vmem:[%s1568_s0 + $0x18] sm:$0xff]  ;;  %v19_v11 = vld [vmem:[%s1568_s0 + $0x28] sm:$0xff] }
   0x4   :  { %865 = vmatprep.mubr.msk.f32.mxu0 %vm86_vm0, %v14_v1  ;;  %913 = vmatprep.mubr.msk.f32.mxu1 %vm86_vm0, %v46_v2  ;;  %v49_v8 = vld [vmem:[%s1568_s0 + $0x118] sm:$0xff]  ;;  %v18_v9 = vld [vmem:[%s1568_s0 + $0x20] sm:$0xff]  ;;  %v51_v12 = vld [vmem:[%s1568_s0 + $0x128] sm:$0xff] }
   0x5   :  { %866 = vmatmul.mubr.msk.f32.vlgmr.msra.gmra.mrb[0].mxu0 %vm86_vm0, %v15_v3  ;;  %914 = vmatmul.mubr.msk.f32.vlgmr.msra.gmra.mrb[0].mxu1 %vm86_vm0, %v47_v4  ;;  %v50_v10 = vld [vmem:[%s1568_s0 + $0x120] sm:$0xff]  ;;  %v20_v13 = vld [vmem:[%s1568_s0 + $0x30] sm:$0xff]  ;;  %v21_v15 = vld [vmem:[%s1568_s0 + $0x38] sm:$0xff] }
   0x6   :  { %868 = vmatprep.mubr.msk.f32.mxu0 %vm86_vm0, %v16_v5  ;;  %916 = vmatprep.mubr.msk.f32.mxu1 %vm86_vm0, %v48_v6  ;;  %v52_v14 = vld [vmem:[%s1568_s0 + $0x130] sm:$0xff]  ;;  %v53_v16 = vld [vmem:[%s1568_s0 + $0x138] sm:$0xff]  ;;  %v22_v17 = vld [vmem:[%s1568_s0 + $0x40] sm:$0xff] }
   0x7   :  { %v54_v18 = vld [vmem:[%s1568_s0 + $0x140] sm:$0xff]  ;;  %v23_v19 = vld [vmem:[%s1568_s0 + $0x48] sm:$0xff]  ;;  %v24_v21 = vld [vmem:[%s1568_s0 + $0x50] sm:$0xff] }
   0x8   :  { %v55_v20 = vld [vmem:[%s1568_s0 + $0x148] sm:$0xff]  ;;  %v56_v22 = vld [vmem:[%s1568_s0 + $0x150] sm:$0xff]  ;;  %v25_v23 = vld [vmem:[%s1568_s0 + $0x58] sm:$0xff] }
   0x9   :  { %869 = vmatmul.mubr.msk.f32.gmra.mrb[2].mxu0 %vm86_vm0, %v17_v7  ;;  %917 = vmatmul.mubr.msk.f32.gmra.mrb[2].mxu1 %vm86_vm0, %v49_v8  ;;  %v57_v24 = vld [vmem:[%s1568_s0 + $0x158] sm:$0xff]  ;;  %v26_v25 = vld [vmem:[%s1568_s0 + $0x60] sm:$0xff]  ;;  %v27_v27 = vld [vmem:[%s1568_s0 + $0x68] sm:$0xff] }
   0xa   :  { %871 = vmatprep.mubr.msk.f32.mxu0 %vm86_vm0, %v18_v9  ;;  %919 = vmatprep.mubr.msk.f32.mxu1 %vm86_vm0, %v50_v10  ;;  %v58_v26 = vld [vmem:[%s1568_s0 + $0x160] sm:$0xff]  ;;  %v59_v28 = vld [vmem:[%s1568_s0 + $0x168] sm:$0xff]  ;;  %v28_v29 = vld [vmem:[%s1568_s0 + $0x70] sm:$0xff] }
   0xb   :  { %v60_v30 = vld [vmem:[%s1568_s0 + $0x170] sm:$0xff]  ;;  %v29_v31 = vld [vmem:[%s1568_s0 + $0x78] sm:$0xff]  ;;  %v30_v33 = vld [vmem:[%s1568_s0 + $0x80] sm:$0xff] }
   0xc   :  { %v61_v32 = vld [vmem:[%s1568_s0 + $0x178] sm:$0xff]  ;;  %v62_v34 = vld [vmem:[%s1568_s0 + $0x180] sm:$0xff]  ;;  %v31_v35 = vld [vmem:[%s1568_s0 + $0x88] sm:$0xff] }
   0xd   :  { %872 = vmatmul.mubr.msk.f32.gmra.mrb[4].mxu0 %vm86_vm0, %v19_v11  ;;  %920 = vmatmul.mubr.msk.f32.gmra.mrb[4].mxu1 %vm86_vm0, %v51_v12  ;;  %v63_v36 = vld [vmem:[%s1568_s0 + $0x188] sm:$0xff]  ;;  %v32_v37 = vld [vmem:[%s1568_s0 + $0x90] sm:$0xff]  ;;  %v33_v39 = vld [vmem:[%s1568_s0 + $0x98] sm:$0xff] }
   0xe   :  { %874 = vmatprep.mubr.msk.f32.mxu0 %vm86_vm0, %v20_v13  ;;  %922 = vmatprep.mubr.msk.f32.mxu1 %vm86_vm0, %v52_v14  ;;  %v64_v38 = vld [vmem:[%s1568_s0 + $0x190] sm:$0xff]  ;;  %v65_v40 = vld [vmem:[%s1568_s0 + $0x198] sm:$0xff]  ;;  %v34_v41 = vld [vmem:[%s1568_s0 + $0xa0] sm:$0xff] }
   0xf   :  { %v66_v42 = vld [vmem:[%s1568_s0 + $0x1a0] sm:$0xff]  ;;  %v35_v43 = vld [vmem:[%s1568_s0 + $0xa8] sm:$0xff]  ;;  %v36_v45 = vld [vmem:[%s1568_s0 + $0xb0] sm:$0xff] }
  0x10   :  { %v67_v44 = vld [vmem:[%s1568_s0 + $0x1a8] sm:$0xff]  ;;  %v68_v46 = vld [vmem:[%s1568_s0 + $0x1b0] sm:$0xff]  ;;  %v37_v47 = vld [vmem:[%s1568_s0 + $0xb8] sm:$0xff] }
  0x11   :  { %875 = vmatmul.mubr.msk.f32.gmra.mrb[6].mxu0 %vm86_vm0, %v21_v15  ;;  %923 = vmatmul.mubr.msk.f32.gmra.mrb[6].mxu1 %vm86_vm0, %v53_v16  ;;  %v69_v48 = vld [vmem:[%s1568_s0 + $0x1b8] sm:$0xff]  ;;  %v38_v49 = vld [vmem:[%s1568_s0 + $0xc0] sm:$0xff]  ;;  %v39_v51 = vld [vmem:[%s1568_s0 + $0xc8] sm:$0xff] }
  0x12   :  { %877 = vmatprep.mubr.msk.f32.mxu0 %vm86_vm0, %v22_v17  ;;  %925 = vmatprep.mubr.msk.f32.mxu1 %vm86_vm0, %v54_v18  ;;  %v70_v50 = vld [vmem:[%s1568_s0 + $0x1c0] sm:$0xff]  ;;  %v71_v52 = vld [vmem:[%s1568_s0 + $0x1c8] sm:$0xff]  ;;  %v40_v53 = vld [vmem:[%s1568_s0 + $0xd0] sm:$0xff] }
  0x13   :  { %v72_v54 = vld [vmem:[%s1568_s0 + $0x1d0] sm:$0xff]  ;;  %v41_v55 = vld [vmem:[%s1568_s0 + $0xd8] sm:$0xff]  ;;  %v42_v57 = vld [vmem:[%s1568_s0 + $0xe0] sm:$0xff] }
  0x14   :  { %v73_v56 = vld [vmem:[%s1568_s0 + $0x1d8] sm:$0xff]  ;;  %v74_v58 = vld [vmem:[%s1568_s0 + $0x1e0] sm:$0xff]  ;;  %v43_v59 = vld [vmem:[%s1568_s0 + $0xe8] sm:$0xff] }
  0x15   :  { %878 = vmatmul.mubr.msk.f32.gmra.mrb[8].mxu0 %vm86_vm0, %v23_v19  ;;  %926 = vmatmul.mubr.msk.f32.gmra.mrb[8].mxu1 %vm86_vm0, %v55_v20  ;;  %v75_v60 = vld [vmem:[%s1568_s0 + $0x1e8] sm:$0xff]  ;;  %v44_v61 = vld [vmem:[%s1568_s0 + $0xf0] sm:$0xff]  ;;  %v45_v63 = vld [vmem:[%s1568_s0 + $0xf8] sm:$0xff] }
  0x16   :  { %880 = vmatprep.mubr.msk.f32.mxu0 %vm86_vm0, %v24_v21  ;;  %928 = vmatprep.mubr.msk.f32.mxu1 %vm86_vm0, %v56_v22  ;;  %v76_v62 = vld [vmem:[%s1568_s0 + $0x1f0] sm:$0xff]  ;;  %v77_v0 = vld [vmem:[%s1568_s0 + $0x1f8] sm:$0xff]  ;;  %v1245_v1 = vld [vmem:[%s1569_s2] ss:$0 sm:$0xff] }
  0x19   :  { %881 = vmatmul.mubr.msk.f32.gmra.mrb[10].mxu0 %vm86_vm0, %v25_v23  ;;  %929 = vmatmul.mubr.msk.f32.gmra.mrb[10].mxu1 %vm86_vm0, %v57_v24 }
  0x1a   :  { %883 = vmatprep.mubr.msk.f32.mxu0 %vm86_vm0, %v26_v25  ;;  %931 = vmatprep.mubr.msk.f32.mxu1 %vm86_vm0, %v58_v26 }
  0x1d   :  { %884 = vmatmul.mubr.msk.f32.gmra.mrb[12].mxu0 %vm86_vm0, %v27_v27  ;;  %932 = vmatmul.mubr.msk.f32.gmra.mrb[12].mxu1 %vm86_vm0, %v59_v28 }
  0x1e   :  { %886 = vmatprep.mubr.msk.f32.mxu0 %vm86_vm0, %v28_v29  ;;  %934 = vmatprep.mubr.msk.f32.mxu1 %vm86_vm0, %v60_v30 }
  0x21   :  { %887 = vmatmul.mubr.msk.f32.gmra.mrb[14].mxu0 %vm86_vm0, %v29_v31  ;;  %935 = vmatmul.mubr.msk.f32.gmra.mrb[14].mxu1 %vm86_vm0, %v61_v32 }
  0x22   :  { %889 = vmatprep.mubr.msk.f32.mxu0 %vm86_vm0, %v30_v33  ;;  %937 = vmatprep.mubr.msk.f32.mxu1 %vm86_vm0, %v62_v34 }
  0x25   :  { %890 = vmatmul.mubr.msk.f32.gmra.mrb[16].mxu0 %vm86_vm0, %v31_v35  ;;  %938 = vmatmul.mubr.msk.f32.gmra.mrb[16].mxu1 %vm86_vm0, %v63_v36 }
  0x26   :  { %892 = vmatprep.mubr.msk.f32.mxu0 %vm86_vm0, %v32_v37  ;;  %940 = vmatprep.mubr.msk.f32.mxu1 %vm86_vm0, %v64_v38 }
  0x29   :  { %893 = vmatmul.mubr.msk.f32.gmra.mrb[18].mxu0 %vm86_vm0, %v33_v39  ;;  %941 = vmatmul.mubr.msk.f32.gmra.mrb[18].mxu1 %vm86_vm0, %v65_v40 }
  0x2a   :  { %895 = vmatprep.mubr.msk.f32.mxu0 %vm86_vm0, %v34_v41  ;;  %943 = vmatprep.mubr.msk.f32.mxu1 %vm86_vm0, %v66_v42 }
  0x2d   :  { %896 = vmatmul.mubr.msk.f32.gmra.mrb[20].mxu0 %vm86_vm0, %v35_v43  ;;  %944 = vmatmul.mubr.msk.f32.gmra.mrb[20].mxu1 %vm86_vm0, %v67_v44 }
  0x2e   :  { %898 = vmatprep.mubr.msk.f32.mxu0 %vm86_vm0, %v36_v45  ;;  %946 = vmatprep.mubr.msk.f32.mxu1 %vm86_vm0, %v68_v46 }
  0x31   :  { %899 = vmatmul.mubr.msk.f32.gmra.mrb[22].mxu0 %vm86_vm0, %v37_v47  ;;  %947 = vmatmul.mubr.msk.f32.gmra.mrb[22].mxu1 %vm86_vm0, %v69_v48 }
  0x32   :  { %901 = vmatprep.mubr.msk.f32.mxu0 %vm86_vm0, %v38_v49  ;;  %949 = vmatprep.mubr.msk.f32.mxu1 %vm86_vm0, %v70_v50 }
  0x35   :  { %902 = vmatmul.mubr.msk.f32.gmra.mrb[24].mxu0 %vm86_vm0, %v39_v51  ;;  %950 = vmatmul.mubr.msk.f32.gmra.mrb[24].mxu1 %vm86_vm0, %v71_v52 }
  0x36   :  { %904 = vmatprep.mubr.msk.f32.mxu0 %vm86_vm0, %v40_v53  ;;  %952 = vmatprep.mubr.msk.f32.mxu1 %vm86_vm0, %v72_v54 }
  0x39   :  { %905 = vmatmul.mubr.msk.f32.gmra.mrb[26].mxu0 %vm86_vm0, %v41_v55  ;;  %953 = vmatmul.mubr.msk.f32.gmra.mrb[26].mxu1 %vm86_vm0, %v73_v56 }
  0x3a   :  { %907 = vmatprep.mubr.msk.f32.mxu0 %vm86_vm0, %v42_v57  ;;  %955 = vmatprep.mubr.msk.f32.mxu1 %vm86_vm0, %v74_v58 }
  0x3d   :  { %908 = vmatmul.mubr.msk.f32.gmra.mrb[28].mxu0 %vm86_vm0, %v43_v59  ;;  %956 = vmatmul.mubr.msk.f32.gmra.mrb[28].mxu1 %vm86_vm0, %v75_v60 }
  0x3e   :  { %910 = vmatprep.mubr.msk.f32.mxu0 %vm86_vm0, %v44_v61  ;;  %958 = vmatprep.mubr.msk.f32.mxu1 %vm86_vm0, %v76_v62 }
  0x41   :  { %911 = vmatmul.mubr.msk.f32.gmra.mrb[30].mxu0 %vm86_vm0, %v45_v63  ;;  %959 = vmatmul.mubr.msk.f32.gmra.mrb[30].mxu1 %vm86_vm0, %v77_v0 }
  0xd8   :  { %v867_v2 = vpop.f32.mrb[0].mxu0  ;;  %v915_v3 = vpop.f32.mrb[0].mxu1 }
  0xd9   :  { %v351_v4 = vadd.f32 %v867_v2, %v1245_v1  ;;  %v511_v5 = vadd.f32 %v915_v3, %v1245_v1  ;;  %v345_v6 = vpop.f32.mrb[1].mxu0  ;;  %v505_v7 = vpop.f32.mrb[1].mxu1 }
  0xda   :  { %v346_v8 = vadd.f32 %v1245_v1, %v345_v6  ;;  %v506_v9 = vadd.f32 %v1245_v1, %v505_v7 }
  0xdb   :  { %666 = vst.msk [vmem:[%s1570_s3 + $0x8] sm:$0xff] %vm664_vm1, %v351_v4  ;;  %698 = vst.msk [vmem:[%s1570_s3 + $0x108] sm:$0xff] %vm664_vm1, %v511_v5 }
  0xdc   :  { %665 = vst.msk [vmem:[%s1570_s3] sm:$0xff] %vm664_vm1, %v346_v8  ;;  %697 = vst.msk [vmem:[%s1570_s3 + $0x100] sm:$0xff] %vm664_vm1, %v506_v9  ;;  %v870_v10 = vpop.f32.mrb[2].mxu0  ;;  %v918_v11 = vpop.f32.mrb[2].mxu1 }
  0xdd   :  { %v361_v12 = vadd.f32 %v870_v10, %v1245_v1  ;;  %v521_v13 = vadd.f32 %v918_v11, %v1245_v1  ;;  %v355_v14 = vpop.f32.mrb[3].mxu0  ;;  %v515_v15 = vpop.f32.mrb[3].mxu1 }
  0xde   :  { %v356_v16 = vadd.f32 %v1245_v1, %v355_v14  ;;  %v516_v17 = vadd.f32 %v1245_v1, %v515_v15 }
  0xdf   :  { %668 = vst.msk [vmem:[%s1570_s3 + $0x18] sm:$0xff] %vm664_vm1, %v361_v12  ;;  %700 = vst.msk [vmem:[%s1570_s3 + $0x118] sm:$0xff] %vm664_vm1, %v521_v13 }
  0xe0   :  { %667 = vst.msk [vmem:[%s1570_s3 + $0x10] sm:$0xff] %vm664_vm1, %v356_v16  ;;  %699 = vst.msk [vmem:[%s1570_s3 + $0x110] sm:$0xff] %vm664_vm1, %v516_v17  ;;  %v873_v18 = vpop.f32.mrb[4].mxu0  ;;  %v921_v19 = vpop.f32.mrb[4].mxu1 }
  0xe1   :  { %v371_v20 = vadd.f32 %v873_v18, %v1245_v1  ;;  %v531_v21 = vadd.f32 %v921_v19, %v1245_v1  ;;  %v365_v22 = vpop.f32.mrb[5].mxu0  ;;  %v525_v23 = vpop.f32.mrb[5].mxu1 }
  0xe2   :  { %v366_v24 = vadd.f32 %v1245_v1, %v365_v22  ;;  %v526_v25 = vadd.f32 %v1245_v1, %v525_v23 }
  0xe3   :  { %670 = vst.msk [vmem:[%s1570_s3 + $0x28] sm:$0xff] %vm664_vm1, %v371_v20  ;;  %702 = vst.msk [vmem:[%s1570_s3 + $0x128] sm:$0xff] %vm664_vm1, %v531_v21 }
  0xe4   :  { %669 = vst.msk [vmem:[%s1570_s3 + $0x20] sm:$0xff] %vm664_vm1, %v366_v24  ;;  %701 = vst.msk [vmem:[%s1570_s3 + $0x120] sm:$0xff] %vm664_vm1, %v526_v25  ;;  %v876_v26 = vpop.f32.mrb[6].mxu0  ;;  %v924_v27 = vpop.f32.mrb[6].mxu1 }
  0xe5   :  { %v381_v28 = vadd.f32 %v876_v26, %v1245_v1  ;;  %v541_v29 = vadd.f32 %v924_v27, %v1245_v1  ;;  %v375_v30 = vpop.f32.mrb[7].mxu0  ;;  %v535_v31 = vpop.f32.mrb[7].mxu1 }
  0xe6   :  { %v376_v32 = vadd.f32 %v1245_v1, %v375_v30  ;;  %v536_v33 = vadd.f32 %v1245_v1, %v535_v31 }
  0xe7   :  { %672 = vst.msk [vmem:[%s1570_s3 + $0x38] sm:$0xff] %vm664_vm1, %v381_v28  ;;  %704 = vst.msk [vmem:[%s1570_s3 + $0x138] sm:$0xff] %vm664_vm1, %v541_v29 }
  0xe8   :  { %671 = vst.msk [vmem:[%s1570_s3 + $0x30] sm:$0xff] %vm664_vm1, %v376_v32  ;;  %703 = vst.msk [vmem:[%s1570_s3 + $0x130] sm:$0xff] %vm664_vm1, %v536_v33  ;;  %v879_v34 = vpop.f32.mrb[8].mxu0  ;;  %v927_v35 = vpop.f32.mrb[8].mxu1 }
  0xe9   :  { %v391_v36 = vadd.f32 %v879_v34, %v1245_v1  ;;  %v551_v37 = vadd.f32 %v927_v35, %v1245_v1  ;;  %v385_v38 = vpop.f32.mrb[9].mxu0  ;;  %v545_v39 = vpop.f32.mrb[9].mxu1 }
  0xea   :  { %v386_v40 = vadd.f32 %v1245_v1, %v385_v38  ;;  %v546_v41 = vadd.f32 %v1245_v1, %v545_v39 }
  0xeb   :  { %674 = vst.msk [vmem:[%s1570_s3 + $0x48] sm:$0xff] %vm664_vm1, %v391_v36  ;;  %706 = vst.msk [vmem:[%s1570_s3 + $0x148] sm:$0xff] %vm664_vm1, %v551_v37 }
  0xec   :  { %673 = vst.msk [vmem:[%s1570_s3 + $0x40] sm:$0xff] %vm664_vm1, %v386_v40  ;;  %705 = vst.msk [vmem:[%s1570_s3 + $0x140] sm:$0xff] %vm664_vm1, %v546_v41  ;;  %v882_v42 = vpop.f32.mrb[10].mxu0  ;;  %v930_v43 = vpop.f32.mrb[10].mxu1 }
  0xed   :  { %v401_v44 = vadd.f32 %v882_v42, %v1245_v1  ;;  %v561_v45 = vadd.f32 %v930_v43, %v1245_v1  ;;  %v395_v46 = vpop.f32.mrb[11].mxu0  ;;  %v555_v47 = vpop.f32.mrb[11].mxu1 }
  0xee   :  { %v396_v48 = vadd.f32 %v1245_v1, %v395_v46  ;;  %v556_v49 = vadd.f32 %v1245_v1, %v555_v47 }
  0xef   :  { %676 = vst.msk [vmem:[%s1570_s3 + $0x58] sm:$0xff] %vm664_vm1, %v401_v44  ;;  %708 = vst.msk [vmem:[%s1570_s3 + $0x158] sm:$0xff] %vm664_vm1, %v561_v45 }
  0xf0   :  { %675 = vst.msk [vmem:[%s1570_s3 + $0x50] sm:$0xff] %vm664_vm1, %v396_v48  ;;  %707 = vst.msk [vmem:[%s1570_s3 + $0x150] sm:$0xff] %vm664_vm1, %v556_v49  ;;  %v885_v50 = vpop.f32.mrb[12].mxu0  ;;  %v933_v51 = vpop.f32.mrb[12].mxu1 }
  0xf1   :  { %v411_v52 = vadd.f32 %v885_v50, %v1245_v1  ;;  %v571_v53 = vadd.f32 %v933_v51, %v1245_v1  ;;  %v405_v54 = vpop.f32.mrb[13].mxu0  ;;  %v565_v55 = vpop.f32.mrb[13].mxu1 }
  0xf2   :  { %v406_v56 = vadd.f32 %v1245_v1, %v405_v54  ;;  %v566_v57 = vadd.f32 %v1245_v1, %v565_v55 }
  0xf3   :  { %678 = vst.msk [vmem:[%s1570_s3 + $0x68] sm:$0xff] %vm664_vm1, %v411_v52  ;;  %710 = vst.msk [vmem:[%s1570_s3 + $0x168] sm:$0xff] %vm664_vm1, %v571_v53 }
  0xf4   :  { %677 = vst.msk [vmem:[%s1570_s3 + $0x60] sm:$0xff] %vm664_vm1, %v406_v56  ;;  %709 = vst.msk [vmem:[%s1570_s3 + $0x160] sm:$0xff] %vm664_vm1, %v566_v57  ;;  %v888_v58 = vpop.f32.mrb[14].mxu0  ;;  %v936_v59 = vpop.f32.mrb[14].mxu1 }
  0xf5   :  { %v421_v60 = vadd.f32 %v888_v58, %v1245_v1  ;;  %v581_v61 = vadd.f32 %v936_v59, %v1245_v1  ;;  %v415_v62 = vpop.f32.mrb[15].mxu0  ;;  %v575_v63 = vpop.f32.mrb[15].mxu1 }
  0xf6   :  { %v416_v0 = vadd.f32 %v1245_v1, %v415_v62  ;;  %v576_v2 = vadd.f32 %v1245_v1, %v575_v63 }
  0xf7   :  { %680 = vst.msk [vmem:[%s1570_s3 + $0x78] sm:$0xff] %vm664_vm1, %v421_v60  ;;  %712 = vst.msk [vmem:[%s1570_s3 + $0x178] sm:$0xff] %vm664_vm1, %v581_v61 }
  0xf8   :  { %679 = vst.msk [vmem:[%s1570_s3 + $0x70] sm:$0xff] %vm664_vm1, %v416_v0  ;;  %711 = vst.msk [vmem:[%s1570_s3 + $0x170] sm:$0xff] %vm664_vm1, %v576_v2  ;;  %v891_v3 = vpop.f32.mrb[16].mxu0  ;;  %v939_v4 = vpop.f32.mrb[16].mxu1 }
  0xf9   :  { %v431_v5 = vadd.f32 %v891_v3, %v1245_v1  ;;  %v591_v6 = vadd.f32 %v939_v4, %v1245_v1  ;;  %v425_v7 = vpop.f32.mrb[17].mxu0  ;;  %v585_v8 = vpop.f32.mrb[17].mxu1 }
  0xfa   :  { %v426_v9 = vadd.f32 %v1245_v1, %v425_v7  ;;  %v586_v10 = vadd.f32 %v1245_v1, %v585_v8 }
  0xfb   :  { %682 = vst.msk [vmem:[%s1570_s3 + $0x88] sm:$0xff] %vm664_vm1, %v431_v5  ;;  %714 = vst.msk [vmem:[%s1570_s3 + $0x188] sm:$0xff] %vm664_vm1, %v591_v6 }
  0xfc   :  { %681 = vst.msk [vmem:[%s1570_s3 + $0x80] sm:$0xff] %vm664_vm1, %v426_v9  ;;  %713 = vst.msk [vmem:[%s1570_s3 + $0x180] sm:$0xff] %vm664_vm1, %v586_v10  ;;  %v894_v11 = vpop.f32.mrb[18].mxu0  ;;  %v942_v12 = vpop.f32.mrb[18].mxu1 }
  0xfd   :  { %v441_v13 = vadd.f32 %v894_v11, %v1245_v1  ;;  %v601_v14 = vadd.f32 %v942_v12, %v1245_v1  ;;  %v435_v15 = vpop.f32.mrb[19].mxu0  ;;  %v595_v16 = vpop.f32.mrb[19].mxu1 }
  0xfe   :  { %v436_v17 = vadd.f32 %v1245_v1, %v435_v15  ;;  %v596_v18 = vadd.f32 %v1245_v1, %v595_v16 }
  0xff   :  { %684 = vst.msk [vmem:[%s1570_s3 + $0x98] sm:$0xff] %vm664_vm1, %v441_v13  ;;  %716 = vst.msk [vmem:[%s1570_s3 + $0x198] sm:$0xff] %vm664_vm1, %v601_v14 }
 0x100   :  { %683 = vst.msk [vmem:[%s1570_s3 + $0x90] sm:$0xff] %vm664_vm1, %v436_v17  ;;  %715 = vst.msk [vmem:[%s1570_s3 + $0x190] sm:$0xff] %vm664_vm1, %v596_v18  ;;  %v897_v19 = vpop.f32.mrb[20].mxu0  ;;  %v945_v20 = vpop.f32.mrb[20].mxu1 }
 0x101   :  { %v451_v21 = vadd.f32 %v897_v19, %v1245_v1  ;;  %v611_v22 = vadd.f32 %v945_v20, %v1245_v1  ;;  %v445_v23 = vpop.f32.mrb[21].mxu0  ;;  %v605_v24 = vpop.f32.mrb[21].mxu1 }
 0x102   :  { %v446_v25 = vadd.f32 %v1245_v1, %v445_v23  ;;  %v606_v26 = vadd.f32 %v1245_v1, %v605_v24 }
 0x103   :  { %686 = vst.msk [vmem:[%s1570_s3 + $0xa8] sm:$0xff] %vm664_vm1, %v451_v21  ;;  %718 = vst.msk [vmem:[%s1570_s3 + $0x1a8] sm:$0xff] %vm664_vm1, %v611_v22 }
 0x104   :  { %685 = vst.msk [vmem:[%s1570_s3 + $0xa0] sm:$0xff] %vm664_vm1, %v446_v25  ;;  %717 = vst.msk [vmem:[%s1570_s3 + $0x1a0] sm:$0xff] %vm664_vm1, %v606_v26  ;;  %v900_v27 = vpop.f32.mrb[22].mxu0  ;;  %v948_v28 = vpop.f32.mrb[22].mxu1 }
 0x105   :  { %v461_v29 = vadd.f32 %v900_v27, %v1245_v1  ;;  %v621_v30 = vadd.f32 %v948_v28, %v1245_v1  ;;  %v455_v31 = vpop.f32.mrb[23].mxu0  ;;  %v615_v32 = vpop.f32.mrb[23].mxu1 }
 0x106   :  { %v456_v33 = vadd.f32 %v1245_v1, %v455_v31  ;;  %v616_v34 = vadd.f32 %v1245_v1, %v615_v32 }
 0x107   :  { %688 = vst.msk [vmem:[%s1570_s3 + $0xb8] sm:$0xff] %vm664_vm1, %v461_v29  ;;  %720 = vst.msk [vmem:[%s1570_s3 + $0x1b8] sm:$0xff] %vm664_vm1, %v621_v30 }
 0x108   :  { %687 = vst.msk [vmem:[%s1570_s3 + $0xb0] sm:$0xff] %vm664_vm1, %v456_v33  ;;  %719 = vst.msk [vmem:[%s1570_s3 + $0x1b0] sm:$0xff] %vm664_vm1, %v616_v34  ;;  %v903_v35 = vpop.f32.mrb[24].mxu0  ;;  %v951_v36 = vpop.f32.mrb[24].mxu1 }
 0x109   :  { %v471_v37 = vadd.f32 %v903_v35, %v1245_v1  ;;  %v631_v38 = vadd.f32 %v951_v36, %v1245_v1  ;;  %v465_v39 = vpop.f32.mrb[25].mxu0  ;;  %v625_v40 = vpop.f32.mrb[25].mxu1 }
 0x10a   :  { %v466_v41 = vadd.f32 %v1245_v1, %v465_v39  ;;  %v626_v42 = vadd.f32 %v1245_v1, %v625_v40 }
 0x10b   :  { %690 = vst.msk [vmem:[%s1570_s3 + $0xc8] sm:$0xff] %vm664_vm1, %v471_v37  ;;  %722 = vst.msk [vmem:[%s1570_s3 + $0x1c8] sm:$0xff] %vm664_vm1, %v631_v38 }
 0x10c   :  { %689 = vst.msk [vmem:[%s1570_s3 + $0xc0] sm:$0xff] %vm664_vm1, %v466_v41  ;;  %721 = vst.msk [vmem:[%s1570_s3 + $0x1c0] sm:$0xff] %vm664_vm1, %v626_v42  ;;  %v906_v43 = vpop.f32.mrb[26].mxu0  ;;  %v954_v44 = vpop.f32.mrb[26].mxu1 }
 0x10d   :  { %v481_v45 = vadd.f32 %v906_v43, %v1245_v1  ;;  %v641_v46 = vadd.f32 %v954_v44, %v1245_v1  ;;  %v475_v47 = vpop.f32.mrb[27].mxu0  ;;  %v635_v48 = vpop.f32.mrb[27].mxu1 }
 0x10e   :  { %v476_v49 = vadd.f32 %v1245_v1, %v475_v47  ;;  %v636_v50 = vadd.f32 %v1245_v1, %v635_v48 }
 0x10f   :  { %692 = vst.msk [vmem:[%s1570_s3 + $0xd8] sm:$0xff] %vm664_vm1, %v481_v45  ;;  %724 = vst.msk [vmem:[%s1570_s3 + $0x1d8] sm:$0xff] %vm664_vm1, %v641_v46 }
 0x110   :  { %691 = vst.msk [vmem:[%s1570_s3 + $0xd0] sm:$0xff] %vm664_vm1, %v476_v49  ;;  %723 = vst.msk [vmem:[%s1570_s3 + $0x1d0] sm:$0xff] %vm664_vm1, %v636_v50  ;;  %v909_v51 = vpop.f32.mrb[28].mxu0  ;;  %v957_v52 = vpop.f32.mrb[28].mxu1 }
 0x111   :  { %v491_v53 = vadd.f32 %v909_v51, %v1245_v1  ;;  %v651_v54 = vadd.f32 %v957_v52, %v1245_v1  ;;  %v485_v55 = vpop.f32.mrb[29].mxu0  ;;  %v645_v56 = vpop.f32.mrb[29].mxu1 }
 0x112   :  { %v486_v57 = vadd.f32 %v1245_v1, %v485_v55  ;;  %v646_v58 = vadd.f32 %v1245_v1, %v645_v56 }
 0x113   :  { %694 = vst.msk [vmem:[%s1570_s3 + $0xe8] sm:$0xff] %vm664_vm1, %v491_v53  ;;  %726 = vst.msk [vmem:[%s1570_s3 + $0x1e8] sm:$0xff] %vm664_vm1, %v651_v54 }
 0x114   :  { %693 = vst.msk [vmem:[%s1570_s3 + $0xe0] sm:$0xff] %vm664_vm1, %v486_v57  ;;  %725 = vst.msk [vmem:[%s1570_s3 + $0x1e0] sm:$0xff] %vm664_vm1, %v646_v58  ;;  %v912_v59 = vpop.f32.mrb[30].mxu0  ;;  %v960_v60 = vpop.f32.mrb[30].mxu1 }
 0x115   :  { %v501_v61 = vadd.f32 %v912_v59, %v1245_v1  ;;  %v661_v62 = vadd.f32 %v960_v60, %v1245_v1  ;;  %v495_v63 = vpop.f32.mrb[31].mxu0  ;;  %v655_v0 = vpop.f32.mrb[31].mxu1 }
 0x116   :  { %v496_v2 = vadd.f32 %v1245_v1, %v495_v63  ;;  %v656_v3 = vadd.f32 %v1245_v1, %v655_v0 }
 0x117   :  { %696 = vst.msk [vmem:[%s1570_s3 + $0xf8] sm:$0xff] %vm664_vm1, %v501_v61  ;;  %728 = vst.msk [vmem:[%s1570_s3 + $0x1f8] sm:$0xff] %vm664_vm1, %v661_v62 }
 0x118   :  { %695 = vst.msk [vmem:[%s1570_s3 + $0xf0] sm:$0xff] %vm664_vm1, %v496_v2  ;;  %727 = vst.msk [vmem:[%s1570_s3 + $0x1f0] sm:$0xff] %vm664_vm1, %v656_v3 }

// kernel: sam_coreml_forward.26
= control target key start
LH: loop header
LB: loop body
LE: loop exit
PB: predicated region body
PF: predicated region fallthrough
CT: control target
= control target key end

     0   :  { %s1657_s9 = smov 0   ;;  %s1659_s10 = smov 0   ;;  %s1980_s0 = inlined_call_operand.vmem [shape: f32[2,4,4], index: 0, kind: input, shape index: {}]   ;;  %s1981_s1 = inlined_call_operand.vmem [shape: f32[2,1024,4], index: 1, kind: input, shape index: {}]   ;;  %s1982_s2 = inlined_call_operand.vmem [shape: f32[2,4,1024], index: 2, kind: output, shape index: {}]  }
   0x1   :  { %s1661_s11 = smov 0  }
   0x2 LB: > { %s24_s12 = sadd.s32 1, %s1636_s10  ;;  %p1124_p0 = scmp.ge.s32.totalorder %s1640_s11, 1  ;;  %s1640_s11 = sphi %s1661_s11, %s12_s11   ;;  %s1636_s10 = sphi %s1659_s10, %s1986_s10   ;;  %s1632_s9 = sphi %s1657_s9, %s1985_s9  }
   0x3   : > { %p26_p1 = scmp.ge.s32.totalorder %s24_s12, 2  ;;  %p142_p2 = scmp.lt.s32.totalorder %s1640_s11, 3 }
   0x5   : > { %s1988_s12 = smov (%p26_p1, %s24_s12), 0  ;;  %p143_p3 = pnand %p1124_p0, %p142_p2 }
   0x6   : > { %p176_p4 = scmp.lt.s32.totalorder (!%p143_p3), %s1632_s9, 1  ;;  %vm329_vm0 = vcmask (!%p143_p3), 31744  }
   0x7   : > { %146 = sbr.rel (%p143_p3) target bundleno = 366 (0x16e), region = 28  ;;  %vm1685_vm1 = vmpackc.low (!%p143_p3), %vm329_vm0, %vm329_vm0 }
   0xe   : > { %s1990_s9 = smov (!%p176_p4, %s1632_s9), 1 }
   0xf   : > { %s1264_s13 = sshll.u32 %s1990_s9, 10  ;;  %s1125_s17 = sshll.u32 %s1990_s9, 2 }
  0x10   : > { %s1681_s16 = scalar_lea.vmem %s1981_s1, %s1264_s13  ;;  %s179_s20 = scalar_lea.vmem %s1980_s0, %s1125_s17 }
  0x11   : > { %v217_v1 = vld [vmem:[%s1681_s16 + $0x80] sm:$0xff]  ;;  %v218_v2 = vld [vmem:[%s1681_s16 + $0x88] sm:$0xff]  ;;  %v219_v12 = vld [vmem:[%s1681_s16 + $0x90] sm:$0xff]  ;;  %s1265_s21 = sshll.u32 %s1990_s9, 5 }
  0x12   : > { %v249_v3 = vld [vmem:[%s1681_s16 + $0x180] sm:$0xff]  ;;  %v1402_v4 = vpack.c.bf16 %v218_v2, %v217_v1  ;;  %v250_v5 = vld [vmem:[%s1681_s16 + $0x188] sm:$0xff]  ;;  %v220_v14 = vld [vmem:[%s1681_s16 + $0x98] sm:$0xff]  ;;  %s198_s24 = scalar_lea.vmem %s1982_s2, %s1265_s21 }
  0x13   : > { %v201_v6 = vld [vmem:[%s1681_s16] sm:$0xff]  ;;  %v202_v7 = vld [vmem:[%s1681_s16 + $0x8] sm:$0xff]  ;;  %v1450_v8 = vpack.c.bf16 %v250_v5, %v249_v3  ;;  %v251_v15 = vld [vmem:[%s1681_s16 + $0x190] sm:$0xff]  ;;  %v1408_v17 = vpack.c.bf16 %v220_v14, %v219_v12 }
  0x14   : > { %v1405_v9 = vpack.c.bf16 %v202_v7, %v201_v6  ;;  %v233_v10 = vld [vmem:[%s1681_s16 + $0x100] sm:$0xff]  ;;  %v234_v11 = vld [vmem:[%s1681_s16 + $0x108] sm:$0xff]  ;;  %1404 = vmatprep.subr.msk.bf16.mxu0 %vm1685_vm1, %v1402_v4  ;;  %v252_v16 = vld [vmem:[%s1681_s16 + $0x198] sm:$0xff] }
  0x15   : > { %v1453_v13 = vpack.c.bf16 %v234_v11, %v233_v10  ;;  %1452 = vmatprep.subr.msk.bf16.mxu1 %vm1685_vm1, %v1450_v8  ;;  %v1456_v18 = vpack.c.bf16 %v252_v16, %v251_v15  ;;  %v203_v19 = vld [vmem:[%s1681_s16 + $0x10] sm:$0xff]  ;;  %v204_v20 = vld [vmem:[%s1681_s16 + $0x18] sm:$0xff]  ;;  %v221_v23 = vld [vmem:[%s1681_s16 + $0xa0] sm:$0xff] }
  0x16   : > { %1407 = vmatpush3.bf16.xpose.msk.msra.mxu0 %vm1685_vm1, %v1405_v9  ;;  %v235_v21 = vld [vmem:[%s1681_s16 + $0x110] sm:$0xff]  ;;  %v236_v22 = vld [vmem:[%s1681_s16 + $0x118] sm:$0xff]  ;;  %v222_v24 = vld [vmem:[%s1681_s16 + $0xa8] sm:$0xff]  ;;  %v1411_v27 = vpack.c.bf16 %v204_v20, %v203_v19 }
  0x17   : > { %1455 = vmatpush3.bf16.xpose.msk.msra.mxu1 %vm1685_vm1, %v1453_v13  ;;  %1410 = vmatprep.subr.msk.bf16.mxu0 %vm1685_vm1, %v1408_v17  ;;  %v253_v25 = vld [vmem:[%s1681_s16 + $0x1a0] sm:$0xff]  ;;  %v254_v26 = vld [vmem:[%s1681_s16 + $0x1a8] sm:$0xff]  ;;  %v1459_v28 = vpack.c.bf16 %v236_v22, %v235_v21  ;;  %v1414_v29 = vpack.c.bf16 %v222_v24, %v221_v23  ;;  %v223_v35 = vld [vmem:[%s1681_s16 + $0xb0] sm:$0xff] }
  0x18   : > { %1458 = vmatprep.subr.msk.bf16.mxu1 %vm1685_vm1, %v1456_v18  ;;  %v1462_v30 = vpack.c.bf16 %v254_v26, %v253_v25  ;;  %v205_v31 = vld [vmem:[%s1681_s16 + $0x20] sm:$0xff]  ;;  %v206_v32 = vld [vmem:[%s1681_s16 + $0x28] sm:$0xff]  ;;  %v224_v36 = vld [vmem:[%s1681_s16 + $0xb8] sm:$0xff] }
  0x19   : > { %v237_v33 = vld [vmem:[%s1681_s16 + $0x120] sm:$0xff]  ;;  %v238_v34 = vld [vmem:[%s1681_s16 + $0x128] sm:$0xff]  ;;  %v255_v37 = vld [vmem:[%s1681_s16 + $0x1b0] sm:$0xff]  ;;  %v1417_v39 = vpack.c.bf16 %v206_v32, %v205_v31  ;;  %v1420_v41 = vpack.c.bf16 %v224_v36, %v223_v35 }
  0x1a   : > { %v256_v38 = vld [vmem:[%s1681_s16 + $0x1b8] sm:$0xff]  ;;  %v1465_v40 = vpack.c.bf16 %v238_v34, %v237_v33  ;;  %v207_v43 = vld [vmem:[%s1681_s16 + $0x30] sm:$0xff]  ;;  %v1750_v46 = vld [vmem:[%s179_s20] sm:$0xf] }
  0x1b   : > { %v1468_v42 = vpack.c.bf16 %v256_v38, %v255_v37  ;;  %v208_v44 = vld [vmem:[%s1681_s16 + $0x38] sm:$0xff]  ;;  %v239_v45 = vld [vmem:[%s1681_s16 + $0x130] sm:$0xff]  ;;  %v225_v48 = vld [vmem:[%s1681_s16 + $0xc0] sm:$0xff]  ;;  %1298 = vmatprep.mubr.msk.f32.mxu0 %vm329_vm0, %v1750_v46  ;;  %1332 = vmatprep.mubr.msk.f32.mxu1 %vm329_vm0, %v1750_v46 }
  0x1c   : > { %v240_v47 = vld [vmem:[%s1681_s16 + $0x138] sm:$0xff]  ;;  %v226_v49 = vld [vmem:[%s1681_s16 + $0xc8] sm:$0xff]  ;;  %v257_v50 = vld [vmem:[%s1681_s16 + $0x1c0] sm:$0xff]  ;;  %v1423_v52 = vpack.c.bf16 %v208_v44, %v207_v43 }
  0x1d   : > { %v258_v51 = vld [vmem:[%s1681_s16 + $0x1c8] sm:$0xff]  ;;  %v1471_v53 = vpack.c.bf16 %v240_v47, %v239_v45  ;;  %v1426_v54 = vpack.c.bf16 %v226_v49, %v225_v48  ;;  %v209_v56 = vld [vmem:[%s1681_s16 + $0x40] sm:$0xff]  ;;  %v227_v60 = vld [vmem:[%s1681_s16 + $0xd0] sm:$0xff] }
  0x1e   : > { %1413 = vmatpush3.bf16.xpose.msk.msra.mxu0 %vm1685_vm1, %v1411_v27  ;;  %v1474_v55 = vpack.c.bf16 %v258_v51, %v257_v50  ;;  %v210_v57 = vld [vmem:[%s1681_s16 + $0x48] sm:$0xff]  ;;  %v241_v58 = vld [vmem:[%s1681_s16 + $0x140] sm:$0xff]  ;;  %v228_v61 = vld [vmem:[%s1681_s16 + $0xd8] sm:$0xff] }
  0x1f   : > { %1461 = vmatpush3.bf16.xpose.msk.msra.mxu1 %vm1685_vm1, %v1459_v28  ;;  %1416 = vmatprep.subr.msk.bf16.mxu0 %vm1685_vm1, %v1414_v29  ;;  %v242_v59 = vld [vmem:[%s1681_s16 + $0x148] sm:$0xff]  ;;  %v259_v62 = vld [vmem:[%s1681_s16 + $0x1d0] sm:$0xff]  ;;  %v260_v63 = vld [vmem:[%s1681_s16 + $0x1d8] sm:$0xff]  ;;  %v1429_v1 = vpack.c.bf16 %v210_v57, %v209_v56  ;;  %v1432_v3 = vpack.c.bf16 %v228_v61, %v227_v60 }
  0x20   : > { %1464 = vmatprep.subr.msk.bf16.mxu1 %vm1685_vm1, %v1462_v30  ;;  %v1477_v2 = vpack.c.bf16 %v242_v59, %v241_v58  ;;  %v1480_v4 = vpack.c.bf16 %v260_v63, %v259_v62  ;;  %v211_v5 = vld [vmem:[%s1681_s16 + $0x50] sm:$0xff]  ;;  %v212_v6 = vld [vmem:[%s1681_s16 + $0x58] sm:$0xff]  ;;  %v229_v9 = vld [vmem:[%s1681_s16 + $0xe0] sm:$0xff] }
  0x21   : > { %v243_v7 = vld [vmem:[%s1681_s16 + $0x150] sm:$0xff]  ;;  %v244_v8 = vld [vmem:[%s1681_s16 + $0x158] sm:$0xff]  ;;  %v230_v10 = vld [vmem:[%s1681_s16 + $0xe8] sm:$0xff]  ;;  %v1435_v13 = vpack.c.bf16 %v212_v6, %v211_v5 }
  0x22   : > { %v261_v11 = vld [vmem:[%s1681_s16 + $0x1e0] sm:$0xff]  ;;  %v262_v12 = vld [vmem:[%s1681_s16 + $0x1e8] sm:$0xff]  ;;  %v1483_v14 = vpack.c.bf16 %v244_v8, %v243_v7  ;;  %v1438_v15 = vpack.c.bf16 %v230_v10, %v229_v9  ;;  %v231_v21 = vld [vmem:[%s1681_s16 + $0xf0] sm:$0xff] }
  0x23   : > { %v1486_v16 = vpack.c.bf16 %v262_v12, %v261_v11  ;;  %v213_v17 = vld [vmem:[%s1681_s16 + $0x60] sm:$0xff]  ;;  %v214_v18 = vld [vmem:[%s1681_s16 + $0x68] sm:$0xff]  ;;  %v232_v22 = vld [vmem:[%s1681_s16 + $0xf8] sm:$0xff] }
  0x24   : > { %v245_v19 = vld [vmem:[%s1681_s16 + $0x160] sm:$0xff]  ;;  %v246_v20 = vld [vmem:[%s1681_s16 + $0x168] sm:$0xff]  ;;  %v263_v23 = vld [vmem:[%s1681_s16 + $0x1f0] sm:$0xff]  ;;  %v1441_v25 = vpack.c.bf16 %v214_v18, %v213_v17  ;;  %v1444_v27 = vpack.c.bf16 %v232_v22, %v231_v21 }
  0x25   : > { %v264_v24 = vld [vmem:[%s1681_s16 + $0x1f8] sm:$0xff]  ;;  %v1489_v26 = vpack.c.bf16 %v246_v20, %v245_v19  ;;  %v215_v29 = vld [vmem:[%s1681_s16 + $0x70] sm:$0xff]  ;;  %v281_v33 = vld [vmem:[%s1681_s16 + $0x280] sm:$0xff] }
  0x26   : > { %1419 = vmatpush3.bf16.xpose.msk.msra.mxu0 %vm1685_vm1, %v1417_v39  ;;  %v1492_v28 = vpack.c.bf16 %v264_v24, %v263_v23  ;;  %v216_v30 = vld [vmem:[%s1681_s16 + $0x78] sm:$0xff]  ;;  %v247_v31 = vld [vmem:[%s1681_s16 + $0x170] sm:$0xff]  ;;  %v282_v34 = vld [vmem:[%s1681_s16 + $0x288] sm:$0xff] }
  0x27   : > { %1467 = vmatpush3.bf16.xpose.msk.msra.mxu1 %vm1685_vm1, %v1465_v40  ;;  %1422 = vmatprep.subr.msk.bf16.mxu0 %vm1685_vm1, %v1420_v41  ;;  %v248_v32 = vld [vmem:[%s1681_s16 + $0x178] sm:$0xff]  ;;  %v313_v35 = vld [vmem:[%s1681_s16 + $0x380] sm:$0xff]  ;;  %v314_v36 = vld [vmem:[%s1681_s16 + $0x388] sm:$0xff]  ;;  %v1447_v37 = vpack.c.bf16 %v216_v30, %v215_v29  ;;  %v1498_v39 = vpack.c.bf16 %v282_v34, %v281_v33 }
  0x28   : > { %1470 = vmatprep.subr.msk.bf16.mxu1 %vm1685_vm1, %v1468_v42  ;;  %v1495_v38 = vpack.c.bf16 %v248_v32, %v247_v31  ;;  %v1546_v40 = vpack.c.bf16 %v314_v36, %v313_v35  ;;  %v265_v41 = vld [vmem:[%s1681_s16 + $0x200] sm:$0xff]  ;;  %v266_v42 = vld [vmem:[%s1681_s16 + $0x208] sm:$0xff]  ;;  %v283_v45 = vld [vmem:[%s1681_s16 + $0x290] sm:$0xff] }
  0x29   : > { %v297_v43 = vld [vmem:[%s1681_s16 + $0x300] sm:$0xff]  ;;  %v298_v44 = vld [vmem:[%s1681_s16 + $0x308] sm:$0xff]  ;;  %v284_v47 = vld [vmem:[%s1681_s16 + $0x298] sm:$0xff]  ;;  %v1501_v50 = vpack.c.bf16 %v266_v42, %v265_v41 }
  0x2a   : > { %v315_v48 = vld [vmem:[%s1681_s16 + $0x390] sm:$0xff]  ;;  %v316_v49 = vld [vmem:[%s1681_s16 + $0x398] sm:$0xff]  ;;  %v1549_v51 = vpack.c.bf16 %v298_v44, %v297_v43  ;;  %v285_v58 = vld [vmem:[%s1681_s16 + $0x2a0] sm:$0xff] }
  0x2b   : > { %v299_v56 = vld [vmem:[%s1681_s16 + $0x310] sm:$0xff]  ;;  %v300_v57 = vld [vmem:[%s1681_s16 + $0x318] sm:$0xff]  ;;  %v286_v59 = vld [vmem:[%s1681_s16 + $0x2a8] sm:$0xff] }
  0x2c   : > { %v317_v60 = vld [vmem:[%s1681_s16 + $0x3a0] sm:$0xff]  ;;  %v318_v61 = vld [vmem:[%s1681_s16 + $0x3a8] sm:$0xff]  ;;  %v1555_v63 = vpack.c.bf16 %v300_v57, %v299_v56  ;;  %v287_v7 = vld [vmem:[%s1681_s16 + $0x2b0] sm:$0xff] }
  0x2d   : > { %v301_v5 = vld [vmem:[%s1681_s16 + $0x320] sm:$0xff]  ;;  %v302_v6 = vld [vmem:[%s1681_s16 + $0x328] sm:$0xff]  ;;  %v288_v8 = vld [vmem:[%s1681_s16 + $0x2b8] sm:$0xff] }
  0x2e   : > { %1425 = vmatpush3.bf16.xpose.msk.msra.mxu0 %vm1685_vm1, %v1423_v52  ;;  %v1504_v52 = vpack.c.bf16 %v284_v47, %v283_v45  ;;  %v319_v9 = vld [vmem:[%s1681_s16 + $0x3b0] sm:$0xff]  ;;  %v320_v10 = vld [vmem:[%s1681_s16 + $0x3b8] sm:$0xff]  ;;  %v1561_v12 = vpack.c.bf16 %v302_v6, %v301_v5  ;;  %v289_v19 = vld [vmem:[%s1681_s16 + $0x2c0] sm:$0xff] }
  0x2f   : > { %1473 = vmatpush3.bf16.xpose.msk.msra.mxu1 %vm1685_vm1, %v1471_v53  ;;  %1428 = vmatprep.subr.msk.bf16.mxu0 %vm1685_vm1, %v1426_v54  ;;  %v1552_v53 = vpack.c.bf16 %v316_v49, %v315_v48  ;;  %v267_v54 = vld [vmem:[%s1681_s16 + $0x210] sm:$0xff]  ;;  %v304_v18 = vld [vmem:[%s1681_s16 + $0x338] sm:$0xff]  ;;  %v290_v20 = vld [vmem:[%s1681_s16 + $0x2c8] sm:$0xff] }
  0x30   : > { %1476 = vmatprep.subr.msk.bf16.mxu1 %vm1685_vm1, %v1474_v55  ;;  %v268_v55 = vld [vmem:[%s1681_s16 + $0x218] sm:$0xff]  ;;  %v303_v17 = vld [vmem:[%s1681_s16 + $0x330] sm:$0xff]  ;;  %v321_v21 = vld [vmem:[%s1681_s16 + $0x3c0] sm:$0xff] }
  0x31   : > { %v1507_v62 = vpack.c.bf16 %v268_v55, %v267_v54  ;;  %v322_v22 = vld [vmem:[%s1681_s16 + $0x3c8] sm:$0xff]  ;;  %v1567_v24 = vpack.c.bf16 %v304_v18, %v303_v17  ;;  %v305_v29 = vld [vmem:[%s1681_s16 + $0x340] sm:$0xff]  ;;  %v291_v31 = vld [vmem:[%s1681_s16 + $0x2d0] sm:$0xff] }
  0x32   : > { %v306_v30 = vld [vmem:[%s1681_s16 + $0x348] sm:$0xff]  ;;  %v292_v32 = vld [vmem:[%s1681_s16 + $0x2d8] sm:$0xff]  ;;  %v323_v33 = vld [vmem:[%s1681_s16 + $0x3d0] sm:$0xff] }
  0x33   : > { %v324_v34 = vld [vmem:[%s1681_s16 + $0x3d8] sm:$0xff]  ;;  %v1573_v36 = vpack.c.bf16 %v306_v30, %v305_v29  ;;  %v307_v41 = vld [vmem:[%s1681_s16 + $0x350] sm:$0xff]  ;;  %v293_v43 = vld [vmem:[%s1681_s16 + $0x2e0] sm:$0xff] }
  0x34   : > { %v308_v42 = vld [vmem:[%s1681_s16 + $0x358] sm:$0xff]  ;;  %v294_v44 = vld [vmem:[%s1681_s16 + $0x2e8] sm:$0xff]  ;;  %v325_v45 = vld [vmem:[%s1681_s16 + $0x3e0] sm:$0xff] }
  0x35   : > { %v326_v47 = vld [vmem:[%s1681_s16 + $0x3e8] sm:$0xff]  ;;  %v1579_v49 = vpack.c.bf16 %v308_v42, %v307_v41  ;;  %v309_v54 = vld [vmem:[%s1681_s16 + $0x360] sm:$0xff]  ;;  %v295_v56 = vld [vmem:[%s1681_s16 + $0x2f0] sm:$0xff] }
  0x36   : > { %1431 = vmatpush3.bf16.xpose.msk.msra.mxu0 %vm1685_vm1, %v1429_v1  ;;  %v1510_v1 = vpack.c.bf16 %v286_v59, %v285_v58  ;;  %v310_v55 = vld [vmem:[%s1681_s16 + $0x368] sm:$0xff]  ;;  %v296_v57 = vld [vmem:[%s1681_s16 + $0x2f8] sm:$0xff]  ;;  %v327_v58 = vld [vmem:[%s1681_s16 + $0x3f0] sm:$0xff] }
  0x37   : > { %1479 = vmatpush3.bf16.xpose.msk.msra.mxu1 %vm1685_vm1, %v1477_v2  ;;  %1434 = vmatprep.subr.msk.bf16.mxu0 %vm1685_vm1, %v1432_v3  ;;  %v1558_v2 = vpack.c.bf16 %v318_v61, %v317_v60  ;;  %v269_v3 = vld [vmem:[%s1681_s16 + $0x220] sm:$0xff]  ;;  %v328_v59 = vld [vmem:[%s1681_s16 + $0x3f8] sm:$0xff]  ;;  %v1585_v61 = vpack.c.bf16 %v310_v55, %v309_v54 }
  0x38   : > { %1482 = vmatprep.subr.msk.bf16.mxu1 %vm1685_vm1, %v1480_v4  ;;  %v270_v4 = vld [vmem:[%s1681_s16 + $0x228] sm:$0xff] }
  0x39   : > { %v1513_v11 = vpack.c.bf16 %v270_v4, %v269_v3  ;;  %v311_v3 = vld [vmem:[%s1681_s16 + $0x370] sm:$0xff]  ;;  %v312_v4 = vld [vmem:[%s1681_s16 + $0x378] sm:$0xff] }
  0x3a   : > { %v1591_v6 = vpack.c.bf16 %v312_v4, %v311_v3 }
  0x3e   : > { %1437 = vmatpush3.bf16.xpose.msk.msra.mxu0 %vm1685_vm1, %v1435_v13  ;;  %v1516_v13 = vpack.c.bf16 %v288_v8, %v287_v7 }
  0x3f   : > { %1485 = vmatpush3.bf16.xpose.msk.msra.mxu1 %vm1685_vm1, %v1483_v14  ;;  %1440 = vmatprep.subr.msk.bf16.mxu0 %vm1685_vm1, %v1438_v15  ;;  %v1564_v14 = vpack.c.bf16 %v320_v10, %v319_v9  ;;  %v271_v15 = vld [vmem:[%s1681_s16 + $0x230] sm:$0xff] }
  0x40   : > { %1488 = vmatprep.subr.msk.bf16.mxu1 %vm1685_vm1, %v1486_v16  ;;  %v272_v16 = vld [vmem:[%s1681_s16 + $0x238] sm:$0xff] }
  0x41   : > { %v1519_v23 = vpack.c.bf16 %v272_v16, %v271_v15 }
  0x46   : > { %1443 = vmatpush3.bf16.xpose.msk.msra.mxu0 %vm1685_vm1, %v1441_v25  ;;  %v1522_v25 = vpack.c.bf16 %v290_v20, %v289_v19 }
  0x47   : > { %1491 = vmatpush3.bf16.xpose.msk.msra.mxu1 %vm1685_vm1, %v1489_v26  ;;  %1446 = vmatprep.subr.msk.bf16.mxu0 %vm1685_vm1, %v1444_v27  ;;  %v1570_v26 = vpack.c.bf16 %v322_v22, %v321_v21  ;;  %v273_v27 = vld [vmem:[%s1681_s16 + $0x240] sm:$0xff] }
  0x48   : > { %1494 = vmatprep.subr.msk.bf16.mxu1 %vm1685_vm1, %v1492_v28  ;;  %v274_v28 = vld [vmem:[%s1681_s16 + $0x248] sm:$0xff] }
  0x49   : > { %v1525_v35 = vpack.c.bf16 %v274_v28, %v273_v27 }
  0x4e   : > { %1449 = vmatpush3.bf16.xpose.msk.msra.mxu0 %vm1685_vm1, %v1447_v37  ;;  %v1528_v37 = vpack.c.bf16 %v292_v32, %v291_v31 }
  0x4f   : > { %1497 = vmatpush3.bf16.xpose.msk.msra.mxu1 %vm1685_vm1, %v1495_v38  ;;  %1500 = vmatprep.subr.msk.bf16.mxu0 %vm1685_vm1, %v1498_v39  ;;  %v1576_v38 = vpack.c.bf16 %v324_v34, %v323_v33  ;;  %v275_v39 = vld [vmem:[%s1681_s16 + $0x250] sm:$0xff] }
  0x50   : > { %1548 = vmatprep.subr.msk.bf16.mxu1 %vm1685_vm1, %v1546_v40  ;;  %v276_v40 = vld [vmem:[%s1681_s16 + $0x258] sm:$0xff] }
  0x51   : > { %v1531_v48 = vpack.c.bf16 %v276_v40, %v275_v39 }
  0x55   : > { %1299 = vmatmul.mubr.msk.f32.vlgmr.msra.gmra.mrb[0].mxu0 %vm329_vm0, %v1750_v46 }
  0x56   : > { %1333 = vmatmul.mubr.msk.f32.vlgmr.msra.gmra.mrb[0].mxu1 %vm329_vm0, %v1750_v46  ;;  %1503 = vmatpush3.bf16.xpose.msk.msra.mxu0 %vm1685_vm1, %v1501_v50  ;;  %v1534_v50 = vpack.c.bf16 %v294_v44, %v293_v43 }
  0x57   : > { %1551 = vmatpush3.bf16.xpose.msk.msra.mxu1 %vm1685_vm1, %v1549_v51  ;;  %1506 = vmatprep.subr.msk.bf16.mxu0 %vm1685_vm1, %v1504_v52  ;;  %v1582_v51 = vpack.c.bf16 %v326_v47, %v325_v45  ;;  %v277_v52 = vld [vmem:[%s1681_s16 + $0x260] sm:$0xff] }
  0x58   : > { %1554 = vmatprep.subr.msk.bf16.mxu1 %vm1685_vm1, %v1552_v53  ;;  %1366 = vmatprep.mubr.msk.f32.mxu0 %vm329_vm0, %v1750_v46  ;;  %v278_v53 = vld [vmem:[%s1681_s16 + $0x268] sm:$0xff] }
  0x59   : > { %1400 = vmatprep.mubr.msk.f32.mxu1 %vm329_vm0, %v1750_v46  ;;  %v1537_v60 = vpack.c.bf16 %v278_v53, %v277_v52 }
  0x5e   : > { %1509 = vmatpush3.bf16.xpose.msk.msra.mxu0 %vm1685_vm1, %v1507_v62  ;;  %v1540_v62 = vpack.c.bf16 %v296_v57, %v295_v56 }
  0x5f   : > { %1557 = vmatpush3.bf16.xpose.msk.msra.mxu1 %vm1685_vm1, %v1555_v63  ;;  %1512 = vmatprep.subr.msk.bf16.mxu0 %vm1685_vm1, %v1510_v1  ;;  %v1588_v63 = vpack.c.bf16 %v328_v59, %v327_v58  ;;  %v279_v1 = vld [vmem:[%s1681_s16 + $0x270] sm:$0xff] }
  0x60   : > { %1560 = vmatprep.subr.msk.bf16.mxu1 %vm1685_vm1, %v1558_v2  ;;  %v280_v2 = vld [vmem:[%s1681_s16 + $0x278] sm:$0xff] }
  0x61   : > { %v1543_v5 = vpack.c.bf16 %v280_v2, %v279_v1 }
  0x66   : > { %1515 = vmatpush3.bf16.xpose.msk.msra.mxu0 %vm1685_vm1, %v1513_v11 }
  0x67   : > { %1563 = vmatpush3.bf16.xpose.msk.msra.mxu1 %vm1685_vm1, %v1561_v12  ;;  %1518 = vmatprep.subr.msk.bf16.mxu0 %vm1685_vm1, %v1516_v13 }
  0x68   : > { %1566 = vmatprep.subr.msk.bf16.mxu1 %vm1685_vm1, %v1564_v14 }
  0x6e   : > { %1521 = vmatpush3.bf16.xpose.msk.msra.mxu0 %vm1685_vm1, %v1519_v23 }
  0x6f   : > { %1569 = vmatpush3.bf16.xpose.msk.msra.mxu1 %vm1685_vm1, %v1567_v24  ;;  %1524 = vmatprep.subr.msk.bf16.mxu0 %vm1685_vm1, %v1522_v25 }
  0x70   : > { %1572 = vmatprep.subr.msk.bf16.mxu1 %vm1685_vm1, %v1570_v26 }
  0x76   : > { %1527 = vmatpush3.bf16.xpose.msk.msra.mxu0 %vm1685_vm1, %v1525_v35 }
  0x77   : > { %1575 = vmatpush3.bf16.xpose.msk.msra.mxu1 %vm1685_vm1, %v1573_v36  ;;  %1530 = vmatprep.subr.msk.bf16.mxu0 %vm1685_vm1, %v1528_v37 }
  0x78   : > { %1578 = vmatprep.subr.msk.bf16.mxu1 %vm1685_vm1, %v1576_v38 }
  0x7e   : > { %1533 = vmatpush3.bf16.xpose.msk.msra.mxu0 %vm1685_vm1, %v1531_v48 }
  0x7f   : > { %1581 = vmatpush3.bf16.xpose.msk.msra.mxu1 %vm1685_vm1, %v1579_v49  ;;  %1536 = vmatprep.subr.msk.bf16.mxu0 %vm1685_vm1, %v1534_v50 }
  0x80   : > { %1584 = vmatprep.subr.msk.bf16.mxu1 %vm1685_vm1, %v1582_v51 }
  0x86   : > { %1539 = vmatpush3.bf16.xpose.msk.msra.mxu0 %vm1685_vm1, %v1537_v60 }
  0x87   : > { %1587 = vmatpush3.bf16.xpose.msk.msra.mxu1 %vm1685_vm1, %v1585_v61  ;;  %1542 = vmatprep.subr.msk.bf16.mxu0 %vm1685_vm1, %v1540_v62 }
  0x88   : > { %1590 = vmatprep.subr.msk.bf16.mxu1 %vm1685_vm1, %v1588_v63 }
  0x8e   : > { %1545 = vmatpush3.bf16.xpose.msk.msra.mxu0 %vm1685_vm1, %v1543_v5 }
  0x8f   : > { %1593 = vmatpush3.bf16.xpose.msk.msra.mxu1 %vm1685_vm1, %v1591_v6 }
  0x95   : > { %1367 = vmatmul.mubr.msk.f32.vlgmr.msra.gmra.mrb[2].mxu0 %vm329_vm0, %v1750_v46 }
  0x96   : > { %1401 = vmatmul.mubr.msk.f32.vlgmr.msra.gmra.mrb[2].mxu1 %vm329_vm0, %v1750_v46 }
 0x128   : > { %v783_v7 = vpop.f32.mrb[0].mxu0 }
 0x129   : > { %v854_v8 = vpop.f32.mrb[0].mxu1  ;;  %v785_v9 = vpop.f32.mrb[1].mxu0 }
 0x12a   : > { %v1009_v10 = vcombine.low %v783_v7, %v785_v9  ;;  %v856_v11 = vpop.f32.mrb[1].mxu1 }
 0x12b   : > { %v1010_v12 = vcombine.low %v854_v8, %v856_v11 }
 0x12c   : > { %1017 = vst [vmem:[%s198_s24] sm:$0xff] %v1009_v10 }
 0x12d   : > { %1018 = vst [vmem:[%s198_s24 + $0x8] sm:$0xff] %v1010_v12 }
 0x168   : > { %v925_v0 = vpop.f32.mrb[2].mxu0 }
 0x169   : > { %v996_v13 = vpop.f32.mrb[2].mxu1  ;;  %v927_v14 = vpop.f32.mrb[3].mxu0 }
 0x16a   : > { %v1011_v15 = vcombine.low %v925_v0, %v927_v14  ;;  %v998_v16 = vpop.f32.mrb[3].mxu1 }
 0x16b   : > { %v1012_v17 = vcombine.low %v996_v13, %v998_v16 }
 0x16c   : > { %1019 = vst [vmem:[%s198_s24 + $0x10] sm:$0xff] %v1011_v15 }
 0x16d   : > { %1020 = vst [vmem:[%s198_s24 + $0x18] sm:$0xff] %v1012_v17 }
 0x16e PF: > { %s12_s11 = sadd.s32 1, %s1640_s11   ;;  %s1985_s9 = smov %s1636_s10 }
 0x16f   : > { %p9_p5 = scmp.ge.s32.totalorder %s12_s11, 4   ;;  %s1986_s10 = smov %s1988_s12 }
 0x171   :  { %11 = sbr.rel (!%p9_p5) target bundleno = 2 (0x2), region = 61 }

</bundles_post_ra>
